<compile_context>
chip_gen: v5e
topology: v5e:2x2
jax: 0.10.0
libtpu: 0.0.40
codegen_flags: <defaults>
</compile_context>

<pallas_src>
import functools
import numpy as np
import jax
import jax.numpy as jnp
from jax.experimental import pallas as pl
from jax.experimental.pallas import tpu as pltpu

# Working sets here are <2 MiB; 32 MiB is comfortably inside v7x's 64 MiB per-TC
# VMEM as well as the 128 MiB of v5e/v6e.  Re-derive if tiles are ever grown.
_VMEM_LIMIT = 32 * 1024 * 1024

_LANES = 128


def _aligned_starts(widths):
    """Column starts for packing segments at 128-lane-aligned offsets, so in-kernel
    static slices land at lane offset 0 (no relayout before the MXU)."""
    starts, off = [], 0
    for wd in widths:
        starts.append(off)
        off += -(-wd // _LANES) * _LANES
    return starts, off


def _row_tile(m):
    for t in (1024, 512, 256, 128, 64, 32, 16, 8):
        if m % t == 0:
            return t
    return m   # tiny / ragged: single full block (block dims == array dims is legal)


# ---------------------------------------------------------------------------
# Row-tiled bias-matmul kernel (patch-embed / downsample im2col GEMMs)
# ---------------------------------------------------------------------------
def _matmul_bias_kernel(x_ref, w_ref, b_ref, o_ref):
    o_ref[...] = jnp.dot(x_ref[...], w_ref[...],
                         preferred_element_type=jnp.float32) + b_ref[...]


def matmul_bias_pallas(x_bf16, w_bf16, b):
    m, k = x_bf16.shape
    n = w_bf16.shape[1]
    tm = _row_tile(m)
    # v7x megacore: make sure there are >= 2 row blocks when possible so the
    # "parallel" grid axis actually spreads across both TensorCores.
    if m >= 16 and m // tm < 2 and tm % 2 == 0 and m % (tm // 2) == 0:
        tm //= 2
    return pl.pallas_call(
        _matmul_bias_kernel,
        grid=(m // tm,),
        in_specs=[pl.BlockSpec((tm, k), lambda i: (i, 0)),
                  pl.BlockSpec((k, n), lambda i: (0, 0)),
                  pl.BlockSpec((1, n), lambda i: (0, 0))],
        out_specs=pl.BlockSpec((tm, n), lambda i: (i, 0)),
        out_shape=jax.ShapeDtypeStruct((m, n), jnp.float32),
        compiler_params=pltpu.CompilerParams(
            dimension_semantics=("parallel",),
            vmem_limit_bytes=_VMEM_LIMIT),
    )(x_bf16, w_bf16, b)


def conv2d_pallas(x, p, stride, pad):
    """NHWC conv: im2col (JAX glue, bf16) + row-tiled Pallas matmul.

    # TODO(synk): stream the kh*kw taps as an in-kernel reduction axis instead of
    # materializing the im2col patches in HBM (negligible at this tiny scale).
    """
    w, b = p["w"], p["b"]                       # w: (kh, kw, cin, cout) bf16
    kh, kw, cin, cout = w.shape
    # Cast before slicing/concat so the materialized patches are bf16 (half the
    # HBM traffic of the dominant GEMM operand); accumulation stays f32.
    xp = jnp.pad(x, ((0, 0), (pad, pad), (pad, pad), (0, 0))).astype(jnp.bfloat16)
    bsz, hp, wp, _ = xp.shape
    ho = (hp - kh) // stride + 1
    wo = (wp - kw) // stride + 1
    cols = []
    for i in range(kh):
        for j in range(kw):
            cols.append(jax.lax.slice(
                xp, (0, i, j, 0),
                (bsz, i + (ho - 1) * stride + 1, j + (wo - 1) * stride + 1, cin),
                (1, stride, stride, 1)))
    patches = jnp.concatenate(cols, axis=-1).reshape(bsz * ho * wo, kh * kw * cin)
    y = matmul_bias_pallas(patches, w.reshape(kh * kw * cin, cout), b)
    return y.reshape(bsz, ho, wo, cout)


# ---------------------------------------------------------------------------
# Fused per-stage CycleBlock kernel
# ---------------------------------------------------------------------------
def _roll_rows(v, k, hw):
    """out[r] = v[(r + k) % hw] for static k; wrapped rows are zeroed by the caller's
    boundary masks (each grid step covers a whole image)."""
    k = k % hw
    if k == 0:
        return v
    if hw % 8 == 0:
        # Single XLU sublane rotation (vector-extended slot) instead of the previous
        # slice+concat which burned vld/vst slots.  np.roll semantics: shifting by
        # hw-k moves row (r+k) into row r.
        return pltpu.roll(v, shift=hw - k, axis=0)
    # Degenerate tiny stages (fewer than 8 rows): proven slice+concat path.
    return jnp.concatenate([v[k:, :], v[:k, :]], axis=0)


def _stage_kernel(x_ref, mask_ref, wk1_ref, wk2_ref, vec_ref, o_ref,
                  *, img_w, c4, ch, eps=1e-5):
    blk = pl.program_id(1)

    # Seed the resident residual stream from x at the first block of the stage;
    # afterwards it lives in the output VMEM block and never round-trips to HBM
    # until the batch index changes.
    @pl.when(blk == 0)
    def _():
        o_ref[...] = x_ref[...]

    x = o_ref[0]                                   # (HW, C) f32
    hw, cdim = x.shape

    # ---- static slices into the packed, 128-lane-aligned weight slabs ----
    s1, _ = _aligned_starts((cdim, cdim, cdim, cdim, ch, c4))
    wh  = wk1_ref[0, :, s1[0]:s1[0] + cdim]
    wwt = wk1_ref[0, :, s1[1]:s1[1] + cdim]
    wc  = wk1_ref[0, :, s1[2]:s1[2] + cdim]
    wp  = wk1_ref[0, :, s1[3]:s1[3] + cdim]
    wm1 = wk1_ref[0, :, s1[4]:s1[4] + ch]
    wr1 = wk1_ref[0, :, s1[5]:s1[5] + c4]
    s2, _ = _aligned_starts((cdim, 3 * cdim))
    wm2 = wk2_ref[0, :, s2[0]:s2[0] + cdim]
    wr2 = wk2_ref[0, 0:c4, s2[1]:s2[1] + 3 * cdim]

    g1, be1 = vec_ref[0, 0:1, 0:cdim], vec_ref[0, 1:2, 0:cdim]
    bh, bw  = vec_ref[0, 2:3, 0:cdim], vec_ref[0, 3:4, 0:cdim]
    bp      = vec_ref[0, 4:5, 0:cdim]
    g2, be2 = vec_ref[0, 5:6, 0:cdim], vec_ref[0, 6:7, 0:cdim]
    bm2     = vec_ref[0, 7:8, 0:cdim]
    br1     = vec_ref[0, 8:9, 0:c4]
    bm1     = vec_ref[0, 9:10, 0:ch]
    br2     = vec_ref[0, 10:11, 0:3 * cdim]

    # ------------------ LayerNorm 1 (f32) ------------------
    mu = jnp.mean(x, axis=-1, keepdims=True)
    xc = x - mu
    var = jnp.mean(xc * xc, axis=-1, keepdims=True)
    xn = xc * jax.lax.rsqrt(var + eps) * g1 + be1

    # ------------------ CycleFC branches ------------------
    # +-1 zero-padded spatial shifts via XLU sublane rolls; the boundary masks are
    # pre-combined with the mod-3 channel-group masks host-side (one vmul each).
    base = xn * mask_ref[4]                                   # zero-offset channels
    sel_h = (base
             + _roll_rows(xn, 1, hw) * mask_ref[0]            # sample (h, w+1)
             + _roll_rows(xn, hw - 1, hw) * mask_ref[1])      # sample (h, w-1)
    sel_w = (base
             + _roll_rows(xn, img_w, hw) * mask_ref[2]        # sample (h+1, w)
             + _roll_rows(xn, hw - img_w, hw) * mask_ref[3])  # sample (h-1, w)

    h = jnp.dot(sel_h.astype(jnp.bfloat16), wh,
                preferred_element_type=jnp.float32) + bh
    w = jnp.dot(sel_w.astype(jnp.bfloat16), wwt,
                preferred_element_type=jnp.float32) + bw
    c = jnp.dot(xn.astype(jnp.bfloat16), wc,
                preferred_element_type=jnp.float32)           # mlp_c (no bias)

    # ------------------ reweight MLP + 3-way softmax ------------------
    # TODO(synk): if profiling shows the M=1 MXU push/drain binding, move these two
    # tiny matmuls to VPU mul + XLU lane-reduce.
    amean = jnp.mean(h + w + c, axis=0, keepdims=True)        # (1, C) spatial mean
    z = jnp.dot(amean.astype(jnp.bfloat16), wr1,
                preferred_element_type=jnp.float32) + br1
    # TODO(synk): PyTorch nn.GELU is exact erf-GELU; tanh approximation used for
    # guaranteed Mosaic lowering (~1e-3 difference).
    z = jax.nn.gelu(z, approximate=True)
    z = jnp.dot(z.astype(jnp.bfloat16), wr2,
                preferred_element_type=jnp.float32) + br2     # (1, 3C), grouped
    a0, a1, a2 = z[:, 0:cdim], z[:, cdim:2 * cdim], z[:, 2 * cdim:3 * cdim]
    amax = jnp.maximum(jnp.maximum(a0, a1), a2)
    e0, e1, e2 = jnp.exp(a0 - amax), jnp.exp(a1 - amax), jnp.exp(a2 - amax)
    inv = pl.reciprocal(e0 + e1 + e2, approx=True)
    a0, a1, a2 = e0 * inv, e1 * inv, e2 * inv

    # ------------------ branch mix + proj + residual ------------------
    mixed = h * a0 + w * a1 + c * a2
    y = x + jnp.dot(mixed.astype(jnp.bfloat16), wp,
                    preferred_element_type=jnp.float32) + bp

    # ------------------ LayerNorm 2 + channel MLP + residual ------------------
    mu2 = jnp.mean(y, axis=-1, keepdims=True)
    yc = y - mu2
    var2 = jnp.mean(yc * yc, axis=-1, keepdims=True)
    yn = yc * jax.lax.rsqrt(var2 + eps) * g2 + be2
    hid = jnp.dot(yn.astype(jnp.bfloat16), wm1,
                  preferred_element_type=jnp.float32) + bm1
    hid = jax.nn.gelu(hid, approximate=True)
    o_ref[0] = y + jnp.dot(hid.astype(jnp.bfloat16), wm2,
                           preferred_element_type=jnp.float32) + bm2


def cycle_stage_pallas(x, stage, masks):
    """All CycleBlocks of one stage fused in a single pallas_call.

    grid = (batch, n_blocks): batch is "parallel" (megacore), the block axis is
    "arbitrary" with the output BlockSpec returning the same block index across it,
    so the residual stream stays resident in VMEM for the whole stage."""
    bsz, hgt, wdt, cdim = x.shape
    hw = hgt * wdt
    wk1, wk2, vec = stage["wk1"], stage["wk2"], stage["vec"]
    nblk = wk1.shape[0]
    ch = wk2.shape[1]          # mlp hidden width (slab rows)
    c4 = cdim // 4             # reweight hidden width (architecture: dim // 4)

    out = pl.pallas_call(
        functools.partial(_stage_kernel, img_w=wdt, c4=c4, ch=ch),
        grid=(bsz, nblk),
        in_specs=[pl.BlockSpec((1, hw, cdim), lambda b, l: (b, 0, 0)),
                  pl.BlockSpec((5, hw, cdim), lambda b, l: (0, 0, 0)),
                  pl.BlockSpec((1, cdim, wk1.shape[2]), lambda b, l: (l, 0, 0)),
                  pl.BlockSpec((1, ch, wk2.shape[2]), lambda b, l: (l, 0, 0)),
                  pl.BlockSpec((1, vec.shape[1], vec.shape[2]),
                               lambda b, l: (l, 0, 0))],
        out_specs=pl.BlockSpec((1, hw, cdim), lambda b, l: (b, 0, 0)),
        out_shape=jax.ShapeDtypeStruct((bsz, hw, cdim), jnp.float32),
        compiler_params=pltpu.CompilerParams(
            dimension_semantics=("parallel", "arbitrary"),
            vmem_limit_bytes=_VMEM_LIMIT),
    )(x.reshape(bsz, hw, cdim), masks, wk1, wk2, vec)
    return out.reshape(bsz, hgt, wdt, cdim)


def block_masks(hgt, wdt, cdim):
    """Host-side constants, combined once per stage geometry: rows 0-3 are the
    (zero-pad boundary mask) x (mod-3 channel-group mask) products for the four
    +-1 spatial shifts, row 4 is the zero-offset channel group.  Shape (5, HW, C)."""
    hw = hgt * wdt
    hh = np.arange(hw) // wdt
    ww = np.arange(hw) % wdt
    rch = np.arange(cdim) % 3                    # CycleFC offsets: dx_i = (i+1)%3 - 1
    c0 = (rch == 0).astype(np.float32)
    c1 = (rch == 1).astype(np.float32)
    c2 = (rch == 2).astype(np.float32)
    m = np.stack([np.outer(ww < wdt - 1, c1),    # sample (h, w+1)
                  np.outer(ww > 0, c2),          # sample (h, w-1)
                  np.outer(hh < hgt - 1, c1),    # sample (h+1, w)
                  np.outer(hh > 0, c2),          # sample (h-1, w)
                  np.tile(c0, (hw, 1))]).astype(np.float32)
    return jnp.asarray(m)


# ---------------------------------------------------------------------------
# Model forward
# ---------------------------------------------------------------------------
def _final_head(params, x):
    # Tiny per-batch epilogue (B rows): plain JAX — a dedicated pallas_call here
    # costs more in launch/DMA overhead than the math itself.
    bsz, hgt, wdt, cdim = x.shape
    x2 = x.reshape(bsz, hgt * wdt, cdim)
    mu = jnp.mean(x2, axis=-1, keepdims=True)
    xc = x2 - mu
    var = jnp.mean(xc * xc, axis=-1, keepdims=True)
    xn = xc * jax.lax.rsqrt(var + 1e-5) * params["norm"]["g"] + params["norm"]["b"]
    pooled = jnp.mean(xn, axis=1)
    return pooled @ params["head"]["w"] + params["head"]["b"]


def cyclemlp_forward(params, x_nchw):
    x = jnp.transpose(x_nchw, (0, 2, 3, 1)).astype(jnp.float32)       # NCHW -> NHWC
    x = conv2d_pallas(x, params["patch_embed"], stride=4, pad=2)      # 7x7 / s4 / p2
    n_stages = len(params["stages"])
    for i in range(n_stages):
        _, hgt, wdt, cdim = x.shape
        masks = block_masks(hgt, wdt, cdim)
        x = cycle_stage_pallas(x, params["stages"][i], masks)         # fused stage
        if i < n_stages - 1:
            x = conv2d_pallas(x, params["downsamples"][i], stride=2, pad=1)  # 3x3/s2/p1
    return _final_head(params, x)


# ---------------------------------------------------------------------------
# Deterministic parameter init (synthetic; same structure as the PyTorch module)
# ---------------------------------------------------------------------------
def _xavier(key, shape, fan_in, fan_out):
    lim = float(np.sqrt(6.0 / (fan_in + fan_out)))
    return jax.random.uniform(key, shape, jnp.float32, -lim, lim)


def init_linear(key, din, dout):
    return {"w": _xavier(key, (din, dout), din, dout),
            "b": jnp.zeros((1, dout), jnp.float32)}


def init_conv(key, kh, kw, cin, cout):
    return {"w": _xavier(key, (kh, kw, cin, cout), kh * kw * cin, kh * kw * cout),
            "b": jnp.zeros((1, cout), jnp.float32)}


def init_ln(dim):
    return {"g": jnp.ones((1, dim), jnp.float32), "b": jnp.zeros((1, dim), jnp.float32)}


def init_cyclefc(key, dim):
    k1, k2 = jax.random.split(key)
    bound = 1.0 / float(np.sqrt(dim))
    return {"w": jax.random.uniform(k1, (dim, dim), jnp.float32, -bound, bound),
            "b": jax.random.uniform(k2, (1, dim), jnp.float32, -bound, bound)}


def init_block(key, dim, mlp_ratio):
    ks = jax.random.split(key, 8)
    attn = {"mlp_c": init_linear(ks[0], dim, dim),          # Linear(bias=False)
            "sfc_h": init_cyclefc(ks[1], dim),
            "sfc_w": init_cyclefc(ks[2], dim),
            "reweight": {"fc1": init_linear(ks[3], dim, dim // 4),
                         "fc2": init_linear(ks[4], dim // 4, dim * 3)},
            "proj": init_linear(ks[5], dim, dim)}
    mlp = {"fc1": init_linear(ks[6], dim, int(dim * mlp_ratio)),
           "fc2": init_linear(ks[7], int(dim * mlp_ratio), dim)}
    return {"norm1": init_ln(dim), "attn": attn, "norm2": init_ln(dim), "mlp": mlp}


def init_cyclemlp(key, layers, embed_dims, mlp_ratios, num_classes):
    n = len(layers)
    keys = jax.random.split(key, sum(layers) + n + 2)
    ki = iter(range(len(keys)))
    params = {"patch_embed": init_conv(keys[next(ki)], 7, 7, 3, embed_dims[0])}
    stages, downs = [], []
    for i in range(n):
        stages.append([init_block(keys[next(ki)], embed_dims[i], mlp_ratios[i])
                       for _ in range(layers[i])])
        if i < n - 1:
            downs.append(init_conv(keys[next(ki)], 3, 3, embed_dims[i], embed_dims[i + 1]))
    params["stages"] = stages
    params["downsamples"] = downs
    params["norm"] = init_ln(embed_dims[-1])
    # NOTE: the reference zero-inits the head; xavier-init here so the output is non-trivial.
    params["head"] = init_linear(keys[next(ki)], embed_dims[-1], num_classes)
    return params


def prepare_params(params):
    """One-time host-side prep:
       * conv weights -> bf16
       * per-stage CycleBlock params packed into 3 stacked slabs (block axis leading):
           wk1 (L, C,  n1) bf16 : sfc_h.w | sfc_w.w | mlp_c.w | proj.w | mlp.fc1.w | rw.fc1.w
           wk2 (L, Ch, n2) bf16 : mlp.fc2.w | rw.fc2.w (columns permuted to grouped [a0|a1|a2])
           vec (L, 11, WV) f32  : LayerNorm gains/biases + all linear biases (zero-padded)
         Segments are 128-lane aligned so in-kernel static slices are zero-cost."""
    bf = lambda w: w.astype(jnp.bfloat16)

    def prep_conv(p):
        return {"w": bf(p["w"]), "b": p["b"]}

    def pack_stage(blocks):
        b0 = blocks[0]
        cdim = b0["attn"]["proj"]["w"].shape[0]
        c4 = b0["attn"]["reweight"]["fc1"]["w"].shape[1]
        ch = b0["mlp"]["fc1"]["w"].shape[1]
        assert c4 == cdim // 4 and ch >= c4       # kernel re-derives (c4, ch) from shapes
        wv = max(3 * cdim, ch)
        perm = np.concatenate([np.arange(cdim) * 3 + j for j in range(3)])
        s1, n1 = _aligned_starts((cdim, cdim, cdim, cdim, ch, c4))
        s2, n2 = _aligned_starts((cdim, 3 * cdim))

        wk1s, wk2s, vecs = [], [], []
        for bp in blocks:
            a, m = bp["attn"], bp["mlp"]
            segs1 = [a["sfc_h"]["w"], a["sfc_w"]["w"], a["mlp_c"]["w"],
                     a["proj"]["w"], m["fc1"]["w"], a["reweight"]["fc1"]["w"]]
            wk1 = jnp.zeros((cdim, n1), jnp.float32)
            for seg, st in zip(segs1, s1):
                wk1 = wk1.at[:, st:st + seg.shape[1]].set(seg)
            wk1s.append(wk1.astype(jnp.bfloat16))

            wk2 = jnp.zeros((ch, n2), jnp.float32)
            wk2 = wk2.at[:, s2[0]:s2[0] + cdim].set(m["fc2"]["w"])
            wk2 = wk2.at[:c4, s2[1]:s2[1] + 3 * cdim].set(
                a["reweight"]["fc2"]["w"][:, perm])
            wk2s.append(wk2.astype(jnp.bfloat16))

            def padv(v):
                return jnp.pad(v, ((0, 0), (0, wv - v.shape[1])))
            vecs.append(jnp.concatenate(
                [padv(bp["norm1"]["g"]), padv(bp["norm1"]["b"]),
                 padv(a["sfc_h"]["b"]), padv(a["sfc_w"]["b"]), padv(a["proj"]["b"]),
                 padv(bp["norm2"]["g"]), padv(bp["norm2"]["b"]), padv(m["fc2"]["b"]),
                 padv(a["reweight"]["fc1"]["b"]), padv(m["fc1"]["b"]),
                 padv(a["reweight"]["fc2"]["b"][:, perm])], axis=0))

        return {"wk1": jnp.stack(wk1s), "wk2": jnp.stack(wk2s), "vec": jnp.stack(vecs)}

    return {"patch_embed": prep_conv(params["patch_embed"]),
            "downsamples": [prep_conv(d) for d in params["downsamples"]],
            "stages": [pack_stage(st) for st in params["stages"]],
            "norm": params["norm"],
            "head": params["head"]}


# ---------------------------------------------------------------------------
if __name__ == "__main__":
    key = jax.random.PRNGKey(0)
    kp, kx = jax.random.split(key)

    # Tiny synthetic config (same structure as CycleMLP-B1, reduced depth/width).
    # Two blocks per stage so the fused stage kernel exercises the block grid axis.
    layers = [2, 2, 2, 2]
    embed_dims = [16, 32, 64, 128]
    mlp_ratios = [2, 2, 2, 2]
    num_classes = 10

    params = prepare_params(init_cyclemlp(kp, layers, embed_dims, mlp_ratios, num_classes))
    x = jax.random.normal(kx, (2, 3, 32, 32), jnp.float32)   # NCHW like PyTorch

    out = jax.block_until_ready(jax.jit(cyclemlp_forward)(params, x))

    assert out.shape == (2, num_classes), out.shape
    assert bool(jnp.all(jnp.isfinite(out)))
    print("KERNEL_OK")
</pallas_src>

<mosaic_0001>
module attributes {stable_mosaic.version = 11 : i64} {
  func.func @_stage_kernel(%arg0: i32, %arg1: i32, %arg2: memref<1x64x16xf32, #tpu.memory_space<vmem>>, %arg3: memref<5x64x16xf32, #tpu.memory_space<vmem>>, %arg4: memref<1x16x768xbf16, #tpu.memory_space<vmem>>, %arg5: memref<1x32x256xbf16, #tpu.memory_space<vmem>>, %arg6: memref<1x11x48xf32, #tpu.memory_space<vmem>>, %arg7: memref<1x64x16xf32, #tpu.memory_space<vmem>>) attributes {dimension_semantics = [#tpu.dimension_semantics<parallel>, #tpu.dimension_semantics<arbitrary>], iteration_bounds = array<i64: 2, 2>, scalar_prefetch = 0 : i64, scratch_operands = 0 : i64, tpu.core_type = #tpu.core_type<tc>, window_params = [{transform_indices = @transform_0, window_bounds = array<i64: 1, 64, 16>}, {pipeline_mode = #tpu.pipeline_mode<synchronous>, transform_indices = @transform_1, window_bounds = array<i64: 5, 64, 16>}, {transform_indices = @transform_2, window_bounds = array<i64: 1, 16, 768>}, {transform_indices = @transform_3, window_bounds = array<i64: 1, 32, 256>}, {transform_indices = @transform_4, window_bounds = array<i64: 1, 11, 48>}, {transform_indices = @transform_5, window_bounds = array<i64: 1, 64, 16>}]} {
    %c0_i32 = arith.constant 0 : i32
    %0 = arith.cmpi eq, %arg1, %c0_i32 : i32
    %1 = arith.extui %0 : i1 to i32
    %c0_i32_0 = arith.constant 0 : i32
    %2 = arith.cmpi ne, %1, %c0_i32_0 : i32
    scf.if %2 {
      %c0_90 = arith.constant 0 : index
      %c0_91 = arith.constant 0 : index
      %c0_92 = arith.constant 0 : index
      %196 = vector.load %arg2[%c0_90, %c0_91, %c0_92] : memref<1x64x16xf32, #tpu.memory_space<vmem>>, vector<1x64x16xf32>
      %c0_93 = arith.constant 0 : index
      %c0_94 = arith.constant 0 : index
      %c0_95 = arith.constant 0 : index
      %197 = vector.load %arg7[%c0_93, %c0_94, %c0_95] : memref<1x64x16xf32, #tpu.memory_space<vmem>>, vector<1x64x16xf32>
      tpu.vector_store %arg7[%c0_93, %c0_94, %c0_95], %196 {strides = array<i32>} : memref<1x64x16xf32, #tpu.memory_space<vmem>>, vector<1x64x16xf32>,
    } else {
    }
    %c0 = arith.constant 0 : index
    %c0_1 = arith.constant 0 : index
    %c0_2 = arith.constant 0 : index
    %3 = vector.load %arg7[%c0, %c0_1, %c0_2] : memref<1x64x16xf32, #tpu.memory_space<vmem>>, vector<1x64x16xf32>
    %4 = vector.shape_cast %3 : vector<1x64x16xf32> to vector<64x16xf32>
    %c0_3 = arith.constant 0 : index
    %c0_4 = arith.constant 0 : index
    %c0_5 = arith.constant 0 : index
    %5 = vector.load %arg4[%c0_3, %c0_4, %c0_5] : memref<1x16x768xbf16, #tpu.memory_space<vmem>>, vector<1x16x16xbf16>
    %6 = vector.shape_cast %5 : vector<1x16x16xbf16> to vector<16x16xbf16>
    %c0_6 = arith.constant 0 : index
    %c0_7 = arith.constant 0 : index
    %c128 = arith.constant 128 : index
    %7 = vector.load %arg4[%c0_6, %c0_7, %c128] : memref<1x16x768xbf16, #tpu.memory_space<vmem>>, vector<1x16x16xbf16>
    %8 = vector.shape_cast %7 : vector<1x16x16xbf16> to vector<16x16xbf16>
    %c0_8 = arith.constant 0 : index
    %c0_9 = arith.constant 0 : index
    %c256 = arith.constant 256 : index
    %9 = vector.load %arg4[%c0_8, %c0_9, %c256] : memref<1x16x768xbf16, #tpu.memory_space<vmem>>, vector<1x16x16xbf16>
    %10 = vector.shape_cast %9 : vector<1x16x16xbf16> to vector<16x16xbf16>
    %c0_10 = arith.constant 0 : index
    %c0_11 = arith.constant 0 : index
    %c384 = arith.constant 384 : index
    %11 = vector.load %arg4[%c0_10, %c0_11, %c384] : memref<1x16x768xbf16, #tpu.memory_space<vmem>>, vector<1x16x16xbf16>
    %12 = vector.shape_cast %11 : vector<1x16x16xbf16> to vector<16x16xbf16>
    %c0_12 = arith.constant 0 : index
    %c0_13 = arith.constant 0 : index
    %c512 = arith.constant 512 : index
    %13 = vector.load %arg4[%c0_12, %c0_13, %c512] : memref<1x16x768xbf16, #tpu.memory_space<vmem>>, vector<1x16x32xbf16>
    %14 = vector.shape_cast %13 : vector<1x16x32xbf16> to vector<16x32xbf16>
    %c0_14 = arith.constant 0 : index
    %c0_15 = arith.constant 0 : index
    %c640 = arith.constant 640 : index
    %15 = vector.load %arg4[%c0_14, %c0_15, %c640] : memref<1x16x768xbf16, #tpu.memory_space<vmem>>, vector<1x16x4xbf16>
    %16 = vector.shape_cast %15 : vector<1x16x4xbf16> to vector<16x4xbf16>
    %c0_16 = arith.constant 0 : index
    %c0_17 = arith.constant 0 : index
    %c0_18 = arith.constant 0 : index
    %17 = vector.load %arg5[%c0_16, %c0_17, %c0_18] : memref<1x32x256xbf16, #tpu.memory_space<vmem>>, vector<1x32x16xbf16>
    %18 = vector.shape_cast %17 : vector<1x32x16xbf16> to vector<32x16xbf16>
    %c0_19 = arith.constant 0 : index
    %c0_20 = arith.constant 0 : index
    %c128_21 = arith.constant 128 : index
    %19 = vector.load %arg5[%c0_19, %c0_20, %c128_21] : memref<1x32x256xbf16, #tpu.memory_space<vmem>>, vector<1x4x48xbf16>
    %20 = vector.shape_cast %19 : vector<1x4x48xbf16> to vector<4x48xbf16>
    %c0_22 = arith.constant 0 : index
    %c0_23 = arith.constant 0 : index
    %c0_24 = arith.constant 0 : index
    %21 = vector.load %arg6[%c0_22, %c0_23, %c0_24] : memref<1x11x48xf32, #tpu.memory_space<vmem>>, vector<1x1x16xf32>
    %22 = vector.shape_cast %21 : vector<1x1x16xf32> to vector<1x16xf32>
    %c0_25 = arith.constant 0 : index
    %c1 = arith.constant 1 : index
    %c0_26 = arith.constant 0 : index
    %23 = vector.load %arg6[%c0_25, %c1, %c0_26] : memref<1x11x48xf32, #tpu.memory_space<vmem>>, vector<1x1x16xf32>
    %24 = vector.shape_cast %23 : vector<1x1x16xf32> to vector<1x16xf32>
    %c0_27 = arith.constant 0 : index
    %c2 = arith.constant 2 : index
    %c0_28 = arith.constant 0 : index
    %25 = vector.load %arg6[%c0_27, %c2, %c0_28] : memref<1x11x48xf32, #tpu.memory_space<vmem>>, vector<1x1x16xf32>
    %26 = vector.shape_cast %25 : vector<1x1x16xf32> to vector<1x16xf32>
    %c0_29 = arith.constant 0 : index
    %c3 = arith.constant 3 : index
    %c0_30 = arith.constant 0 : index
    %27 = vector.load %arg6[%c0_29, %c3, %c0_30] : memref<1x11x48xf32, #tpu.memory_space<vmem>>, vector<1x1x16xf32>
    %28 = vector.shape_cast %27 : vector<1x1x16xf32> to vector<1x16xf32>
    %c0_31 = arith.constant 0 : index
    %c4 = arith.constant 4 : index
    %c0_32 = arith.constant 0 : index
    %29 = vector.load %arg6[%c0_31, %c4, %c0_32] : memref<1x11x48xf32, #tpu.memory_space<vmem>>, vector<1x1x16xf32>
    %30 = vector.shape_cast %29 : vector<1x1x16xf32> to vector<1x16xf32>
    %c0_33 = arith.constant 0 : index
    %c5 = arith.constant 5 : index
    %c0_34 = arith.constant 0 : index
    %31 = vector.load %arg6[%c0_33, %c5, %c0_34] : memref<1x11x48xf32, #tpu.memory_space<vmem>>, vector<1x1x16xf32>
    %32 = vector.shape_cast %31 : vector<1x1x16xf32> to vector<1x16xf32>
    %c0_35 = arith.constant 0 : index
    %c6 = arith.constant 6 : index
    %c0_36 = arith.constant 0 : index
    %33 = vector.load %arg6[%c0_35, %c6, %c0_36] : memref<1x11x48xf32, #tpu.memory_space<vmem>>, vector<1x1x16xf32>
    %34 = vector.shape_cast %33 : vector<1x1x16xf32> to vector<1x16xf32>
    %c0_37 = arith.constant 0 : index
    %c7 = arith.constant 7 : index
    %c0_38 = arith.constant 0 : index
    %35 = vector.load %arg6[%c0_37, %c7, %c0_38] : memref<1x11x48xf32, #tpu.memory_space<vmem>>, vector<1x1x16xf32>
    %36 = vector.shape_cast %35 : vector<1x1x16xf32> to vector<1x16xf32>
    %c0_39 = arith.constant 0 : index
    %c8 = arith.constant 8 : index
    %c0_40 = arith.constant 0 : index
    %37 = vector.load %arg6[%c0_39, %c8, %c0_40] : memref<1x11x48xf32, #tpu.memory_space<vmem>>, vector<1x1x4xf32>
    %38 = vector.shape_cast %37 : vector<1x1x4xf32> to vector<1x4xf32>
    %c0_41 = arith.constant 0 : index
    %c9 = arith.constant 9 : index
    %c0_42 = arith.constant 0 : index
    %39 = vector.load %arg6[%c0_41, %c9, %c0_42] : memref<1x11x48xf32, #tpu.memory_space<vmem>>, vector<1x1x32xf32>
    %40 = vector.shape_cast %39 : vector<1x1x32xf32> to vector<1x32xf32>
    %c0_43 = arith.constant 0 : index
    %c10 = arith.constant 10 : index
    %c0_44 = arith.constant 0 : index
    %41 = vector.load %arg6[%c0_43, %c10, %c0_44] : memref<1x11x48xf32, #tpu.memory_space<vmem>>, vector<1x1x48xf32>
    %42 = vector.shape_cast %41 : vector<1x1x48xf32> to vector<1x48xf32>
    %cst = arith.constant dense<0.000000e+00> : vector<64xf32>
    %43 = vector.multi_reduction <add>, %4, %cst [1] : vector<64x16xf32> to vector<64xf32>
    %44 = vector.shape_cast %43 : vector<64xf32> to vector<64x1xf32>
    %cst_45 = arith.constant 1.600000e+01 : f32
    %45 = vector.broadcast %cst_45 : f32 to vector<64x1xf32>
    %46 = arith.divf %44, %45 : vector<64x1xf32>
    %47 = vector.broadcast %46 : vector<64x1xf32> to vector<64x16xf32>
    %48 = arith.subf %4, %47 : vector<64x16xf32>
    %49 = arith.mulf %48, %48 : vector<64x16xf32>
    %cst_46 = arith.constant dense<0.000000e+00> : vector<64xf32>
    %50 = vector.multi_reduction <add>, %49, %cst_46 [1] : vector<64x16xf32> to vector<64xf32>
    %51 = vector.shape_cast %50 : vector<64xf32> to vector<64x1xf32>
    %cst_47 = arith.constant 1.600000e+01 : f32
    %52 = vector.broadcast %cst_47 : f32 to vector<64x1xf32>
    %53 = arith.divf %51, %52 : vector<64x1xf32>
    %cst_48 = arith.constant 9.99999974E-6 : f32
    %54 = vector.broadcast %cst_48 : f32 to vector<64x1xf32>
    %55 = arith.addf %53, %54 : vector<64x1xf32>
    %56 = math.rsqrt %55 : vector<64x1xf32>
    %57 = vector.broadcast %56 : vector<64x1xf32> to vector<64x16xf32>
    %58 = arith.mulf %48, %57 : vector<64x16xf32>
    %59 = vector.broadcast %22 : vector<1x16xf32> to vector<64x16xf32>
    %60 = arith.mulf %58, %59 : vector<64x16xf32>
    %61 = vector.broadcast %24 : vector<1x16xf32> to vector<64x16xf32>
    %62 = arith.addf %60, %61 : vector<64x16xf32>
    %c4_49 = arith.constant 4 : index
    %c0_50 = arith.constant 0 : index
    %c0_51 = arith.constant 0 : index
    %63 = vector.load %arg3[%c4_49, %c0_50, %c0_51] : memref<5x64x16xf32, #tpu.memory_space<vmem>>, vector<1x64x16xf32>
    %64 = vector.shape_cast %63 : vector<1x64x16xf32> to vector<64x16xf32>
    %65 = arith.mulf %62, %64 : vector<64x16xf32>
    %c63_i32 = arith.constant 63 : i32
    %66 = tpu.dynamic_rotate %62 by %c63_i32 dim 0 : vector<64x16xf32>, i32 -> vector<64x16xf32>
    %c0_52 = arith.constant 0 : index
    %c0_53 = arith.constant 0 : index
    %c0_54 = arith.constant 0 : index
    %67 = vector.load %arg3[%c0_52, %c0_53, %c0_54] : memref<5x64x16xf32, #tpu.memory_space<vmem>>, vector<1x64x16xf32>
    %68 = vector.shape_cast %67 : vector<1x64x16xf32> to vector<64x16xf32>
    %69 = arith.mulf %66, %68 : vector<64x16xf32>
    %70 = arith.addf %65, %69 : vector<64x16xf32>
    %c1_i32 = arith.constant 1 : i32
    %71 = tpu.dynamic_rotate %62 by %c1_i32 dim 0 : vector<64x16xf32>, i32 -> vector<64x16xf32>
    %c1_55 = arith.constant 1 : index
    %c0_56 = arith.constant 0 : index
    %c0_57 = arith.constant 0 : index
    %72 = vector.load %arg3[%c1_55, %c0_56, %c0_57] : memref<5x64x16xf32, #tpu.memory_space<vmem>>, vector<1x64x16xf32>
    %73 = vector.shape_cast %72 : vector<1x64x16xf32> to vector<64x16xf32>
    %74 = arith.mulf %71, %73 : vector<64x16xf32>
    %75 = arith.addf %70, %74 : vector<64x16xf32>
    %c56_i32 = arith.constant 56 : i32
    %76 = tpu.dynamic_rotate %62 by %c56_i32 dim 0 : vector<64x16xf32>, i32 -> vector<64x16xf32>
    %c2_58 = arith.constant 2 : index
    %c0_59 = arith.constant 0 : index
    %c0_60 = arith.constant 0 : index
    %77 = vector.load %arg3[%c2_58, %c0_59, %c0_60] : memref<5x64x16xf32, #tpu.memory_space<vmem>>, vector<1x64x16xf32>
    %78 = vector.shape_cast %77 : vector<1x64x16xf32> to vector<64x16xf32>
    %79 = arith.mulf %76, %78 : vector<64x16xf32>
    %80 = arith.addf %65, %79 : vector<64x16xf32>
    %c8_i32 = arith.constant 8 : i32
    %81 = tpu.dynamic_rotate %62 by %c8_i32 dim 0 : vector<64x16xf32>, i32 -> vector<64x16xf32>
    %c3_61 = arith.constant 3 : index
    %c0_62 = arith.constant 0 : index
    %c0_63 = arith.constant 0 : index
    %82 = vector.load %arg3[%c3_61, %c0_62, %c0_63] : memref<5x64x16xf32, #tpu.memory_space<vmem>>, vector<1x64x16xf32>
    %83 = vector.shape_cast %82 : vector<1x64x16xf32> to vector<64x16xf32>
    %84 = arith.mulf %81, %83 : vector<64x16xf32>
    %85 = arith.addf %80, %84 : vector<64x16xf32>
    %86 = arith.truncf %75 : vector<64x16xf32> to vector<64x16xbf16>
    %cst_64 = arith.constant dense<0.000000e+00> : vector<64x16xf32>
    %87 = tpu.matmul %86, %6, %cst_64 {dimension_numbers = #tpu.dot_dimension_numbers<[1], [0], [0], [1], [0, 0, 1, 1], [], []>} : vector<64x16xbf16>, vector<16x16xbf16>, vector<64x16xf32> -> vector<64x16xf32>
    %88 = vector.broadcast %26 : vector<1x16xf32> to vector<64x16xf32>
    %89 = arith.addf %87, %88 : vector<64x16xf32>
    %90 = arith.truncf %85 : vector<64x16xf32> to vector<64x16xbf16>
    %cst_65 = arith.constant dense<0.000000e+00> : vector<64x16xf32>
    %91 = tpu.matmul %90, %8, %cst_65 {dimension_numbers = #tpu.dot_dimension_numbers<[1], [0], [0], [1], [0, 0, 1, 1], [], []>} : vector<64x16xbf16>, vector<16x16xbf16>, vector<64x16xf32> -> vector<64x16xf32>
    %92 = vector.broadcast %28 : vector<1x16xf32> to vector<64x16xf32>
    %93 = arith.addf %91, %92 : vector<64x16xf32>
    %94 = arith.truncf %62 : vector<64x16xf32> to vector<64x16xbf16>
    %cst_66 = arith.constant dense<0.000000e+00> : vector<64x16xf32>
    %95 = tpu.matmul %94, %10, %cst_66 {dimension_numbers = #tpu.dot_dimension_numbers<[1], [0], [0], [1], [0, 0, 1, 1], [], []>} : vector<64x16xbf16>, vector<16x16xbf16>, vector<64x16xf32> -> vector<64x16xf32>
    %96 = arith.addf %89, %93 : vector<64x16xf32>
    %97 = arith.addf %96, %95 : vector<64x16xf32>
    %cst_67 = arith.constant dense<0.000000e+00> : vector<16xf32>
    %98 = vector.multi_reduction <add>, %97, %cst_67 [0] : vector<64x16xf32> to vector<16xf32>
    %99 = vector.shape_cast %98 : vector<16xf32> to vector<1x16xf32>
    %cst_68 = arith.constant 6.400000e+01 : f32
    %100 = vector.broadcast %cst_68 : f32 to vector<1x16xf32>
    %101 = arith.divf %99, %100 : vector<1x16xf32>
    %102 = arith.truncf %101 : vector<1x16xf32> to vector<1x16xbf16>
    %cst_69 = arith.constant dense<0.000000e+00> : vector<1x4xf32>
    %103 = tpu.matmul %102, %16, %cst_69 {dimension_numbers = #tpu.dot_dimension_numbers<[1], [0], [0], [1], [0, 0, 1, 1], [], []>} : vector<1x16xbf16>, vector<16x4xbf16>, vector<1x4xf32> -> vector<1x4xf32>
    %104 = arith.addf %103, %38 : vector<1x4xf32>
    %105 = arith.mulf %104, %104 : vector<1x4xf32>
    %106 = arith.mulf %104, %105 : vector<1x4xf32>
    %cst_70 = arith.constant 4.471500e-02 : f32
    %107 = vector.broadcast %cst_70 : f32 to vector<1x4xf32>
    %108 = arith.mulf %107, %106 : vector<1x4xf32>
    %109 = arith.addf %104, %108 : vector<1x4xf32>
    %cst_71 = arith.constant 0.797884583 : f32
    %110 = vector.broadcast %cst_71 : f32 to vector<1x4xf32>
    %111 = arith.mulf %110, %109 : vector<1x4xf32>
    %112 = math.tanh %111 : vector<1x4xf32>
    %cst_72 = arith.constant 1.000000e+00 : f32
    %113 = vector.broadcast %cst_72 : f32 to vector<1x4xf32>
    %114 = arith.addf %113, %112 : vector<1x4xf32>
    %cst_73 = arith.constant 5.000000e-01 : f32
    %115 = vector.broadcast %cst_73 : f32 to vector<1x4xf32>
    %116 = arith.mulf %115, %114 : vector<1x4xf32>
    %117 = arith.mulf %104, %116 : vector<1x4xf32>
    %118 = arith.truncf %117 : vector<1x4xf32> to vector<1x4xbf16>
    %cst_74 = arith.constant dense<0.000000e+00> : vector<1x48xf32>
    %119 = tpu.matmul %118, %20, %cst_74 {dimension_numbers = #tpu.dot_dimension_numbers<[1], [0], [0], [1], [0, 0, 1, 1], [], []>} : vector<1x4xbf16>, vector<4x48xbf16>, vector<1x48xf32> -> vector<1x48xf32>
    %120 = arith.addf %119, %42 : vector<1x48xf32>
    %121 = vector.extract_strided_slice %120 {offsets = [0, 0], sizes = [1, 16], strides = [1, 1]} : vector<1x48xf32> to vector<1x16xf32>
    %122 = vector.extract_strided_slice %120 {offsets = [0, 16], sizes = [1, 16], strides = [1, 1]} : vector<1x48xf32> to vector<1x16xf32>
    %123 = vector.extract_strided_slice %120 {offsets = [0, 32], sizes = [1, 16], strides = [1, 1]} : vector<1x48xf32> to vector<1x16xf32>
    %124 = arith.maximumf %121, %122 : vector<1x16xf32>
    %125 = arith.maximumf %124, %123 : vector<1x16xf32>
    %126 = arith.subf %121, %125 : vector<1x16xf32>
    %127 = math.exp %126 : vector<1x16xf32>
    %128 = arith.subf %122, %125 : vector<1x16xf32>
    %129 = math.exp %128 : vector<1x16xf32>
    %130 = arith.subf %123, %125 : vector<1x16xf32>
    %131 = math.exp %130 : vector<1x16xf32>
    %132 = arith.addf %127, %129 : vector<1x16xf32>
    %133 = arith.addf %132, %131 : vector<1x16xf32>
    %134 = tpu.reciprocal %133 {approx = true} : vector<1x16xf32> -> vector<1x16xf32>
    %135 = arith.mulf %127, %134 : vector<1x16xf32>
    %136 = arith.mulf %129, %134 : vector<1x16xf32>
    %137 = arith.mulf %131, %134 : vector<1x16xf32>
    %138 = vector.broadcast %135 : vector<1x16xf32> to vector<64x16xf32>
    %139 = arith.mulf %89, %138 : vector<64x16xf32>
    %140 = vector.broadcast %136 : vector<1x16xf32> to vector<64x16xf32>
    %141 = arith.mulf %93, %140 : vector<64x16xf32>
    %142 = arith.addf %139, %141 : vector<64x16xf32>
    %143 = vector.broadcast %137 : vector<1x16xf32> to vector<64x16xf32>
    %144 = arith.mulf %95, %143 : vector<64x16xf32>
    %145 = arith.addf %142, %144 : vector<64x16xf32>
    %146 = arith.truncf %145 : vector<64x16xf32> to vector<64x16xbf16>
    %cst_75 = arith.constant dense<0.000000e+00> : vector<64x16xf32>
    %147 = tpu.matmul %146, %12, %cst_75 {dimension_numbers = #tpu.dot_dimension_numbers<[1], [0], [0], [1], [0, 0, 1, 1], [], []>} : vector<64x16xbf16>, vector<16x16xbf16>, vector<64x16xf32> -> vector<64x16xf32>
    %148 = arith.addf %4, %147 : vector<64x16xf32>
    %149 = vector.broadcast %30 : vector<1x16xf32> to vector<64x16xf32>
    %150 = arith.addf %148, %149 : vector<64x16xf32>
    %cst_76 = arith.constant dense<0.000000e+00> : vector<64xf32>
    %151 = vector.multi_reduction <add>, %150, %cst_76 [1] : vector<64x16xf32> to vector<64xf32>
    %152 = vector.shape_cast %151 : vector<64xf32> to vector<64x1xf32>
    %cst_77 = arith.constant 1.600000e+01 : f32
    %153 = vector.broadcast %cst_77 : f32 to vector<64x1xf32>
    %154 = arith.divf %152, %153 : vector<64x1xf32>
    %155 = vector.broadcast %154 : vector<64x1xf32> to vector<64x16xf32>
    %156 = arith.subf %150, %155 : vector<64x16xf32>
    %157 = arith.mulf %156, %156 : vector<64x16xf32>
    %cst_78 = arith.constant dense<0.000000e+00> : vector<64xf32>
    %158 = vector.multi_reduction <add>, %157, %cst_78 [1] : vector<64x16xf32> to vector<64xf32>
    %159 = vector.shape_cast %158 : vector<64xf32> to vector<64x1xf32>
    %cst_79 = arith.constant 1.600000e+01 : f32
    %160 = vector.broadcast %cst_79 : f32 to vector<64x1xf32>
    %161 = arith.divf %159, %160 : vector<64x1xf32>
    %cst_80 = arith.constant 9.99999974E-6 : f32
    %162 = vector.broadcast %cst_80 : f32 to vector<64x1xf32>
    %163 = arith.addf %161, %162 : vector<64x1xf32>
    %164 = math.rsqrt %163 : vector<64x1xf32>
    %165 = vector.broadcast %164 : vector<64x1xf32> to vector<64x16xf32>
    %166 = arith.mulf %156, %165 : vector<64x16xf32>
    %167 = vector.broadcast %32 : vector<1x16xf32> to vector<64x16xf32>
    %168 = arith.mulf %166, %167 : vector<64x16xf32>
    %169 = vector.broadcast %34 : vector<1x16xf32> to vector<64x16xf32>
    %170 = arith.addf %168, %169 : vector<64x16xf32>
    %171 = arith.truncf %170 : vector<64x16xf32> to vector<64x16xbf16>
    %cst_81 = arith.constant dense<0.000000e+00> : vector<64x32xf32>
    %172 = tpu.matmul %171, %14, %cst_81 {dimension_numbers = #tpu.dot_dimension_numbers<[1], [0], [0], [1], [0, 0, 1, 1], [], []>} : vector<64x16xbf16>, vector<16x32xbf16>, vector<64x32xf32> -> vector<64x32xf32>
    %173 = vector.broadcast %40 : vector<1x32xf32> to vector<64x32xf32>
    %174 = arith.addf %172, %173 : vector<64x32xf32>
    %175 = arith.mulf %174, %174 : vector<64x32xf32>
    %176 = arith.mulf %174, %175 : vector<64x32xf32>
    %cst_82 = arith.constant 4.471500e-02 : f32
    %177 = vector.broadcast %cst_82 : f32 to vector<64x32xf32>
    %178 = arith.mulf %177, %176 : vector<64x32xf32>
    %179 = arith.addf %174, %178 : vector<64x32xf32>
    %cst_83 = arith.constant 0.797884583 : f32
    %180 = vector.broadcast %cst_83 : f32 to vector<64x32xf32>
    %181 = arith.mulf %180, %179 : vector<64x32xf32>
    %182 = math.tanh %181 : vector<64x32xf32>
    %cst_84 = arith.constant 1.000000e+00 : f32
    %183 = vector.broadcast %cst_84 : f32 to vector<64x32xf32>
    %184 = arith.addf %183, %182 : vector<64x32xf32>
    %cst_85 = arith.constant 5.000000e-01 : f32
    %185 = vector.broadcast %cst_85 : f32 to vector<64x32xf32>
    %186 = arith.mulf %185, %184 : vector<64x32xf32>
    %187 = arith.mulf %174, %186 : vector<64x32xf32>
    %188 = arith.truncf %187 : vector<64x32xf32> to vector<64x32xbf16>
    %cst_86 = arith.constant dense<0.000000e+00> : vector<64x16xf32>
    %189 = tpu.matmul %188, %18, %cst_86 {dimension_numbers = #tpu.dot_dimension_numbers<[1], [0], [0], [1], [0, 0, 1, 1], [], []>} : vector<64x32xbf16>, vector<32x16xbf16>, vector<64x16xf32> -> vector<64x16xf32>
    %190 = arith.addf %150, %189 : vector<64x16xf32>
    %191 = vector.broadcast %36 : vector<1x16xf32> to vector<64x16xf32>
    %192 = arith.addf %190, %191 : vector<64x16xf32>
    %c0_87 = arith.constant 0 : index
    %c0_88 = arith.constant 0 : index
    %c0_89 = arith.constant 0 : index
    %193 = vector.load %arg7[%c0_87, %c0_88, %c0_89] : memref<1x64x16xf32, #tpu.memory_space<vmem>>, vector<1x64x16xf32>
    %194 = vector.shape_cast %193 : vector<1x64x16xf32> to vector<64x16xf32>
    %195 = vector.shape_cast %192 : vector<64x16xf32> to vector<1x64x16xf32>
    tpu.vector_store %arg7[%c0_87, %c0_88, %c0_89], %195 {strides = array<i32>} : memref<1x64x16xf32, #tpu.memory_space<vmem>>, vector<1x64x16xf32>,
    return
  }
  func.func @transform_0(%arg0: i32, %arg1: i32) -> (i32, i32, i32) {
    %c0_i32 = arith.constant 0 : i32
    %c0_i32_0 = arith.constant 0 : i32
    %c0_i32_1 = arith.constant 0 : i32
    return %arg0, %c0_i32, %c0_i32_0 : i32, i32, i32
  }
  func.func @transform_1(%arg0: i32, %arg1: i32) -> (i32, i32, i32) {
    %c0_i32 = arith.constant 0 : i32
    %c0_i32_0 = arith.constant 0 : i32
    %c0_i32_1 = arith.constant 0 : i32
    %c0_i32_2 = arith.constant 0 : i32
    return %c0_i32, %c0_i32_0, %c0_i32_1 : i32, i32, i32
  }
  func.func @transform_2(%arg0: i32, %arg1: i32) -> (i32, i32, i32) {
    %c0_i32 = arith.constant 0 : i32
    %c0_i32_0 = arith.constant 0 : i32
    %c0_i32_1 = arith.constant 0 : i32
    return %arg1, %c0_i32, %c0_i32_0 : i32, i32, i32
  }
  func.func @transform_3(%arg0: i32, %arg1: i32) -> (i32, i32, i32) {
    %c0_i32 = arith.constant 0 : i32
    %c0_i32_0 = arith.constant 0 : i32
    %c0_i32_1 = arith.constant 0 : i32
    return %arg1, %c0_i32, %c0_i32_0 : i32, i32, i32
  }
  func.func @transform_4(%arg0: i32, %arg1: i32) -> (i32, i32, i32) {
    %c0_i32 = arith.constant 0 : i32
    %c0_i32_0 = arith.constant 0 : i32
    %c0_i32_1 = arith.constant 0 : i32
    return %arg1, %c0_i32, %c0_i32_0 : i32, i32, i32
  }
  func.func @transform_5(%arg0: i32, %arg1: i32) -> (i32, i32, i32) {
    %c0_i32 = arith.constant 0 : i32
    %c0_i32_0 = arith.constant 0 : i32
    %c0_i32_1 = arith.constant 0 : i32
    return %arg0, %c0_i32, %c0_i32_0 : i32, i32, i32
  }
}

module attributes {stable_mosaic.version = 11 : i64} {
  func.func @_matmul_bias_kernel(%arg0: i32, %arg1: memref<64x147xbf16, #tpu.memory_space<vmem>>, %arg2: memref<147x16xbf16, #tpu.memory_space<vmem>>, %arg3: memref<1x16xf32, #tpu.memory_space<vmem>>, %arg4: memref<64x16xf32, #tpu.memory_space<vmem>>) attributes {dimension_semantics = [#tpu.dimension_semantics<parallel>], iteration_bounds = array<i64: 2>, scalar_prefetch = 0 : i64, scratch_operands = 0 : i64, tpu.core_type = #tpu.core_type<tc>, window_params = [{transform_indices = @transform_0, window_bounds = array<i64: 64, 147>}, {pipeline_mode = #tpu.pipeline_mode<synchronous>, transform_indices = @transform_1, window_bounds = array<i64: 147, 16>}, {pipeline_mode = #tpu.pipeline_mode<synchronous>, transform_indices = @transform_2, window_bounds = array<i64: 1, 16>}, {transform_indices = @transform_3, window_bounds = array<i64: 64, 16>}]} {
    %c0 = arith.constant 0 : index
    %c0_0 = arith.constant 0 : index
    %0 = vector.load %arg1[%c0, %c0_0] : memref<64x147xbf16, #tpu.memory_space<vmem>>, vector<64x147xbf16>
    %c0_1 = arith.constant 0 : index
    %c0_2 = arith.constant 0 : index
    %1 = vector.load %arg2[%c0_1, %c0_2] : memref<147x16xbf16, #tpu.memory_space<vmem>>, vector<147x16xbf16>
    %cst = arith.constant dense<0.000000e+00> : vector<64x16xf32>
    %2 = tpu.matmul %0, %1, %cst {dimension_numbers = #tpu.dot_dimension_numbers<[1], [0], [0], [1], [0, 0, 1, 1], [], []>} : vector<64x147xbf16>, vector<147x16xbf16>, vector<64x16xf32> -> vector<64x16xf32>
    %c0_3 = arith.constant 0 : index
    %c0_4 = arith.constant 0 : index
    %3 = vector.load %arg3[%c0_3, %c0_4] : memref<1x16xf32, #tpu.memory_space<vmem>>, vector<1x16xf32>
    %4 = vector.broadcast %3 : vector<1x16xf32> to vector<64x16xf32>
    %5 = arith.addf %2, %4 : vector<64x16xf32>
    %c0_5 = arith.constant 0 : index
    %c0_6 = arith.constant 0 : index
    %6 = vector.load %arg4[%c0_5, %c0_6] : memref<64x16xf32, #tpu.memory_space<vmem>>, vector<64x16xf32>
    tpu.vector_store %arg4[%c0_5, %c0_6], %5 {strides = array<i32>} : memref<64x16xf32, #tpu.memory_space<vmem>>, vector<64x16xf32>,
    return
  }
  func.func @transform_0(%arg0: i32) -> (i32, i32) {
    %c0_i32 = arith.constant 0 : i32
    %c0_i32_0 = arith.constant 0 : i32
    return %arg0, %c0_i32 : i32, i32
  }
  func.func @transform_1(%arg0: i32) -> (i32, i32) {
    %c0_i32 = arith.constant 0 : i32
    %c0_i32_0 = arith.constant 0 : i32
    %c0_i32_1 = arith.constant 0 : i32
    return %c0_i32, %c0_i32_0 : i32, i32
  }
  func.func @transform_2(%arg0: i32) -> (i32, i32) {
    %c0_i32 = arith.constant 0 : i32
    %c0_i32_0 = arith.constant 0 : i32
    %c0_i32_1 = arith.constant 0 : i32
    return %c0_i32, %c0_i32_0 : i32, i32
  }
  func.func @transform_3(%arg0: i32) -> (i32, i32) {
    %c0_i32 = arith.constant 0 : i32
    %c0_i32_0 = arith.constant 0 : i32
    return %arg0, %c0_i32 : i32, i32
  }
}

module attributes {stable_mosaic.version = 11 : i64} {
  func.func @_matmul_bias_kernel(%arg0: i32, %arg1: memref<16x144xbf16, #tpu.memory_space<vmem>>, %arg2: memref<144x32xbf16, #tpu.memory_space<vmem>>, %arg3: memref<1x32xf32, #tpu.memory_space<vmem>>, %arg4: memref<16x32xf32, #tpu.memory_space<vmem>>) attributes {dimension_semantics = [#tpu.dimension_semantics<parallel>], iteration_bounds = array<i64: 2>, scalar_prefetch = 0 : i64, scratch_operands = 0 : i64, tpu.core_type = #tpu.core_type<tc>, window_params = [{transform_indices = @transform_0, window_bounds = array<i64: 16, 144>}, {pipeline_mode = #tpu.pipeline_mode<synchronous>, transform_indices = @transform_1, window_bounds = array<i64: 144, 32>}, {pipeline_mode = #tpu.pipeline_mode<synchronous>, transform_indices = @transform_2, window_bounds = array<i64: 1, 32>}, {transform_indices = @transform_3, window_bounds = array<i64: 16, 32>}]} {
    %c0 = arith.constant 0 : index
    %c0_0 = arith.constant 0 : index
    %0 = vector.load %arg1[%c0, %c0_0] : memref<16x144xbf16, #tpu.memory_space<vmem>>, vector<16x144xbf16>
    %c0_1 = arith.constant 0 : index
    %c0_2 = arith.constant 0 : index
    %1 = vector.load %arg2[%c0_1, %c0_2] : memref<144x32xbf16, #tpu.memory_space<vmem>>, vector<144x32xbf16>
    %cst = arith.constant dense<0.000000e+00> : vector<16x32xf32>
    %2 = tpu.matmul %0, %1, %cst {dimension_numbers = #tpu.dot_dimension_numbers<[1], [0], [0], [1], [0, 0, 1, 1], [], []>} : vector<16x144xbf16>, vector<144x32xbf16>, vector<16x32xf32> -> vector<16x32xf32>
    %c0_3 = arith.constant 0 : index
    %c0_4 = arith.constant 0 : index
    %3 = vector.load %arg3[%c0_3, %c0_4] : memref<1x32xf32, #tpu.memory_space<vmem>>, vector<1x32xf32>
    %4 = vector.broadcast %3 : vector<1x32xf32> to vector<16x32xf32>
    %5 = arith.addf %2, %4 : vector<16x32xf32>
    %c0_5 = arith.constant 0 : index
    %c0_6 = arith.constant 0 : index
    %6 = vector.load %arg4[%c0_5, %c0_6] : memref<16x32xf32, #tpu.memory_space<vmem>>, vector<16x32xf32>
    tpu.vector_store %arg4[%c0_5, %c0_6], %5 {strides = array<i32>} : memref<16x32xf32, #tpu.memory_space<vmem>>, vector<16x32xf32>,
    return
  }
  func.func @transform_0(%arg0: i32) -> (i32, i32) {
    %c0_i32 = arith.constant 0 : i32
    %c0_i32_0 = arith.constant 0 : i32
    return %arg0, %c0_i32 : i32, i32
  }
  func.func @transform_1(%arg0: i32) -> (i32, i32) {
    %c0_i32 = arith.constant 0 : i32
    %c0_i32_0 = arith.constant 0 : i32
    %c0_i32_1 = arith.constant 0 : i32
    return %c0_i32, %c0_i32_0 : i32, i32
  }
  func.func @transform_2(%arg0: i32) -> (i32, i32) {
    %c0_i32 = arith.constant 0 : i32
    %c0_i32_0 = arith.constant 0 : i32
    %c0_i32_1 = arith.constant 0 : i32
    return %c0_i32, %c0_i32_0 : i32, i32
  }
  func.func @transform_3(%arg0: i32) -> (i32, i32) {
    %c0_i32 = arith.constant 0 : i32
    %c0_i32_0 = arith.constant 0 : i32
    return %arg0, %c0_i32 : i32, i32
  }
}

module attributes {stable_mosaic.version = 11 : i64} {
  func.func @_stage_kernel(%arg0: i32, %arg1: i32, %arg2: memref<1x16x32xf32, #tpu.memory_space<vmem>>, %arg3: memref<5x16x32xf32, #tpu.memory_space<vmem>>, %arg4: memref<1x32x768xbf16, #tpu.memory_space<vmem>>, %arg5: memref<1x64x256xbf16, #tpu.memory_space<vmem>>, %arg6: memref<1x11x96xf32, #tpu.memory_space<vmem>>, %arg7: memref<1x16x32xf32, #tpu.memory_space<vmem>>) attributes {dimension_semantics = [#tpu.dimension_semantics<parallel>, #tpu.dimension_semantics<arbitrary>], iteration_bounds = array<i64: 2, 2>, scalar_prefetch = 0 : i64, scratch_operands = 0 : i64, tpu.core_type = #tpu.core_type<tc>, window_params = [{transform_indices = @transform_0, window_bounds = array<i64: 1, 16, 32>}, {pipeline_mode = #tpu.pipeline_mode<synchronous>, transform_indices = @transform_1, window_bounds = array<i64: 5, 16, 32>}, {transform_indices = @transform_2, window_bounds = array<i64: 1, 32, 768>}, {transform_indices = @transform_3, window_bounds = array<i64: 1, 64, 256>}, {transform_indices = @transform_4, window_bounds = array<i64: 1, 11, 96>}, {transform_indices = @transform_5, window_bounds = array<i64: 1, 16, 32>}]} {
    %c0_i32 = arith.constant 0 : i32
    %0 = arith.cmpi eq, %arg1, %c0_i32 : i32
    %1 = arith.extui %0 : i1 to i32
    %c0_i32_0 = arith.constant 0 : i32
    %2 = arith.cmpi ne, %1, %c0_i32_0 : i32
    scf.if %2 {
      %c0_90 = arith.constant 0 : index
      %c0_91 = arith.constant 0 : index
      %c0_92 = arith.constant 0 : index
      %196 = vector.load %arg2[%c0_90, %c0_91, %c0_92] : memref<1x16x32xf32, #tpu.memory_space<vmem>>, vector<1x16x32xf32>
      %c0_93 = arith.constant 0 : index
      %c0_94 = arith.constant 0 : index
      %c0_95 = arith.constant 0 : index
      %197 = vector.load %arg7[%c0_93, %c0_94, %c0_95] : memref<1x16x32xf32, #tpu.memory_space<vmem>>, vector<1x16x32xf32>
      tpu.vector_store %arg7[%c0_93, %c0_94, %c0_95], %196 {strides = array<i32>} : memref<1x16x32xf32, #tpu.memory_space<vmem>>, vector<1x16x32xf32>,
    } else {
    }
    %c0 = arith.constant 0 : index
    %c0_1 = arith.constant 0 : index
    %c0_2 = arith.constant 0 : index
    %3 = vector.load %arg7[%c0, %c0_1, %c0_2] : memref<1x16x32xf32, #tpu.memory_space<vmem>>, vector<1x16x32xf32>
    %4 = vector.shape_cast %3 : vector<1x16x32xf32> to vector<16x32xf32>
    %c0_3 = arith.constant 0 : index
    %c0_4 = arith.constant 0 : index
    %c0_5 = arith.constant 0 : index
    %5 = vector.load %arg4[%c0_3, %c0_4, %c0_5] : memref<1x32x768xbf16, #tpu.memory_space<vmem>>, vector<1x32x32xbf16>
    %6 = vector.shape_cast %5 : vector<1x32x32xbf16> to vector<32x32xbf16>
    %c0_6 = arith.constant 0 : index
    %c0_7 = arith.constant 0 : index
    %c128 = arith.constant 128 : index
    %7 = vector.load %arg4[%c0_6, %c0_7, %c128] : memref<1x32x768xbf16, #tpu.memory_space<vmem>>, vector<1x32x32xbf16>
    %8 = vector.shape_cast %7 : vector<1x32x32xbf16> to vector<32x32xbf16>
    %c0_8 = arith.constant 0 : index
    %c0_9 = arith.constant 0 : index
    %c256 = arith.constant 256 : index
    %9 = vector.load %arg4[%c0_8, %c0_9, %c256] : memref<1x32x768xbf16, #tpu.memory_space<vmem>>, vector<1x32x32xbf16>
    %10 = vector.shape_cast %9 : vector<1x32x32xbf16> to vector<32x32xbf16>
    %c0_10 = arith.constant 0 : index
    %c0_11 = arith.constant 0 : index
    %c384 = arith.constant 384 : index
    %11 = vector.load %arg4[%c0_10, %c0_11, %c384] : memref<1x32x768xbf16, #tpu.memory_space<vmem>>, vector<1x32x32xbf16>
    %12 = vector.shape_cast %11 : vector<1x32x32xbf16> to vector<32x32xbf16>
    %c0_12 = arith.constant 0 : index
    %c0_13 = arith.constant 0 : index
    %c512 = arith.constant 512 : index
    %13 = vector.load %arg4[%c0_12, %c0_13, %c512] : memref<1x32x768xbf16, #tpu.memory_space<vmem>>, vector<1x32x64xbf16>
    %14 = vector.shape_cast %13 : vector<1x32x64xbf16> to vector<32x64xbf16>
    %c0_14 = arith.constant 0 : index
    %c0_15 = arith.constant 0 : index
    %c640 = arith.constant 640 : index
    %15 = vector.load %arg4[%c0_14, %c0_15, %c640] : memref<1x32x768xbf16, #tpu.memory_space<vmem>>, vector<1x32x8xbf16>
    %16 = vector.shape_cast %15 : vector<1x32x8xbf16> to vector<32x8xbf16>
    %c0_16 = arith.constant 0 : index
    %c0_17 = arith.constant 0 : index
    %c0_18 = arith.constant 0 : index
    %17 = vector.load %arg5[%c0_16, %c0_17, %c0_18] : memref<1x64x256xbf16, #tpu.memory_space<vmem>>, vector<1x64x32xbf16>
    %18 = vector.shape_cast %17 : vector<1x64x32xbf16> to vector<64x32xbf16>
    %c0_19 = arith.constant 0 : index
    %c0_20 = arith.constant 0 : index
    %c128_21 = arith.constant 128 : index
    %19 = vector.load %arg5[%c0_19, %c0_20, %c128_21] : memref<1x64x256xbf16, #tpu.memory_space<vmem>>, vector<1x8x96xbf16>
    %20 = vector.shape_cast %19 : vector<1x8x96xbf16> to vector<8x96xbf16>
    %c0_22 = arith.constant 0 : index
    %c0_23 = arith.constant 0 : index
    %c0_24 = arith.constant 0 : index
    %21 = vector.load %arg6[%c0_22, %c0_23, %c0_24] : memref<1x11x96xf32, #tpu.memory_space<vmem>>, vector<1x1x32xf32>
    %22 = vector.shape_cast %21 : vector<1x1x32xf32> to vector<1x32xf32>
    %c0_25 = arith.constant 0 : index
    %c1 = arith.constant 1 : index
    %c0_26 = arith.constant 0 : index
    %23 = vector.load %arg6[%c0_25, %c1, %c0_26] : memref<1x11x96xf32, #tpu.memory_space<vmem>>, vector<1x1x32xf32>
    %24 = vector.shape_cast %23 : vector<1x1x32xf32> to vector<1x32xf32>
    %c0_27 = arith.constant 0 : index
    %c2 = arith.constant 2 : index
    %c0_28 = arith.constant 0 : index
    %25 = vector.load %arg6[%c0_27, %c2, %c0_28] : memref<1x11x96xf32, #tpu.memory_space<vmem>>, vector<1x1x32xf32>
    %26 = vector.shape_cast %25 : vector<1x1x32xf32> to vector<1x32xf32>
    %c0_29 = arith.constant 0 : index
    %c3 = arith.constant 3 : index
    %c0_30 = arith.constant 0 : index
    %27 = vector.load %arg6[%c0_29, %c3, %c0_30] : memref<1x11x96xf32, #tpu.memory_space<vmem>>, vector<1x1x32xf32>
    %28 = vector.shape_cast %27 : vector<1x1x32xf32> to vector<1x32xf32>
    %c0_31 = arith.constant 0 : index
    %c4 = arith.constant 4 : index
    %c0_32 = arith.constant 0 : index
    %29 = vector.load %arg6[%c0_31, %c4, %c0_32] : memref<1x11x96xf32, #tpu.memory_space<vmem>>, vector<1x1x32xf32>
    %30 = vector.shape_cast %29 : vector<1x1x32xf32> to vector<1x32xf32>
    %c0_33 = arith.constant 0 : index
    %c5 = arith.constant 5 : index
    %c0_34 = arith.constant 0 : index
    %31 = vector.load %arg6[%c0_33, %c5, %c0_34] : memref<1x11x96xf32, #tpu.memory_space<vmem>>, vector<1x1x32xf32>
    %32 = vector.shape_cast %31 : vector<1x1x32xf32> to vector<1x32xf32>
    %c0_35 = arith.constant 0 : index
    %c6 = arith.constant 6 : index
    %c0_36 = arith.constant 0 : index
    %33 = vector.load %arg6[%c0_35, %c6, %c0_36] : memref<1x11x96xf32, #tpu.memory_space<vmem>>, vector<1x1x32xf32>
    %34 = vector.shape_cast %33 : vector<1x1x32xf32> to vector<1x32xf32>
    %c0_37 = arith.constant 0 : index
    %c7 = arith.constant 7 : index
    %c0_38 = arith.constant 0 : index
    %35 = vector.load %arg6[%c0_37, %c7, %c0_38] : memref<1x11x96xf32, #tpu.memory_space<vmem>>, vector<1x1x32xf32>
    %36 = vector.shape_cast %35 : vector<1x1x32xf32> to vector<1x32xf32>
    %c0_39 = arith.constant 0 : index
    %c8 = arith.constant 8 : index
    %c0_40 = arith.constant 0 : index
    %37 = vector.load %arg6[%c0_39, %c8, %c0_40] : memref<1x11x96xf32, #tpu.memory_space<vmem>>, vector<1x1x8xf32>
    %38 = vector.shape_cast %37 : vector<1x1x8xf32> to vector<1x8xf32>
    %c0_41 = arith.constant 0 : index
    %c9 = arith.constant 9 : index
    %c0_42 = arith.constant 0 : index
    %39 = vector.load %arg6[%c0_41, %c9, %c0_42] : memref<1x11x96xf32, #tpu.memory_space<vmem>>, vector<1x1x64xf32>
    %40 = vector.shape_cast %39 : vector<1x1x64xf32> to vector<1x64xf32>
    %c0_43 = arith.constant 0 : index
    %c10 = arith.constant 10 : index
    %c0_44 = arith.constant 0 : index
    %41 = vector.load %arg6[%c0_43, %c10, %c0_44] : memref<1x11x96xf32, #tpu.memory_space<vmem>>, vector<1x1x96xf32>
    %42 = vector.shape_cast %41 : vector<1x1x96xf32> to vector<1x96xf32>
    %cst = arith.constant dense<0.000000e+00> : vector<16xf32>
    %43 = vector.multi_reduction <add>, %4, %cst [1] : vector<16x32xf32> to vector<16xf32>
    %44 = vector.shape_cast %43 : vector<16xf32> to vector<16x1xf32>
    %cst_45 = arith.constant 3.200000e+01 : f32
    %45 = vector.broadcast %cst_45 : f32 to vector<16x1xf32>
    %46 = arith.divf %44, %45 : vector<16x1xf32>
    %47 = vector.broadcast %46 : vector<16x1xf32> to vector<16x32xf32>
    %48 = arith.subf %4, %47 : vector<16x32xf32>
    %49 = arith.mulf %48, %48 : vector<16x32xf32>
    %cst_46 = arith.constant dense<0.000000e+00> : vector<16xf32>
    %50 = vector.multi_reduction <add>, %49, %cst_46 [1] : vector<16x32xf32> to vector<16xf32>
    %51 = vector.shape_cast %50 : vector<16xf32> to vector<16x1xf32>
    %cst_47 = arith.constant 3.200000e+01 : f32
    %52 = vector.broadcast %cst_47 : f32 to vector<16x1xf32>
    %53 = arith.divf %51, %52 : vector<16x1xf32>
    %cst_48 = arith.constant 9.99999974E-6 : f32
    %54 = vector.broadcast %cst_48 : f32 to vector<16x1xf32>
    %55 = arith.addf %53, %54 : vector<16x1xf32>
    %56 = math.rsqrt %55 : vector<16x1xf32>
    %57 = vector.broadcast %56 : vector<16x1xf32> to vector<16x32xf32>
    %58 = arith.mulf %48, %57 : vector<16x32xf32>
    %59 = vector.broadcast %22 : vector<1x32xf32> to vector<16x32xf32>
    %60 = arith.mulf %58, %59 : vector<16x32xf32>
    %61 = vector.broadcast %24 : vector<1x32xf32> to vector<16x32xf32>
    %62 = arith.addf %60, %61 : vector<16x32xf32>
    %c4_49 = arith.constant 4 : index
    %c0_50 = arith.constant 0 : index
    %c0_51 = arith.constant 0 : index
    %63 = vector.load %arg3[%c4_49, %c0_50, %c0_51] : memref<5x16x32xf32, #tpu.memory_space<vmem>>, vector<1x16x32xf32>
    %64 = vector.shape_cast %63 : vector<1x16x32xf32> to vector<16x32xf32>
    %65 = arith.mulf %62, %64 : vector<16x32xf32>
    %c15_i32 = arith.constant 15 : i32
    %66 = tpu.dynamic_rotate %62 by %c15_i32 dim 0 : vector<16x32xf32>, i32 -> vector<16x32xf32>
    %c0_52 = arith.constant 0 : index
    %c0_53 = arith.constant 0 : index
    %c0_54 = arith.constant 0 : index
    %67 = vector.load %arg3[%c0_52, %c0_53, %c0_54] : memref<5x16x32xf32, #tpu.memory_space<vmem>>, vector<1x16x32xf32>
    %68 = vector.shape_cast %67 : vector<1x16x32xf32> to vector<16x32xf32>
    %69 = arith.mulf %66, %68 : vector<16x32xf32>
    %70 = arith.addf %65, %69 : vector<16x32xf32>
    %c1_i32 = arith.constant 1 : i32
    %71 = tpu.dynamic_rotate %62 by %c1_i32 dim 0 : vector<16x32xf32>, i32 -> vector<16x32xf32>
    %c1_55 = arith.constant 1 : index
    %c0_56 = arith.constant 0 : index
    %c0_57 = arith.constant 0 : index
    %72 = vector.load %arg3[%c1_55, %c0_56, %c0_57] : memref<5x16x32xf32, #tpu.memory_space<vmem>>, vector<1x16x32xf32>
    %73 = vector.shape_cast %72 : vector<1x16x32xf32> to vector<16x32xf32>
    %74 = arith.mulf %71, %73 : vector<16x32xf32>
    %75 = arith.addf %70, %74 : vector<16x32xf32>
    %c12_i32 = arith.constant 12 : i32
    %76 = tpu.dynamic_rotate %62 by %c12_i32 dim 0 : vector<16x32xf32>, i32 -> vector<16x32xf32>
    %c2_58 = arith.constant 2 : index
    %c0_59 = arith.constant 0 : index
    %c0_60 = arith.constant 0 : index
    %77 = vector.load %arg3[%c2_58, %c0_59, %c0_60] : memref<5x16x32xf32, #tpu.memory_space<vmem>>, vector<1x16x32xf32>
    %78 = vector.shape_cast %77 : vector<1x16x32xf32> to vector<16x32xf32>
    %79 = arith.mulf %76, %78 : vector<16x32xf32>
    %80 = arith.addf %65, %79 : vector<16x32xf32>
    %c4_i32 = arith.constant 4 : i32
    %81 = tpu.dynamic_rotate %62 by %c4_i32 dim 0 : vector<16x32xf32>, i32 -> vector<16x32xf32>
    %c3_61 = arith.constant 3 : index
    %c0_62 = arith.constant 0 : index
    %c0_63 = arith.constant 0 : index
    %82 = vector.load %arg3[%c3_61, %c0_62, %c0_63] : memref<5x16x32xf32, #tpu.memory_space<vmem>>, vector<1x16x32xf32>
    %83 = vector.shape_cast %82 : vector<1x16x32xf32> to vector<16x32xf32>
    %84 = arith.mulf %81, %83 : vector<16x32xf32>
    %85 = arith.addf %80, %84 : vector<16x32xf32>
    %86 = arith.truncf %75 : vector<16x32xf32> to vector<16x32xbf16>
    %cst_64 = arith.constant dense<0.000000e+00> : vector<16x32xf32>
    %87 = tpu.matmul %86, %6, %cst_64 {dimension_numbers = #tpu.dot_dimension_numbers<[1], [0], [0], [1], [0, 0, 1, 1], [], []>} : vector<16x32xbf16>, vector<32x32xbf16>, vector<16x32xf32> -> vector<16x32xf32>
    %88 = vector.broadcast %26 : vector<1x32xf32> to vector<16x32xf32>
    %89 = arith.addf %87, %88 : vector<16x32xf32>
    %90 = arith.truncf %85 : vector<16x32xf32> to vector<16x32xbf16>
    %cst_65 = arith.constant dense<0.000000e+00> : vector<16x32xf32>
    %91 = tpu.matmul %90, %8, %cst_65 {dimension_numbers = #tpu.dot_dimension_numbers<[1], [0], [0], [1], [0, 0, 1, 1], [], []>} : vector<16x32xbf16>, vector<32x32xbf16>, vector<16x32xf32> -> vector<16x32xf32>
    %92 = vector.broadcast %28 : vector<1x32xf32> to vector<16x32xf32>
    %93 = arith.addf %91, %92 : vector<16x32xf32>
    %94 = arith.truncf %62 : vector<16x32xf32> to vector<16x32xbf16>
    %cst_66 = arith.constant dense<0.000000e+00> : vector<16x32xf32>
    %95 = tpu.matmul %94, %10, %cst_66 {dimension_numbers = #tpu.dot_dimension_numbers<[1], [0], [0], [1], [0, 0, 1, 1], [], []>} : vector<16x32xbf16>, vector<32x32xbf16>, vector<16x32xf32> -> vector<16x32xf32>
    %96 = arith.addf %89, %93 : vector<16x32xf32>
    %97 = arith.addf %96, %95 : vector<16x32xf32>
    %cst_67 = arith.constant dense<0.000000e+00> : vector<32xf32>
    %98 = vector.multi_reduction <add>, %97, %cst_67 [0] : vector<16x32xf32> to vector<32xf32>
    %99 = vector.shape_cast %98 : vector<32xf32> to vector<1x32xf32>
    %cst_68 = arith.constant 1.600000e+01 : f32
    %100 = vector.broadcast %cst_68 : f32 to vector<1x32xf32>
    %101 = arith.divf %99, %100 : vector<1x32xf32>
    %102 = arith.truncf %101 : vector<1x32xf32> to vector<1x32xbf16>
    %cst_69 = arith.constant dense<0.000000e+00> : vector<1x8xf32>
    %103 = tpu.matmul %102, %16, %cst_69 {dimension_numbers = #tpu.dot_dimension_numbers<[1], [0], [0], [1], [0, 0, 1, 1], [], []>} : vector<1x32xbf16>, vector<32x8xbf16>, vector<1x8xf32> -> vector<1x8xf32>
    %104 = arith.addf %103, %38 : vector<1x8xf32>
    %105 = arith.mulf %104, %104 : vector<1x8xf32>
    %106 = arith.mulf %104, %105 : vector<1x8xf32>
    %cst_70 = arith.constant 4.471500e-02 : f32
    %107 = vector.broadcast %cst_70 : f32 to vector<1x8xf32>
    %108 = arith.mulf %107, %106 : vector<1x8xf32>
    %109 = arith.addf %104, %108 : vector<1x8xf32>
    %cst_71 = arith.constant 0.797884583 : f32
    %110 = vector.broadcast %cst_71 : f32 to vector<1x8xf32>
    %111 = arith.mulf %110, %109 : vector<1x8xf32>
    %112 = math.tanh %111 : vector<1x8xf32>
    %cst_72 = arith.constant 1.000000e+00 : f32
    %113 = vector.broadcast %cst_72 : f32 to vector<1x8xf32>
    %114 = arith.addf %113, %112 : vector<1x8xf32>
    %cst_73 = arith.constant 5.000000e-01 : f32
    %115 = vector.broadcast %cst_73 : f32 to vector<1x8xf32>
    %116 = arith.mulf %115, %114 : vector<1x8xf32>
    %117 = arith.mulf %104, %116 : vector<1x8xf32>
    %118 = arith.truncf %117 : vector<1x8xf32> to vector<1x8xbf16>
    %cst_74 = arith.constant dense<0.000000e+00> : vector<1x96xf32>
    %119 = tpu.matmul %118, %20, %cst_74 {dimension_numbers = #tpu.dot_dimension_numbers<[1], [0], [0], [1], [0, 0, 1, 1], [], []>} : vector<1x8xbf16>, vector<8x96xbf16>, vector<1x96xf32> -> vector<1x96xf32>
    %120 = arith.addf %119, %42 : vector<1x96xf32>
    %121 = vector.extract_strided_slice %120 {offsets = [0, 0], sizes = [1, 32], strides = [1, 1]} : vector<1x96xf32> to vector<1x32xf32>
    %122 = vector.extract_strided_slice %120 {offsets = [0, 32], sizes = [1, 32], strides = [1, 1]} : vector<1x96xf32> to vector<1x32xf32>
    %123 = vector.extract_strided_slice %120 {offsets = [0, 64], sizes = [1, 32], strides = [1, 1]} : vector<1x96xf32> to vector<1x32xf32>
    %124 = arith.maximumf %121, %122 : vector<1x32xf32>
    %125 = arith.maximumf %124, %123 : vector<1x32xf32>
    %126 = arith.subf %121, %125 : vector<1x32xf32>
    %127 = math.exp %126 : vector<1x32xf32>
    %128 = arith.subf %122, %125 : vector<1x32xf32>
    %129 = math.exp %128 : vector<1x32xf32>
    %130 = arith.subf %123, %125 : vector<1x32xf32>
    %131 = math.exp %130 : vector<1x32xf32>
    %132 = arith.addf %127, %129 : vector<1x32xf32>
    %133 = arith.addf %132, %131 : vector<1x32xf32>
    %134 = tpu.reciprocal %133 {approx = true} : vector<1x32xf32> -> vector<1x32xf32>
    %135 = arith.mulf %127, %134 : vector<1x32xf32>
    %136 = arith.mulf %129, %134 : vector<1x32xf32>
    %137 = arith.mulf %131, %134 : vector<1x32xf32>
    %138 = vector.broadcast %135 : vector<1x32xf32> to vector<16x32xf32>
    %139 = arith.mulf %89, %138 : vector<16x32xf32>
    %140 = vector.broadcast %136 : vector<1x32xf32> to vector<16x32xf32>
    %141 = arith.mulf %93, %140 : vector<16x32xf32>
    %142 = arith.addf %139, %141 : vector<16x32xf32>
    %143 = vector.broadcast %137 : vector<1x32xf32> to vector<16x32xf32>
    %144 = arith.mulf %95, %143 : vector<16x32xf32>
    %145 = arith.addf %142, %144 : vector<16x32xf32>
    %146 = arith.truncf %145 : vector<16x32xf32> to vector<16x32xbf16>
    %cst_75 = arith.constant dense<0.000000e+00> : vector<16x32xf32>
    %147 = tpu.matmul %146, %12, %cst_75 {dimension_numbers = #tpu.dot_dimension_numbers<[1], [0], [0], [1], [0, 0, 1, 1], [], []>} : vector<16x32xbf16>, vector<32x32xbf16>, vector<16x32xf32> -> vector<16x32xf32>
    %148 = arith.addf %4, %147 : vector<16x32xf32>
    %149 = vector.broadcast %30 : vector<1x32xf32> to vector<16x32xf32>
    %150 = arith.addf %148, %149 : vector<16x32xf32>
    %cst_76 = arith.constant dense<0.000000e+00> : vector<16xf32>
    %151 = vector.multi_reduction <add>, %150, %cst_76 [1] : vector<16x32xf32> to vector<16xf32>
    %152 = vector.shape_cast %151 : vector<16xf32> to vector<16x1xf32>
    %cst_77 = arith.constant 3.200000e+01 : f32
    %153 = vector.broadcast %cst_77 : f32 to vector<16x1xf32>
    %154 = arith.divf %152, %153 : vector<16x1xf32>
    %155 = vector.broadcast %154 : vector<16x1xf32> to vector<16x32xf32>
    %156 = arith.subf %150, %155 : vector<16x32xf32>
    %157 = arith.mulf %156, %156 : vector<16x32xf32>
    %cst_78 = arith.constant dense<0.000000e+00> : vector<16xf32>
    %158 = vector.multi_reduction <add>, %157, %cst_78 [1] : vector<16x32xf32> to vector<16xf32>
    %159 = vector.shape_cast %158 : vector<16xf32> to vector<16x1xf32>
    %cst_79 = arith.constant 3.200000e+01 : f32
    %160 = vector.broadcast %cst_79 : f32 to vector<16x1xf32>
    %161 = arith.divf %159, %160 : vector<16x1xf32>
    %cst_80 = arith.constant 9.99999974E-6 : f32
    %162 = vector.broadcast %cst_80 : f32 to vector<16x1xf32>
    %163 = arith.addf %161, %162 : vector<16x1xf32>
    %164 = math.rsqrt %163 : vector<16x1xf32>
    %165 = vector.broadcast %164 : vector<16x1xf32> to vector<16x32xf32>
    %166 = arith.mulf %156, %165 : vector<16x32xf32>
    %167 = vector.broadcast %32 : vector<1x32xf32> to vector<16x32xf32>
    %168 = arith.mulf %166, %167 : vector<16x32xf32>
    %169 = vector.broadcast %34 : vector<1x32xf32> to vector<16x32xf32>
    %170 = arith.addf %168, %169 : vector<16x32xf32>
    %171 = arith.truncf %170 : vector<16x32xf32> to vector<16x32xbf16>
    %cst_81 = arith.constant dense<0.000000e+00> : vector<16x64xf32>
    %172 = tpu.matmul %171, %14, %cst_81 {dimension_numbers = #tpu.dot_dimension_numbers<[1], [0], [0], [1], [0, 0, 1, 1], [], []>} : vector<16x32xbf16>, vector<32x64xbf16>, vector<16x64xf32> -> vector<16x64xf32>
    %173 = vector.broadcast %40 : vector<1x64xf32> to vector<16x64xf32>
    %174 = arith.addf %172, %173 : vector<16x64xf32>
    %175 = arith.mulf %174, %174 : vector<16x64xf32>
    %176 = arith.mulf %174, %175 : vector<16x64xf32>
    %cst_82 = arith.constant 4.471500e-02 : f32
    %177 = vector.broadcast %cst_82 : f32 to vector<16x64xf32>
    %178 = arith.mulf %177, %176 : vector<16x64xf32>
    %179 = arith.addf %174, %178 : vector<16x64xf32>
    %cst_83 = arith.constant 0.797884583 : f32
    %180 = vector.broadcast %cst_83 : f32 to vector<16x64xf32>
    %181 = arith.mulf %180, %179 : vector<16x64xf32>
    %182 = math.tanh %181 : vector<16x64xf32>
    %cst_84 = arith.constant 1.000000e+00 : f32
    %183 = vector.broadcast %cst_84 : f32 to vector<16x64xf32>
    %184 = arith.addf %183, %182 : vector<16x64xf32>
    %cst_85 = arith.constant 5.000000e-01 : f32
    %185 = vector.broadcast %cst_85 : f32 to vector<16x64xf32>
    %186 = arith.mulf %185, %184 : vector<16x64xf32>
    %187 = arith.mulf %174, %186 : vector<16x64xf32>
    %188 = arith.truncf %187 : vector<16x64xf32> to vector<16x64xbf16>
    %cst_86 = arith.constant dense<0.000000e+00> : vector<16x32xf32>
    %189 = tpu.matmul %188, %18, %cst_86 {dimension_numbers = #tpu.dot_dimension_numbers<[1], [0], [0], [1], [0, 0, 1, 1], [], []>} : vector<16x64xbf16>, vector<64x32xbf16>, vector<16x32xf32> -> vector<16x32xf32>
    %190 = arith.addf %150, %189 : vector<16x32xf32>
    %191 = vector.broadcast %36 : vector<1x32xf32> to vector<16x32xf32>
    %192 = arith.addf %190, %191 : vector<16x32xf32>
    %c0_87 = arith.constant 0 : index
    %c0_88 = arith.constant 0 : index
    %c0_89 = arith.constant 0 : index
    %193 = vector.load %arg7[%c0_87, %c0_88, %c0_89] : memref<1x16x32xf32, #tpu.memory_space<vmem>>, vector<1x16x32xf32>
    %194 = vector.shape_cast %193 : vector<1x16x32xf32> to vector<16x32xf32>
    %195 = vector.shape_cast %192 : vector<16x32xf32> to vector<1x16x32xf32>
    tpu.vector_store %arg7[%c0_87, %c0_88, %c0_89], %195 {strides = array<i32>} : memref<1x16x32xf32, #tpu.memory_space<vmem>>, vector<1x16x32xf32>,
    return
  }
  func.func @transform_0(%arg0: i32, %arg1: i32) -> (i32, i32, i32) {
    %c0_i32 = arith.constant 0 : i32
    %c0_i32_0 = arith.constant 0 : i32
    %c0_i32_1 = arith.constant 0 : i32
    return %arg0, %c0_i32, %c0_i32_0 : i32, i32, i32
  }
  func.func @transform_1(%arg0: i32, %arg1: i32) -> (i32, i32, i32) {
    %c0_i32 = arith.constant 0 : i32
    %c0_i32_0 = arith.constant 0 : i32
    %c0_i32_1 = arith.constant 0 : i32
    %c0_i32_2 = arith.constant 0 : i32
    return %c0_i32, %c0_i32_0, %c0_i32_1 : i32, i32, i32
  }
  func.func @transform_2(%arg0: i32, %arg1: i32) -> (i32, i32, i32) {
    %c0_i32 = arith.constant 0 : i32
    %c0_i32_0 = arith.constant 0 : i32
    %c0_i32_1 = arith.constant 0 : i32
    return %arg1, %c0_i32, %c0_i32_0 : i32, i32, i32
  }
  func.func @transform_3(%arg0: i32, %arg1: i32) -> (i32, i32, i32) {
    %c0_i32 = arith.constant 0 : i32
    %c0_i32_0 = arith.constant 0 : i32
    %c0_i32_1 = arith.constant 0 : i32
    return %arg1, %c0_i32, %c0_i32_0 : i32, i32, i32
  }
  func.func @transform_4(%arg0: i32, %arg1: i32) -> (i32, i32, i32) {
    %c0_i32 = arith.constant 0 : i32
    %c0_i32_0 = arith.constant 0 : i32
    %c0_i32_1 = arith.constant 0 : i32
    return %arg1, %c0_i32, %c0_i32_0 : i32, i32, i32
  }
  func.func @transform_5(%arg0: i32, %arg1: i32) -> (i32, i32, i32) {
    %c0_i32 = arith.constant 0 : i32
    %c0_i32_0 = arith.constant 0 : i32
    %c0_i32_1 = arith.constant 0 : i32
    return %arg0, %c0_i32, %c0_i32_0 : i32, i32, i32
  }
}

module attributes {stable_mosaic.version = 11 : i64} {
  func.func @_matmul_bias_kernel(%arg0: i32, %arg1: memref<8x288xbf16, #tpu.memory_space<vmem>>, %arg2: memref<288x64xbf16, #tpu.memory_space<vmem>>, %arg3: memref<1x64xf32, #tpu.memory_space<vmem>>, %arg4: memref<8x64xf32, #tpu.memory_space<vmem>>) attributes {dimension_semantics = [#tpu.dimension_semantics<parallel>], iteration_bounds = array<i64: 1>, scalar_prefetch = 0 : i64, scratch_operands = 0 : i64, tpu.core_type = #tpu.core_type<tc>, window_params = [{transform_indices = @transform_0, window_bounds = array<i64: 8, 288>}, {pipeline_mode = #tpu.pipeline_mode<synchronous>, transform_indices = @transform_1, window_bounds = array<i64: 288, 64>}, {pipeline_mode = #tpu.pipeline_mode<synchronous>, transform_indices = @transform_2, window_bounds = array<i64: 1, 64>}, {transform_indices = @transform_3, window_bounds = array<i64: 8, 64>}]} {
    %c0 = arith.constant 0 : index
    %c0_0 = arith.constant 0 : index
    %0 = vector.load %arg1[%c0, %c0_0] : memref<8x288xbf16, #tpu.memory_space<vmem>>, vector<8x288xbf16>
    %c0_1 = arith.constant 0 : index
    %c0_2 = arith.constant 0 : index
    %1 = vector.load %arg2[%c0_1, %c0_2] : memref<288x64xbf16, #tpu.memory_space<vmem>>, vector<288x64xbf16>
    %cst = arith.constant dense<0.000000e+00> : vector<8x64xf32>
    %2 = tpu.matmul %0, %1, %cst {dimension_numbers = #tpu.dot_dimension_numbers<[1], [0], [0], [1], [0, 0, 1, 1], [], []>} : vector<8x288xbf16>, vector<288x64xbf16>, vector<8x64xf32> -> vector<8x64xf32>
    %c0_3 = arith.constant 0 : index
    %c0_4 = arith.constant 0 : index
    %3 = vector.load %arg3[%c0_3, %c0_4] : memref<1x64xf32, #tpu.memory_space<vmem>>, vector<1x64xf32>
    %4 = vector.broadcast %3 : vector<1x64xf32> to vector<8x64xf32>
    %5 = arith.addf %2, %4 : vector<8x64xf32>
    %c0_5 = arith.constant 0 : index
    %c0_6 = arith.constant 0 : index
    %6 = vector.load %arg4[%c0_5, %c0_6] : memref<8x64xf32, #tpu.memory_space<vmem>>, vector<8x64xf32>
    tpu.vector_store %arg4[%c0_5, %c0_6], %5 {strides = array<i32>} : memref<8x64xf32, #tpu.memory_space<vmem>>, vector<8x64xf32>,
    return
  }
  func.func @transform_0(%arg0: i32) -> (i32, i32) {
    %c0_i32 = arith.constant 0 : i32
    %c0_i32_0 = arith.constant 0 : i32
    return %arg0, %c0_i32 : i32, i32
  }
  func.func @transform_1(%arg0: i32) -> (i32, i32) {
    %c0_i32 = arith.constant 0 : i32
    %c0_i32_0 = arith.constant 0 : i32
    %c0_i32_1 = arith.constant 0 : i32
    return %c0_i32, %c0_i32_0 : i32, i32
  }
  func.func @transform_2(%arg0: i32) -> (i32, i32) {
    %c0_i32 = arith.constant 0 : i32
    %c0_i32_0 = arith.constant 0 : i32
    %c0_i32_1 = arith.constant 0 : i32
    return %c0_i32, %c0_i32_0 : i32, i32
  }
  func.func @transform_3(%arg0: i32) -> (i32, i32) {
    %c0_i32 = arith.constant 0 : i32
    %c0_i32_0 = arith.constant 0 : i32
    return %arg0, %c0_i32 : i32, i32
  }
}

module attributes {stable_mosaic.version = 11 : i64} {
  func.func @_stage_kernel(%arg0: i32, %arg1: i32, %arg2: memref<1x4x64xf32, #tpu.memory_space<vmem>>, %arg3: memref<5x4x64xf32, #tpu.memory_space<vmem>>, %arg4: memref<1x64x768xbf16, #tpu.memory_space<vmem>>, %arg5: memref<1x128x384xbf16, #tpu.memory_space<vmem>>, %arg6: memref<1x11x192xf32, #tpu.memory_space<vmem>>, %arg7: memref<1x4x64xf32, #tpu.memory_space<vmem>>) attributes {dimension_semantics = [#tpu.dimension_semantics<parallel>, #tpu.dimension_semantics<arbitrary>], iteration_bounds = array<i64: 2, 2>, scalar_prefetch = 0 : i64, scratch_operands = 0 : i64, tpu.core_type = #tpu.core_type<tc>, window_params = [{transform_indices = @transform_0, window_bounds = array<i64: 1, 4, 64>}, {pipeline_mode = #tpu.pipeline_mode<synchronous>, transform_indices = @transform_1, window_bounds = array<i64: 5, 4, 64>}, {transform_indices = @transform_2, window_bounds = array<i64: 1, 64, 768>}, {transform_indices = @transform_3, window_bounds = array<i64: 1, 128, 384>}, {transform_indices = @transform_4, window_bounds = array<i64: 1, 11, 192>}, {transform_indices = @transform_5, window_bounds = array<i64: 1, 4, 64>}]} {
    %c0_i32 = arith.constant 0 : i32
    %0 = arith.cmpi eq, %arg1, %c0_i32 : i32
    %1 = arith.extui %0 : i1 to i32
    %c0_i32_0 = arith.constant 0 : i32
    %2 = arith.cmpi ne, %1, %c0_i32_0 : i32
    scf.if %2 {
      %c0_90 = arith.constant 0 : index
      %c0_91 = arith.constant 0 : index
      %c0_92 = arith.constant 0 : index
      %204 = vector.load %arg2[%c0_90, %c0_91, %c0_92] : memref<1x4x64xf32, #tpu.memory_space<vmem>>, vector<1x4x64xf32>
      %c0_93 = arith.constant 0 : index
      %c0_94 = arith.constant 0 : index
      %c0_95 = arith.constant 0 : index
      %205 = vector.load %arg7[%c0_93, %c0_94, %c0_95] : memref<1x4x64xf32, #tpu.memory_space<vmem>>, vector<1x4x64xf32>
      tpu.vector_store %arg7[%c0_93, %c0_94, %c0_95], %204 {strides = array<i32>} : memref<1x4x64xf32, #tpu.memory_space<vmem>>, vector<1x4x64xf32>,
    } else {
    }
    %c0 = arith.constant 0 : index
    %c0_1 = arith.constant 0 : index
    %c0_2 = arith.constant 0 : index
    %3 = vector.load %arg7[%c0, %c0_1, %c0_2] : memref<1x4x64xf32, #tpu.memory_space<vmem>>, vector<1x4x64xf32>
    %4 = vector.shape_cast %3 : vector<1x4x64xf32> to vector<4x64xf32>
    %c0_3 = arith.constant 0 : index
    %c0_4 = arith.constant 0 : index
    %c0_5 = arith.constant 0 : index
    %5 = vector.load %arg4[%c0_3, %c0_4, %c0_5] : memref<1x64x768xbf16, #tpu.memory_space<vmem>>, vector<1x64x64xbf16>
    %6 = vector.shape_cast %5 : vector<1x64x64xbf16> to vector<64x64xbf16>
    %c0_6 = arith.constant 0 : index
    %c0_7 = arith.constant 0 : index
    %c128 = arith.constant 128 : index
    %7 = vector.load %arg4[%c0_6, %c0_7, %c128] : memref<1x64x768xbf16, #tpu.memory_space<vmem>>, vector<1x64x64xbf16>
    %8 = vector.shape_cast %7 : vector<1x64x64xbf16> to vector<64x64xbf16>
    %c0_8 = arith.constant 0 : index
    %c0_9 = arith.constant 0 : index
    %c256 = arith.constant 256 : index
    %9 = vector.load %arg4[%c0_8, %c0_9, %c256] : memref<1x64x768xbf16, #tpu.memory_space<vmem>>, vector<1x64x64xbf16>
    %10 = vector.shape_cast %9 : vector<1x64x64xbf16> to vector<64x64xbf16>
    %c0_10 = arith.constant 0 : index
    %c0_11 = arith.constant 0 : index
    %c384 = arith.constant 384 : index
    %11 = vector.load %arg4[%c0_10, %c0_11, %c384] : memref<1x64x768xbf16, #tpu.memory_space<vmem>>, vector<1x64x64xbf16>
    %12 = vector.shape_cast %11 : vector<1x64x64xbf16> to vector<64x64xbf16>
    %c0_12 = arith.constant 0 : index
    %c0_13 = arith.constant 0 : index
    %c512 = arith.constant 512 : index
    %13 = vector.load %arg4[%c0_12, %c0_13, %c512] : memref<1x64x768xbf16, #tpu.memory_space<vmem>>, vector<1x64x128xbf16>
    %14 = vector.shape_cast %13 : vector<1x64x128xbf16> to vector<64x128xbf16>
    %c0_14 = arith.constant 0 : index
    %c0_15 = arith.constant 0 : index
    %c640 = arith.constant 640 : index
    %15 = vector.load %arg4[%c0_14, %c0_15, %c640] : memref<1x64x768xbf16, #tpu.memory_space<vmem>>, vector<1x64x16xbf16>
    %16 = vector.shape_cast %15 : vector<1x64x16xbf16> to vector<64x16xbf16>
    %c0_16 = arith.constant 0 : index
    %c0_17 = arith.constant 0 : index
    %c0_18 = arith.constant 0 : index
    %17 = vector.load %arg5[%c0_16, %c0_17, %c0_18] : memref<1x128x384xbf16, #tpu.memory_space<vmem>>, vector<1x128x64xbf16>
    %18 = vector.shape_cast %17 : vector<1x128x64xbf16> to vector<128x64xbf16>
    %c0_19 = arith.constant 0 : index
    %c0_20 = arith.constant 0 : index
    %c128_21 = arith.constant 128 : index
    %19 = vector.load %arg5[%c0_19, %c0_20, %c128_21] : memref<1x128x384xbf16, #tpu.memory_space<vmem>>, vector<1x16x192xbf16>
    %20 = vector.shape_cast %19 : vector<1x16x192xbf16> to vector<16x192xbf16>
    %c0_22 = arith.constant 0 : index
    %c0_23 = arith.constant 0 : index
    %c0_24 = arith.constant 0 : index
    %21 = vector.load %arg6[%c0_22, %c0_23, %c0_24] : memref<1x11x192xf32, #tpu.memory_space<vmem>>, vector<1x1x64xf32>
    %22 = vector.shape_cast %21 : vector<1x1x64xf32> to vector<1x64xf32>
    %c0_25 = arith.constant 0 : index
    %c1 = arith.constant 1 : index
    %c0_26 = arith.constant 0 : index
    %23 = vector.load %arg6[%c0_25, %c1, %c0_26] : memref<1x11x192xf32, #tpu.memory_space<vmem>>, vector<1x1x64xf32>
    %24 = vector.shape_cast %23 : vector<1x1x64xf32> to vector<1x64xf32>
    %c0_27 = arith.constant 0 : index
    %c2 = arith.constant 2 : index
    %c0_28 = arith.constant 0 : index
    %25 = vector.load %arg6[%c0_27, %c2, %c0_28] : memref<1x11x192xf32, #tpu.memory_space<vmem>>, vector<1x1x64xf32>
    %26 = vector.shape_cast %25 : vector<1x1x64xf32> to vector<1x64xf32>
    %c0_29 = arith.constant 0 : index
    %c3 = arith.constant 3 : index
    %c0_30 = arith.constant 0 : index
    %27 = vector.load %arg6[%c0_29, %c3, %c0_30] : memref<1x11x192xf32, #tpu.memory_space<vmem>>, vector<1x1x64xf32>
    %28 = vector.shape_cast %27 : vector<1x1x64xf32> to vector<1x64xf32>
    %c0_31 = arith.constant 0 : index
    %c4 = arith.constant 4 : index
    %c0_32 = arith.constant 0 : index
    %29 = vector.load %arg6[%c0_31, %c4, %c0_32] : memref<1x11x192xf32, #tpu.memory_space<vmem>>, vector<1x1x64xf32>
    %30 = vector.shape_cast %29 : vector<1x1x64xf32> to vector<1x64xf32>
    %c0_33 = arith.constant 0 : index
    %c5 = arith.constant 5 : index
    %c0_34 = arith.constant 0 : index
    %31 = vector.load %arg6[%c0_33, %c5, %c0_34] : memref<1x11x192xf32, #tpu.memory_space<vmem>>, vector<1x1x64xf32>
    %32 = vector.shape_cast %31 : vector<1x1x64xf32> to vector<1x64xf32>
    %c0_35 = arith.constant 0 : index
    %c6 = arith.constant 6 : index
    %c0_36 = arith.constant 0 : index
    %33 = vector.load %arg6[%c0_35, %c6, %c0_36] : memref<1x11x192xf32, #tpu.memory_space<vmem>>, vector<1x1x64xf32>
    %34 = vector.shape_cast %33 : vector<1x1x64xf32> to vector<1x64xf32>
    %c0_37 = arith.constant 0 : index
    %c7 = arith.constant 7 : index
    %c0_38 = arith.constant 0 : index
    %35 = vector.load %arg6[%c0_37, %c7, %c0_38] : memref<1x11x192xf32, #tpu.memory_space<vmem>>, vector<1x1x64xf32>
    %36 = vector.shape_cast %35 : vector<1x1x64xf32> to vector<1x64xf32>
    %c0_39 = arith.constant 0 : index
    %c8 = arith.constant 8 : index
    %c0_40 = arith.constant 0 : index
    %37 = vector.load %arg6[%c0_39, %c8, %c0_40] : memref<1x11x192xf32, #tpu.memory_space<vmem>>, vector<1x1x16xf32>
    %38 = vector.shape_cast %37 : vector<1x1x16xf32> to vector<1x16xf32>
    %c0_41 = arith.constant 0 : index
    %c9 = arith.constant 9 : index
    %c0_42 = arith.constant 0 : index
    %39 = vector.load %arg6[%c0_41, %c9, %c0_42] : memref<1x11x192xf32, #tpu.memory_space<vmem>>, vector<1x1x128xf32>
    %40 = vector.shape_cast %39 : vector<1x1x128xf32> to vector<1x128xf32>
    %c0_43 = arith.constant 0 : index
    %c10 = arith.constant 10 : index
    %c0_44 = arith.constant 0 : index
    %41 = vector.load %arg6[%c0_43, %c10, %c0_44] : memref<1x11x192xf32, #tpu.memory_space<vmem>>, vector<1x1x192xf32>
    %42 = vector.shape_cast %41 : vector<1x1x192xf32> to vector<1x192xf32>
    %cst = arith.constant dense<0.000000e+00> : vector<4xf32>
    %43 = vector.multi_reduction <add>, %4, %cst [1] : vector<4x64xf32> to vector<4xf32>
    %44 = vector.shape_cast %43 : vector<4xf32> to vector<4x1xf32>
    %cst_45 = arith.constant 6.400000e+01 : f32
    %45 = vector.broadcast %cst_45 : f32 to vector<4x1xf32>
    %46 = arith.divf %44, %45 : vector<4x1xf32>
    %47 = vector.broadcast %46 : vector<4x1xf32> to vector<4x64xf32>
    %48 = arith.subf %4, %47 : vector<4x64xf32>
    %49 = arith.mulf %48, %48 : vector<4x64xf32>
    %cst_46 = arith.constant dense<0.000000e+00> : vector<4xf32>
    %50 = vector.multi_reduction <add>, %49, %cst_46 [1] : vector<4x64xf32> to vector<4xf32>
    %51 = vector.shape_cast %50 : vector<4xf32> to vector<4x1xf32>
    %cst_47 = arith.constant 6.400000e+01 : f32
    %52 = vector.broadcast %cst_47 : f32 to vector<4x1xf32>
    %53 = arith.divf %51, %52 : vector<4x1xf32>
    %cst_48 = arith.constant 9.99999974E-6 : f32
    %54 = vector.broadcast %cst_48 : f32 to vector<4x1xf32>
    %55 = arith.addf %53, %54 : vector<4x1xf32>
    %56 = math.rsqrt %55 : vector<4x1xf32>
    %57 = vector.broadcast %56 : vector<4x1xf32> to vector<4x64xf32>
    %58 = arith.mulf %48, %57 : vector<4x64xf32>
    %59 = vector.broadcast %22 : vector<1x64xf32> to vector<4x64xf32>
    %60 = arith.mulf %58, %59 : vector<4x64xf32>
    %61 = vector.broadcast %24 : vector<1x64xf32> to vector<4x64xf32>
    %62 = arith.addf %60, %61 : vector<4x64xf32>
    %c4_49 = arith.constant 4 : index
    %c0_50 = arith.constant 0 : index
    %c0_51 = arith.constant 0 : index
    %63 = vector.load %arg3[%c4_49, %c0_50, %c0_51] : memref<5x4x64xf32, #tpu.memory_space<vmem>>, vector<1x4x64xf32>
    %64 = vector.shape_cast %63 : vector<1x4x64xf32> to vector<4x64xf32>
    %65 = arith.mulf %62, %64 : vector<4x64xf32>
    %66 = vector.extract_strided_slice %62 {offsets = [1, 0], sizes = [3, 64], strides = [1, 1]} : vector<4x64xf32> to vector<3x64xf32>
    %67 = vector.extract_strided_slice %62 {offsets = [0, 0], sizes = [1, 64], strides = [1, 1]} : vector<4x64xf32> to vector<1x64xf32>
    %68 = tpu.concatenate %66, %67 in 0 : vector<3x64xf32>, vector<1x64xf32> -> vector<4x64xf32>
    %c0_52 = arith.constant 0 : index
    %c0_53 = arith.constant 0 : index
    %c0_54 = arith.constant 0 : index
    %69 = vector.load %arg3[%c0_52, %c0_53, %c0_54] : memref<5x4x64xf32, #tpu.memory_space<vmem>>, vector<1x4x64xf32>
    %70 = vector.shape_cast %69 : vector<1x4x64xf32> to vector<4x64xf32>
    %71 = arith.mulf %68, %70 : vector<4x64xf32>
    %72 = arith.addf %65, %71 : vector<4x64xf32>
    %73 = vector.extract_strided_slice %62 {offsets = [3, 0], sizes = [1, 64], strides = [1, 1]} : vector<4x64xf32> to vector<1x64xf32>
    %74 = vector.extract_strided_slice %62 {offsets = [0, 0], sizes = [3, 64], strides = [1, 1]} : vector<4x64xf32> to vector<3x64xf32>
    %75 = tpu.concatenate %73, %74 in 0 : vector<1x64xf32>, vector<3x64xf32> -> vector<4x64xf32>
    %c1_55 = arith.constant 1 : index
    %c0_56 = arith.constant 0 : index
    %c0_57 = arith.constant 0 : index
    %76 = vector.load %arg3[%c1_55, %c0_56, %c0_57] : memref<5x4x64xf32, #tpu.memory_space<vmem>>, vector<1x4x64xf32>
    %77 = vector.shape_cast %76 : vector<1x4x64xf32> to vector<4x64xf32>
    %78 = arith.mulf %75, %77 : vector<4x64xf32>
    %79 = arith.addf %72, %78 : vector<4x64xf32>
    %80 = vector.extract_strided_slice %62 {offsets = [2, 0], sizes = [2, 64], strides = [1, 1]} : vector<4x64xf32> to vector<2x64xf32>
    %81 = vector.extract_strided_slice %62 {offsets = [0, 0], sizes = [2, 64], strides = [1, 1]} : vector<4x64xf32> to vector<2x64xf32>
    %82 = tpu.concatenate %80, %81 in 0 : vector<2x64xf32>, vector<2x64xf32> -> vector<4x64xf32>
    %c2_58 = arith.constant 2 : index
    %c0_59 = arith.constant 0 : index
    %c0_60 = arith.constant 0 : index
    %83 = vector.load %arg3[%c2_58, %c0_59, %c0_60] : memref<5x4x64xf32, #tpu.memory_space<vmem>>, vector<1x4x64xf32>
    %84 = vector.shape_cast %83 : vector<1x4x64xf32> to vector<4x64xf32>
    %85 = arith.mulf %82, %84 : vector<4x64xf32>
    %86 = arith.addf %65, %85 : vector<4x64xf32>
    %87 = vector.extract_strided_slice %62 {offsets = [2, 0], sizes = [2, 64], strides = [1, 1]} : vector<4x64xf32> to vector<2x64xf32>
    %88 = vector.extract_strided_slice %62 {offsets = [0, 0], sizes = [2, 64], strides = [1, 1]} : vector<4x64xf32> to vector<2x64xf32>
    %89 = tpu.concatenate %87, %88 in 0 : vector<2x64xf32>, vector<2x64xf32> -> vector<4x64xf32>
    %c3_61 = arith.constant 3 : index
    %c0_62 = arith.constant 0 : index
    %c0_63 = arith.constant 0 : index
    %90 = vector.load %arg3[%c3_61, %c0_62, %c0_63] : memref<5x4x64xf32, #tpu.memory_space<vmem>>, vector<1x4x64xf32>
    %91 = vector.shape_cast %90 : vector<1x4x64xf32> to vector<4x64xf32>
    %92 = arith.mulf %89, %91 : vector<4x64xf32>
    %93 = arith.addf %86, %92 : vector<4x64xf32>
    %94 = arith.truncf %79 : vector<4x64xf32> to vector<4x64xbf16>
    %cst_64 = arith.constant dense<0.000000e+00> : vector<4x64xf32>
    %95 = tpu.matmul %94, %6, %cst_64 {dimension_numbers = #tpu.dot_dimension_numbers<[1], [0], [0], [1], [0, 0, 1, 1], [], []>} : vector<4x64xbf16>, vector<64x64xbf16>, vector<4x64xf32> -> vector<4x64xf32>
    %96 = vector.broadcast %26 : vector<1x64xf32> to vector<4x64xf32>
    %97 = arith.addf %95, %96 : vector<4x64xf32>
    %98 = arith.truncf %93 : vector<4x64xf32> to vector<4x64xbf16>
    %cst_65 = arith.constant dense<0.000000e+00> : vector<4x64xf32>
    %99 = tpu.matmul %98, %8, %cst_65 {dimension_numbers = #tpu.dot_dimension_numbers<[1], [0], [0], [1], [0, 0, 1, 1], [], []>} : vector<4x64xbf16>, vector<64x64xbf16>, vector<4x64xf32> -> vector<4x64xf32>
    %100 = vector.broadcast %28 : vector<1x64xf32> to vector<4x64xf32>
    %101 = arith.addf %99, %100 : vector<4x64xf32>
    %102 = arith.truncf %62 : vector<4x64xf32> to vector<4x64xbf16>
    %cst_66 = arith.constant dense<0.000000e+00> : vector<4x64xf32>
    %103 = tpu.matmul %102, %10, %cst_66 {dimension_numbers = #tpu.dot_dimension_numbers<[1], [0], [0], [1], [0, 0, 1, 1], [], []>} : vector<4x64xbf16>, vector<64x64xbf16>, vector<4x64xf32> -> vector<4x64xf32>
    %104 = arith.addf %97, %101 : vector<4x64xf32>
    %105 = arith.addf %104, %103 : vector<4x64xf32>
    %cst_67 = arith.constant dense<0.000000e+00> : vector<64xf32>
    %106 = vector.multi_reduction <add>, %105, %cst_67 [0] : vector<4x64xf32> to vector<64xf32>
    %107 = vector.shape_cast %106 : vector<64xf32> to vector<1x64xf32>
    %cst_68 = arith.constant 4.000000e+00 : f32
    %108 = vector.broadcast %cst_68 : f32 to vector<1x64xf32>
    %109 = arith.divf %107, %108 : vector<1x64xf32>
    %110 = arith.truncf %109 : vector<1x64xf32> to vector<1x64xbf16>
    %cst_69 = arith.constant dense<0.000000e+00> : vector<1x16xf32>
    %111 = tpu.matmul %110, %16, %cst_69 {dimension_numbers = #tpu.dot_dimension_numbers<[1], [0], [0], [1], [0, 0, 1, 1], [], []>} : vector<1x64xbf16>, vector<64x16xbf16>, vector<1x16xf32> -> vector<1x16xf32>
    %112 = arith.addf %111, %38 : vector<1x16xf32>
    %113 = arith.mulf %112, %112 : vector<1x16xf32>
    %114 = arith.mulf %112, %113 : vector<1x16xf32>
    %cst_70 = arith.constant 4.471500e-02 : f32
    %115 = vector.broadcast %cst_70 : f32 to vector<1x16xf32>
    %116 = arith.mulf %115, %114 : vector<1x16xf32>
    %117 = arith.addf %112, %116 : vector<1x16xf32>
    %cst_71 = arith.constant 0.797884583 : f32
    %118 = vector.broadcast %cst_71 : f32 to vector<1x16xf32>
    %119 = arith.mulf %118, %117 : vector<1x16xf32>
    %120 = math.tanh %119 : vector<1x16xf32>
    %cst_72 = arith.constant 1.000000e+00 : f32
    %121 = vector.broadcast %cst_72 : f32 to vector<1x16xf32>
    %122 = arith.addf %121, %120 : vector<1x16xf32>
    %cst_73 = arith.constant 5.000000e-01 : f32
    %123 = vector.broadcast %cst_73 : f32 to vector<1x16xf32>
    %124 = arith.mulf %123, %122 : vector<1x16xf32>
    %125 = arith.mulf %112, %124 : vector<1x16xf32>
    %126 = arith.truncf %125 : vector<1x16xf32> to vector<1x16xbf16>
    %cst_74 = arith.constant dense<0.000000e+00> : vector<1x192xf32>
    %127 = tpu.matmul %126, %20, %cst_74 {dimension_numbers = #tpu.dot_dimension_numbers<[1], [0], [0], [1], [0, 0, 1, 1], [], []>} : vector<1x16xbf16>, vector<16x192xbf16>, vector<1x192xf32> -> vector<1x192xf32>
    %128 = arith.addf %127, %42 : vector<1x192xf32>
    %129 = vector.extract_strided_slice %128 {offsets = [0, 0], sizes = [1, 64], strides = [1, 1]} : vector<1x192xf32> to vector<1x64xf32>
    %130 = vector.extract_strided_slice %128 {offsets = [0, 64], sizes = [1, 64], strides = [1, 1]} : vector<1x192xf32> to vector<1x64xf32>
    %131 = vector.extract_strided_slice %128 {offsets = [0, 128], sizes = [1, 64], strides = [1, 1]} : vector<1x192xf32> to vector<1x64xf32>
    %132 = arith.maximumf %129, %130 : vector<1x64xf32>
    %133 = arith.maximumf %132, %131 : vector<1x64xf32>
    %134 = arith.subf %129, %133 : vector<1x64xf32>
    %135 = math.exp %134 : vector<1x64xf32>
    %136 = arith.subf %130, %133 : vector<1x64xf32>
    %137 = math.exp %136 : vector<1x64xf32>
    %138 = arith.subf %131, %133 : vector<1x64xf32>
    %139 = math.exp %138 : vector<1x64xf32>
    %140 = arith.addf %135, %137 : vector<1x64xf32>
    %141 = arith.addf %140, %139 : vector<1x64xf32>
    %142 = tpu.reciprocal %141 {approx = true} : vector<1x64xf32> -> vector<1x64xf32>
    %143 = arith.mulf %135, %142 : vector<1x64xf32>
    %144 = arith.mulf %137, %142 : vector<1x64xf32>
    %145 = arith.mulf %139, %142 : vector<1x64xf32>
    %146 = vector.broadcast %143 : vector<1x64xf32> to vector<4x64xf32>
    %147 = arith.mulf %97, %146 : vector<4x64xf32>
    %148 = vector.broadcast %144 : vector<1x64xf32> to vector<4x64xf32>
    %149 = arith.mulf %101, %148 : vector<4x64xf32>
    %150 = arith.addf %147, %149 : vector<4x64xf32>
    %151 = vector.broadcast %145 : vector<1x64xf32> to vector<4x64xf32>
    %152 = arith.mulf %103, %151 : vector<4x64xf32>
    %153 = arith.addf %150, %152 : vector<4x64xf32>
    %154 = arith.truncf %153 : vector<4x64xf32> to vector<4x64xbf16>
    %cst_75 = arith.constant dense<0.000000e+00> : vector<4x64xf32>
    %155 = tpu.matmul %154, %12, %cst_75 {dimension_numbers = #tpu.dot_dimension_numbers<[1], [0], [0], [1], [0, 0, 1, 1], [], []>} : vector<4x64xbf16>, vector<64x64xbf16>, vector<4x64xf32> -> vector<4x64xf32>
    %156 = arith.addf %4, %155 : vector<4x64xf32>
    %157 = vector.broadcast %30 : vector<1x64xf32> to vector<4x64xf32>
    %158 = arith.addf %156, %157 : vector<4x64xf32>
    %cst_76 = arith.constant dense<0.000000e+00> : vector<4xf32>
    %159 = vector.multi_reduction <add>, %158, %cst_76 [1] : vector<4x64xf32> to vector<4xf32>
    %160 = vector.shape_cast %159 : vector<4xf32> to vector<4x1xf32>
    %cst_77 = arith.constant 6.400000e+01 : f32
    %161 = vector.broadcast %cst_77 : f32 to vector<4x1xf32>
    %162 = arith.divf %160, %161 : vector<4x1xf32>
    %163 = vector.broadcast %162 : vector<4x1xf32> to vector<4x64xf32>
    %164 = arith.subf %158, %163 : vector<4x64xf32>
    %165 = arith.mulf %164, %164 : vector<4x64xf32>
    %cst_78 = arith.constant dense<0.000000e+00> : vector<4xf32>
    %166 = vector.multi_reduction <add>, %165, %cst_78 [1] : vector<4x64xf32> to vector<4xf32>
    %167 = vector.shape_cast %166 : vector<4xf32> to vector<4x1xf32>
    %cst_79 = arith.constant 6.400000e+01 : f32
    %168 = vector.broadcast %cst_79 : f32 to vector<4x1xf32>
    %169 = arith.divf %167, %168 : vector<4x1xf32>
    %cst_80 = arith.constant 9.99999974E-6 : f32
    %170 = vector.broadcast %cst_80 : f32 to vector<4x1xf32>
    %171 = arith.addf %169, %170 : vector<4x1xf32>
    %172 = math.rsqrt %171 : vector<4x1xf32>
    %173 = vector.broadcast %172 : vector<4x1xf32> to vector<4x64xf32>
    %174 = arith.mulf %164, %173 : vector<4x64xf32>
    %175 = vector.broadcast %32 : vector<1x64xf32> to vector<4x64xf32>
    %176 = arith.mulf %174, %175 : vector<4x64xf32>
    %177 = vector.broadcast %34 : vector<1x64xf32> to vector<4x64xf32>
    %178 = arith.addf %176, %177 : vector<4x64xf32>
    %179 = arith.truncf %178 : vector<4x64xf32> to vector<4x64xbf16>
    %cst_81 = arith.constant dense<0.000000e+00> : vector<4x128xf32>
    %180 = tpu.matmul %179, %14, %cst_81 {dimension_numbers = #tpu.dot_dimension_numbers<[1], [0], [0], [1], [0, 0, 1, 1], [], []>} : vector<4x64xbf16>, vector<64x128xbf16>, vector<4x128xf32> -> vector<4x128xf32>
    %181 = vector.broadcast %40 : vector<1x128xf32> to vector<4x128xf32>
    %182 = arith.addf %180, %181 : vector<4x128xf32>
    %183 = arith.mulf %182, %182 : vector<4x128xf32>
    %184 = arith.mulf %182, %183 : vector<4x128xf32>
    %cst_82 = arith.constant 4.471500e-02 : f32
    %185 = vector.broadcast %cst_82 : f32 to vector<4x128xf32>
    %186 = arith.mulf %185, %184 : vector<4x128xf32>
    %187 = arith.addf %182, %186 : vector<4x128xf32>
    %cst_83 = arith.constant 0.797884583 : f32
    %188 = vector.broadcast %cst_83 : f32 to vector<4x128xf32>
    %189 = arith.mulf %188, %187 : vector<4x128xf32>
    %190 = math.tanh %189 : vector<4x128xf32>
    %cst_84 = arith.constant 1.000000e+00 : f32
    %191 = vector.broadcast %cst_84 : f32 to vector<4x128xf32>
    %192 = arith.addf %191, %190 : vector<4x128xf32>
    %cst_85 = arith.constant 5.000000e-01 : f32
    %193 = vector.broadcast %cst_85 : f32 to vector<4x128xf32>
    %194 = arith.mulf %193, %192 : vector<4x128xf32>
    %195 = arith.mulf %182, %194 : vector<4x128xf32>
    %196 = arith.truncf %195 : vector<4x128xf32> to vector<4x128xbf16>
    %cst_86 = arith.constant dense<0.000000e+00> : vector<4x64xf32>
    %197 = tpu.matmul %196, %18, %cst_86 {dimension_numbers = #tpu.dot_dimension_numbers<[1], [0], [0], [1], [0, 0, 1, 1], [], []>} : vector<4x128xbf16>, vector<128x64xbf16>, vector<4x64xf32> -> vector<4x64xf32>
    %198 = arith.addf %158, %197 : vector<4x64xf32>
    %199 = vector.broadcast %36 : vector<1x64xf32> to vector<4x64xf32>
    %200 = arith.addf %198, %199 : vector<4x64xf32>
    %c0_87 = arith.constant 0 : index
    %c0_88 = arith.constant 0 : index
    %c0_89 = arith.constant 0 : index
    %201 = vector.load %arg7[%c0_87, %c0_88, %c0_89] : memref<1x4x64xf32, #tpu.memory_space<vmem>>, vector<1x4x64xf32>
    %202 = vector.shape_cast %201 : vector<1x4x64xf32> to vector<4x64xf32>
    %203 = vector.shape_cast %200 : vector<4x64xf32> to vector<1x4x64xf32>
    tpu.vector_store %arg7[%c0_87, %c0_88, %c0_89], %203 {strides = array<i32>} : memref<1x4x64xf32, #tpu.memory_space<vmem>>, vector<1x4x64xf32>,
    return
  }
  func.func @transform_0(%arg0: i32, %arg1: i32) -> (i32, i32, i32) {
    %c0_i32 = arith.constant 0 : i32
    %c0_i32_0 = arith.constant 0 : i32
    %c0_i32_1 = arith.constant 0 : i32
    return %arg0, %c0_i32, %c0_i32_0 : i32, i32, i32
  }
  func.func @transform_1(%arg0: i32, %arg1: i32) -> (i32, i32, i32) {
    %c0_i32 = arith.constant 0 : i32
    %c0_i32_0 = arith.constant 0 : i32
    %c0_i32_1 = arith.constant 0 : i32
    %c0_i32_2 = arith.constant 0 : i32
    return %c0_i32, %c0_i32_0, %c0_i32_1 : i32, i32, i32
  }
  func.func @transform_2(%arg0: i32, %arg1: i32) -> (i32, i32, i32) {
    %c0_i32 = arith.constant 0 : i32
    %c0_i32_0 = arith.constant 0 : i32
    %c0_i32_1 = arith.constant 0 : i32
    return %arg1, %c0_i32, %c0_i32_0 : i32, i32, i32
  }
  func.func @transform_3(%arg0: i32, %arg1: i32) -> (i32, i32, i32) {
    %c0_i32 = arith.constant 0 : i32
    %c0_i32_0 = arith.constant 0 : i32
    %c0_i32_1 = arith.constant 0 : i32
    return %arg1, %c0_i32, %c0_i32_0 : i32, i32, i32
  }
  func.func @transform_4(%arg0: i32, %arg1: i32) -> (i32, i32, i32) {
    %c0_i32 = arith.constant 0 : i32
    %c0_i32_0 = arith.constant 0 : i32
    %c0_i32_1 = arith.constant 0 : i32
    return %arg1, %c0_i32, %c0_i32_0 : i32, i32, i32
  }
  func.func @transform_5(%arg0: i32, %arg1: i32) -> (i32, i32, i32) {
    %c0_i32 = arith.constant 0 : i32
    %c0_i32_0 = arith.constant 0 : i32
    %c0_i32_1 = arith.constant 0 : i32
    return %arg0, %c0_i32, %c0_i32_0 : i32, i32, i32
  }
}

module attributes {stable_mosaic.version = 11 : i64} {
  func.func @_matmul_bias_kernel(%arg0: i32, %arg1: memref<2x576xbf16, #tpu.memory_space<vmem>>, %arg2: memref<576x128xbf16, #tpu.memory_space<vmem>>, %arg3: memref<1x128xf32, #tpu.memory_space<vmem>>, %arg4: memref<2x128xf32, #tpu.memory_space<vmem>>) attributes {dimension_semantics = [#tpu.dimension_semantics<parallel>], iteration_bounds = array<i64: 1>, scalar_prefetch = 0 : i64, scratch_operands = 0 : i64, tpu.core_type = #tpu.core_type<tc>, window_params = [{transform_indices = @transform_0, window_bounds = array<i64: 2, 576>}, {pipeline_mode = #tpu.pipeline_mode<synchronous>, transform_indices = @transform_1, window_bounds = array<i64: 576, 128>}, {pipeline_mode = #tpu.pipeline_mode<synchronous>, transform_indices = @transform_2, window_bounds = array<i64: 1, 128>}, {transform_indices = @transform_3, window_bounds = array<i64: 2, 128>}]} {
    %c0 = arith.constant 0 : index
    %c0_0 = arith.constant 0 : index
    %0 = vector.load %arg1[%c0, %c0_0] : memref<2x576xbf16, #tpu.memory_space<vmem>>, vector<2x576xbf16>
    %c0_1 = arith.constant 0 : index
    %c0_2 = arith.constant 0 : index
    %1 = vector.load %arg2[%c0_1, %c0_2] : memref<576x128xbf16, #tpu.memory_space<vmem>>, vector<576x128xbf16>
    %cst = arith.constant dense<0.000000e+00> : vector<2x128xf32>
    %2 = tpu.matmul %0, %1, %cst {dimension_numbers = #tpu.dot_dimension_numbers<[1], [0], [0], [1], [0, 0, 1, 1], [], []>} : vector<2x576xbf16>, vector<576x128xbf16>, vector<2x128xf32> -> vector<2x128xf32>
    %c0_3 = arith.constant 0 : index
    %c0_4 = arith.constant 0 : index
    %3 = vector.load %arg3[%c0_3, %c0_4] : memref<1x128xf32, #tpu.memory_space<vmem>>, vector<1x128xf32>
    %4 = vector.broadcast %3 : vector<1x128xf32> to vector<2x128xf32>
    %5 = arith.addf %2, %4 : vector<2x128xf32>
    %c0_5 = arith.constant 0 : index
    %c0_6 = arith.constant 0 : index
    %6 = vector.load %arg4[%c0_5, %c0_6] : memref<2x128xf32, #tpu.memory_space<vmem>>, vector<2x128xf32>
    tpu.vector_store %arg4[%c0_5, %c0_6], %5 {strides = array<i32>} : memref<2x128xf32, #tpu.memory_space<vmem>>, vector<2x128xf32>,
    return
  }
  func.func @transform_0(%arg0: i32) -> (i32, i32) {
    %c0_i32 = arith.constant 0 : i32
    %c0_i32_0 = arith.constant 0 : i32
    return %arg0, %c0_i32 : i32, i32
  }
  func.func @transform_1(%arg0: i32) -> (i32, i32) {
    %c0_i32 = arith.constant 0 : i32
    %c0_i32_0 = arith.constant 0 : i32
    %c0_i32_1 = arith.constant 0 : i32
    return %c0_i32, %c0_i32_0 : i32, i32
  }
  func.func @transform_2(%arg0: i32) -> (i32, i32) {
    %c0_i32 = arith.constant 0 : i32
    %c0_i32_0 = arith.constant 0 : i32
    %c0_i32_1 = arith.constant 0 : i32
    return %c0_i32, %c0_i32_0 : i32, i32
  }
  func.func @transform_3(%arg0: i32) -> (i32, i32) {
    %c0_i32 = arith.constant 0 : i32
    %c0_i32_0 = arith.constant 0 : i32
    return %arg0, %c0_i32 : i32, i32
  }
}

module attributes {stable_mosaic.version = 11 : i64} {
  func.func @_stage_kernel(%arg0: i32, %arg1: i32, %arg2: memref<1x1x128xf32, #tpu.memory_space<vmem>>, %arg3: memref<5x1x128xf32, #tpu.memory_space<vmem>>, %arg4: memref<1x128x896xbf16, #tpu.memory_space<vmem>>, %arg5: memref<1x256x512xbf16, #tpu.memory_space<vmem>>, %arg6: memref<1x11x384xf32, #tpu.memory_space<vmem>>, %arg7: memref<1x1x128xf32, #tpu.memory_space<vmem>>) attributes {dimension_semantics = [#tpu.dimension_semantics<parallel>, #tpu.dimension_semantics<arbitrary>], iteration_bounds = array<i64: 2, 2>, scalar_prefetch = 0 : i64, scratch_operands = 0 : i64, tpu.core_type = #tpu.core_type<tc>, window_params = [{transform_indices = @transform_0, window_bounds = array<i64: 1, 1, 128>}, {pipeline_mode = #tpu.pipeline_mode<synchronous>, transform_indices = @transform_1, window_bounds = array<i64: 5, 1, 128>}, {transform_indices = @transform_2, window_bounds = array<i64: 1, 128, 896>}, {transform_indices = @transform_3, window_bounds = array<i64: 1, 256, 512>}, {transform_indices = @transform_4, window_bounds = array<i64: 1, 11, 384>}, {transform_indices = @transform_5, window_bounds = array<i64: 1, 1, 128>}]} {
    %c0_i32 = arith.constant 0 : i32
    %0 = arith.cmpi eq, %arg1, %c0_i32 : i32
    %1 = arith.extui %0 : i1 to i32
    %c0_i32_0 = arith.constant 0 : i32
    %2 = arith.cmpi ne, %1, %c0_i32_0 : i32
    scf.if %2 {
      %c0_90 = arith.constant 0 : index
      %c0_91 = arith.constant 0 : index
      %c0_92 = arith.constant 0 : index
      %180 = vector.load %arg2[%c0_90, %c0_91, %c0_92] : memref<1x1x128xf32, #tpu.memory_space<vmem>>, vector<1x1x128xf32>
      %c0_93 = arith.constant 0 : index
      %c0_94 = arith.constant 0 : index
      %c0_95 = arith.constant 0 : index
      %181 = vector.load %arg7[%c0_93, %c0_94, %c0_95] : memref<1x1x128xf32, #tpu.memory_space<vmem>>, vector<1x1x128xf32>
      tpu.vector_store %arg7[%c0_93, %c0_94, %c0_95], %180 {strides = array<i32>} : memref<1x1x128xf32, #tpu.memory_space<vmem>>, vector<1x1x128xf32>,
    } else {
    }
    %c0 = arith.constant 0 : index
    %c0_1 = arith.constant 0 : index
    %c0_2 = arith.constant 0 : index
    %3 = vector.load %arg7[%c0, %c0_1, %c0_2] : memref<1x1x128xf32, #tpu.memory_space<vmem>>, vector<1x1x128xf32>
    %4 = vector.shape_cast %3 : vector<1x1x128xf32> to vector<1x128xf32>
    %c0_3 = arith.constant 0 : index
    %c0_4 = arith.constant 0 : index
    %c0_5 = arith.constant 0 : index
    %5 = vector.load %arg4[%c0_3, %c0_4, %c0_5] : memref<1x128x896xbf16, #tpu.memory_space<vmem>>, vector<1x128x128xbf16>
    %6 = vector.shape_cast %5 : vector<1x128x128xbf16> to vector<128x128xbf16>
    %c0_6 = arith.constant 0 : index
    %c0_7 = arith.constant 0 : index
    %c128 = arith.constant 128 : index
    %7 = vector.load %arg4[%c0_6, %c0_7, %c128] : memref<1x128x896xbf16, #tpu.memory_space<vmem>>, vector<1x128x128xbf16>
    %8 = vector.shape_cast %7 : vector<1x128x128xbf16> to vector<128x128xbf16>
    %c0_8 = arith.constant 0 : index
    %c0_9 = arith.constant 0 : index
    %c256 = arith.constant 256 : index
    %9 = vector.load %arg4[%c0_8, %c0_9, %c256] : memref<1x128x896xbf16, #tpu.memory_space<vmem>>, vector<1x128x128xbf16>
    %10 = vector.shape_cast %9 : vector<1x128x128xbf16> to vector<128x128xbf16>
    %c0_10 = arith.constant 0 : index
    %c0_11 = arith.constant 0 : index
    %c384 = arith.constant 384 : index
    %11 = vector.load %arg4[%c0_10, %c0_11, %c384] : memref<1x128x896xbf16, #tpu.memory_space<vmem>>, vector<1x128x128xbf16>
    %12 = vector.shape_cast %11 : vector<1x128x128xbf16> to vector<128x128xbf16>
    %c0_12 = arith.constant 0 : index
    %c0_13 = arith.constant 0 : index
    %c512 = arith.constant 512 : index
    %13 = vector.load %arg4[%c0_12, %c0_13, %c512] : memref<1x128x896xbf16, #tpu.memory_space<vmem>>, vector<1x128x256xbf16>
    %14 = vector.shape_cast %13 : vector<1x128x256xbf16> to vector<128x256xbf16>
    %c0_14 = arith.constant 0 : index
    %c0_15 = arith.constant 0 : index
    %c768 = arith.constant 768 : index
    %15 = vector.load %arg4[%c0_14, %c0_15, %c768] : memref<1x128x896xbf16, #tpu.memory_space<vmem>>, vector<1x128x32xbf16>
    %16 = vector.shape_cast %15 : vector<1x128x32xbf16> to vector<128x32xbf16>
    %c0_16 = arith.constant 0 : index
    %c0_17 = arith.constant 0 : index
    %c0_18 = arith.constant 0 : index
    %17 = vector.load %arg5[%c0_16, %c0_17, %c0_18] : memref<1x256x512xbf16, #tpu.memory_space<vmem>>, vector<1x256x128xbf16>
    %18 = vector.shape_cast %17 : vector<1x256x128xbf16> to vector<256x128xbf16>
    %c0_19 = arith.constant 0 : index
    %c0_20 = arith.constant 0 : index
    %c128_21 = arith.constant 128 : index
    %19 = vector.load %arg5[%c0_19, %c0_20, %c128_21] : memref<1x256x512xbf16, #tpu.memory_space<vmem>>, vector<1x32x384xbf16>
    %20 = vector.shape_cast %19 : vector<1x32x384xbf16> to vector<32x384xbf16>
    %c0_22 = arith.constant 0 : index
    %c0_23 = arith.constant 0 : index
    %c0_24 = arith.constant 0 : index
    %21 = vector.load %arg6[%c0_22, %c0_23, %c0_24] : memref<1x11x384xf32, #tpu.memory_space<vmem>>, vector<1x1x128xf32>
    %22 = vector.shape_cast %21 : vector<1x1x128xf32> to vector<1x128xf32>
    %c0_25 = arith.constant 0 : index
    %c1 = arith.constant 1 : index
    %c0_26 = arith.constant 0 : index
    %23 = vector.load %arg6[%c0_25, %c1, %c0_26] : memref<1x11x384xf32, #tpu.memory_space<vmem>>, vector<1x1x128xf32>
    %24 = vector.shape_cast %23 : vector<1x1x128xf32> to vector<1x128xf32>
    %c0_27 = arith.constant 0 : index
    %c2 = arith.constant 2 : index
    %c0_28 = arith.constant 0 : index
    %25 = vector.load %arg6[%c0_27, %c2, %c0_28] : memref<1x11x384xf32, #tpu.memory_space<vmem>>, vector<1x1x128xf32>
    %26 = vector.shape_cast %25 : vector<1x1x128xf32> to vector<1x128xf32>
    %c0_29 = arith.constant 0 : index
    %c3 = arith.constant 3 : index
    %c0_30 = arith.constant 0 : index
    %27 = vector.load %arg6[%c0_29, %c3, %c0_30] : memref<1x11x384xf32, #tpu.memory_space<vmem>>, vector<1x1x128xf32>
    %28 = vector.shape_cast %27 : vector<1x1x128xf32> to vector<1x128xf32>
    %c0_31 = arith.constant 0 : index
    %c4 = arith.constant 4 : index
    %c0_32 = arith.constant 0 : index
    %29 = vector.load %arg6[%c0_31, %c4, %c0_32] : memref<1x11x384xf32, #tpu.memory_space<vmem>>, vector<1x1x128xf32>
    %30 = vector.shape_cast %29 : vector<1x1x128xf32> to vector<1x128xf32>
    %c0_33 = arith.constant 0 : index
    %c5 = arith.constant 5 : index
    %c0_34 = arith.constant 0 : index
    %31 = vector.load %arg6[%c0_33, %c5, %c0_34] : memref<1x11x384xf32, #tpu.memory_space<vmem>>, vector<1x1x128xf32>
    %32 = vector.shape_cast %31 : vector<1x1x128xf32> to vector<1x128xf32>
    %c0_35 = arith.constant 0 : index
    %c6 = arith.constant 6 : index
    %c0_36 = arith.constant 0 : index
    %33 = vector.load %arg6[%c0_35, %c6, %c0_36] : memref<1x11x384xf32, #tpu.memory_space<vmem>>, vector<1x1x128xf32>
    %34 = vector.shape_cast %33 : vector<1x1x128xf32> to vector<1x128xf32>
    %c0_37 = arith.constant 0 : index
    %c7 = arith.constant 7 : index
    %c0_38 = arith.constant 0 : index
    %35 = vector.load %arg6[%c0_37, %c7, %c0_38] : memref<1x11x384xf32, #tpu.memory_space<vmem>>, vector<1x1x128xf32>
    %36 = vector.shape_cast %35 : vector<1x1x128xf32> to vector<1x128xf32>
    %c0_39 = arith.constant 0 : index
    %c8 = arith.constant 8 : index
    %c0_40 = arith.constant 0 : index
    %37 = vector.load %arg6[%c0_39, %c8, %c0_40] : memref<1x11x384xf32, #tpu.memory_space<vmem>>, vector<1x1x32xf32>
    %38 = vector.shape_cast %37 : vector<1x1x32xf32> to vector<1x32xf32>
    %c0_41 = arith.constant 0 : index
    %c9 = arith.constant 9 : index
    %c0_42 = arith.constant 0 : index
    %39 = vector.load %arg6[%c0_41, %c9, %c0_42] : memref<1x11x384xf32, #tpu.memory_space<vmem>>, vector<1x1x256xf32>
    %40 = vector.shape_cast %39 : vector<1x1x256xf32> to vector<1x256xf32>
    %c0_43 = arith.constant 0 : index
    %c10 = arith.constant 10 : index
    %c0_44 = arith.constant 0 : index
    %41 = vector.load %arg6[%c0_43, %c10, %c0_44] : memref<1x11x384xf32, #tpu.memory_space<vmem>>, vector<1x1x384xf32>
    %42 = vector.shape_cast %41 : vector<1x1x384xf32> to vector<1x384xf32>
    %cst = arith.constant dense<0.000000e+00> : vector<1xf32>
    %43 = vector.multi_reduction <add>, %4, %cst [1] : vector<1x128xf32> to vector<1xf32>
    %44 = vector.shape_cast %43 : vector<1xf32> to vector<1x1xf32>
    %cst_45 = arith.constant 1.280000e+02 : f32
    %45 = vector.broadcast %cst_45 : f32 to vector<1x1xf32>
    %46 = arith.divf %44, %45 : vector<1x1xf32>
    %47 = vector.broadcast %46 : vector<1x1xf32> to vector<1x128xf32>
    %48 = arith.subf %4, %47 : vector<1x128xf32>
    %49 = arith.mulf %48, %48 : vector<1x128xf32>
    %cst_46 = arith.constant dense<0.000000e+00> : vector<1xf32>
    %50 = vector.multi_reduction <add>, %49, %cst_46 [1] : vector<1x128xf32> to vector<1xf32>
    %51 = vector.shape_cast %50 : vector<1xf32> to vector<1x1xf32>
    %cst_47 = arith.constant 1.280000e+02 : f32
    %52 = vector.broadcast %cst_47 : f32 to vector<1x1xf32>
    %53 = arith.divf %51, %52 : vector<1x1xf32>
    %cst_48 = arith.constant 9.99999974E-6 : f32
    %54 = vector.broadcast %cst_48 : f32 to vector<1x1xf32>
    %55 = arith.addf %53, %54 : vector<1x1xf32>
    %56 = math.rsqrt %55 : vector<1x1xf32>
    %57 = vector.broadcast %56 : vector<1x1xf32> to vector<1x128xf32>
    %58 = arith.mulf %48, %57 : vector<1x128xf32>
    %59 = arith.mulf %58, %22 : vector<1x128xf32>
    %60 = arith.addf %59, %24 : vector<1x128xf32>
    %c4_49 = arith.constant 4 : index
    %c0_50 = arith.constant 0 : index
    %c0_51 = arith.constant 0 : index
    %61 = vector.load %arg3[%c4_49, %c0_50, %c0_51] : memref<5x1x128xf32, #tpu.memory_space<vmem>>, vector<1x1x128xf32>
    %62 = vector.shape_cast %61 : vector<1x1x128xf32> to vector<1x128xf32>
    %63 = arith.mulf %60, %62 : vector<1x128xf32>
    %c0_52 = arith.constant 0 : index
    %c0_53 = arith.constant 0 : index
    %c0_54 = arith.constant 0 : index
    %64 = vector.load %arg3[%c0_52, %c0_53, %c0_54] : memref<5x1x128xf32, #tpu.memory_space<vmem>>, vector<1x1x128xf32>
    %65 = vector.shape_cast %64 : vector<1x1x128xf32> to vector<1x128xf32>
    %66 = arith.mulf %60, %65 : vector<1x128xf32>
    %67 = arith.addf %63, %66 : vector<1x128xf32>
    %c1_55 = arith.constant 1 : index
    %c0_56 = arith.constant 0 : index
    %c0_57 = arith.constant 0 : index
    %68 = vector.load %arg3[%c1_55, %c0_56, %c0_57] : memref<5x1x128xf32, #tpu.memory_space<vmem>>, vector<1x1x128xf32>
    %69 = vector.shape_cast %68 : vector<1x1x128xf32> to vector<1x128xf32>
    %70 = arith.mulf %60, %69 : vector<1x128xf32>
    %71 = arith.addf %67, %70 : vector<1x128xf32>
    %c2_58 = arith.constant 2 : index
    %c0_59 = arith.constant 0 : index
    %c0_60 = arith.constant 0 : index
    %72 = vector.load %arg3[%c2_58, %c0_59, %c0_60] : memref<5x1x128xf32, #tpu.memory_space<vmem>>, vector<1x1x128xf32>
    %73 = vector.shape_cast %72 : vector<1x1x128xf32> to vector<1x128xf32>
    %74 = arith.mulf %60, %73 : vector<1x128xf32>
    %75 = arith.addf %63, %74 : vector<1x128xf32>
    %c3_61 = arith.constant 3 : index
    %c0_62 = arith.constant 0 : index
    %c0_63 = arith.constant 0 : index
    %76 = vector.load %arg3[%c3_61, %c0_62, %c0_63] : memref<5x1x128xf32, #tpu.memory_space<vmem>>, vector<1x1x128xf32>
    %77 = vector.shape_cast %76 : vector<1x1x128xf32> to vector<1x128xf32>
    %78 = arith.mulf %60, %77 : vector<1x128xf32>
    %79 = arith.addf %75, %78 : vector<1x128xf32>
    %80 = arith.truncf %71 : vector<1x128xf32> to vector<1x128xbf16>
    %cst_64 = arith.constant dense<0.000000e+00> : vector<1x128xf32>
    %81 = tpu.matmul %80, %6, %cst_64 {dimension_numbers = #tpu.dot_dimension_numbers<[1], [0], [0], [1], [0, 0, 1, 1], [], []>} : vector<1x128xbf16>, vector<128x128xbf16>, vector<1x128xf32> -> vector<1x128xf32>
    %82 = arith.addf %81, %26 : vector<1x128xf32>
    %83 = arith.truncf %79 : vector<1x128xf32> to vector<1x128xbf16>
    %cst_65 = arith.constant dense<0.000000e+00> : vector<1x128xf32>
    %84 = tpu.matmul %83, %8, %cst_65 {dimension_numbers = #tpu.dot_dimension_numbers<[1], [0], [0], [1], [0, 0, 1, 1], [], []>} : vector<1x128xbf16>, vector<128x128xbf16>, vector<1x128xf32> -> vector<1x128xf32>
    %85 = arith.addf %84, %28 : vector<1x128xf32>
    %86 = arith.truncf %60 : vector<1x128xf32> to vector<1x128xbf16>
    %cst_66 = arith.constant dense<0.000000e+00> : vector<1x128xf32>
    %87 = tpu.matmul %86, %10, %cst_66 {dimension_numbers = #tpu.dot_dimension_numbers<[1], [0], [0], [1], [0, 0, 1, 1], [], []>} : vector<1x128xbf16>, vector<128x128xbf16>, vector<1x128xf32> -> vector<1x128xf32>
    %88 = arith.addf %82, %85 : vector<1x128xf32>
    %89 = arith.addf %88, %87 : vector<1x128xf32>
    %cst_67 = arith.constant dense<0.000000e+00> : vector<128xf32>
    %90 = vector.multi_reduction <add>, %89, %cst_67 [0] : vector<1x128xf32> to vector<128xf32>
    %91 = vector.shape_cast %90 : vector<128xf32> to vector<1x128xf32>
    %cst_68 = arith.constant 1.000000e+00 : f32
    %92 = vector.broadcast %cst_68 : f32 to vector<1x128xf32>
    %93 = arith.divf %91, %92 : vector<1x128xf32>
    %94 = arith.truncf %93 : vector<1x128xf32> to vector<1x128xbf16>
    %cst_69 = arith.constant dense<0.000000e+00> : vector<1x32xf32>
    %95 = tpu.matmul %94, %16, %cst_69 {dimension_numbers = #tpu.dot_dimension_numbers<[1], [0], [0], [1], [0, 0, 1, 1], [], []>} : vector<1x128xbf16>, vector<128x32xbf16>, vector<1x32xf32> -> vector<1x32xf32>
    %96 = arith.addf %95, %38 : vector<1x32xf32>
    %97 = arith.mulf %96, %96 : vector<1x32xf32>
    %98 = arith.mulf %96, %97 : vector<1x32xf32>
    %cst_70 = arith.constant 4.471500e-02 : f32
    %99 = vector.broadcast %cst_70 : f32 to vector<1x32xf32>
    %100 = arith.mulf %99, %98 : vector<1x32xf32>
    %101 = arith.addf %96, %100 : vector<1x32xf32>
    %cst_71 = arith.constant 0.797884583 : f32
    %102 = vector.broadcast %cst_71 : f32 to vector<1x32xf32>
    %103 = arith.mulf %102, %101 : vector<1x32xf32>
    %104 = math.tanh %103 : vector<1x32xf32>
    %cst_72 = arith.constant 1.000000e+00 : f32
    %105 = vector.broadcast %cst_72 : f32 to vector<1x32xf32>
    %106 = arith.addf %105, %104 : vector<1x32xf32>
    %cst_73 = arith.constant 5.000000e-01 : f32
    %107 = vector.broadcast %cst_73 : f32 to vector<1x32xf32>
    %108 = arith.mulf %107, %106 : vector<1x32xf32>
    %109 = arith.mulf %96, %108 : vector<1x32xf32>
    %110 = arith.truncf %109 : vector<1x32xf32> to vector<1x32xbf16>
    %cst_74 = arith.constant dense<0.000000e+00> : vector<1x384xf32>
    %111 = tpu.matmul %110, %20, %cst_74 {dimension_numbers = #tpu.dot_dimension_numbers<[1], [0], [0], [1], [0, 0, 1, 1], [], []>} : vector<1x32xbf16>, vector<32x384xbf16>, vector<1x384xf32> -> vector<1x384xf32>
    %112 = arith.addf %111, %42 : vector<1x384xf32>
    %113 = vector.extract_strided_slice %112 {offsets = [0, 0], sizes = [1, 128], strides = [1, 1]} : vector<1x384xf32> to vector<1x128xf32>
    %114 = vector.extract_strided_slice %112 {offsets = [0, 128], sizes = [1, 128], strides = [1, 1]} : vector<1x384xf32> to vector<1x128xf32>
    %115 = vector.extract_strided_slice %112 {offsets = [0, 256], sizes = [1, 128], strides = [1, 1]} : vector<1x384xf32> to vector<1x128xf32>
    %116 = arith.maximumf %113, %114 : vector<1x128xf32>
    %117 = arith.maximumf %116, %115 : vector<1x128xf32>
    %118 = arith.subf %113, %117 : vector<1x128xf32>
    %119 = math.exp %118 : vector<1x128xf32>
    %120 = arith.subf %114, %117 : vector<1x128xf32>
    %121 = math.exp %120 : vector<1x128xf32>
    %122 = arith.subf %115, %117 : vector<1x128xf32>
    %123 = math.exp %122 : vector<1x128xf32>
    %124 = arith.addf %119, %121 : vector<1x128xf32>
    %125 = arith.addf %124, %123 : vector<1x128xf32>
    %126 = tpu.reciprocal %125 {approx = true} : vector<1x128xf32> -> vector<1x128xf32>
    %127 = arith.mulf %119, %126 : vector<1x128xf32>
    %128 = arith.mulf %121, %126 : vector<1x128xf32>
    %129 = arith.mulf %123, %126 : vector<1x128xf32>
    %130 = arith.mulf %82, %127 : vector<1x128xf32>
    %131 = arith.mulf %85, %128 : vector<1x128xf32>
    %132 = arith.addf %130, %131 : vector<1x128xf32>
    %133 = arith.mulf %87, %129 : vector<1x128xf32>
    %134 = arith.addf %132, %133 : vector<1x128xf32>
    %135 = arith.truncf %134 : vector<1x128xf32> to vector<1x128xbf16>
    %cst_75 = arith.constant dense<0.000000e+00> : vector<1x128xf32>
    %136 = tpu.matmul %135, %12, %cst_75 {dimension_numbers = #tpu.dot_dimension_numbers<[1], [0], [0], [1], [0, 0, 1, 1], [], []>} : vector<1x128xbf16>, vector<128x128xbf16>, vector<1x128xf32> -> vector<1x128xf32>
    %137 = arith.addf %4, %136 : vector<1x128xf32>
    %138 = arith.addf %137, %30 : vector<1x128xf32>
    %cst_76 = arith.constant dense<0.000000e+00> : vector<1xf32>
    %139 = vector.multi_reduction <add>, %138, %cst_76 [1] : vector<1x128xf32> to vector<1xf32>
    %140 = vector.shape_cast %139 : vector<1xf32> to vector<1x1xf32>
    %cst_77 = arith.constant 1.280000e+02 : f32
    %141 = vector.broadcast %cst_77 : f32 to vector<1x1xf32>
    %142 = arith.divf %140, %141 : vector<1x1xf32>
    %143 = vector.broadcast %142 : vector<1x1xf32> to vector<1x128xf32>
    %144 = arith.subf %138, %143 : vector<1x128xf32>
    %145 = arith.mulf %144, %144 : vector<1x128xf32>
    %cst_78 = arith.constant dense<0.000000e+00> : vector<1xf32>
    %146 = vector.multi_reduction <add>, %145, %cst_78 [1] : vector<1x128xf32> to vector<1xf32>
    %147 = vector.shape_cast %146 : vector<1xf32> to vector<1x1xf32>
    %cst_79 = arith.constant 1.280000e+02 : f32
    %148 = vector.broadcast %cst_79 : f32 to vector<1x1xf32>
    %149 = arith.divf %147, %148 : vector<1x1xf32>
    %cst_80 = arith.constant 9.99999974E-6 : f32
    %150 = vector.broadcast %cst_80 : f32 to vector<1x1xf32>
    %151 = arith.addf %149, %150 : vector<1x1xf32>
    %152 = math.rsqrt %151 : vector<1x1xf32>
    %153 = vector.broadcast %152 : vector<1x1xf32> to vector<1x128xf32>
    %154 = arith.mulf %144, %153 : vector<1x128xf32>
    %155 = arith.mulf %154, %32 : vector<1x128xf32>
    %156 = arith.addf %155, %34 : vector<1x128xf32>
    %157 = arith.truncf %156 : vector<1x128xf32> to vector<1x128xbf16>
    %cst_81 = arith.constant dense<0.000000e+00> : vector<1x256xf32>
    %158 = tpu.matmul %157, %14, %cst_81 {dimension_numbers = #tpu.dot_dimension_numbers<[1], [0], [0], [1], [0, 0, 1, 1], [], []>} : vector<1x128xbf16>, vector<128x256xbf16>, vector<1x256xf32> -> vector<1x256xf32>
    %159 = arith.addf %158, %40 : vector<1x256xf32>
    %160 = arith.mulf %159, %159 : vector<1x256xf32>
    %161 = arith.mulf %159, %160 : vector<1x256xf32>
    %cst_82 = arith.constant 4.471500e-02 : f32
    %162 = vector.broadcast %cst_82 : f32 to vector<1x256xf32>
    %163 = arith.mulf %162, %161 : vector<1x256xf32>
    %164 = arith.addf %159, %163 : vector<1x256xf32>
    %cst_83 = arith.constant 0.797884583 : f32
    %165 = vector.broadcast %cst_83 : f32 to vector<1x256xf32>
    %166 = arith.mulf %165, %164 : vector<1x256xf32>
    %167 = math.tanh %166 : vector<1x256xf32>
    %cst_84 = arith.constant 1.000000e+00 : f32
    %168 = vector.broadcast %cst_84 : f32 to vector<1x256xf32>
    %169 = arith.addf %168, %167 : vector<1x256xf32>
    %cst_85 = arith.constant 5.000000e-01 : f32
    %170 = vector.broadcast %cst_85 : f32 to vector<1x256xf32>
    %171 = arith.mulf %170, %169 : vector<1x256xf32>
    %172 = arith.mulf %159, %171 : vector<1x256xf32>
    %173 = arith.truncf %172 : vector<1x256xf32> to vector<1x256xbf16>
    %cst_86 = arith.constant dense<0.000000e+00> : vector<1x128xf32>
    %174 = tpu.matmul %173, %18, %cst_86 {dimension_numbers = #tpu.dot_dimension_numbers<[1], [0], [0], [1], [0, 0, 1, 1], [], []>} : vector<1x256xbf16>, vector<256x128xbf16>, vector<1x128xf32> -> vector<1x128xf32>
    %175 = arith.addf %138, %174 : vector<1x128xf32>
    %176 = arith.addf %175, %36 : vector<1x128xf32>
    %c0_87 = arith.constant 0 : index
    %c0_88 = arith.constant 0 : index
    %c0_89 = arith.constant 0 : index
    %177 = vector.load %arg7[%c0_87, %c0_88, %c0_89] : memref<1x1x128xf32, #tpu.memory_space<vmem>>, vector<1x1x128xf32>
    %178 = vector.shape_cast %177 : vector<1x1x128xf32> to vector<1x128xf32>
    %179 = vector.shape_cast %176 : vector<1x128xf32> to vector<1x1x128xf32>
    tpu.vector_store %arg7[%c0_87, %c0_88, %c0_89], %179 {strides = array<i32>} : memref<1x1x128xf32, #tpu.memory_space<vmem>>, vector<1x1x128xf32>,
    return
  }
  func.func @transform_0(%arg0: i32, %arg1: i32) -> (i32, i32, i32) {
    %c0_i32 = arith.constant 0 : i32
    %c0_i32_0 = arith.constant 0 : i32
    %c0_i32_1 = arith.constant 0 : i32
    return %arg0, %c0_i32, %c0_i32_0 : i32, i32, i32
  }
  func.func @transform_1(%arg0: i32, %arg1: i32) -> (i32, i32, i32) {
    %c0_i32 = arith.constant 0 : i32
    %c0_i32_0 = arith.constant 0 : i32
    %c0_i32_1 = arith.constant 0 : i32
    %c0_i32_2 = arith.constant 0 : i32
    return %c0_i32, %c0_i32_0, %c0_i32_1 : i32, i32, i32
  }
  func.func @transform_2(%arg0: i32, %arg1: i32) -> (i32, i32, i32) {
    %c0_i32 = arith.constant 0 : i32
    %c0_i32_0 = arith.constant 0 : i32
    %c0_i32_1 = arith.constant 0 : i32
    return %arg1, %c0_i32, %c0_i32_0 : i32, i32, i32
  }
  func.func @transform_3(%arg0: i32, %arg1: i32) -> (i32, i32, i32) {
    %c0_i32 = arith.constant 0 : i32
    %c0_i32_0 = arith.constant 0 : i32
    %c0_i32_1 = arith.constant 0 : i32
    return %arg1, %c0_i32, %c0_i32_0 : i32, i32, i32
  }
  func.func @transform_4(%arg0: i32, %arg1: i32) -> (i32, i32, i32) {
    %c0_i32 = arith.constant 0 : i32
    %c0_i32_0 = arith.constant 0 : i32
    %c0_i32_1 = arith.constant 0 : i32
    return %arg1, %c0_i32, %c0_i32_0 : i32, i32, i32
  }
  func.func @transform_5(%arg0: i32, %arg1: i32) -> (i32, i32, i32) {
    %c0_i32 = arith.constant 0 : i32
    %c0_i32_0 = arith.constant 0 : i32
    %c0_i32_1 = arith.constant 0 : i32
    return %arg0, %c0_i32, %c0_i32_0 : i32, i32, i32
  }
}

</mosaic_0001>

<bundles_post_ra>
// kernel: cyclemlp_forward.8
= control target key start
LH: loop header
LB: loop body
LE: loop exit
PB: predicated region body
PF: predicated region fallthrough
CT: control target
= control target key end

     0   :  { %s596_s12 = smov 0   ;;  %s693_s0 = inlined_call_operand.vmem [shape: bf16[128,147], index: 0, kind: input, shape index: {}]   ;;  %s694_s1 = inlined_call_operand.vmem [shape: bf16[147,16], index: 1, kind: input, shape index: {}]   ;;  %s695_s2 = inlined_call_operand.vmem [shape: f32[1,16], index: 2, kind: input, shape index: {}]   ;;  %s696_s3 = inlined_call_operand.vmem [shape: f32[128,16], index: 3, kind: output, shape index: {}]  }
   0x1 LB: > { %s445_s13 = sadd.s32 4294967295, %s573_s12   ;;  %p449_p0 = scmp.ge.s32.totalorder %s573_s12, 1  ;;  %s573_s12 = sphi %s596_s12, %s13_s12  }
   0x2   : > { %p139_p1 = scmp.lt.s32.totalorder %s573_s12, 3 }
   0x4   : > { %p140_p2 = pnand %p449_p0, %p139_p1 }
   0x5   : > { %s450_s18 = sshll.u32 (!%p140_p2), %s445_s13, 3 }
   0x6   : > { %143 = sbr.rel (%p140_p2) target bundleno = 204 (0xcc), region = 32  ;;  %p165_p3 = scmp.lt.s32.totalorder (!%p140_p2), %s450_s18, 15 }
   0xb   : > { %v545_v0 = vld [vmem:[%s694_s1 + $0x38] sm:$0xff]  ;;  %v204_v1 = vld [vmem:[%s694_s1 + $0x48] sm:$0x3]  ;;  %vm315_vm0 = vcmask 1040384   ;;  %vm316_vm1 = vcmask 1041408   ;;  %v544_v3 = vld [vmem:[%s694_s1 + $0x30] sm:$0xff] }
   0xc   : > { %v282_v2 = vunpack.c.l.b16 %v204_v1  ;;  %322 = vmatpush.bf16.msra.mxu0 %v545_v0  ;;  %547 = vmatpush.bf16.msra.mxu2 %v545_v0  ;;  %v575_v4 = vmov 65535   ;;  %s698_s18 = smov (!%p165_p3, %s450_s18), 15  ;;  %v543_v9 = vld [vmem:[%s694_s1 + $0x28] sm:$0xff]  ;;  %v546_v10 = vld [vmem:[%s694_s1 + $0x40] sm:$0xff]  ;;  %vm302_vm2 = vcmask 154624   ;;  %v541_v18 = vld [vmem:[%s694_s1 + $0x18] sm:$0xff] }
   0xd   : > { %v317_v5 = vsel %vm315_vm0, 4294967295, %v575_v4  ;;  %s529_s23 = sshll.u32 %s698_s18, 3  ;;  %v542_v14 = vld [vmem:[%s694_s1 + $0x20] sm:$0xff]  ;;  %v540_v19 = vld [vmem:[%s694_s1 + $0x10] sm:$0xff]  ;;  %v539_v20 = vld [vmem:[%s694_s1 + $0x8] sm:$0xff]  ;;  %vm380_vm3 = vcmask 130048  }
   0xe   : > { %v292_v6 = vpack.c.b16 %v282_v2, %v282_v2  ;;  %v318_v7 = vsel %vm316_vm1, %v317_v5, 0  ;;  %s627_s28 = scalar_lea.vmem %s693_s0, %s529_s23  ;;  %v538_v24 = vld [vmem:[%s694_s1] sm:$0xff]  ;;  %s672_s17 = scalar_lea.vmem %s696_s3, %s529_s23 }
   0xf   : > { %v532_v11 = vld [vmem:[%s627_s28 + $0x14] sm:$0xf]  ;;  %v467_v12 = vld [vmem:[%s627_s28 + $0x18] sm:$0xf0]  ;;  %v530_v15 = vld [vmem:[%s627_s28 + $0x4] sm:$0xf] }
  0x10   : > { %v320_v8 = vand.u32 %v318_v7, %v292_v6  ;;  %323 = vmatpush.bf16.msra.mxu0 %v544_v3  ;;  %548 = vmatpush.bf16.msra.mxu2 %v544_v3  ;;  %v470_v13 = vor.u32 %v532_v11, %v467_v12  ;;  %v459_v16 = vld [vmem:[%s627_s28 + $0x8] sm:$0xf0]  ;;  %v534_v21 = vld [vmem:[%s627_s28 + $0x24] sm:$0xf]  ;;  %v457_v25 = vld [vmem:[%s627_s28] sm:$0xf] }
  0x11   : > { %v462_v17 = vor.u32 %v530_v15, %v459_v16  ;;  %v475_v22 = vld [vmem:[%s627_s28 + $0x28] sm:$0xf0]  ;;  %v531_v26 = vld [vmem:[%s627_s28 + $0x4] sm:$0xf0]  ;;  %v473_v27 = vld [vmem:[%s627_s28 + $0x20] sm:$0xf] }
  0x12   : > { %555 = vmatpush.bf16.msra.mxu3 %v320_v8  ;;  %357 = vmatpush.bf16.msra.mxu1 %v320_v8  ;;  %v478_v23 = vor.u32 %v534_v21, %v475_v22  ;;  %v535_v28 = vld [vmem:[%s627_s28 + $0x24] sm:$0xf0]  ;;  %v458_v29 = vor.u32 %v531_v26, %v457_v25  ;;  %v536_v31 = vld [vmem:[%s627_s28 + $0x34] sm:$0xf]  ;;  %v483_v32 = vld [vmem:[%s627_s28 + $0x38] sm:$0xf0] }
  0x13   : > { %v474_v30 = vor.u32 %v535_v28, %v473_v27  ;;  %v486_v33 = vor.u32 %v536_v31, %v483_v32  ;;  %v465_v34 = vld [vmem:[%s627_s28 + $0x10] sm:$0xf]  ;;  %v533_v35 = vld [vmem:[%s627_s28 + $0x14] sm:$0xf0]  ;;  %v566_v42 = vld [vmem:[%s695_s2] ss:$0 sm:$0xff] }
  0x14   : > { %324 = vmatpush.bf16.msra.mxu0 %v543_v9  ;;  %549 = vmatpush.bf16.msra.mxu2 %v543_v9  ;;  %v481_v36 = vld [vmem:[%s627_s28 + $0x30] sm:$0xf]  ;;  %v537_v37 = vld [vmem:[%s627_s28 + $0x34] sm:$0xf0]  ;;  %v466_v38 = vor.u32 %v533_v35, %v465_v34 }
  0x15   : > { %v482_v39 = vor.u32 %v537_v37, %v481_v36 }
  0x16   : > { %556 = vmatpush.bf16.msra.mxu3 %v546_v10  ;;  %358 = vmatpush.bf16.msra.mxu1 %v546_v10 }
  0x18   : > { %325 = vmatpush.bf16.msra.mxu0 %v542_v14  ;;  %550 = vmatpush.bf16.msra.mxu2 %v542_v14 }
  0x19   : > { %524 = vmatmul.msk.bf16.vlgmr.msra.gmra.mxu3 %vm302_vm2, %v470_v13  ;;  %523 = vmatmul.msk.bf16.vlgmr.msra.gmra.mxu1 %vm302_vm2, %v462_v17 }
  0x1c   : > { %326 = vmatpush.bf16.msra.mxu0 %v541_v18  ;;  %551 = vmatpush.bf16.msra.mxu2 %v541_v18 }
  0x20   : > { %327 = vmatpush.bf16.msra.mxu0 %v540_v19  ;;  %552 = vmatpush.bf16.msra.mxu2 %v540_v19 }
  0x24   : > { %328 = vmatpush.bf16.msra.mxu0 %v539_v20  ;;  %553 = vmatpush.bf16.msra.mxu2 %v539_v20 }
  0x28   : > { %329 = vmatpush.bf16.msra.mxu0 %v538_v24  ;;  %554 = vmatpush.bf16.msra.mxu2 %v538_v24 }
  0x29   : > { %525 = vmatmul.msk.bf16.gmra.mxu3 %vm302_vm2, %v478_v23 }
  0x2b   : > { %330 = vmatmul.bf16.vlgmr.msra.gmra.mxu0 %v458_v29  ;;  %340 = vmatmul.bf16.vlgmr.msra.gmra.mxu2 %v474_v30 }
  0x39   : > { %526 = vmatmul.msk.bf16.gmra.mxu3 %vm302_vm2, %v486_v33 }
  0x3b   : > { %335 = vmatmul.bf16.gmra.mxu0 %v466_v38  ;;  %345 = vmatmul.bf16.gmra.mxu2 %v482_v39 }
  0x96   : > { %v360_v43 = vpop.f32.mrf.mxu1 }
  0x9c   : > { %v365_v40 = vpop.f32.mrf.mxu3 }
  0x9e   : > { %v362_v51 = vpop.f32.mrf.mxu1 }
  0xa4   : > { %v367_v41 = vpop.f32.mrf.mxu3 }
  0xa8   : > { %v331_v44 = vpop.f32.mrf.mxu0 }
  0xa9   : > { %v332_v45 = vadd.f32 %v566_v42, %v331_v44 }
  0xab   : > { %v361_v46 = vadd.f32 %v360_v43, %v332_v45 }
  0xac   : > { %v370_v47 = vpop.f32.mrf.mxu3 }
  0xad   : > { %381 = vst.msk [vmem:[%s672_s17] sm:$0xff] %vm380_vm3, %v361_v46 }
  0xae   : > { %v341_v48 = vpop.f32.mrf.mxu2 }
  0xaf   : > { %v342_v49 = vadd.f32 %v566_v42, %v341_v48 }
  0xb0   : > { %v333_v50 = vpop.f32.mrf.mxu0 }
  0xb1   : > { %v334_v52 = vadd.f32 %v566_v42, %v333_v50  ;;  %v371_v53 = vadd.f32 %v370_v47, %v342_v49 }
  0xb3   : > { %v363_v54 = vadd.f32 %v362_v51, %v334_v52  ;;  %385 = vst.msk [vmem:[%s672_s17 + $0x20] sm:$0xff] %vm380_vm3, %v371_v53 }
  0xb4   : > { %v372_v55 = vpop.f32.mrf.mxu3 }
  0xb5   : > { %382 = vst.msk [vmem:[%s672_s17 + $0x8] sm:$0xff] %vm380_vm3, %v363_v54 }
  0xb6   : > { %v343_v56 = vpop.f32.mrf.mxu2 }
  0xb7   : > { %v344_v57 = vadd.f32 %v566_v42, %v343_v56 }
  0xb8   : > { %v336_v58 = vpop.f32.mrf.mxu0 }
  0xb9   : > { %v337_v59 = vadd.f32 %v566_v42, %v336_v58  ;;  %v373_v60 = vadd.f32 %v372_v55, %v344_v57 }
  0xbb   : > { %v366_v61 = vadd.f32 %v365_v40, %v337_v59  ;;  %386 = vst.msk [vmem:[%s672_s17 + $0x28] sm:$0xff] %vm380_vm3, %v373_v60 }
  0xbc   : > { %v375_v62 = vpop.f32.mrf.mxu3 }
  0xbd   : > { %383 = vst.msk [vmem:[%s672_s17 + $0x10] sm:$0xff] %vm380_vm3, %v366_v61 }
  0xbe   : > { %v346_v63 = vpop.f32.mrf.mxu2 }
  0xbf   : > { %v347_v0 = vadd.f32 %v566_v42, %v346_v63 }
  0xc0   : > { %v338_v1 = vpop.f32.mrf.mxu0 }
  0xc1   : > { %v339_v2 = vadd.f32 %v566_v42, %v338_v1  ;;  %v376_v3 = vadd.f32 %v375_v62, %v347_v0 }
  0xc3   : > { %v368_v4 = vadd.f32 %v367_v41, %v339_v2  ;;  %387 = vst.msk [vmem:[%s672_s17 + $0x30] sm:$0xff] %vm380_vm3, %v376_v3 }
  0xc4   : > { %v377_v7 = vpop.f32.mrf.mxu3 }
  0xc5   : > { %384 = vst.msk [vmem:[%s672_s17 + $0x18] sm:$0xff] %vm380_vm3, %v368_v4 }
  0xc6   : > { %v348_v5 = vpop.f32.mrf.mxu2 }
  0xc7   : > { %v349_v6 = vadd.f32 %v566_v42, %v348_v5 }
  0xc9   : > { %v378_v8 = vadd.f32 %v377_v7, %v349_v6 }
  0xcb   : > { %388 = vst.msk [vmem:[%s672_s17 + $0x38] sm:$0xff] %vm380_vm3, %v378_v8 }
  0xcc PF: > { %s13_s12 = sadd.s32 1, %s573_s12  }
  0xcd   : > { %p10_p4 = scmp.ge.s32.totalorder %s13_s12, 4  }
  0xcf   :  { %12 = sbr.rel (!%p10_p4) target bundleno = 1 (0x1), region = 62 }

// kernel: cyclemlp_forward.10
= control target key start
LH: loop header
LB: loop body
LE: loop exit
PB: predicated region body
PF: predicated region fallthrough
CT: control target
= control target key end

     0   :  { %s462_s12 = smov 0   ;;  %s512_s0 = inlined_call_operand.vmem [shape: bf16[32,144], index: 0, kind: input, shape index: {}]   ;;  %s513_s1 = inlined_call_operand.vmem [shape: bf16[144,32], index: 1, kind: input, shape index: {}]   ;;  %s514_s2 = inlined_call_operand.vmem [shape: f32[1,32], index: 2, kind: input, shape index: {}]   ;;  %s515_s3 = inlined_call_operand.vmem [shape: f32[32,32], index: 3, kind: output, shape index: {}]  }
   0x1 LB: > { %s356_s13 = sadd.s32 4294967295, %s440_s12   ;;  %p360_p0 = scmp.ge.s32.totalorder %s440_s12, 1  ;;  %s440_s12 = sphi %s462_s12, %s13_s12  }
   0x2   : > { %p139_p1 = scmp.lt.s32.totalorder %s440_s12, 3 }
   0x4   : > { %p140_p2 = pnand %p360_p0, %p139_p1 }
   0x5   : > { %s361_s16 = sshll.u32 (!%p140_p2), %s356_s13, 1 }
   0x6   : > { %143 = sbr.rel (%p140_p2) target bundleno = 182 (0xb6), region = 32  ;;  %p165_p3 = scmp.lt.s32.totalorder (!%p140_p2), %s361_s16, 3 }
   0xb   : > { %v423_v0 = vld [vmem:[%s513_s1 + $0x38] sm:$0xff]  ;;  %v422_v1 = vld [vmem:[%s513_s1 + $0x30] sm:$0xff]  ;;  %v424_v2 = vld [vmem:[%s513_s1 + $0x40] sm:$0xff]  ;;  %s517_s16 = smov (!%p165_p3, %s361_s16), 3  ;;  %vm265_vm0 = vcmask 130048   ;;  %vm297_vm1 = vcmask 261120  }
   0xc   : > { %269 = vmatpush.bf16.msra.mxu0 %v423_v0  ;;  %290 = vmatpush.bf16.msra.mxu1 %v424_v2  ;;  %s413_s21 = sshll.u32 %s517_s16, 3  ;;  %v421_v3 = vld [vmem:[%s513_s1 + $0x28] sm:$0xff]  ;;  %v420_v7 = vld [vmem:[%s513_s1 + $0x20] sm:$0xff]  ;;  %v419_v8 = vld [vmem:[%s513_s1 + $0x18] sm:$0xff] }
   0xd   : > { %s169_s26 = scalar_lea.vmem %s512_s0, %s413_s21  ;;  %v418_v9 = vld [vmem:[%s513_s1 + $0x10] sm:$0xff]  ;;  %v417_v10 = vld [vmem:[%s513_s1 + $0x8] sm:$0xff]  ;;  %v416_v11 = vld [vmem:[%s513_s1] sm:$0xff]  ;;  %s175_s15 = scalar_lea.vmem %s515_s3, %s413_s21 }
   0xe   : > { %v414_v4 = vld [vmem:[%s169_s26 + $0x4] sm:$0xf]  ;;  %v370_v5 = vld [vmem:[%s169_s26 + $0x8] sm:$0xf0]  ;;  %v368_v12 = vld [vmem:[%s169_s26] sm:$0xf] }
   0xf   : > { %v373_v6 = vor.u32 %v414_v4, %v370_v5  ;;  %v415_v13 = vld [vmem:[%s169_s26 + $0x4] sm:$0xf0]  ;;  %v433_v15 = vld [vmem:[%s514_s2] ss:$0 sm:$0xff] }
  0x10   : > { %270 = vmatpush.bf16.msra.mxu0 %v422_v1  ;;  %v369_v14 = vor.u32 %v415_v13, %v368_v12 }
  0x11   : > { %410 = vmatmul.msk.bf16.vlgmr.msra.gmra.mxu1 %vm265_vm0, %v373_v6 }
  0x14   : > { %271 = vmatpush.bf16.msra.mxu0 %v421_v3 }
  0x18   : > { %272 = vmatpush.bf16.msra.mxu0 %v420_v7 }
  0x1c   : > { %273 = vmatpush.bf16.msra.mxu0 %v419_v8 }
  0x20   : > { %274 = vmatpush.bf16.msra.mxu0 %v418_v9 }
  0x24   : > { %275 = vmatpush.bf16.msra.mxu0 %v417_v10 }
  0x28   : > { %276 = vmatpush.bf16.msra.mxu0 %v416_v11 }
  0x2b   : > { %277 = vmatmul.bf16.vlgmr.msra.gmra.mxu0 %v369_v14 }
  0x8e   : > { %v292_v16 = vpop.f32.mrf.mxu1 }
  0x96   : > { %v294_v22 = vpop.f32.mrf.mxu1 }
  0xa8   : > { %v278_v17 = vpop.f32.mrf.mxu0 }
  0xa9   : > { %v279_v18 = vadd.f32 %v433_v15, %v278_v17 }
  0xab   : > { %v293_v19 = vadd.f32 %v292_v16, %v279_v18 }
  0xad   : > { %298 = vst.msk [vmem:[%s175_s15] sm:$0xff] %vm297_vm1, %v293_v19 }
  0xb0   : > { %v280_v20 = vpop.f32.mrf.mxu0 }
  0xb1   : > { %v281_v21 = vadd.f32 %v433_v15, %v280_v20 }
  0xb3   : > { %v295_v23 = vadd.f32 %v294_v22, %v281_v21 }
  0xb5   : > { %299 = vst.msk [vmem:[%s175_s15 + $0x8] sm:$0xff] %vm297_vm1, %v295_v23 }
  0xb6 PF: > { %s13_s12 = sadd.s32 1, %s440_s12  }
  0xb7   : > { %p10_p4 = scmp.ge.s32.totalorder %s13_s12, 4  }
  0xb9   :  { %12 = sbr.rel (!%p10_p4) target bundleno = 1 (0x1), region = 62 }

// kernel: cyclemlp_forward.9
= control target key start
LH: loop header
LB: loop body
LE: loop exit
PB: predicated region body
PF: predicated region fallthrough
CT: control target
= control target key end

     0   :  { %s1954_s18 = smov 0   ;;  %s1956_s19 = smov 0   ;;  %s2828_s0 = inlined_call_operand.vmem [shape: f32[2,64,16], index: 0, kind: input, shape index: {}]   ;;  %s2829_s1 = inlined_call_operand.vmem [shape: f32[5,64,16], index: 1, kind: input, shape index: {}]   ;;  %s2830_s2 = inlined_call_operand.vmem [shape: bf16[2,16,768], index: 2, kind: input, shape index: {}]   ;;  %s2831_s3 = inlined_call_operand.vmem [shape: bf16[2,32,256], index: 3, kind: input, shape index: {}]   ;;  %s2832_s4 = inlined_call_operand.vmem [shape: f32[2,11,48], index: 4, kind: input, shape index: {}]   ;;  %s2833_s5 = inlined_call_operand.vmem [shape: f32[2,64,16], index: 5, kind: output, shape index: {}]  }
   0x1   :  { %s1958_s20 = smov 0   ;;  %s1960_s21 = smov 0  }
   0x2   :  { %s1962_s22 = smov 0  }
   0x3 LB: > { %s24_s23 = sadd.s32 1, %s1908_s20  ;;  %s27_s24 = sadd.s32 1, %s1912_s21  ;;  %s1916_s22 = sphi %s1962_s22, %s15_s22   ;;  %s1912_s21 = sphi %s1960_s21, %s2843_s21   ;;  %s1908_s20 = sphi %s1958_s20, %s2842_s20   ;;  %s1904_s19 = sphi %s1956_s19, %s2841_s19   ;;  %s1900_s18 = sphi %s1954_s18, %s2840_s18  }
   0x4   : > { %p25_p0 = scmp.ge.s32.totalorder %s24_s23, 2  ;;  %p1635_p1 = scmp.ge.s32.totalorder %s1916_s22, 1 }
   0x5   : > { %p229_p2 = scmp.lt.s32.totalorder %s1916_s22, 5 }
   0x6   : > { %s2845_s23 = smov (%p25_p0, %s24_s23), 0  ;;  %s2847_s24 = smov (!%p25_p0, %s27_s24), %s1912_s21 }
   0x7   : > { %p230_p3 = pnand %p1635_p1, %p229_p2  ;;  %p29_p4 = scmp.ge.s32.totalorder %s2847_s24, 2 }
   0x8   : > { %p272_p5 = scmp.lt.s32.totalorder (!%p230_p3), %s1904_s19, 1  ;;  %p277_p6 = scmp.lt.s32.totalorder (!%p230_p3), %s1900_s18, 1 }
   0x9   : > { %s2849_s24 = smov (%p29_p4, %s2847_s24), 0  ;;  %233 = sbr.rel (%p230_p3) target bundleno = 2302 (0x8fe), region = 40 }
   0xa   : > { %p1645_p7 = scmp.ne.s32.totalorder (!%p230_p3), %s1900_s18, 0 }
   0xe   : > { %s2851_s19 = smov (!%p272_p5, %s1904_s19), 1 }
   0xf   : > { %s278_s25 = scalar_select %p277_p6, %s1900_s18, 1 }
  0x10   : > { %s1738_s26 = sshll.u32 %s2851_s19, 6  ;;  %301 = sbr.rel (%p1645_p7) target bundleno = 30 (0x1e), region = 44 }
  0x11   : > { %s276_s29 = scalar_lea.vmem %s2828_s0, %s1738_s26  ;;  %s1752_s30 = smul.u32 48, %s278_s25 }
  0x12   : > { %s1739_s6 = sshll.u32 %s278_s25, 5  ;;  %s1740_s7 = sshll.u32 %s278_s25, 4 }
  0x13   : > { %s1994_s10 = scalar_lea.vmem %s2830_s2, %s1752_s30  ;;  %s1999_s13 = scalar_lea.vmem %s2831_s3, %s1739_s6 }
  0x14   : > { %s2004_s16 = scalar_lea.vmem %s2832_s4, %s1740_s7  ;;  %s2009_s27 = scalar_lea.vmem %s2833_s5, %s1738_s26 }
  0x15   : > { %v302_v0 = vld [vmem:[%s276_s29] sm:$0xff]  ;;  %vm310_vm0 = vcmask 130048   ;;  %v303_v1 = vld [vmem:[%s276_s29 + $0x8] sm:$0xff]  ;;  %v304_v2 = vld [vmem:[%s276_s29 + $0x10] sm:$0xff] }
  0x16   : > { %311 = vst.msk [vmem:[%s2009_s27] sm:$0xff] %vm310_vm0, %v302_v0  ;;  %v305_v3 = vld [vmem:[%s276_s29 + $0x18] sm:$0xff]  ;;  %v306_v4 = vld [vmem:[%s276_s29 + $0x20] sm:$0xff]  ;;  %v307_v5 = vld [vmem:[%s276_s29 + $0x28] sm:$0xff] }
  0x17   : > { %312 = vst.msk [vmem:[%s2009_s27 + $0x8] sm:$0xff] %vm310_vm0, %v303_v1  ;;  %v308_v6 = vld [vmem:[%s276_s29 + $0x30] sm:$0xff]  ;;  %v309_v7 = vld [vmem:[%s276_s29 + $0x38] sm:$0xff] }
  0x18   : > { %313 = vst.msk [vmem:[%s2009_s27 + $0x10] sm:$0xff] %vm310_vm0, %v304_v2 }
  0x19   : > { %314 = vst.msk [vmem:[%s2009_s27 + $0x18] sm:$0xff] %vm310_vm0, %v305_v3 }
  0x1a   : > { %315 = vst.msk [vmem:[%s2009_s27 + $0x20] sm:$0xff] %vm310_vm0, %v306_v4 }
  0x1b   : > { %316 = vst.msk [vmem:[%s2009_s27 + $0x28] sm:$0xff] %vm310_vm0, %v307_v5 }
  0x1c   : > { %317 = vst.msk [vmem:[%s2009_s27 + $0x30] sm:$0xff] %vm310_vm0, %v308_v6 }
  0x1d   : > { %318 = vst.msk [vmem:[%s2009_s27 + $0x38] sm:$0xff] %vm310_vm0, %v309_v7 }
  0x1e PF: > { %vm355_vm1 = vcmask 130048   ;;  %v320_v16 = vld [vmem:[%s2009_s27 + $0x8] sm:$0xff]  ;;  %v319_v21 = vld [vmem:[%s2009_s27] sm:$0xff]  ;;  %v1918_v24 = vmov 16.0   ;;  %s1920_s18 = smov 96   ;;  %s1921_s25 = smov 112  }
  0x1f   : > { %v321_v10 = vld [vmem:[%s2009_s27 + $0x10] sm:$0xff]  ;;  %v359_v18 = vsel %vm355_vm1, %v320_v16, 0.0  ;;  %v356_v23 = vsel %vm355_vm1, %v319_v21, 0.0  ;;  %1808 = vrcp.f32 %v1918_v24  ;;  %s1922_s26 = smov 32   ;;  %s1923_s28 = smov 16  }
  0x20   : > { %v362_v13 = vsel %vm355_vm1, %v321_v10, 0.0  ;;  %v322_v15 = vld [vmem:[%s2009_s27 + $0x18] sm:$0xff] }
  0x21   : > { %v323_v9 = vld [vmem:[%s2009_s27 + $0x20] sm:$0xff]  ;;  %363 = vadd.xlane.f32.xlu0 %v362_v13  ;;  %v365_v19 = vsel %vm355_vm1, %v322_v15, 0.0 }
  0x22   : > { %v324_v8 = vld [vmem:[%s2009_s27 + $0x28] sm:$0xff]  ;;  %v368_v12 = vsel %vm355_vm1, %v323_v9, 0.0 }
  0x23   : > { %v371_v11 = vsel %vm355_vm1, %v324_v8, 0.0  ;;  %369 = vadd.xlane.f32.xlu1 %v368_v12  ;;  %v325_v14 = vld [vmem:[%s2009_s27 + $0x30] sm:$0xff] }
  0x24   : > { %372 = vadd.xlane.f32.xlu2 %v371_v11  ;;  %v374_v17 = vsel %vm355_vm1, %v325_v14, 0.0  ;;  %v326_v20 = vld [vmem:[%s2009_s27 + $0x38] sm:$0xff] }
  0x25   : > { %v377_v22 = vsel %vm355_vm1, %v326_v20, 0.0  ;;  %v1809_v25 = vpop.eup %1808 }
  0x26   : > { %v381_v26 = vmul.f32 16.0, %v1809_v25  ;;  %vm385_vm2 = vweird.f32 %v1809_v25 }
  0x28   : > { %v382_v27 = vsub.f32 1.0, %v381_v26 }
  0x29   : > { %366 = vadd.xlane.f32.xlu0 %v365_v19 }
  0x2a   : > { %v383_v28 = vmul.f32 %v1809_v25, %v382_v27  ;;  %v1743_v27 = vld [vmem:[%s1994_s10 + $0x18] sm:$0xf0] }
  0x2b   : > { %360 = vadd.xlane.f32.xlu1 %v359_v18 }
  0x2c   : > { %375 = vadd.xlane.f32.xlu2 %v374_v17  ;;  %v384_v29 = vadd.f32 %v1809_v25, %v383_v28 }
  0x2e   : > { %v2036_v30 = vsel %vm385_vm2, %v1809_v25, %v384_v29  ;;  %v1688_v25 = vld [vmem:[%s1994_s10 + $0x4] sm:$0xf] }
  0x31   : > { %357 = vadd.xlane.f32.xlu0 %v356_v23 }
  0x33   : > { %378 = vadd.xlane.f32.xlu1 %v377_v22 }
  0x94   : > { %v364_v34 = vpop.xlane.xlu0 %363 }
  0x95   : > { %v389_v35 = vmul.f32 %v2036_v30, %v364_v34 }
  0x96   : > { %v370_v32 = vpop.xlane.xlu1 %369 }
  0x97   : > { %v373_v31 = vpop.xlane.xlu2 %372  ;;  %v391_v33 = vmul.f32 %v2036_v30, %v370_v32  ;;  %v2042_v37 = vsub.f32 %v321_v10, %v389_v35  ;;  %v1680_v32 = vld [vmem:[%s1994_s10] sm:$0xf] }
  0x98   : > { %v392_v47 = vmul.f32 %v2036_v30, %v373_v31  ;;  %v1689_v31 = vor.u32 %v1743_v27, %v1688_v25 }
  0x99   : > { %v2040_v36 = vsub.f32 %v323_v9, %v391_v33  ;;  %v405_v39 = vmul.f32 %v2042_v37, %v2042_v37  ;;  %v1742_v33 = vld [vmem:[%s1994_s10 + $0x14] sm:$0xf0] }
  0x9a   : > { %v2064_v54 = vsub.f32 %v324_v8, %v392_v47  ;;  %v1681_v35 = vor.u32 %v1742_v33, %v1680_v32  ;;  %1751 = vmatpush.bf16.msra.mxu1 %v1689_v31 }
  0x9b   : > { %v407_v38 = vmul.f32 %v2040_v36, %v2040_v36  ;;  %v417_v42 = vsel %vm355_vm1, %v405_v39, 0.0 }
  0x9c   : > { %418 = vadd.xlane.f32.xlu2 %v417_v42  ;;  %v367_v45 = vpop.xlane.xlu0 %366  ;;  %v408_v63 = vmul.f32 %v2064_v54, %v2064_v54  ;;  %1750 = vmatpush.bf16.msra.mxu2 %v1681_v35 }
  0x9d   : > { %v423_v40 = vsel %vm355_vm1, %v407_v38, 0.0  ;;  %v390_v48 = vmul.f32 %v2036_v30, %v367_v45  ;;  %739 = vmatpush.bf16.msra.mxu0 %v1681_v35 }
  0x9e   : > { %424 = vadd.xlane.f32.xlu1 %v423_v40  ;;  %v361_v43 = vpop.xlane.xlu1 %360  ;;  %v426_v2 = vsel %vm355_vm1, %v408_v63, 0.0 }
  0x9f   : > { %v376_v41 = vpop.xlane.xlu2 %375  ;;  %v388_v46 = vmul.f32 %v2036_v30, %v361_v43  ;;  %v2058_v51 = vsub.f32 %v322_v15, %v390_v48 }
  0xa0   : > { %v393_v44 = vmul.f32 %v2036_v30, %v376_v41 }
  0xa1   : > { %v2056_v50 = vsub.f32 %v320_v16, %v388_v46  ;;  %v406_v55 = vmul.f32 %v2058_v51, %v2058_v51  ;;  %791 = vmatpush.bf16.msrb.mxu0 %v1689_v31  ;;  %v1665_v31 = vld [vmem:[%s2829_s1 + $0x98] sm:$0xff] }
  0xa2   : > { %v2054_v49 = vsub.f32 %v325_v14, %v393_v44 }
  0xa3   : > { %v404_v53 = vmul.f32 %v2056_v50, %v2056_v50  ;;  %v420_v58 = vsel %vm355_vm1, %v406_v55, 0.0  ;;  %v2117_v55 = vld [vmem:[%s2004_s16] ss:$0 sm:$0xff] }
  0xa4   : > { %v409_v52 = vmul.f32 %v2054_v49, %v2054_v49  ;;  %421 = vadd.xlane.f32.xlu0 %v420_v58  ;;  %v358_v60 = vpop.xlane.xlu0 %357 }
  0xa5   : > { %v414_v57 = vsel %vm355_vm1, %v404_v53, 0.0  ;;  %v387_v61 = vmul.f32 %v2036_v30, %v358_v60 }
  0xa6   : > { %v429_v56 = vsel %vm355_vm1, %v409_v52, 0.0  ;;  %v379_v59 = vpop.xlane.xlu1 %378  ;;  %415 = vadd.xlane.f32.xlu2 %v414_v57 }
  0xa7   : > { %430 = vadd.xlane.f32.xlu1 %v429_v56  ;;  %v394_v62 = vmul.f32 %v2036_v30, %v379_v59  ;;  %v2075_v0 = vsub.f32 %v319_v21, %v387_v61  ;;  %v582_v59 = vlaneseq }
  0xa9   : > { %v2077_v1 = vsub.f32 %v326_v20, %v394_v62  ;;  %v403_v3 = vmul.f32 %v2075_v0, %v2075_v0 }
  0xab   : > { %v411_v4 = vsel %vm355_vm1, %v403_v3, 0.0  ;;  %v410_v5 = vmul.f32 %v2077_v1, %v2077_v1 }
  0xac   : > { %427 = vadd.xlane.f32.xlu0 %v426_v2 }
  0xad   : > { %v432_v6 = vsel %vm355_vm1, %v410_v5, 0.0 }
  0xae   : > { %412 = vadd.xlane.f32.xlu2 %v411_v4 }
  0xb4   : > { %433 = vadd.xlane.f32.xlu0 %v432_v6 }
 0x10f   : > { %v419_v8 = vpop.xlane.xlu2 %418 }
 0x110   : > { %v437_v10 = vmul.f32 %v419_v8, %v2036_v30  ;;  %v1744_v8 = vld [vmem:[%s1994_s10 + $0x1c] sm:$0xf0] }
 0x111   : > { %v425_v7 = vpop.xlane.xlu1 %424 }
 0x112   : > { %v439_v9 = vmul.f32 %v425_v7, %v2036_v30  ;;  %v445_v12 = vadd.f32 1e-05, %v437_v10  ;;  %v1696_v7 = vld [vmem:[%s1994_s10 + $0x8] sm:$0xf] }
 0x114   : > { %v447_v11 = vadd.f32 1e-05, %v439_v9  ;;  %vm477_vm6 = vweird.f32 %v445_v12  ;;  %v2138_v9 = vld [vmem:[%s2004_s16 + $0x1] ss:$0 sm:$0xff] }
 0x116   : > { %1810 = vrsqrt.f32 %v447_v11  ;;  %vm497_vm5 = vweird.f32 %v447_v11 }
 0x117   : > { %1812 = vrsqrt.f32 %v445_v12  ;;  %v422_v16 = vpop.xlane.xlu0 %421 }
 0x118   : > { %v438_v18 = vmul.f32 %v422_v16, %v2036_v30 }
 0x119   : > { %v416_v14 = vpop.xlane.xlu2 %415 }
 0x11a   : > { %v431_v13 = vpop.xlane.xlu1 %430  ;;  %v436_v17 = vmul.f32 %v416_v14, %v2036_v30  ;;  %v2095_v24 = vadd.f32 1e-05, %v438_v18  ;;  %v1697_v18 = vor.u32 %v1744_v8, %v1696_v7 }
 0x11b   : > { %v441_v15 = vmul.f32 %v431_v13, %v2036_v30 }
 0x11c   : > { %v1811_v19 = vpop.eup %1810  ;;  %v2093_v23 = vadd.f32 1e-05, %v436_v17  ;;  %vm487_vm15 = vweird.f32 %v2095_v24  ;;  %842 = vmatpush.bf16.msrb.mxu2 %v1697_v18 }
 0x11d   : > { %v2091_v20 = vadd.f32 1e-05, %v441_v15  ;;  %v1813_v21 = vpop.eup %1812  ;;  %v492_v22 = vmul.f32 %v1811_v19, %v447_v11  ;;  %vm498_vm3 = vweird.f32 %v1811_v19 }
 0x11e   : > { %v472_v26 = vmul.f32 %v1813_v21, %v445_v12  ;;  %vm478_vm4 = vweird.f32 %v1813_v21  ;;  %vm499_vm7 = vmor %vm497_vm5, %vm498_vm3  ;;  %vm467_vm14 = vweird.f32 %v2093_v23 }
 0x11f   : > { %1814 = vrsqrt.f32 %v2091_v20  ;;  %v493_v28 = vmul.f32 %v1811_v19, %v492_v22  ;;  %v428_v40 = vpop.xlane.xlu0 %427  ;;  %vm479_vm8 = vmor %vm477_vm6, %vm478_vm4  ;;  %vm517_vm9 = vweird.f32 %v2091_v20 }
 0x120   : > { %1816 = vrsqrt.f32 %v2093_v23  ;;  %v473_v29 = vmul.f32 %v1813_v21, %v472_v26  ;;  %v440_v43 = vmul.f32 %v428_v40, %v2036_v30 }
 0x121   : > { %1818 = vrsqrt.f32 %v2095_v24  ;;  %v494_v34 = vmul.f32 0.5, %v493_v28  ;;  %v413_v39 = vpop.xlane.xlu2 %412 }
 0x122   : > { %v474_v38 = vmul.f32 0.5, %v473_v29  ;;  %v435_v42 = vmul.f32 %v413_v39, %v2036_v30  ;;  %v2122_v58 = vadd.f32 1e-05, %v440_v43 }
 0x123   : > { %v495_v41 = vsub.f32 1.5, %v494_v34 }
 0x124   : > { %v475_v45 = vsub.f32 1.5, %v474_v38  ;;  %v2112_v52 = vadd.f32 1e-05, %v435_v42  ;;  %vm507_vm5 = vweird.f32 %v2122_v58 }
 0x125   : > { %v2106_v44 = vpop.eup %1814  ;;  %v496_v47 = vmul.f32 %v1811_v19, %v495_v41 }
 0x126   : > { %v2108_v46 = vpop.eup %1816  ;;  %v512_v48 = vmul.f32 %v2106_v44, %v2091_v20  ;;  %v476_v56 = vmul.f32 %v1813_v21, %v475_v45  ;;  %1820 = vrsqrt.f32 %v2112_v52  ;;  %vm518_vm10 = vweird.f32 %v2106_v44 }
 0x127   : > { %v2114_v53 = vpop.eup %1818  ;;  %v462_v57 = vmul.f32 %v2108_v46, %v2093_v23  ;;  %v500_v60 = vsel %vm499_vm7, %v1811_v19, %v496_v47  ;;  %1822 = vrsqrt.f32 %v2122_v58  ;;  %vm468_vm11 = vweird.f32 %v2108_v46  ;;  %vm2151_vm12 = vmor %vm517_vm9, %vm518_vm10 }
 0x128   : > { %v513_v61 = vmul.f32 %v2106_v44, %v512_v48  ;;  %v482_v62 = vmul.f32 %v2114_v53, %v2095_v24  ;;  %v480_v63 = vsel %vm479_vm8, %v1813_v21, %v476_v56  ;;  %v535_v2 = vmul.f32 %v500_v60, %v2040_v36  ;;  %v434_v36 = vpop.xlane.xlu0 %433  ;;  %vm469_vm0 = vmor %vm467_vm14, %vm468_vm11  ;;  %v1672_v60 = vld [vmem:[%s2829_s1 + $0xd0] sm:$0xff] }
 0x129   : > { %v463_v3 = vmul.f32 %v2108_v46, %v462_v57  ;;  %v533_v4 = vmul.f32 %v480_v63, %v2042_v37  ;;  %v442_v14 = vmul.f32 %v434_v36, %v2036_v30  ;;  %v2143_v37 = vshrl.u32 %v582_v59, 7  ;;  %v1649_v57 = vld [vmem:[%s2829_s1 + $0x118] sm:$0xff]  ;;  %v1664_v59 = vld [vmem:[%s2829_s1 + $0x90] sm:$0xff] }
 0x12a   : > { %v514_v5 = vmul.f32 0.5, %v513_v61  ;;  %v483_v6 = vmul.f32 %v2114_v53, %v482_v62  ;;  %v544_v10 = vmul.f32 %v2117_v55, %v535_v2  ;;  %vm488_vm13 = vweird.f32 %v2114_v53 }
 0x12b   : > { %v464_v11 = vmul.f32 0.5, %v463_v3  ;;  %v542_v15 = vmul.f32 %v2117_v55, %v533_v4  ;;  %v2157_v22 = vadd.f32 1e-05, %v442_v14  ;;  %vm457_vm2 = vweird.f32 %v2112_v52  ;;  %vm489_vm4 = vmor %vm487_vm15, %vm488_vm13  ;;  %v1675_v3 = vld [vmem:[%s2829_s1 + $0xe8] sm:$0xff] }
 0x12c   : > { %v515_v12 = vsub.f32 1.5, %v514_v5  ;;  %v484_v13 = vmul.f32 0.5, %v483_v6  ;;  %v2159_v25 = vpop.eup %1820  ;;  %v2162_v26 = vadd.f32 %v2138_v9, %v544_v10  ;;  %vm584_vm3 = vcmp.lt.s32.totalorder %v2143_v37, 7 }
 0x12d   : > { %v465_v16 = vsub.f32 1.5, %v464_v11  ;;  %v452_v29 = vmul.f32 %v2159_v25, %v2112_v52  ;;  %v2178_v23 = vpop.eup %1822  ;;  %v2181_v24 = vadd.f32 %v2138_v9, %v542_v15  ;;  %1824 = vrsqrt.f32 %v2157_v22 }
 0x12e   : > { %v516_v19 = vmul.f32 %v2106_v44, %v515_v12  ;;  %v485_v21 = vsub.f32 1.5, %v484_v13  ;;  %v502_v39 = vmul.f32 %v2178_v23, %v2122_v58  ;;  %v671_v42 = vmul.f32 %v1665_v31, %v2162_v26  ;;  %v596_v12 = vld [vmem:[%s2829_s1 + $0x18] sm:$0xff] }
 0x12f   : > { %v466_v27 = vmul.f32 %v2108_v46, %v465_v16  ;;  %v453_v38 = vmul.f32 %v2159_v25, %v452_v29  ;;  %v578_v43 = vrot.slane %v2162_v26, 1  ;;  %vm458_vm6 = vweird.f32 %v2159_v25 }
 0x130   : > { %v520_v20 = vsel %vm2151_vm12, %v2106_v44, %v516_v19  ;;  %v486_v28 = vmul.f32 %v2114_v53, %v485_v21  ;;  %vm625_vm7 = vcmp.lt.s32.totalorder %v2143_v37, 1  ;;  %vm508_vm8 = vweird.f32 %v2178_v23  ;;  %vm2235_vm10 = vmor %vm457_vm2, %vm458_vm6 }
 0x131   : > { %v470_v32 = vsel %vm469_vm0, %v2108_v46, %v466_v27  ;;  %v537_v33 = vmul.f32 %v520_v20, %v2054_v49  ;;  %v1648_v49 = vld [vmem:[%s2829_s1 + $0x110] sm:$0xff]  ;;  %v454_v45 = vmul.f32 0.5, %v453_v38  ;;  %v503_v46 = vmul.f32 %v2178_v23, %v502_v39  ;;  %vm509_vm12 = vmor %vm507_vm5, %vm508_vm8  ;;  %v1657_v39 = vld [vmem:[%s2829_s1 + $0x58] sm:$0xff] }
 0x132   : > { %v532_v34 = vmul.f32 %v470_v32, %v2056_v50  ;;  %v490_v35 = vsel %vm489_vm4, %v2114_v53, %v486_v28  ;;  %v1673_v50 = vld [vmem:[%s2829_s1 + $0xd8] sm:$0xff]  ;;  %vm527_vm9 = vweird.f32 %v2157_v22  ;;  %v576_v4 = vrot.slane %v2181_v24, 1 }
 0x133   : > { %v546_v40 = vmul.f32 %v2117_v55, %v537_v33  ;;  %v534_v41 = vmul.f32 %v490_v35, %v2058_v51  ;;  %v568_v51 = vmul.f32 %v1648_v49, %v2181_v24  ;;  %v455_v53 = vsub.f32 1.5, %v454_v45  ;;  %v1825_v62 = vpop.eup %1824  ;;  %v1656_v33 = vld [vmem:[%s2829_s1 + $0x50] sm:$0xff] }
 0x134   : > { %v541_v44 = vmul.f32 %v2117_v55, %v532_v34  ;;  %v504_v56 = vmul.f32 0.5, %v503_v46  ;;  %v696_v61 = vmul.f32 %v1673_v50, %v2181_v24  ;;  %v619_v5 = vrot.slane %v2181_v24, 7  ;;  %v1650_v50 = vld [vmem:[%s2829_s1 + $0x120] sm:$0xff] }
 0x135   : > { %v543_v47 = vmul.f32 %v2117_v55, %v534_v41  ;;  %v2226_v63 = vadd.f32 %v2138_v9, %v546_v40  ;;  %v456_v6 = vmul.f32 %v2159_v25, %v455_v53  ;;  %v522_v8 = vmul.f32 %v1825_v62, %v2157_v22  ;;  %v1666_v53 = vld [vmem:[%s2829_s1 + $0xa0] sm:$0xff] }
 0x136   : > { %v2213_v48 = vadd.f32 %v2138_v9, %v541_v44  ;;  %v505_v7 = vsub.f32 1.5, %v504_v56  ;;  %vm528_vm11 = vweird.f32 %v1825_v62  ;;  %vm946_vm15 = vcmask 1041408  }
 0x137   : > { %v2229_v2 = vadd.f32 %v2138_v9, %v543_v47  ;;  %v460_v13 = vsel %vm2235_vm10, %v2159_v25, %v456_v6  ;;  %v523_v15 = vmul.f32 %v1825_v62, %v522_v8  ;;  %v595_v25 = vld [vmem:[%s2829_s1 + $0x10] sm:$0xff]  ;;  %vm2288_vm13 = vmor %vm527_vm9, %vm528_vm11  ;;  %v1651_v47 = vld [vmem:[%s2829_s1 + $0x128] sm:$0xff]  ;;  %vm942_vm0 = vcmask 31744  }
 0x138   : > { %v695_v52 = vmul.f32 %v1672_v60, %v2213_v48  ;;  %v506_v14 = vmul.f32 %v2178_v23, %v505_v7  ;;  %v618_v16 = vrot.slane %v2213_v48, 7  ;;  %v531_v17 = vmul.f32 %v460_v13, %v2075_v0 }
 0x139   : > { %v569_v10 = vmul.f32 %v1649_v57, %v2229_v2  ;;  %v670_v11 = vmul.f32 %v1664_v59, %v2229_v2  ;;  %v577_v36 = vrot.slane %v2229_v2, 1  ;;  %v524_v20 = vmul.f32 0.5, %v523_v15  ;;  %v1674_v15 = vld [vmem:[%s2829_s1 + $0xe0] sm:$0xff] }
 0x13a   : > { %v510_v27 = vsel %vm509_vm12, %v2178_v23, %v506_v14  ;;  %v540_v28 = vmul.f32 %v2117_v55, %v531_v17  ;;  %v620_v38 = vrot.slane %v2229_v2, 7  ;;  %v570_v60 = vmul.f32 %v1650_v50, %v2162_v26 }
 0x13b   : > { %v678_v18 = vadd.f32 %v670_v11, %v568_v51  ;;  %v679_v19 = vadd.f32 %v671_v42, %v569_v10  ;;  %v588_v21 = vsel %vm584_vm3, %v577_v36, %v578_v43  ;;  %v589_v0 = vsel %vm584_vm3, %v576_v4, %v577_v36  ;;  %v593_v11 = vld [vmem:[%s2829_s1] sm:$0xff] }
 0x13c   : > { %v604_v58 = vmul.f32 %v596_v12, %v588_v21  ;;  %v536_v29 = vmul.f32 %v510_v27, %v2064_v54  ;;  %v525_v34 = vsub.f32 1.5, %v524_v20  ;;  %v603_v35 = vmul.f32 %v595_v25, %v589_v0  ;;  %v1646_v21 = vld [vmem:[%s2829_s1 + $0x100] sm:$0xff]  ;;  %v598_v0 = vld [vmem:[%s2829_s1 + $0x28] sm:$0xff] }
 0x13d   : > { %v703_v31 = vadd.f32 %v695_v52, %v678_v18  ;;  %v704_v32 = vadd.f32 %v696_v61, %v679_v19  ;;  %v2282_v49 = vadd.f32 %v2138_v9, %v540_v28  ;;  %v631_v42 = vsel %vm625_vm7, %v618_v16, %v619_v5  ;;  %v1667_v61 = vld [vmem:[%s2829_s1 + $0xa8] sm:$0xff]  ;;  %v597_v20 = vld [vmem:[%s2829_s1 + $0x20] sm:$0xff] }
 0x13e   : > { %v612_v23 = vadd.f32 %v604_v58, %v569_v10  ;;  %v545_v54 = vmul.f32 %v2117_v55, %v536_v29  ;;  %v526_v44 = vmul.f32 %v1825_v62, %v525_v34  ;;  %v611_v45 = vadd.f32 %v603_v35, %v568_v51  ;;  %v594_v18 = vld [vmem:[%s2829_s1 + $0x8] sm:$0xff] }
 0x13f   : > { %v762_v41 = vpack.c.bf16 %v704_v32, %v703_v31  ;;  %v630_v22 = vsel %vm625_vm7, %v619_v5, %v620_v38  ;;  %v645_v46 = vmul.f32 %v1656_v33, %v631_v42  ;;  %v574_v5 = vrot.slane %v2282_v49, 1  ;;  %v1647_v28 = vld [vmem:[%s2829_s1 + $0x108] sm:$0xff] }
 0x140   : > { %v2310_v56 = vadd.f32 %v2138_v9, %v545_v54  ;;  %v646_v51 = vmul.f32 %v1657_v39, %v630_v22  ;;  %v530_v57 = vsel %vm2288_vm13, %v1825_v62, %v526_v44  ;;  %v575_v10 = vrot.slane %v2213_v48, 1  ;;  %v1655_v32 = vld [vmem:[%s2829_s1 + $0x48] sm:$0xff] }
 0x141   : > { %1691 = vmatmul.msk.bf16.vlgmr.msra.gmra.mxu1 %vm355_vm1, %v762_v41  ;;  %v653_v59 = vadd.f32 %v645_v46, %v611_v45  ;;  %v538_v6 = vmul.f32 %v530_v57, %v2077_v1  ;;  %v617_v52 = vrot.slane %v2282_v49, 7  ;;  %v580_v12 = vrot.slane %v2226_v63, 1  ;;  %v1658_v57 = vld [vmem:[%s2829_s1 + $0x60] sm:$0xff] }
 0x142   : > { %v654_v7 = vadd.f32 %v646_v51, %v612_v23  ;;  %v571_v8 = vmul.f32 %v1651_v47, %v2310_v56  ;;  %v672_v62 = vmul.f32 %v1666_v53, %v2310_v56  ;;  %v579_v36 = vrot.slane %v2310_v56, 1 }
 0x143   : > { %v547_v13 = vmul.f32 %v2117_v55, %v538_v6  ;;  %v673_v14 = vmul.f32 %v1667_v61, %v2226_v63  ;;  %v698_v17 = vmul.f32 %v1675_v3, %v2162_v26  ;;  %v590_v55 = vsel %vm584_vm3, %v575_v10, %v576_v4 }
 0x144   : > { %v710_v1 = vpack.c.bf16 %v654_v7, %v653_v59  ;;  %v680_v19 = vadd.f32 %v672_v62, %v570_v60  ;;  %v591_v25 = vsel %vm584_vm3, %v574_v5, %v575_v10  ;;  %v586_v27 = vsel %vm584_vm3, %v579_v36, %v580_v12  ;;  %v1659_v59 = vld [vmem:[%s2829_s1 + $0x68] sm:$0xff] }
 0x145   : > { %v2364_v4 = vadd.f32 %v2138_v9, %v547_v13  ;;  %v681_v58 = vadd.f32 %v673_v14, %v571_v8  ;;  %v601_v29 = vmul.f32 %v593_v11, %v591_v25  ;;  %v632_v31 = vsel %vm625_vm7, %v617_v52, %v618_v16  ;;  %v1654_v16 = vld [vmem:[%s2829_s1 + $0x40] sm:$0xff]  ;;  %v1677_v25 = vld [vmem:[%s2829_s1 + $0xf8] sm:$0xff] }
 0x146   : > { %1683 = vmatmul.msk.bf16.vlgmr.msra.gmra.mxu2 %vm355_vm1, %v710_v1  ;;  %v697_v9 = vmul.f32 %v1674_v15, %v2229_v2  ;;  %v602_v33 = vmul.f32 %v594_v18, %v590_v55  ;;  %v587_v34 = vsel %vm584_vm3, %v578_v43, %v579_v36  ;;  %v622_v35 = vrot.slane %v2310_v56, 7  ;;  %v1668_v36 = vld [vmem:[%s2829_s1 + $0xb0] sm:$0xff] }
 0x147   : > { %v2384_v23 = vmul.f32 %v1646_v21, %v2282_v49  ;;  %v624_v39 = vrot.slane %v2364_v4, 7  ;;  %v605_v54 = vmul.f32 %v597_v20, %v587_v34  ;;  %v606_v40 = vmul.f32 %v598_v0, %v586_v27  ;;  %v1662_v27 = vld [vmem:[%s2829_s1 + $0x80] sm:$0xff]  ;;  %v1676_v0 = vld [vmem:[%s2829_s1 + $0xf0] sm:$0xff] }
 0x148   : > { %v2391_v41 = vmul.f32 %v1647_v28, %v2213_v48  ;;  %v644_v42 = vmul.f32 %v1655_v32, %v632_v31  ;;  %v621_v50 = vrot.slane %v2162_v26, 7  ;;  %v705_v43 = vadd.f32 %v697_v9, %v680_v19  ;;  %v1663_v9 = vld [vmem:[%s2829_s1 + $0x88] sm:$0xff] }
 0x149   : > { %v706_v44 = vadd.f32 %v698_v17, %v681_v58  ;;  %v609_v45 = vadd.f32 %v601_v29, %v2384_v23  ;;  %v633_v22 = vsel %vm625_vm7, %v624_v39, %v617_v52  ;;  %v613_v61 = vadd.f32 %v605_v54, %v570_v60  ;;  %v1652_v60 = vld [vmem:[%s2829_s1 + $0x130] sm:$0xff] }
 0x14a   : > { %v610_v46 = vadd.f32 %v602_v33, %v2391_v41  ;;  %v643_v47 = vmul.f32 %v1654_v16, %v633_v22  ;;  %v628_v53 = vsel %vm625_vm7, %v621_v50, %v622_v35  ;;  %v629_v51 = vsel %vm625_vm7, %v620_v38, %v621_v50  ;;  %v1653_v38 = vld [vmem:[%s2829_s1 + $0x138] sm:$0xff]  ;;  %v599_v29 = vld [vmem:[%s2829_s1 + $0x30] sm:$0xff] }
 0x14b   : > { %v614_v3 = vadd.f32 %v606_v40, %v571_v8  ;;  %v763_v62 = vpack.c.bf16 %v706_v44, %v705_v43  ;;  %v647_v10 = vmul.f32 %v1658_v57, %v629_v51  ;;  %v648_v11 = vmul.f32 %v1659_v59, %v628_v53  ;;  %v1669_v8 = vld [vmem:[%s2829_s1 + $0xb8] sm:$0xff] }
 0x14c   : > { %v651_v6 = vadd.f32 %v643_v47, %v609_v45  ;;  %v652_v7 = vadd.f32 %v644_v42, %v610_v46  ;;  %v581_v14 = vrot.slane %v2364_v4, 1  ;;  %v814_v15 = vpack.c.bf16 %v2229_v2, %v2181_v24  ;;  %v1670_v2 = vld [vmem:[%s2829_s1 + $0xc0] sm:$0xff] }
 0x14d   : > { %v655_v13 = vadd.f32 %v647_v10, %v613_v61  ;;  %v656_v1 = vadd.f32 %v648_v11, %v614_v3  ;;  %v573_v17 = vmul.f32 %v1653_v38, %v2364_v4  ;;  %v674_v18 = vmul.f32 %v1668_v36, %v2364_v4 }
 0x14e   : > { %v709_v52 = vpack.c.bf16 %v652_v7, %v651_v6  ;;  %v572_v21 = vmul.f32 %v1652_v60, %v2226_v63  ;;  %v675_v55 = vmul.f32 %v1669_v8, %v2282_v49  ;;  %v815_v20 = vpack.c.bf16 %v2310_v56, %v2162_v26  ;;  %v600_v26 = vld [vmem:[%s2829_s1 + $0x38] sm:$0xff] }
 0x14f   : > { %v711_v19 = vpack.c.bf16 %v656_v1, %v655_v13  ;;  %v585_v58 = vsel %vm584_vm3, %v580_v12, %v581_v14  ;;  %v592_v28 = vsel %vm584_vm3, %v581_v14, %v574_v5  ;;  %v816_v31 = vpack.c.bf16 %v2364_v4, %v2226_v63  ;;  %v1671_v5 = vld [vmem:[%s2829_s1 + $0xc8] sm:$0xff] }
 0x150   : > { %1682 = vmatmul.msk.bf16.vlgmr.msra.gmra.mxu0 %vm355_vm1, %v709_v52  ;;  %v682_v32 = vadd.f32 %v674_v18, %v572_v21  ;;  %v683_v12 = vadd.f32 %v675_v55, %v573_v17  ;;  %v668_v33 = vmul.f32 %v1662_v27, %v2213_v48  ;;  %v693_v34 = vmul.f32 %v1670_v2, %v2364_v4  ;;  %v1801_v55 = vld [vmem:[%s2004_s16 + $0x3] ss:$0 sm:$0xff]  ;;  %v1704_v2 = vld [vmem:[%s1994_s10 + $0x14] sm:$0xf] }
 0x151   : > { %1692 = vmatmul.msk.bf16.gmra.mxu1 %vm355_vm1, %v763_v62  ;;  %v699_v16 = vmul.f32 %v1676_v0, %v2310_v56  ;;  %v700_v54 = vmul.f32 %v1677_v25, %v2226_v63  ;;  %v607_v40 = vmul.f32 %v599_v29, %v585_v58  ;;  %v608_v42 = vmul.f32 %v600_v26, %v592_v28  ;;  %v1802_v25 = vld [vmem:[%s2004_s16 + $0x2] ss:$0 sm:$0xff] }
 0x152   : > { %v669_v50 = vmul.f32 %v1663_v9, %v2181_v24  ;;  %v676_v43 = vadd.f32 %v668_v33, %v2384_v23  ;;  %v694_v44 = vmul.f32 %v1671_v5, %v2282_v49  ;;  %v623_v45 = vrot.slane %v2226_v63, 7  ;;  %v1660_v23 = vld [vmem:[%s2829_s1 + $0x70] sm:$0xff]  ;;  %v1661_v63 = vld [vmem:[%s2829_s1 + $0x78] sm:$0xff] }
 0x153   : > { %v707_v22 = vadd.f32 %v699_v16, %v682_v32  ;;  %v708_v46 = vadd.f32 %v700_v54, %v683_v12  ;;  %v616_v57 = vadd.f32 %v608_v42, %v573_v17  ;;  %v813_v6 = vpack.c.bf16 %v2213_v48, %v2282_v49 }
 0x154   : > { %v677_v47 = vadd.f32 %v669_v50, %v2391_v41  ;;  %v701_v53 = vadd.f32 %v693_v34, %v676_v43  ;;  %v626_v51 = vsel %vm625_vm7, %v623_v45, %v624_v39  ;;  %v627_v24 = vsel %vm625_vm7, %v622_v35, %v623_v45 }
 0x155   : > { %v615_v41 = vadd.f32 %v607_v40, %v572_v21  ;;  %v764_v4 = vpack.c.bf16 %v708_v46, %v707_v22  ;;  %v649_v61 = vmul.f32 %v1660_v23, %v627_v24  ;;  %v650_v3 = vmul.f32 %v1661_v63, %v626_v51 }
 0x156   : > { %1684 = vmatmul.msk.bf16.gmra.mxu2 %vm355_vm1, %v711_v19  ;;  %v702_v59 = vadd.f32 %v694_v44, %v677_v47  ;;  %v1919_v23 = vmov 64.0  }
 0x157   : > { %v657_v56 = vadd.f32 %v649_v61, %v615_v41  ;;  %v658_v37 = vadd.f32 %v650_v3, %v616_v57  ;;  %1826 = vrcp.f32 %v1919_v23  ;;  %v352_v23 = vld [vmem:[%s2004_s16 + $0x8] sm:$0x1] }
 0x158   : > { %v761_v39 = vpack.c.bf16 %v702_v59, %v701_v53 }
 0x159   : > { %v712_v35 = vpack.c.bf16 %v658_v37, %v657_v56 }
 0x160   : > { %1690 = vmatmul.msk.bf16.vlgmr.msrb.gmra.mxu0 %vm355_vm1, %v761_v39 }
 0x161   : > { %1693 = vmatmul.msk.bf16.gmra.mxu1 %vm355_vm1, %v764_v4 }
 0x166   : > { %1685 = vmatmul.msk.bf16.gmra.mxu2 %vm355_vm1, %v712_v35 }
 0x176   : > { %1698 = vmatmul.msk.bf16.vlgmr.msrb.gmra.mxu2 %vm355_vm1, %v813_v6 }
 0x186   : > { %1699 = vmatmul.msk.bf16.gmra.mxu2 %vm355_vm1, %v814_v15 }
 0x196   : > { %1700 = vmatmul.msk.bf16.gmra.mxu2 %vm355_vm1, %v815_v20  ;;  %v1747_v20 = vld [vmem:[%s1994_s10 + $0x28] sm:$0xf0] }
 0x197   : > { %v1705_v29 = vor.u32 %v1747_v20, %v1704_v2 }
 0x199   : > { %926 = vmatpush.bf16.msra.mxu3 %v1705_v29 }
 0x1a6   : > { %1701 = vmatmul.msk.bf16.gmra.mxu2 %vm355_vm1, %v816_v31 }
 0x1be   : > { %v798_v36 = vpop.f32.mrf.mxu1 }
 0x1bf   : > { %v2528_v31 = vadd.f32 %v1801_v55, %v798_v36 }
 0x1c6   : > { %v800_v1 = vpop.f32.mrf.mxu1 }
 0x1c7   : > { %v2534_v9 = vadd.f32 %v1801_v55, %v800_v1 }
 0x1c9   : > { %v746_v7 = vpop.f32.mrf.mxu2 }
 0x1ca   : > { %v2520_v0 = vadd.f32 %v1802_v25, %v746_v7 }
 0x1cc   : > { %v866_v34 = vadd.f32 %v2528_v31, %v2520_v0 }
 0x1cd   : > { %v741_v48 = vpop.f32.mrf.mxu0 }
 0x1ce   : > { %v803_v14 = vpop.f32.mrf.mxu1  ;;  %v2530_v32 = vadd.f32 %v1802_v25, %v741_v48 }
 0x1cf   : > { %v2545_v42 = vadd.f32 %v1801_v55, %v803_v14 }
 0x1d1   : > { %v748_v62 = vpop.f32.mrf.mxu2 }
 0x1d2   : > { %v2526_v26 = vadd.f32 %v1802_v25, %v748_v62 }
 0x1d4   : > { %v867_v50 = vadd.f32 %v2534_v9, %v2526_v26 }
 0x1d5   : > { %v743_v60 = vpop.f32.mrf.mxu0 }
 0x1d6   : > { %v805_v18 = vpop.f32.mrf.mxu1  ;;  %v2522_v58 = vadd.f32 %v1802_v25, %v743_v60 }
 0x1d7   : > { %v2553_v22 = vadd.f32 %v1801_v55, %v805_v18 }
 0x1d9   : > { %v751_v10 = vpop.f32.mrf.mxu2 }
 0x1da   : > { %v2540_v16 = vadd.f32 %v1802_v25, %v751_v10  ;;  %v1827_v10 = vpop.eup %1826 }
 0x1db   : > { %v902_v14 = vmul.f32 64.0, %v1827_v10  ;;  %vm906_vm14 = vweird.f32 %v1827_v10 }
 0x1dc   : > { %v868_v46 = vadd.f32 %v2545_v42, %v2540_v16 }
 0x1dd   : > { %v793_v15 = vpop.f32.mrf.mxu0 }
 0x1de   : > { %v2524_v28 = vadd.f32 %v1801_v55, %v793_v15  ;;  %v808_v5 = vpop.f32.mrf.mxu1 }
 0x1df   : > { %v2561_v24 = vadd.f32 %v1801_v55, %v808_v5 }
 0x1e0   : > { %v864_v54 = vadd.f32 %v2524_v28, %v2530_v32 }
 0x1e1   : > { %v753_v11 = vpop.f32.mrf.mxu2 }
 0x1e2   : > { %v2549_v43 = vadd.f32 %v1802_v25, %v753_v11 }
 0x1e4   : > { %v869_v63 = vadd.f32 %v2553_v22, %v2549_v43 }
 0x1e5   : > { %v795_v19 = vpop.f32.mrf.mxu0 }
 0x1e6   : > { %v2516_v27 = vadd.f32 %v1801_v55, %v795_v19  ;;  %v810_v37 = vpop.f32.mrf.mxu1 }
 0x1e8   : > { %v865_v12 = vadd.f32 %v2516_v27, %v2522_v58 }
 0x1e9   : > { %v756_v52 = vpop.f32.mrf.mxu2 }
 0x1ea   : > { %v2557_v47 = vadd.f32 %v1802_v25, %v756_v52  ;;  %v2578_v52 = vadd.f32 %v1801_v55, %v810_v37  ;;  %v903_v55 = vsub.f32 1.0, %v902_v14 }
 0x1ec   : > { %v870_v3 = vadd.f32 %v2561_v24, %v2557_v47  ;;  %v904_v29 = vmul.f32 %v1827_v10, %v903_v55 }
 0x1f1   : > { %v758_v38 = vpop.f32.mrf.mxu2 }
 0x1f2   : > { %v2574_v6 = vadd.f32 %v1802_v25, %v758_v38 }
 0x1f4   : > { %v871_v60 = vadd.f32 %v2578_v52, %v2574_v6 }
 0x1f9   : > { %v2504_v13 = vpop.f32.mrf.mxu2 }
 0x1fa   : > { %v872_v44 = vadd.f32 %v864_v54, %v2504_v13 }
 0x1fc   : > { %v880_v41 = vsel %vm355_vm1, %v872_v44, 0.0 }
 0x201   : > { %v2506_v49 = vpop.f32.mrf.mxu2 }
 0x202   : > { %v873_v40 = vadd.f32 %v865_v12, %v2506_v49 }
 0x204   : > { %v881_v53 = vsel %vm355_vm1, %v873_v40, 0.0 }
 0x205   : > { %v882_v4 = vadd.f32 %v881_v53, %v880_v41  ;;  %v343_v53 = vld [vmem:[%s1999_s13 + $0x4] sm:$0x3] }
 0x209   : > { %v2508_v8 = vpop.f32.mrf.mxu2 }
 0x20a   : > { %v874_v45 = vadd.f32 %v866_v34, %v2508_v8  ;;  %v905_v34 = vadd.f32 %v1827_v10, %v904_v29 }
 0x20c   : > { %v883_v57 = vsel %vm355_vm1, %v874_v45, 0.0 }
 0x20d   : > { %v884_v35 = vadd.f32 %v883_v57, %v882_v4 }
 0x211   : > { %v2510_v17 = vpop.f32.mrf.mxu2 }
 0x212   : > { %v875_v51 = vadd.f32 %v867_v50, %v2510_v17  ;;  %v907_v50 = vsel %vm906_vm14, %v1827_v10, %v905_v34 }
 0x214   : > { %v885_v39 = vsel %vm355_vm1, %v875_v51, 0.0  ;;  %v948_v51 = vsel %vm946_vm15, %v343_v53, 0 }
 0x215   : > { %v886_v11 = vadd.f32 %v885_v39, %v884_v35  ;;  %957 = vmatpush.bf16.msrb.mxu3 %v948_v51 }
 0x219   : > { %v2512_v21 = vpop.f32.mrf.mxu2 }
 0x21a   : > { %v876_v59 = vadd.f32 %v868_v46, %v2512_v21 }
 0x21c   : > { %v887_v7 = vsel %vm355_vm1, %v876_v59, 0.0 }
 0x21d   : > { %v888_v48 = vadd.f32 %v887_v7, %v886_v11  ;;  %v354_v11 = vld [vmem:[%s2004_s16 + $0xa] sm:$0x1] }
 0x221   : > { %v2536_v33 = vpop.f32.mrf.mxu2 }
 0x222   : > { %v877_v56 = vadd.f32 %v869_v63, %v2536_v33 }
 0x224   : > { %v889_v36 = vsel %vm355_vm1, %v877_v56, 0.0 }
 0x225   : > { %v890_v15 = vadd.f32 %v889_v36, %v888_v48 }
 0x229   : > { %v2568_v61 = vpop.f32.mrf.mxu2 }
 0x22a   : > { %v878_v62 = vadd.f32 %v870_v3, %v2568_v61 }
 0x22c   : > { %v891_v1 = vsel %vm355_vm1, %v878_v62, 0.0 }
 0x22d   : > { %v892_v19 = vadd.f32 %v891_v1, %v890_v15 }
 0x231   : > { %v2584_v38 = vpop.f32.mrf.mxu2 }
 0x232   : > { %v879_v18 = vadd.f32 %v871_v60, %v2584_v38 }
 0x234   : > { %v893_v25 = vsel %vm355_vm1, %v879_v18, 0.0 }
 0x235   : > { %v894_v2 = vadd.f32 %v893_v25, %v892_v19 }
 0x237   : > { %v895_v20 = vrot.slane %v894_v2, 4 }
 0x239   : > { %v896_v12 = vadd.f32 %v895_v20, %v894_v2 }
 0x23b   : > { %v897_v5 = vrot.slane %v896_v12, 2 }
 0x23d   : > { %v898_v54 = vadd.f32 %v897_v5, %v896_v12 }
 0x23f   : > { %v899_v40 = vrot.slane %v898_v54, 1 }
 0x241   : > { %v900_v44 = vadd.f32 %v899_v40, %v898_v54 }
 0x243   : > { %v908_v45 = vmul.f32 %v907_v50, %v900_v44 }
 0x245   : > { %v909_v46 = vpack.c.bf16 %v908_v45, %v908_v45 }
 0x247   : > { %1706 = vmatmul.msk.bf16.vlgmr.msra.gmra.mxu3 %vm355_vm1, %v909_v46 }
 0x2ca   : > { %v928_v63 = vpop.f32.mrf.mxu3 }
 0x2cb   : > { %v929_v41 = vadd.f32 %v928_v63, %v352_v23  ;;  %v1710_v23 = vld [vmem:[%s1994_s10 + $0xc] sm:$0xf]  ;;  %v1745_v63 = vld [vmem:[%s1994_s10 + $0x20] sm:$0xf0] }
 0x2cd   : > { %v932_v57 = vmul.f32 %v929_v41, %v929_v41 }
 0x2cf   : > { %v933_v59 = vmul.f32 %v932_v57, %v929_v41 }
 0x2d1   : > { %v934_v4 = vmul.f32 0.044715, %v933_v59 }
 0x2d2   : > { %v930_v3 = vpop.f32.mrf.mxu3 }
 0x2d3   : > { %v935_v39 = vadd.f32 %v934_v4, %v929_v41 }
 0x2d5   : > { %v936_v56 = vmul.f32 0.7978846, %v935_v39 }
 0x2d7   : > { %1828 = vtanh.f32 %v936_v56 }
 0x2dd   : > { %v1829_v37 = vpop.eup %1828 }
 0x2de   : > { %v938_v35 = vadd.f32 1.0, %v1829_v37 }
 0x2e0   : > { %v939_v7 = vmul.f32 0.5, %v938_v35 }
 0x2e2   : > { %v940_v62 = vmul.f32 %v939_v7, %v929_v41  ;;  %v1711_v41 = vor.u32 %v1745_v63, %v1710_v23  ;;  %v1871_v63 = vld [vmem:[%s2009_s27 + $0x8] sm:$0xff] }
 0x2e4   : > { %v941_v10 = vpack.c.bf16 %v940_v62, %v940_v62  ;;  %1089 = vmatpush.bf16.msra.mxu3 %v1711_v41 }
 0x2e6   : > { %1707 = vmatmul.msk.bf16.vlgmr.msrb.gmra.mxu3 %vm942_vm0, %v941_v10 }
 0x369   : > { %v959_v36 = vpop.f32.mrf.mxu3 }
 0x36a   : > { %v960_v48 = vadd.f32 %v959_v36, %v354_v11 }
 0x36c   : > { %968 = vrot.lane.b32.xlu2 %v960_v48, %s1920_s18  ;;  %964 = vrot.lane.b32.xlu1 %v960_v48, %s1921_s25 }
 0x371   : > { %v961_v1 = vpop.f32.mrf.mxu3 }
 0x3c6   : > { %v969_v15 = vpop.permute.xlu2 %968 }
 0x3de   : > { %v965_v60 = vpop.permute.xlu1 %964 }
 0x3df   : > { %v967_v14 = vmax.f32 %v960_v48, %v965_v60 }
 0x3e1   : > { %v971_v18 = vmax.f32 %v967_v14, %v969_v15 }
 0x3e3   : > { %982 = vrot.lane.b32.xlu2 %v971_v18, %s1922_s26  ;;  %976 = vrot.lane.b32.xlu0 %v971_v18, %s1923_s28  ;;  %v972_v34 = vsub.f32 %v960_v48, %v971_v18 }
 0x3e5   : > { %v973_v54 = vmul.f32 1.442695, %v972_v34 }
 0x43d   : > { %v983_v19 = vpop.permute.xlu2 %982 }
 0x43e   : > { %v985_v25 = vsub.f32 %v960_v48, %v983_v19 }
 0x440   : > { %v986_v55 = vmul.f32 1.442695, %v985_v25 }
 0x442   : > { %1830 = vpow2.f32 %v986_v55 }
 0x448   : > { %v1831_v2 = vpop.eup %1830 }
 0x449   : > { %994 = vrot.lane.b32.xlu0 %v1831_v2, %s1920_s18 }
 0x455   : > { %v977_v20 = vpop.permute.xlu0 %976 }
 0x456   : > { %v979_v29 = vsub.f32 %v960_v48, %v977_v20 }
 0x458   : > { %v980_v12 = vmul.f32 1.442695, %v979_v29 }
 0x45a   : > { %1832 = vpow2.f32 %v980_v12 }
 0x45b   : > { %1834 = vpow2.f32 %v973_v54 }
 0x460   : > { %v1833_v5 = vpop.eup %1832 }
 0x461   : > { %989 = vrot.lane.b32.xlu1 %v1833_v5, %s1921_s25  ;;  %v1835_v40 = vpop.eup %1834 }
 0x4bb   : > { %v995_v45 = vpop.permute.xlu0 %994 }
 0x4d3   : > { %v990_v50 = vpop.permute.xlu1 %989 }
 0x4d4   : > { %v992_v44 = vadd.f32 %v1835_v40, %v990_v50 }
 0x4d6   : > { %v997_v46 = vadd.f32 %v995_v45, %v992_v44 }
 0x4d8   : > { %1836 = vrcp.f32 %v997_v46 }
 0x4de   : > { %v1837_v53 = vpop.eup %1836 }
 0x4df   : > { %v999_v51 = vmul.f32 %v1837_v53, %v1835_v40  ;;  %1005 = vrot.lane.b32.xlu1 %v1837_v53, %s1922_s26  ;;  %1001 = vrot.lane.b32.xlu2 %v1837_v53, %s1923_s28 }
 0x4e1   : > { %v1009_v37 = vperm.slane %v999_v51, 0 }
 0x4e3   : > { %v1010_v62 = vmul.f32 %v1009_v37, %v2530_v32  ;;  %v1011_v10 = vmul.f32 %v1009_v37, %v2522_v58  ;;  %v1012_v58 = vmul.f32 %v1009_v37, %v2520_v0  ;;  %v1015_v0 = vmul.f32 %v1009_v37, %v2549_v43 }
 0x4e4   : > { %v1017_v43 = vmul.f32 %v1009_v37, %v2574_v6 }
 0x539   : > { %v1002_v57 = vpop.permute.xlu2 %1001 }
 0x53a   : > { %v1004_v59 = vmul.f32 %v1833_v5, %v1002_v57 }
 0x53c   : > { %v1018_v4 = vperm.slane %v1004_v59, 0 }
 0x53e   : > { %1020 = vrot.lane.b32.xlu0 %v1018_v4, %s1921_s25  ;;  %v1872_v4 = vld [vmem:[%s2009_s27 + $0x10] sm:$0xff] }
 0x551   : > { %v1006_v3 = vpop.permute.xlu1 %1005 }
 0x552   : > { %v1008_v39 = vmul.f32 %v1831_v2, %v1006_v3 }
 0x554   : > { %v1039_v56 = vperm.slane %v1008_v39, 0 }
 0x556   : > { %1041 = vrot.lane.b32.xlu2 %v1039_v56, %s1920_s18 }
 0x5b0   : > { %v1021_v35 = vpop.permute.xlu0 %1020  ;;  %v1042_v7 = vpop.permute.xlu2 %1041 }
 0x5b1   : > { %v1023_v11 = vmul.f32 %v1021_v35, %v2524_v28  ;;  %v1024_v36 = vmul.f32 %v1021_v35, %v2516_v27  ;;  %v1044_v60 = vmul.f32 %v1042_v7, %v2504_v13  ;;  %v1045_v14 = vmul.f32 %v1042_v7, %v2506_v49 }
 0x5b2   : > { %v1025_v25 = vmul.f32 %v1021_v35, %v2528_v31  ;;  %v1026_v32 = vmul.f32 %v1021_v35, %v2534_v9  ;;  %v1013_v28 = vmul.f32 %v1009_v37, %v2526_v26  ;;  %v1046_v2 = vmul.f32 %v1042_v7, %v2508_v8 }
 0x5b3   : > { %v1031_v48 = vadd.f32 %v1023_v11, %v1010_v62  ;;  %v1032_v1 = vadd.f32 %v1024_v36, %v1011_v10  ;;  %v1047_v13 = vmul.f32 %v1042_v7, %v2510_v17  ;;  %v1027_v12 = vmul.f32 %v1021_v35, %v2545_v42  ;;  %v1874_v36 = vld [vmem:[%s2009_s27 + $0x20] sm:$0xff] }
 0x5b4   : > { %v1033_v27 = vadd.f32 %v1025_v25, %v1012_v58  ;;  %v1034_v55 = vadd.f32 %v1026_v32, %v1013_v28  ;;  %v1028_v31 = vmul.f32 %v1021_v35, %v2553_v22  ;;  %v1014_v9 = vmul.f32 %v1009_v37, %v2540_v16  ;;  %v1876_v58 = vld [vmem:[%s2009_s27 + $0x30] sm:$0xff] }
 0x5b5   : > { %v1052_v15 = vadd.f32 %v1044_v60, %v1031_v48  ;;  %v1053_v18 = vadd.f32 %v1045_v14, %v1032_v1  ;;  %v1048_v34 = vmul.f32 %v1042_v7, %v2512_v21  ;;  %v1049_v8 = vmul.f32 %v1042_v7, %v2536_v33 }
 0x5b6   : > { %v1054_v49 = vadd.f32 %v1046_v2, %v1033_v27  ;;  %v1055_v20 = vadd.f32 %v1047_v13, %v1034_v55  ;;  %v1035_v26 = vadd.f32 %v1027_v12, %v1014_v9  ;;  %v1036_v5 = vadd.f32 %v1028_v31, %v1015_v0  ;;  %v1877_v12 = vld [vmem:[%s2009_s27 + $0x38] sm:$0xff] }
 0x5b7   : > { %v1060_v19 = vpack.c.bf16 %v1053_v18, %v1052_v15  ;;  %v1029_v42 = vmul.f32 %v1021_v35, %v2561_v24  ;;  %v1030_v22 = vmul.f32 %v1021_v35, %v2578_v52  ;;  %v1016_v16 = vmul.f32 %v1009_v37, %v2557_v47  ;;  %v1803_v24 = vld [vmem:[%s2004_s16 + $0x4] ss:$0 sm:$0xff]  ;;  %v1873_v35 = vld [vmem:[%s2009_s27 + $0x18] sm:$0xff]  ;;  %v1875_v15 = vld [vmem:[%s2009_s27 + $0x28] sm:$0xff] }
 0x5b8   : > { %v1061_v29 = vpack.c.bf16 %v1055_v20, %v1054_v49  ;;  %v1056_v17 = vadd.f32 %v1048_v34, %v1035_v26  ;;  %v1057_v54 = vadd.f32 %v1049_v8, %v1036_v5  ;;  %v1050_v33 = vmul.f32 %v1042_v7, %v2568_v61  ;;  %v1870_v52 = vld [vmem:[%s2009_s27] sm:$0xff] }
 0x5b9   : > { %1712 = vmatmul.msk.bf16.vlgmr.msra.gmra.mxu3 %vm355_vm1, %v1060_v19  ;;  %v1037_v50 = vadd.f32 %v1029_v42, %v1016_v16  ;;  %v1038_v21 = vadd.f32 %v1030_v22, %v1017_v43  ;;  %v1051_v44 = vmul.f32 %v1042_v7, %v2584_v38 }
 0x5ba   : > { %v1062_v40 = vpack.c.bf16 %v1057_v54, %v1056_v17 }
 0x5bb   : > { %v1058_v45 = vadd.f32 %v1050_v33, %v1037_v50  ;;  %v1059_v46 = vadd.f32 %v1051_v44, %v1038_v21 }
 0x5bd   : > { %v1063_v53 = vpack.c.bf16 %v1059_v46, %v1058_v45 }
 0x5c9   : > { %1713 = vmatmul.msk.bf16.gmra.mxu3 %vm355_vm1, %v1061_v29 }
 0x5d9   : > { %1714 = vmatmul.msk.bf16.gmra.mxu3 %vm355_vm1, %v1062_v40 }
 0x5e9   : > { %1715 = vmatmul.msk.bf16.gmra.mxu3 %vm355_vm1, %v1063_v53 }
 0x63c   : > { %v1091_v51 = vpop.f32.mrf.mxu3 }
 0x63d   : > { %v1111_v23 = vadd.f32 %v1870_v52, %v1091_v51 }
 0x63f   : > { %v2630_v47 = vadd.f32 %v1803_v24, %v1111_v23 }
 0x641   : > { %v1128_v6 = vsel %vm355_vm1, %v2630_v47, 0.0 }
 0x642   : > { %1129 = vadd.xlane.f32.xlu1 %v1128_v6 }
 0x644   : > { %v1093_v61 = vpop.f32.mrf.mxu3 }
 0x645   : > { %v1112_v38 = vadd.f32 %v1871_v63, %v1093_v61 }
 0x647   : > { %v2635_v41 = vadd.f32 %v1803_v24, %v1112_v38 }
 0x649   : > { %v1131_v57 = vsel %vm355_vm1, %v2635_v41, 0.0 }
 0x64a   : > { %1132 = vadd.xlane.f32.xlu0 %v1131_v57 }
 0x64c   : > { %v1096_v59 = vpop.f32.mrf.mxu3 }
 0x64d   : > { %v1113_v3 = vadd.f32 %v1872_v4, %v1096_v59 }
 0x64f   : > { %v2640_v39 = vadd.f32 %v1803_v24, %v1113_v3 }
 0x651   : > { %v1134_v56 = vsel %vm355_vm1, %v2640_v39, 0.0 }
 0x652   : > { %1135 = vadd.xlane.f32.xlu2 %v1134_v56 }
 0x654   : > { %v1098_v37 = vpop.f32.mrf.mxu3 }
 0x655   : > { %v1114_v7 = vadd.f32 %v1873_v35, %v1098_v37 }
 0x657   : > { %v2645_v62 = vadd.f32 %v1803_v24, %v1114_v7 }
 0x659   : > { %v1137_v10 = vsel %vm355_vm1, %v2645_v62, 0.0 }
 0x65a   : > { %1138 = vadd.xlane.f32.xlu1 %v1137_v10 }
 0x65c   : > { %v1101_v11 = vpop.f32.mrf.mxu3 }
 0x65d   : > { %v1115_v48 = vadd.f32 %v1874_v36, %v1101_v11 }
 0x65f   : > { %v2650_v1 = vadd.f32 %v1803_v24, %v1115_v48 }
 0x661   : > { %v1140_v60 = vsel %vm355_vm1, %v2650_v1, 0.0 }
 0x662   : > { %1141 = vadd.xlane.f32.xlu0 %v1140_v60 }
 0x664   : > { %v1103_v14 = vpop.f32.mrf.mxu3 }
 0x665   : > { %v1116_v18 = vadd.f32 %v1875_v15, %v1103_v14 }
 0x667   : > { %v2655_v19 = vadd.f32 %v1803_v24, %v1116_v18 }
 0x669   : > { %v1143_v25 = vsel %vm355_vm1, %v2655_v19, 0.0 }
 0x66a   : > { %1144 = vadd.xlane.f32.xlu2 %v1143_v25 }
 0x66c   : > { %v1106_v32 = vpop.f32.mrf.mxu3 }
 0x66d   : > { %v1117_v28 = vadd.f32 %v1876_v58, %v1106_v32 }
 0x66f   : > { %v2660_v27 = vadd.f32 %v1803_v24, %v1117_v28 }
 0x671   : > { %v1146_v55 = vsel %vm355_vm1, %v2660_v27, 0.0 }
 0x672   : > { %1147 = vadd.xlane.f32.xlu2 %v1146_v55 }
 0x674   : > { %v1108_v20 = vpop.f32.mrf.mxu3 }
 0x675   : > { %v1118_v31 = vadd.f32 %v1877_v12, %v1108_v20 }
 0x677   : > { %v2673_v5 = vadd.f32 %v1803_v24, %v1118_v31 }
 0x679   : > { %v1149_v54 = vsel %vm355_vm1, %v2673_v5, 0.0 }
 0x6b5   : > { %v1130_v2 = vpop.xlane.xlu1 %1129 }
 0x6b6   : > { %v1152_v13 = vmul.f32 %v1130_v2, %v2036_v30 }
 0x6b8   : > { %v2666_v49 = vsub.f32 %v2630_v47, %v1152_v13 }
 0x6ba   : > { %v1168_v29 = vmul.f32 %v2666_v49, %v2666_v49 }
 0x6bc   : > { %v1176_v9 = vsel %vm355_vm1, %v1168_v29, 0.0 }
 0x6bd   : > { %v1133_v0 = vpop.xlane.xlu0 %1132  ;;  %1177 = vadd.xlane.f32.xlu1 %v1176_v9 }
 0x6be   : > { %v1153_v26 = vmul.f32 %v1133_v0, %v2036_v30  ;;  %v1718_v0 = vld [vmem:[%s1994_s10 + $0x10] sm:$0xf] }
 0x6c0   : > { %v2676_v34 = vsub.f32 %v2635_v41, %v1153_v26  ;;  %v1746_v26 = vld [vmem:[%s1994_s10 + $0x24] sm:$0xf0] }
 0x6c2   : > { %v1169_v8 = vmul.f32 %v2676_v34, %v2676_v34 }
 0x6c4   : > { %v1179_v17 = vsel %vm355_vm1, %v1169_v8, 0.0 }
 0x6c5   : > { %v1136_v40 = vpop.xlane.xlu2 %1135  ;;  %1180 = vadd.xlane.f32.xlu0 %v1179_v17  ;;  %1150 = vadd.xlane.f32.xlu1 %v1149_v54 }
 0x6c6   : > { %v1154_v42 = vmul.f32 %v1136_v40, %v2036_v30  ;;  %v1719_v40 = vor.u32 %v1746_v26, %v1718_v0 }
 0x6c8   : > { %v2685_v22 = vsub.f32 %v2640_v39, %v1154_v42  ;;  %1352 = vmatpush.bf16.msra.mxu0 %v1719_v40 }
 0x6ca   : > { %v1170_v16 = vmul.f32 %v2685_v22, %v2685_v22 }
 0x6cc   : > { %v1182_v43 = vsel %vm355_vm1, %v1170_v16, 0.0 }
 0x6cd   : > { %v1139_v50 = vpop.xlane.xlu1 %1138  ;;  %1183 = vadd.xlane.f32.xlu0 %v1182_v43 }
 0x6ce   : > { %v1155_v21 = vmul.f32 %v1139_v50, %v2036_v30  ;;  %v2732_v50 = vld [vmem:[%s2004_s16 + $0x5] ss:$0 sm:$0xff] }
 0x6d0   : > { %v2692_v33 = vsub.f32 %v2645_v62, %v1155_v21 }
 0x6d2   : > { %v1171_v44 = vmul.f32 %v2692_v33, %v2692_v33 }
 0x6d4   : > { %v1185_v45 = vsel %vm355_vm1, %v1171_v44, 0.0 }
 0x6d5   : > { %v1142_v46 = vpop.xlane.xlu0 %1141  ;;  %1186 = vadd.xlane.f32.xlu2 %v1185_v45 }
 0x6d6   : > { %v1156_v53 = vmul.f32 %v1142_v46, %v2036_v30 }
 0x6d8   : > { %v2699_v24 = vsub.f32 %v2650_v1, %v1156_v53 }
 0x6da   : > { %v1172_v51 = vmul.f32 %v2699_v24, %v2699_v24 }
 0x6dc   : > { %v1188_v52 = vsel %vm355_vm1, %v1172_v51, 0.0 }
 0x6dd   : > { %v1145_v23 = vpop.xlane.xlu2 %1144  ;;  %1189 = vadd.xlane.f32.xlu1 %v1188_v52  ;;  %v2736_v52 = vld [vmem:[%s2004_s16 + $0x6] ss:$0 sm:$0xff] }
 0x6de   : > { %v1157_v6 = vmul.f32 %v1145_v23, %v2036_v30 }
 0x6e0   : > { %v2706_v61 = vsub.f32 %v2655_v19, %v1157_v6 }
 0x6e2   : > { %v1173_v63 = vmul.f32 %v2706_v61, %v2706_v61 }
 0x6e4   : > { %v1191_v38 = vsel %vm355_vm1, %v1173_v63, 0.0 }
 0x6e5   : > { %1192 = vadd.xlane.f32.xlu0 %v1191_v38  ;;  %v1148_v57 = vpop.xlane.xlu2 %1147 }
 0x6e6   : > { %v1158_v59 = vmul.f32 %v1148_v57, %v2036_v30 }
 0x6e8   : > { %v2713_v4 = vsub.f32 %v2660_v27, %v1158_v59 }
 0x6ea   : > { %v1174_v3 = vmul.f32 %v2713_v4, %v2713_v4 }
 0x6ec   : > { %v1194_v56 = vsel %vm355_vm1, %v1174_v3, 0.0 }
 0x6ed   : > { %1195 = vadd.xlane.f32.xlu2 %v1194_v56 }
 0x730   : > { %v1178_v37 = vpop.xlane.xlu1 %1177 }
 0x731   : > { %v1200_v35 = vmul.f32 %v1178_v37, %v2036_v30 }
 0x733   : > { %v1208_v7 = vadd.f32 1e-05, %v1200_v35 }
 0x735   : > { %1838 = vrsqrt.f32 %v1208_v7  ;;  %vm1222_vm3 = vweird.f32 %v1208_v7 }
 0x738   : > { %v1181_v10 = vpop.xlane.xlu0 %1180  ;;  %v1151_v11 = vpop.xlane.xlu1 %1150 }
 0x739   : > { %v1201_v36 = vmul.f32 %v1181_v10, %v2036_v30  ;;  %v1159_v48 = vmul.f32 %v1151_v11, %v2036_v30 }
 0x73b   : > { %v1839_v60 = vpop.eup %1838  ;;  %v1209_v14 = vadd.f32 1e-05, %v1201_v36  ;;  %v2722_v15 = vsub.f32 %v2673_v5, %v1159_v48 }
 0x73c   : > { %v1217_v18 = vmul.f32 %v1839_v60, %v1208_v7  ;;  %vm1223_vm2 = vweird.f32 %v1839_v60 }
 0x73d   : > { %1840 = vrsqrt.f32 %v1209_v14  ;;  %v1175_v25 = vmul.f32 %v2722_v15, %v2722_v15  ;;  %vm1224_vm4 = vmor %vm1222_vm3, %vm1223_vm2  ;;  %vm1232_vm6 = vweird.f32 %v1209_v14 }
 0x73e   : > { %v1218_v32 = vmul.f32 %v1839_v60, %v1217_v18 }
 0x73f   : > { %v1197_v58 = vsel %vm355_vm1, %v1175_v25, 0.0 }
 0x740   : > { %v1219_v28 = vmul.f32 0.5, %v1218_v32  ;;  %v1184_v55 = vpop.xlane.xlu0 %1183  ;;  %1198 = vadd.xlane.f32.xlu1 %v1197_v58 }
 0x741   : > { %v1202_v2 = vmul.f32 %v1184_v55, %v2036_v30 }
 0x742   : > { %v1220_v13 = vsub.f32 1.5, %v1219_v28 }
 0x743   : > { %v1841_v20 = vpop.eup %1840  ;;  %v1210_v29 = vadd.f32 1e-05, %v1202_v2 }
 0x744   : > { %v1221_v12 = vmul.f32 %v1839_v60, %v1220_v13  ;;  %v1227_v31 = vmul.f32 %v1841_v20, %v1209_v14  ;;  %vm1233_vm5 = vweird.f32 %v1841_v20 }
 0x745   : > { %1842 = vrsqrt.f32 %v1210_v29  ;;  %vm1234_vm7 = vmor %vm1232_vm6, %vm1233_vm5  ;;  %vm1242_vm9 = vweird.f32 %v1210_v29 }
 0x746   : > { %v1228_v9 = vmul.f32 %v1841_v20, %v1227_v31  ;;  %v1225_v8 = vsel %vm1224_vm4, %v1839_v60, %v1221_v12 }
 0x747   : > { %v1296_v21 = vmul.f32 %v1225_v8, %v2666_v49 }
 0x748   : > { %v1229_v17 = vmul.f32 0.5, %v1228_v9  ;;  %v1187_v54 = vpop.xlane.xlu2 %1186 }
 0x749   : > { %v1203_v42 = vmul.f32 %v1187_v54, %v2036_v30  ;;  %v1305_v23 = vmul.f32 %v2732_v50, %v1296_v21 }
 0x74a   : > { %v1230_v16 = vsub.f32 1.5, %v1229_v17 }
 0x74b   : > { %v1843_v43 = vpop.eup %1842  ;;  %v1211_v44 = vadd.f32 1e-05, %v1203_v42  ;;  %v1314_v56 = vadd.f32 %v2736_v52, %v1305_v23 }
 0x74c   : > { %v1231_v45 = vmul.f32 %v1841_v20, %v1230_v16  ;;  %v1237_v46 = vmul.f32 %v1843_v43, %v1210_v29  ;;  %vm1243_vm8 = vweird.f32 %v1843_v43 }
 0x74d   : > { %1844 = vrsqrt.f32 %v1211_v44  ;;  %vm1244_vm10 = vmor %vm1242_vm9, %vm1243_vm8  ;;  %vm1252_vm12 = vweird.f32 %v1211_v44 }
 0x74e   : > { %v1235_v53 = vsel %vm1234_vm7, %v1841_v20, %v1231_v45  ;;  %v1238_v51 = vmul.f32 %v1843_v43, %v1237_v46 }
 0x74f   : > { %v1297_v6 = vmul.f32 %v1235_v53, %v2676_v34 }
 0x750   : > { %v1239_v63 = vmul.f32 0.5, %v1238_v51  ;;  %v1190_v38 = vpop.xlane.xlu1 %1189 }
 0x751   : > { %v1306_v57 = vmul.f32 %v2732_v50, %v1297_v6  ;;  %v1204_v49 = vmul.f32 %v1190_v38, %v2036_v30 }
 0x752   : > { %v1240_v59 = vsub.f32 1.5, %v1239_v63 }
 0x753   : > { %v1845_v3 = vpop.eup %1844  ;;  %v1315_v37 = vadd.f32 %v2736_v52, %v1306_v57  ;;  %v1212_v35 = vadd.f32 1e-05, %v1204_v49 }
 0x754   : > { %v1241_v7 = vmul.f32 %v1843_v43, %v1240_v59  ;;  %v1247_v10 = vmul.f32 %v1845_v3, %v1211_v44  ;;  %vm1253_vm11 = vweird.f32 %v1845_v3 }
 0x755   : > { %1846 = vrsqrt.f32 %v1212_v35  ;;  %v1322_v11 = vpack.c.bf16 %v1315_v37, %v1314_v56  ;;  %vm1254_vm13 = vmor %vm1252_vm12, %vm1253_vm11  ;;  %vm1262_vm15 = vweird.f32 %v1212_v35  ;;  %vm1462_vm11 = vcmask 261120  }
 0x756   : > { %v1248_v34 = vmul.f32 %v1845_v3, %v1247_v10  ;;  %v1245_v36 = vsel %vm1244_vm10, %v1843_v43, %v1241_v7 }
 0x757   : > { %1720 = vmatmul.msk.bf16.vlgmr.msra.gmra.mxu0 %vm355_vm1, %v1322_v11  ;;  %v1298_v32 = vmul.f32 %v1245_v36, %v2685_v22 }
 0x758   : > { %v1249_v48 = vmul.f32 0.5, %v1248_v34  ;;  %v1193_v60 = vpop.xlane.xlu0 %1192 }
 0x759   : > { %v1205_v14 = vmul.f32 %v1193_v60, %v2036_v30  ;;  %v1307_v29 = vmul.f32 %v2732_v50, %v1298_v32 }
 0x75a   : > { %v1250_v18 = vsub.f32 1.5, %v1249_v48 }
 0x75b   : > { %v1847_v25 = vpop.eup %1846  ;;  %v1213_v58 = vadd.f32 1e-05, %v1205_v14  ;;  %v1316_v26 = vadd.f32 %v2736_v52, %v1307_v29 }
 0x75c   : > { %v1251_v28 = vmul.f32 %v1845_v3, %v1250_v18  ;;  %v1257_v55 = vmul.f32 %v1847_v25, %v1212_v35  ;;  %vm1263_vm14 = vweird.f32 %v1847_v25 }
 0x75d   : > { %1848 = vrsqrt.f32 %v1213_v58  ;;  %vm1264_vm0 = vmor %vm1262_vm15, %vm1263_vm14  ;;  %vm1272_vm3 = vweird.f32 %v1213_v58 }
 0x75e   : > { %v1255_v2 = vsel %vm1254_vm13, %v1845_v3, %v1251_v28  ;;  %v1258_v13 = vmul.f32 %v1847_v25, %v1257_v55 }
 0x75f   : > { %v1299_v20 = vmul.f32 %v1255_v2, %v2692_v33 }
 0x760   : > { %v1259_v12 = vmul.f32 0.5, %v1258_v13  ;;  %v1196_v63 = vpop.xlane.xlu2 %1195  ;;  %v2769_v13 = vld [vmem:[%s2004_s16 + $0x9] ss:$0 sm:$0xff] }
 0x761   : > { %v1308_v31 = vmul.f32 %v2732_v50, %v1299_v20 }
 0x762   : > { %v1260_v9 = vsub.f32 1.5, %v1259_v12  ;;  %v1730_v12 = vld [vmem:[%s1999_s13 + $0x10] sm:$0xf] }
 0x763   : > { %v1849_v0 = vpop.eup %1848  ;;  %v1317_v22 = vadd.f32 %v2736_v52, %v1308_v31  ;;  %v1749_v31 = vld [vmem:[%s1999_s13 + $0x14] sm:$0xf0] }
 0x764   : > { %v1261_v8 = vmul.f32 %v1847_v25, %v1260_v9  ;;  %v1267_v17 = vmul.f32 %v1849_v0, %v1213_v58  ;;  %vm1273_vm2 = vweird.f32 %v1849_v0  ;;  %v1731_v9 = vor.u32 %v1749_v31, %v1730_v12 }
 0x765   : > { %v1323_v54 = vpack.c.bf16 %v1317_v22, %v1316_v26  ;;  %vm1274_vm4 = vmor %vm1272_vm3, %vm1273_vm2 }
 0x766   : > { %v1268_v40 = vmul.f32 %v1849_v0, %v1267_v17  ;;  %v1265_v33 = vsel %vm1264_vm0, %v1847_v25, %v1261_v8  ;;  %1481 = vmatpush.bf16.msrb.mxu1 %v1731_v9 }
 0x767   : > { %1721 = vmatmul.msk.bf16.gmra.mxu0 %vm355_vm1, %v1323_v54  ;;  %v1300_v43 = vmul.f32 %v1265_v33, %v2699_v24  ;;  %v1206_v24 = vmul.f32 %v1196_v63, %v2036_v30  ;;  %v1726_v54 = vld [vmem:[%s1999_s13] sm:$0xf] }
 0x768   : > { %v1269_v42 = vmul.f32 0.5, %v1268_v40  ;;  %v1748_v40 = vld [vmem:[%s1999_s13 + $0x4] sm:$0xf0] }
 0x769   : > { %v1309_v46 = vmul.f32 %v2732_v50, %v1300_v43  ;;  %v1214_v38 = vadd.f32 1e-05, %v1206_v24  ;;  %v1727_v33 = vor.u32 %v1748_v40, %v1726_v54 }
 0x76a   : > { %v1270_v16 = vsub.f32 1.5, %v1269_v42 }
 0x76b   : > { %v1318_v51 = vadd.f32 %v2736_v52, %v1309_v46  ;;  %1850 = vrsqrt.f32 %v1214_v38  ;;  %vm1282_vm6 = vweird.f32 %v1214_v38  ;;  %1482 = vmatpush.bf16.msrb.mxu1 %v1727_v33 }
 0x76c   : > { %v1271_v21 = vmul.f32 %v1849_v0, %v1270_v16 }
 0x76e   : > { %v1275_v44 = vsel %vm1274_vm4, %v1849_v0, %v1271_v21 }
 0x76f   : > { %v1301_v45 = vmul.f32 %v1275_v44, %v2706_v61 }
 0x771   : > { %v1310_v53 = vmul.f32 %v2732_v50, %v1301_v45  ;;  %v1851_v57 = vpop.eup %1850 }
 0x772   : > { %v1277_v49 = vmul.f32 %v1851_v57, %v1214_v38  ;;  %vm1283_vm5 = vweird.f32 %v1851_v57 }
 0x773   : > { %v1319_v23 = vadd.f32 %v2736_v52, %v1310_v53  ;;  %vm1284_vm7 = vmor %vm1282_vm6, %vm1283_vm5 }
 0x774   : > { %v1278_v59 = vmul.f32 %v1851_v57, %v1277_v49 }
 0x775   : > { %v1324_v6 = vpack.c.bf16 %v1319_v23, %v1318_v51 }
 0x776   : > { %v1279_v37 = vmul.f32 0.5, %v1278_v59 }
 0x777   : > { %1722 = vmatmul.msk.bf16.gmra.mxu0 %vm355_vm1, %v1324_v6 }
 0x778   : > { %v1280_v35 = vsub.f32 1.5, %v1279_v37 }
 0x77a   : > { %v1281_v10 = vmul.f32 %v1851_v57, %v1280_v35 }
 0x77c   : > { %v1285_v36 = vsel %vm1284_vm7, %v1851_v57, %v1281_v10 }
 0x77d   : > { %v1302_v14 = vmul.f32 %v1285_v36, %v2713_v4 }
 0x77f   : > { %v1311_v32 = vmul.f32 %v2732_v50, %v1302_v14 }
 0x781   : > { %v1320_v28 = vadd.f32 %v2736_v52, %v1311_v32 }
 0x7b3   : > { %v1199_v61 = vpop.xlane.xlu1 %1198 }
 0x7b4   : > { %v1207_v3 = vmul.f32 %v1199_v61, %v2036_v30 }
 0x7b6   : > { %v1215_v56 = vadd.f32 1e-05, %v1207_v3 }
 0x7b8   : > { %1852 = vrsqrt.f32 %v1215_v56  ;;  %vm1292_vm9 = vweird.f32 %v1215_v56 }
 0x7be   : > { %v1853_v7 = vpop.eup %1852 }
 0x7bf   : > { %v1287_v11 = vmul.f32 %v1853_v7, %v1215_v56  ;;  %vm1293_vm8 = vweird.f32 %v1853_v7 }
 0x7c0   : > { %vm1294_vm10 = vmor %vm1292_vm9, %vm1293_vm8 }
 0x7c1   : > { %v1288_v34 = vmul.f32 %v1853_v7, %v1287_v11 }
 0x7c3   : > { %v1289_v48 = vmul.f32 0.5, %v1288_v34 }
 0x7c5   : > { %v1290_v60 = vsub.f32 1.5, %v1289_v48 }
 0x7c7   : > { %v1291_v18 = vmul.f32 %v1853_v7, %v1290_v60 }
 0x7c9   : > { %v1295_v30 = vsel %vm1294_vm10, %v1853_v7, %v1291_v18 }
 0x7ca   : > { %v1303_v25 = vmul.f32 %v1295_v30, %v2722_v15 }
 0x7cc   : > { %v1312_v58 = vmul.f32 %v2732_v50, %v1303_v25 }
 0x7ce   : > { %v1321_v55 = vadd.f32 %v2736_v52, %v1312_v58 }
 0x7d0   : > { %v1325_v2 = vpack.c.bf16 %v1321_v55, %v1320_v28 }
 0x7d2   : > { %1723 = vmatmul.msk.bf16.gmra.mxu0 %vm355_vm1, %v1325_v2 }
 0x7d4   : > { %v1354_v4 = vpop.f32.mrf.mxu0 }
 0x7d5   : > { %v1355_v20 = vadd.f32 %v2769_v13, %v1354_v4 }
 0x7d7   : > { %v1374_v29 = vmul.f32 %v1355_v20, %v1355_v20 }
 0x7d9   : > { %v1382_v15 = vmul.f32 %v1374_v29, %v1355_v20 }
 0x7db   : > { %v1390_v50 = vmul.f32 0.044715, %v1382_v15 }
 0x7dc   : > { %v1356_v0 = vpop.f32.mrf.mxu0 }
 0x7dd   : > { %v1398_v26 = vadd.f32 %v1390_v50, %v1355_v20  ;;  %v1357_v52 = vadd.f32 %v2769_v13, %v1356_v0 }
 0x7df   : > { %v1406_v22 = vmul.f32 0.7978846, %v1398_v26  ;;  %v1375_v8 = vmul.f32 %v1357_v52, %v1357_v52 }
 0x7e1   : > { %v1383_v17 = vmul.f32 %v1375_v8, %v1357_v52  ;;  %1854 = vtanh.f32 %v1406_v22 }
 0x7e3   : > { %v1391_v42 = vmul.f32 0.044715, %v1383_v17 }
 0x7e4   : > { %v1359_v16 = vpop.f32.mrf.mxu0 }
 0x7e5   : > { %v1399_v43 = vadd.f32 %v1391_v42, %v1357_v52  ;;  %v1360_v21 = vadd.f32 %v2769_v13, %v1359_v16 }
 0x7e7   : > { %v1407_v44 = vmul.f32 0.7978846, %v1399_v43  ;;  %v1376_v45 = vmul.f32 %v1360_v21, %v1360_v21  ;;  %v1855_v46 = vpop.eup %1854 }
 0x7e8   : > { %v1422_v23 = vadd.f32 1.0, %v1855_v46 }
 0x7e9   : > { %1856 = vtanh.f32 %v1407_v44  ;;  %v1384_v53 = vmul.f32 %v1376_v45, %v1360_v21 }
 0x7ea   : > { %v1430_v59 = vmul.f32 0.5, %v1422_v23 }
 0x7eb   : > { %v1392_v51 = vmul.f32 0.044715, %v1384_v53 }
 0x7ec   : > { %v1361_v6 = vpop.f32.mrf.mxu0  ;;  %v1438_v35 = vmul.f32 %v1430_v59, %v1355_v20 }
 0x7ed   : > { %v1400_v63 = vadd.f32 %v1392_v51, %v1360_v21  ;;  %v1362_v24 = vadd.f32 %v2769_v13, %v1361_v6 }
 0x7ef   : > { %v1857_v38 = vpop.eup %1856  ;;  %v1408_v57 = vmul.f32 0.7978846, %v1400_v63  ;;  %v1377_v49 = vmul.f32 %v1362_v24, %v1362_v24 }
 0x7f0   : > { %v1423_v61 = vadd.f32 1.0, %v1857_v38 }
 0x7f1   : > { %v1385_v3 = vmul.f32 %v1377_v49, %v1362_v24  ;;  %1858 = vtanh.f32 %v1408_v57 }
 0x7f2   : > { %v1431_v56 = vmul.f32 0.5, %v1423_v61 }
 0x7f3   : > { %v1393_v37 = vmul.f32 0.044715, %v1385_v3 }
 0x7f4   : > { %v1439_v7 = vmul.f32 %v1431_v56, %v1357_v52  ;;  %v1364_v10 = vpop.f32.mrf.mxu0 }
 0x7f5   : > { %v1401_v11 = vadd.f32 %v1393_v37, %v1362_v24  ;;  %v1365_v34 = vadd.f32 %v2769_v13, %v1364_v10 }
 0x7f6   : > { %v1446_v36 = vpack.c.bf16 %v1439_v7, %v1438_v35 }
 0x7f7   : > { %v1409_v48 = vmul.f32 0.7978846, %v1401_v11  ;;  %v1378_v60 = vmul.f32 %v1365_v34, %v1365_v34  ;;  %v1859_v14 = vpop.eup %1858 }
 0x7f8   : > { %1732 = vmatmul.msk.bf16.vlgmr.msrb.gmra.mxu1 %vm1462_vm11, %v1446_v36  ;;  %v1424_v32 = vadd.f32 1.0, %v1859_v14 }
 0x7f9   : > { %1860 = vtanh.f32 %v1409_v48  ;;  %v1386_v18 = vmul.f32 %v1378_v60, %v1365_v34 }
 0x7fa   : > { %v1432_v29 = vmul.f32 0.5, %v1424_v32 }
 0x7fb   : > { %v1394_v30 = vmul.f32 0.044715, %v1386_v18 }
 0x7fc   : > { %v1366_v25 = vpop.f32.mrf.mxu0  ;;  %v1440_v9 = vmul.f32 %v1432_v29, %v1360_v21 }
 0x7fd   : > { %v1402_v58 = vadd.f32 %v1394_v30, %v1365_v34  ;;  %v1367_v28 = vadd.f32 %v2769_v13, %v1366_v25 }
 0x7ff   : > { %v1861_v55 = vpop.eup %1860  ;;  %v1410_v2 = vmul.f32 0.7978846, %v1402_v58  ;;  %v1379_v4 = vmul.f32 %v1367_v28, %v1367_v28 }
 0x800   : > { %v1425_v20 = vadd.f32 1.0, %v1861_v55 }
 0x801   : > { %v1387_v15 = vmul.f32 %v1379_v4, %v1367_v28  ;;  %1862 = vtanh.f32 %v1410_v2 }
 0x802   : > { %v1433_v12 = vmul.f32 0.5, %v1425_v20 }
 0x803   : > { %v1395_v31 = vmul.f32 0.044715, %v1387_v15 }
 0x804   : > { %v1441_v50 = vmul.f32 %v1433_v12, %v1362_v24 }
 0x805   : > { %v1403_v0 = vadd.f32 %v1395_v31, %v1367_v28 }
 0x806   : > { %v1447_v26 = vpack.c.bf16 %v1441_v50, %v1440_v9 }
 0x807   : > { %v1411_v52 = vmul.f32 0.7978846, %v1403_v0  ;;  %v1863_v22 = vpop.eup %1862 }
 0x808   : > { %1733 = vmatmul.msk.bf16.gmra.mxu1 %vm1462_vm11, %v1447_v26  ;;  %v1426_v8 = vadd.f32 1.0, %v1863_v22 }
 0x809   : > { %1864 = vtanh.f32 %v1411_v52 }
 0x80a   : > { %v1434_v40 = vmul.f32 0.5, %v1426_v8 }
 0x80c   : > { %v1442_v42 = vmul.f32 %v1434_v40, %v1365_v34  ;;  %v1807_v34 = vld [vmem:[%s2004_s16 + $0x7] ss:$0 sm:$0xff] }
 0x80f   : > { %v1865_v17 = vpop.eup %1864 }
 0x810   : > { %v1427_v54 = vadd.f32 1.0, %v1865_v17 }
 0x812   : > { %v1435_v33 = vmul.f32 0.5, %v1427_v54 }
 0x814   : > { %v1443_v16 = vmul.f32 %v1435_v33, %v1367_v28 }
 0x816   : > { %v1448_v43 = vpack.c.bf16 %v1443_v16, %v1442_v42 }
 0x818   : > { %1734 = vmatmul.msk.bf16.gmra.mxu1 %vm1462_vm11, %v1448_v43 }
 0x84f   : > { %v1369_v44 = vpop.f32.mrf.mxu0 }
 0x850   : > { %v1370_v21 = vadd.f32 %v2769_v13, %v1369_v44 }
 0x852   : > { %v1380_v45 = vmul.f32 %v1370_v21, %v1370_v21 }
 0x854   : > { %v1388_v46 = vmul.f32 %v1380_v45, %v1370_v21 }
 0x856   : > { %v1396_v53 = vmul.f32 0.044715, %v1388_v46 }
 0x857   : > { %v1371_v51 = vpop.f32.mrf.mxu0 }
 0x858   : > { %v1404_v23 = vadd.f32 %v1396_v53, %v1370_v21  ;;  %v1372_v6 = vadd.f32 %v2769_v13, %v1371_v51 }
 0x85a   : > { %v1412_v63 = vmul.f32 0.7978846, %v1404_v23  ;;  %v1381_v24 = vmul.f32 %v1372_v6, %v1372_v6 }
 0x85c   : > { %v1389_v38 = vmul.f32 %v1381_v24, %v1372_v6  ;;  %1866 = vtanh.f32 %v1412_v63 }
 0x85e   : > { %v1397_v57 = vmul.f32 0.044715, %v1389_v38 }
 0x860   : > { %v1405_v49 = vadd.f32 %v1397_v57, %v1372_v6 }
 0x862   : > { %v1413_v59 = vmul.f32 0.7978846, %v1405_v49  ;;  %v1867_v61 = vpop.eup %1866 }
 0x863   : > { %v1428_v3 = vadd.f32 1.0, %v1867_v61 }
 0x864   : > { %1868 = vtanh.f32 %v1413_v59 }
 0x865   : > { %v1436_v35 = vmul.f32 0.5, %v1428_v3 }
 0x867   : > { %v1444_v10 = vmul.f32 %v1436_v35, %v1370_v21 }
 0x86a   : > { %v1869_v56 = vpop.eup %1868 }
 0x86b   : > { %v1429_v37 = vadd.f32 1.0, %v1869_v56 }
 0x86d   : > { %v1437_v7 = vmul.f32 0.5, %v1429_v37 }
 0x86f   : > { %v1445_v13 = vmul.f32 %v1437_v7, %v1372_v6 }
 0x871   : > { %v1449_v11 = vpack.c.bf16 %v1445_v13, %v1444_v10 }
 0x873   : > { %1735 = vmatmul.msk.bf16.gmra.mxu1 %vm1462_vm11, %v1449_v11 }
 0x875   : > { %v1484_v36 = vpop.f32.mrf.mxu1 }
 0x876   : > { %v1504_v48 = vadd.f32 %v1484_v36, %v2630_v47 }
 0x878   : > { %v1513_v60 = vadd.f32 %v1807_v34, %v1504_v48 }
 0x87a   : > { %1521 = vst.msk [vmem:[%s2009_s27] sm:$0xff] %vm355_vm1, %v1513_v60 }
 0x87d   : > { %v1486_v14 = vpop.f32.mrf.mxu1 }
 0x87e   : > { %v1505_v18 = vadd.f32 %v1486_v14, %v2635_v41 }
 0x880   : > { %v1514_v30 = vadd.f32 %v1807_v34, %v1505_v18 }
 0x882   : > { %1522 = vst.msk [vmem:[%s2009_s27 + $0x8] sm:$0xff] %vm355_vm1, %v1514_v30 }
 0x885   : > { %v1489_v25 = vpop.f32.mrf.mxu1 }
 0x886   : > { %v1506_v32 = vadd.f32 %v1489_v25, %v2640_v39 }
 0x888   : > { %v1515_v58 = vadd.f32 %v1807_v34, %v1506_v32 }
 0x88a   : > { %1523 = vst.msk [vmem:[%s2009_s27 + $0x10] sm:$0xff] %vm355_vm1, %v1515_v58 }
 0x88d   : > { %v1491_v28 = vpop.f32.mrf.mxu1 }
 0x88e   : > { %v1507_v47 = vadd.f32 %v1491_v28, %v2645_v62 }
 0x890   : > { %v1516_v55 = vadd.f32 %v1807_v34, %v1507_v47 }
 0x892   : > { %1524 = vst.msk [vmem:[%s2009_s27 + $0x18] sm:$0xff] %vm355_vm1, %v1516_v55 }
 0x895   : > { %v1494_v2 = vpop.f32.mrf.mxu1 }
 0x896   : > { %v1508_v41 = vadd.f32 %v1494_v2, %v2650_v1 }
 0x898   : > { %v1517_v4 = vadd.f32 %v1807_v34, %v1508_v41 }
 0x89a   : > { %1525 = vst.msk [vmem:[%s2009_s27 + $0x20] sm:$0xff] %vm355_vm1, %v1517_v4 }
 0x89d   : > { %v1496_v20 = vpop.f32.mrf.mxu1 }
 0x89e   : > { %v1509_v39 = vadd.f32 %v1496_v20, %v2655_v19 }
 0x8a0   : > { %v1518_v29 = vadd.f32 %v1807_v34, %v1509_v39 }
 0x8a2   : > { %1526 = vst.msk [vmem:[%s2009_s27 + $0x28] sm:$0xff] %vm355_vm1, %v1518_v29 }
 0x8f0   : > { %v1499_v15 = vpop.f32.mrf.mxu1 }
 0x8f1   : > { %v1510_v12 = vadd.f32 %v1499_v15, %v2660_v27 }
 0x8f3   : > { %v1519_v62 = vadd.f32 %v1807_v34, %v1510_v12 }
 0x8f5   : > { %1527 = vst.msk [vmem:[%s2009_s27 + $0x30] sm:$0xff] %vm355_vm1, %v1519_v62 }
 0x8f8   : > { %v1501_v31 = vpop.f32.mrf.mxu1 }
 0x8f9   : > { %v1511_v9 = vadd.f32 %v1501_v31, %v2673_v5 }
 0x8fb   : > { %v1520_v50 = vadd.f32 %v1807_v34, %v1511_v9 }
 0x8fd   : > { %1528 = vst.msk [vmem:[%s2009_s27 + $0x38] sm:$0xff] %vm355_vm1, %v1520_v50 }
 0x8fe PF: > { %s15_s22 = sadd.s32 1, %s1916_s22   ;;  %s2840_s18 = smov %s1908_s20 }
 0x8ff   : > { %p12_p8 = scmp.ge.s32.totalorder %s15_s22, 6   ;;  %s2841_s19 = smov %s1912_s21 }
 0x900   : > { %s2842_s20 = smov %s2845_s23  ;;  %s2843_s21 = smov %s2849_s24 }
 0x901   :  { %14 = sbr.rel (!%p12_p8) target bundleno = 3 (0x3), region = 87 }

// kernel: cyclemlp_forward.11
= control target key start
LH: loop header
LB: loop body
LE: loop exit
PB: predicated region body
PF: predicated region fallthrough
CT: control target
= control target key end

     0   :  { %s1259_s18 = smov 0   ;;  %s1261_s19 = smov 0   ;;  %s1498_s0 = inlined_call_operand.vmem [shape: f32[2,16,32], index: 0, kind: input, shape index: {}]   ;;  %s1499_s1 = inlined_call_operand.vmem [shape: f32[5,16,32], index: 1, kind: input, shape index: {}]   ;;  %s1500_s2 = inlined_call_operand.vmem [shape: bf16[2,32,768], index: 2, kind: input, shape index: {}]   ;;  %s1501_s3 = inlined_call_operand.vmem [shape: bf16[2,64,256], index: 3, kind: input, shape index: {}]   ;;  %s1502_s4 = inlined_call_operand.vmem [shape: f32[2,11,96], index: 4, kind: input, shape index: {}]   ;;  %s1503_s5 = inlined_call_operand.vmem [shape: f32[2,16,32], index: 5, kind: output, shape index: {}]  }
   0x1   :  { %s1263_s20 = smov 0   ;;  %s1265_s21 = smov 0  }
   0x2   :  { %s1267_s22 = smov 0  }
   0x3 LB: > { %s24_s23 = sadd.s32 1, %s1214_s20  ;;  %s27_s24 = sadd.s32 1, %s1218_s21  ;;  %s1222_s22 = sphi %s1267_s22, %s15_s22   ;;  %s1218_s21 = sphi %s1265_s21, %s1507_s21   ;;  %s1214_s20 = sphi %s1263_s20, %s1506_s20   ;;  %s1210_s19 = sphi %s1261_s19, %s1505_s19   ;;  %s1206_s18 = sphi %s1259_s18, %s1504_s18  }
   0x4   : > { %p25_p0 = scmp.ge.s32.totalorder %s24_s23, 2  ;;  %p990_p1 = scmp.ge.s32.totalorder %s1222_s22, 1 }
   0x5   : > { %p229_p2 = scmp.lt.s32.totalorder %s1222_s22, 5 }
   0x6   : > { %s1509_s23 = smov (%p25_p0, %s24_s23), 0  ;;  %s1511_s24 = smov (!%p25_p0, %s27_s24), %s1218_s21 }
   0x7   : > { %p230_p3 = pnand %p990_p1, %p229_p2  ;;  %p29_p4 = scmp.ge.s32.totalorder %s1511_s24, 2 }
   0x8   : > { %p272_p5 = scmp.lt.s32.totalorder (!%p230_p3), %s1210_s19, 1  ;;  %p277_p6 = scmp.lt.s32.totalorder (!%p230_p3), %s1206_s18, 1 }
   0x9   : > { %s1513_s24 = smov (%p29_p4, %s1511_s24), 0  ;;  %233 = sbr.rel (%p230_p3) target bundleno = 2060 (0x80c), region = 40 }
   0xa   : > { %p1000_p7 = scmp.ne.s32.totalorder (!%p230_p3), %s1206_s18, 0 }
   0xe   : > { %s1515_s19 = smov (!%p272_p5, %s1210_s19), 1 }
   0xf   : > { %s278_s25 = scalar_select %p277_p6, %s1206_s18, 1 }
  0x10   : > { %s1083_s26 = sshll.u32 %s1515_s19, 4  ;;  %301 = sbr.rel (%p1000_p7) target bundleno = 24 (0x18), region = 44 }
  0x11   : > { %s276_s29 = scalar_lea.vmem %s1498_s0, %s1083_s26  ;;  %s1103_s30 = smul.u32 96, %s278_s25 }
  0x12   : > { %s1084_s6 = sshll.u32 %s278_s25, 6  ;;  %s1085_s7 = sshll.u32 %s278_s25, 4 }
  0x13   : > { %s1299_s10 = scalar_lea.vmem %s1500_s2, %s1103_s30  ;;  %s1304_s13 = scalar_lea.vmem %s1501_s3, %s1084_s6 }
  0x14   : > { %s1309_s16 = scalar_lea.vmem %s1502_s4, %s1085_s7  ;;  %s1314_s27 = scalar_lea.vmem %s1503_s5, %s1083_s26 }
  0x15   : > { %v302_v0 = vld [vmem:[%s276_s29] sm:$0xff]  ;;  %vm304_vm0 = vcmask 261120   ;;  %v303_v1 = vld [vmem:[%s276_s29 + $0x8] sm:$0xff] }
  0x16   : > { %305 = vst.msk [vmem:[%s1314_s27] sm:$0xff] %vm304_vm0, %v302_v0 }
  0x17   : > { %306 = vst.msk [vmem:[%s1314_s27 + $0x8] sm:$0xff] %vm304_vm0, %v303_v1 }
  0x18 PF: > { %vm353_vm1 = vcmask 261120   ;;  %v1224_v6 = vmov 32.0   ;;  %v1033_v23 = vld [vmem:[%s1299_s10 + $0x38] sm:$0xf]  ;;  %v1092_v24 = vld [vmem:[%s1299_s10 + $0x4c] sm:$0xf0]  ;;  %v418_v0 = vlaneseq }
  0x19   : > { %1158 = vrcp.f32 %v1224_v6  ;;  %v1034_v25 = vor.u32 %v1092_v24, %v1033_v23  ;;  %v1029_v28 = vld [vmem:[%s1299_s10 + $0x8] sm:$0xf]  ;;  %v1091_v29 = vld [vmem:[%s1299_s10 + $0x1c] sm:$0xf0]  ;;  %v1015_v32 = vld [vmem:[%s1299_s10 + $0x30] sm:$0xf] }
  0x1a   : > { %v1030_v30 = vor.u32 %v1091_v29, %v1029_v28  ;;  %v1088_v33 = vld [vmem:[%s1299_s10 + $0x44] sm:$0xf0]  ;;  %v1024_v34 = vld [vmem:[%s1299_s10 + $0x34] sm:$0xf]  ;;  %v1090_v36 = vld [vmem:[%s1299_s10 + $0x48] sm:$0xf0] }
  0x1b   : > { %544 = vmatpush.bf16.msra.mxu2 %v1034_v25  ;;  %v1016_v35 = vor.u32 %v1088_v33, %v1015_v32  ;;  %v1011_v37 = vld [vmem:[%s1299_s10] sm:$0xf]  ;;  %v1087_v38 = vld [vmem:[%s1299_s10 + $0x14] sm:$0xf0]  ;;  %v1025_v40 = vor.u32 %v1090_v36, %v1024_v34  ;;  %v1020_v41 = vld [vmem:[%s1299_s10 + $0x4] sm:$0xf] }
  0x1c   : > { %v1089_v42 = vld [vmem:[%s1299_s10 + $0x18] sm:$0xf0]  ;;  %v1012_v44 = vor.u32 %v1087_v38, %v1011_v37  ;;  %v1149_v57 = vld [vmem:[%s1309_s16] ss:$0 sm:$0xff]  ;;  %v1150_v61 = vld [vmem:[%s1309_s16 + $0x1] ss:$0 sm:$0xff] }
  0x1d   : > { %v1320_v2 = vld [vmem:[%s1314_s27] sm:$0xff]  ;;  %483 = vmatpush.bf16.msra.mxu0 %v1016_v35  ;;  %514 = vmatpush.bf16.msra.mxu1 %v1025_v40  ;;  %v1021_v45 = vor.u32 %v1089_v42, %v1020_v41  ;;  %v419_v6 = vshrl.u32 %v418_v0, 7  ;;  %v1006_v28 = vld [vmem:[%s1499_s1 + $0x28] sm:$0xff]  ;;  %v1007_v33 = vld [vmem:[%s1499_s1 + $0x30] sm:$0xff]  ;;  %v1225_v0 = vmov 16.0   ;;  %vm616_vm13 = vcmask 1043456  }
  0x1e   : > { %v354_v3 = vsel %vm353_vm1, %v1320_v2, 0.0  ;;  %v1325_v4 = vld [vmem:[%s1314_s27 + $0x8] sm:$0xff]  ;;  %v1008_v34 = vld [vmem:[%s1499_s1 + $0x38] sm:$0xff]  ;;  %vm612_vm14 = vcmask 64512   ;;  %s1226_s29 = smov 96   ;;  %s1227_s30 = smov 64  }
  0x1f   : > { %355 = vadd.xlane.f32.xlu0 %v354_v3  ;;  %v357_v5 = vsel %vm353_vm1, %v1325_v4, 0.0  ;;  %v1159_v7 = vpop.eup %1158  ;;  %545 = vmatpush.bf16.msra.mxu2 %v1030_v30  ;;  %vm420_vm9 = vcmp.lt.s32.totalorder %v419_v6, 7  ;;  %vm431_vm10 = vcmp.lt.s32.totalorder %v419_v6, 1  ;;  %vm443_vm11 = vcmp.lt.s32.totalorder %v419_v6, 4  ;;  %s1228_s6 = smov 32  }
  0x20   : > { %v361_v8 = vmul.f32 32.0, %v1159_v7  ;;  %vm365_vm2 = vweird.f32 %v1159_v7 }
  0x21   : > { %484 = vmatpush.bf16.msra.mxu0 %v1012_v44  ;;  %515 = vmatpush.bf16.msra.mxu1 %v1021_v45 }
  0x22   : > { %v362_v9 = vsub.f32 1.0, %v361_v8 }
  0x24   : > { %v363_v10 = vmul.f32 %v1159_v7, %v362_v9  ;;  %v1001_v9 = vld [vmem:[%s1499_s1 + $0x40] sm:$0xff] }
  0x26   : > { %v364_v11 = vadd.f32 %v1159_v7, %v363_v10 }
  0x27   : > { %358 = vadd.xlane.f32.xlu0 %v357_v5 }
  0x28   : > { %v1329_v12 = vsel %vm365_vm2, %v1159_v7, %v364_v11 }
  0x92   : > { %v356_v13 = vpop.xlane.xlu0 %355 }
  0x93   : > { %v367_v14 = vmul.f32 %v1329_v12, %v356_v13  ;;  %v1002_v13 = vld [vmem:[%s1499_s1 + $0x48] sm:$0xff] }
  0x95   : > { %v369_v15 = vsub.f32 %v1320_v2, %v367_v14 }
  0x97   : > { %v371_v16 = vmul.f32 %v369_v15, %v369_v15 }
  0x99   : > { %v373_v17 = vsel %vm353_vm1, %v371_v16, 0.0  ;;  %v424_v16 = vld [vmem:[%s1499_s1 + $0x8] sm:$0xff] }
  0x9a   : > { %374 = vadd.xlane.f32.xlu1 %v373_v17  ;;  %v359_v18 = vpop.xlane.xlu0 %358 }
  0x9b   : > { %v368_v19 = vmul.f32 %v1329_v12, %v359_v18 }
  0x9d   : > { %v370_v20 = vsub.f32 %v1325_v4, %v368_v19  ;;  %v1003_v19 = vld [vmem:[%s1499_s1 + $0x10] sm:$0xff] }
  0x9f   : > { %v372_v21 = vmul.f32 %v370_v20, %v370_v20 }
  0xa1   : > { %v376_v22 = vsel %vm353_vm1, %v372_v21, 0.0 }
  0xa2   : > { %377 = vadd.xlane.f32.xlu1 %v376_v22 }
 0x10d   : > { %v375_v26 = vpop.xlane.xlu1 %374 }
 0x10e   : > { %v379_v27 = vmul.f32 %v375_v26, %v1329_v12 }
 0x110   : > { %v381_v31 = vadd.f32 1e-05, %v379_v27  ;;  %v1005_v27 = vld [vmem:[%s1499_s1 + $0x20] sm:$0xff] }
 0x112   : > { %1160 = vrsqrt.f32 %v381_v31  ;;  %vm389_vm4 = vweird.f32 %v381_v31 }
 0x115   : > { %v378_v39 = vpop.xlane.xlu1 %377 }
 0x116   : > { %v380_v43 = vmul.f32 %v378_v39, %v1329_v12 }
 0x118   : > { %v1161_v46 = vpop.eup %1160  ;;  %v382_v47 = vadd.f32 1e-05, %v380_v43 }
 0x119   : > { %v384_v48 = vmul.f32 %v1161_v46, %v381_v31  ;;  %vm390_vm3 = vweird.f32 %v1161_v46 }
 0x11a   : > { %1162 = vrsqrt.f32 %v382_v47  ;;  %vm391_vm5 = vmor %vm389_vm4, %vm390_vm3  ;;  %vm399_vm7 = vweird.f32 %v382_v47 }
 0x11b   : > { %v385_v49 = vmul.f32 %v1161_v46, %v384_v48  ;;  %1164 = vrcp.f32 %v1225_v0 }
 0x11d   : > { %v386_v50 = vmul.f32 0.5, %v385_v49 }
 0x11f   : > { %v387_v51 = vsub.f32 1.5, %v386_v50 }
 0x120   : > { %v1163_v52 = vpop.eup %1162 }
 0x121   : > { %v388_v53 = vmul.f32 %v1161_v46, %v387_v51  ;;  %v394_v54 = vmul.f32 %v1163_v52, %v382_v47  ;;  %vm400_vm6 = vweird.f32 %v1163_v52 }
 0x122   : > { %vm401_vm8 = vmor %vm399_vm7, %vm400_vm6  ;;  %vm859_vm6 = vcmask 523264  }
 0x123   : > { %v392_v55 = vsel %vm391_vm5, %v1161_v46, %v388_v53  ;;  %v395_v56 = vmul.f32 %v1163_v52, %v394_v54  ;;  %v1042_v53 = vld [vmem:[%s1299_s10 + $0x44] sm:$0xf]  ;;  %v1098_v54 = vld [vmem:[%s1299_s10 + $0x58] sm:$0xf0] }
 0x124   : > { %v403_v58 = vmul.f32 %v392_v55, %v369_v15  ;;  %v423_v15 = vld [vmem:[%s1499_s1] sm:$0xff]  ;;  %v1038_v55 = vld [vmem:[%s1299_s10 + $0x14] sm:$0xf] }
 0x125   : > { %v396_v59 = vmul.f32 0.5, %v395_v56  ;;  %v1043_v56 = vor.u32 %v1098_v54, %v1042_v53 }
 0x126   : > { %v406_v62 = vmul.f32 %v1149_v57, %v403_v58 }
 0x127   : > { %v397_v60 = vsub.f32 1.5, %v396_v59  ;;  %595 = vmatpush.bf16.msra.mxu3 %v1043_v56 }
 0x128   : > { %v409_v5 = vadd.f32 %v1150_v61, %v406_v62 }
 0x129   : > { %v398_v63 = vmul.f32 %v1163_v52, %v397_v60  ;;  %v1151_v60 = vld [vmem:[%s1309_s16 + $0x2] ss:$0 sm:$0xff] }
 0x12a   : > { %v416_v10 = vrot.slane %v409_v5, 1  ;;  %v429_v17 = vrot.slane %v409_v5, 7  ;;  %v441_v21 = vrot.slane %v409_v5, 4  ;;  %v414_v29 = vmul.f32 %v1001_v9, %v409_v5 }
 0x12b   : > { %v402_v1 = vsel %vm401_vm8, %v1163_v52, %v398_v63 }
 0x12c   : > { %v404_v3 = vmul.f32 %v402_v1, %v370_v20  ;;  %v1004_v20 = vld [vmem:[%s1499_s1 + $0x18] sm:$0xff] }
 0x12e   : > { %v407_v7 = vmul.f32 %v1149_v57, %v404_v3  ;;  %v1097_v57 = vld [vmem:[%s1299_s10 + $0x28] sm:$0xf0] }
 0x12f   : > { %v1039_v58 = vor.u32 %v1097_v57, %v1038_v55 }
 0x130   : > { %v410_v8 = vadd.f32 %v1150_v61, %v407_v7  ;;  %v1152_v61 = vld [vmem:[%s1309_s16 + $0x3] ss:$0 sm:$0xff] }
 0x131   : > { %596 = vmatpush.bf16.msra.mxu3 %v1039_v58 }
 0x132   : > { %v522_v11 = vpack.c.bf16 %v410_v8, %v409_v5  ;;  %v417_v14 = vrot.slane %v410_v8, 1  ;;  %v430_v18 = vrot.slane %v410_v8, 7  ;;  %v442_v22 = vrot.slane %v410_v8, 4 }
 0x133   : > { %v415_v30 = vmul.f32 %v1002_v13, %v410_v8  ;;  %v1165_v8 = vpop.eup %1164 }
 0x134   : > { %1035 = vmatmul.msk.bf16.vlgmr.msra.gmra.mxu2 %vm353_vm1, %v522_v11  ;;  %v421_v23 = vsel %vm420_vm9, %v416_v10, %v417_v14  ;;  %v422_v24 = vsel %vm420_vm9, %v417_v14, %v416_v10  ;;  %v432_v25 = vsel %vm431_vm10, %v429_v17, %v430_v18  ;;  %v433_v26 = vsel %vm431_vm10, %v430_v18, %v429_v17 }
 0x135   : > { %v425_v31 = vmul.f32 %v423_v15, %v421_v23  ;;  %v426_v32 = vmul.f32 %v424_v16, %v422_v24  ;;  %v437_v35 = vmul.f32 %v1003_v19, %v433_v26  ;;  %v438_v36 = vmul.f32 %v1004_v20, %v432_v25 }
 0x136   : > { %v444_v37 = vsel %vm443_vm11, %v441_v21, %v442_v22  ;;  %v445_v38 = vsel %vm443_vm11, %v442_v22, %v441_v21  ;;  %v566_v14 = vmul.f32 16.0, %v1165_v8  ;;  %vm570_vm12 = vweird.f32 %v1165_v8 }
 0x137   : > { %v427_v39 = vadd.f32 %v425_v31, %v414_v29  ;;  %v428_v40 = vadd.f32 %v426_v32, %v415_v30  ;;  %v449_v41 = vmul.f32 %v1005_v27, %v444_v37  ;;  %v450_v42 = vmul.f32 %v1006_v28, %v445_v38  ;;  %v341_v32 = vld [vmem:[%s1304_s13 + $0x4] sm:$0xf] }
 0x138   : > { %v456_v43 = vmul.f32 %v1007_v33, %v445_v38  ;;  %v457_v44 = vmul.f32 %v1008_v34, %v444_v37  ;;  %v567_v19 = vsub.f32 1.0, %v566_v14  ;;  %v618_v33 = vsel %vm616_vm13, %v341_v32, 0  ;;  %v350_v34 = vld [vmem:[%s1309_s16 + $0x8] sm:$0x1] }
 0x139   : > { %v439_v45 = vadd.f32 %v437_v35, %v427_v39  ;;  %v440_v46 = vadd.f32 %v438_v36, %v428_v40  ;;  %v451_v47 = vadd.f32 %v449_v41, %v414_v29  ;;  %v452_v48 = vadd.f32 %v450_v42, %v415_v30  ;;  %627 = vmatpush.bf16.msrb.mxu0 %v618_v33 }
 0x13a   : > { %v568_v22 = vmul.f32 %v1165_v8, %v567_v19 }
 0x13b   : > { %v460_v49 = vpack.c.bf16 %v440_v46, %v439_v45  ;;  %v458_v50 = vadd.f32 %v456_v43, %v451_v47  ;;  %v459_v51 = vadd.f32 %v457_v44, %v452_v48  ;;  %v352_v48 = vld [vmem:[%s1309_s16 + $0xa] sm:$0x1] }
 0x13c   : > { %v569_v25 = vadd.f32 %v1165_v8, %v568_v22 }
 0x13d   : > { %1017 = vmatmul.msk.bf16.vlgmr.msra.gmra.mxu0 %vm353_vm1, %v460_v49  ;;  %v491_v52 = vpack.c.bf16 %v459_v51, %v458_v50 }
 0x13e   : > { %v571_v28 = vsel %vm570_vm12, %v1165_v8, %v569_v25  ;;  %v1094_v25 = vld [vmem:[%s1299_s10 + $0x50] sm:$0xf0] }
 0x13f   : > { %1026 = vmatmul.msk.bf16.vlgmr.msra.gmra.mxu1 %vm353_vm1, %v491_v52 }
 0x1b7   : > { %v1398_v63 = vpop.f32.mrf.mxu2 }
 0x1ba   : > { %v486_v59 = vpop.f32.mrf.mxu0 }
 0x1bb   : > { %v1400_v1 = vadd.f32 %v1151_v60, %v486_v59 }
 0x1bc   : > { %v517_v62 = vpop.f32.mrf.mxu1 }
 0x1bd   : > { %v1402_v3 = vadd.f32 %v1152_v61, %v517_v62 }
 0x1bf   : > { %v552_v6 = vadd.f32 %v1402_v3, %v1400_v1  ;;  %v1413_v15 = vpop.f32.mrf.mxu2 }
 0x1c1   : > { %v554_v11 = vadd.f32 %v552_v6, %v1398_v63 }
 0x1c2   : > { %v488_v5 = vpop.f32.mrf.mxu0 }
 0x1c3   : > { %v1406_v7 = vadd.f32 %v1151_v60, %v488_v5  ;;  %v556_v17 = vsel %vm353_vm1, %v554_v11, 0.0 }
 0x1c4   : > { %v519_v9 = vpop.f32.mrf.mxu1 }
 0x1c5   : > { %v1408_v10 = vadd.f32 %v1152_v61, %v519_v9 }
 0x1c7   : > { %v553_v13 = vadd.f32 %v1408_v10, %v1406_v7 }
 0x1c9   : > { %v555_v16 = vadd.f32 %v553_v13, %v1413_v15 }
 0x1cb   : > { %v557_v18 = vsel %vm353_vm1, %v555_v16, 0.0 }
 0x1cc   : > { %v558_v20 = vadd.f32 %v557_v18, %v556_v17 }
 0x1ce   : > { %v559_v21 = vrot.slane %v558_v20, 4 }
 0x1d0   : > { %v560_v23 = vadd.f32 %v559_v21, %v558_v20 }
 0x1d2   : > { %v561_v24 = vrot.slane %v560_v23, 2 }
 0x1d4   : > { %v562_v26 = vadd.f32 %v561_v24, %v560_v23  ;;  %v1052_v24 = vld [vmem:[%s1299_s10 + $0x3c] sm:$0xf] }
 0x1d6   : > { %v563_v27 = vrot.slane %v562_v26, 1 }
 0x1d8   : > { %v564_v29 = vadd.f32 %v563_v27, %v562_v26  ;;  %v1048_v26 = vld [vmem:[%s1299_s10 + $0xc] sm:$0xf]  ;;  %v1053_v27 = vor.u32 %v1094_v25, %v1052_v24  ;;  %v1154_v24 = vld [vmem:[%s1309_s16 + $0x5] ss:$0 sm:$0xff] }
 0x1da   : > { %v572_v30 = vmul.f32 %v571_v28, %v564_v29  ;;  %v1093_v28 = vld [vmem:[%s1299_s10 + $0x20] sm:$0xf0]  ;;  %722 = vmatpush.bf16.msrb.mxu1 %v1053_v27 }
 0x1db   : > { %v1049_v29 = vor.u32 %v1093_v28, %v1048_v26 }
 0x1dc   : > { %v573_v31 = vpack.c.bf16 %v572_v30, %v572_v30 }
 0x1de   : > { %1044 = vmatmul.msk.bf16.vlgmr.msra.gmra.mxu3 %vm353_vm1, %v573_v31  ;;  %723 = vmatpush.bf16.msrb.mxu1 %v1049_v29  ;;  %v1155_v29 = vld [vmem:[%s1309_s16 + $0x6] ss:$0 sm:$0xff] }
 0x261   : > { %v598_v35 = vpop.f32.mrf.mxu3 }
 0x262   : > { %v599_v36 = vadd.f32 %v598_v35, %v350_v34 }
 0x264   : > { %v602_v37 = vmul.f32 %v599_v36, %v599_v36 }
 0x266   : > { %v603_v38 = vmul.f32 %v602_v37, %v599_v36 }
 0x268   : > { %v604_v39 = vmul.f32 0.044715, %v603_v38 }
 0x269   : > { %v600_v40 = vpop.f32.mrf.mxu3 }
 0x26a   : > { %v605_v41 = vadd.f32 %v604_v39, %v599_v36 }
 0x26c   : > { %v606_v42 = vmul.f32 0.7978846, %v605_v41 }
 0x26e   : > { %1166 = vtanh.f32 %v606_v42 }
 0x274   : > { %v1167_v43 = vpop.eup %1166 }
 0x275   : > { %v608_v44 = vadd.f32 1.0, %v1167_v43 }
 0x277   : > { %v609_v45 = vmul.f32 0.5, %v608_v44  ;;  %v1153_v44 = vld [vmem:[%s1309_s16 + $0x4] ss:$0 sm:$0xff] }
 0x279   : > { %v610_v46 = vmul.f32 %v609_v45, %v599_v36 }
 0x27b   : > { %v611_v47 = vpack.c.bf16 %v610_v46, %v610_v46 }
 0x27d   : > { %1045 = vmatmul.msk.bf16.vlgmr.msrb.gmra.mxu0 %vm612_vm14, %v611_v47 }
 0x2fa   : > { %v629_v49 = vpop.f32.mrf.mxu0 }
 0x2fb   : > { %v630_v50 = vadd.f32 %v629_v49, %v352_v48 }
 0x2fd   : > { %634 = vrot.lane.b32.xlu2 %v630_v50, %s1226_s29 }
 0x302   : > { %v631_v51 = vpop.f32.mrf.mxu0 }
 0x305   : > { %638 = vrot.lane.b32.xlu2 %v630_v50, %s1227_s30 }
 0x357   : > { %v635_v52 = vpop.permute.xlu2 %634 }
 0x358   : > { %v637_v53 = vmax.f32 %v630_v50, %v635_v52 }
 0x35f   : > { %v639_v54 = vpop.permute.xlu2 %638 }
 0x360   : > { %v641_v55 = vmax.f32 %v637_v53, %v639_v54 }
 0x362   : > { %652 = vrot.lane.b32.xlu1 %v641_v55, %s1227_s30  ;;  %646 = vrot.lane.b32.xlu0 %v641_v55, %s1228_s6  ;;  %v642_v5 = vsub.f32 %v630_v50, %v641_v55  ;;  %v1061_v55 = vld [vmem:[%s1299_s10 + $0x40] sm:$0xf] }
 0x364   : > { %v643_v6 = vmul.f32 1.442695, %v642_v5 }
 0x3d4   : > { %v647_v56 = vpop.permute.xlu0 %646  ;;  %v653_v58 = vpop.permute.xlu1 %652 }
 0x3d5   : > { %v649_v57 = vsub.f32 %v630_v50, %v647_v56  ;;  %v655_v60 = vsub.f32 %v630_v50, %v653_v58  ;;  %v1096_v56 = vld [vmem:[%s1299_s10 + $0x54] sm:$0xf0]  ;;  %v1057_v58 = vld [vmem:[%s1299_s10 + $0x10] sm:$0xf] }
 0x3d7   : > { %v650_v59 = vmul.f32 1.442695, %v649_v57  ;;  %v656_v61 = vmul.f32 1.442695, %v655_v60  ;;  %v1062_v57 = vor.u32 %v1096_v56, %v1061_v55 }
 0x3d9   : > { %1168 = vpow2.f32 %v650_v59  ;;  %v1095_v59 = vld [vmem:[%s1299_s10 + $0x24] sm:$0xf0]  ;;  %808 = vmatpush.bf16.msrb.mxu2 %v1062_v57 }
 0x3da   : > { %1170 = vpow2.f32 %v656_v61  ;;  %v1058_v61 = vor.u32 %v1095_v59, %v1057_v58 }
 0x3db   : > { %1172 = vpow2.f32 %v643_v6 }
 0x3dd   : > { %809 = vmatpush.bf16.msrb.mxu2 %v1058_v61 }
 0x3df   : > { %v1169_v62 = vpop.eup %1168 }
 0x3e0   : > { %659 = vrot.lane.b32.xlu2 %v1169_v62, %s1226_s29  ;;  %v1171_v0 = vpop.eup %1170 }
 0x3e1   : > { %v1173_v9 = vpop.eup %1172 }
 0x3e8   : > { %664 = vrot.lane.b32.xlu2 %v1171_v0, %s1227_s30 }
 0x43a   : > { %v660_v8 = vpop.permute.xlu2 %659 }
 0x43b   : > { %v662_v11 = vadd.f32 %v1173_v9, %v660_v8 }
 0x442   : > { %v665_v13 = vpop.permute.xlu2 %664 }
 0x443   : > { %v667_v14 = vadd.f32 %v665_v13, %v662_v11 }
 0x445   : > { %1174 = vrcp.f32 %v667_v14 }
 0x44b   : > { %v1175_v16 = vpop.eup %1174 }
 0x44c   : > { %675 = vrot.lane.b32.xlu0 %v1175_v16, %s1227_s30  ;;  %671 = vrot.lane.b32.xlu2 %v1175_v16, %s1228_s6  ;;  %v669_v17 = vmul.f32 %v1175_v16, %v1173_v9 }
 0x44e   : > { %v679_v31 = vperm.slane %v669_v17, 0 }
 0x450   : > { %v680_v34 = vmul.f32 %v679_v31, %v1400_v1  ;;  %v681_v35 = vmul.f32 %v679_v31, %v1406_v7 }
 0x4a6   : > { %v672_v18 = vpop.permute.xlu2 %671 }
 0x4a7   : > { %v674_v19 = vmul.f32 %v1169_v62, %v672_v18 }
 0x4a9   : > { %v682_v20 = vperm.slane %v674_v19, 0 }
 0x4ab   : > { %684 = vrot.lane.b32.xlu2 %v682_v20, %s1226_s29 }
 0x4be   : > { %v676_v21 = vpop.permute.xlu0 %675 }
 0x4bf   : > { %v678_v22 = vmul.f32 %v1171_v0, %v676_v21 }
 0x4c1   : > { %v691_v23 = vperm.slane %v678_v22, 0 }
 0x4c3   : > { %693 = vrot.lane.b32.xlu1 %v691_v23, %s1227_s30 }
 0x505   : > { %v685_v30 = vpop.permute.xlu2 %684 }
 0x506   : > { %v687_v32 = vmul.f32 %v685_v30, %v1402_v3  ;;  %v688_v33 = vmul.f32 %v685_v30, %v1408_v10 }
 0x508   : > { %v689_v37 = vadd.f32 %v687_v32, %v680_v34  ;;  %v690_v38 = vadd.f32 %v688_v33, %v681_v35  ;;  %v1078_v34 = vld [vmem:[%s1304_s13 + $0x30] sm:$0xf]  ;;  %v1102_v35 = vld [vmem:[%s1304_s13 + $0x34] sm:$0xf0] }
 0x535   : > { %v694_v36 = vpop.permute.xlu1 %693 }
 0x536   : > { %v696_v39 = vmul.f32 %v694_v36, %v1398_v63  ;;  %v697_v40 = vmul.f32 %v694_v36, %v1413_v15  ;;  %v1079_v36 = vor.u32 %v1102_v35, %v1078_v34 }
 0x538   : > { %v698_v41 = vadd.f32 %v696_v39, %v689_v37  ;;  %v699_v42 = vadd.f32 %v697_v40, %v690_v38  ;;  %867 = vmatpush.bf16.msrb.mxu3 %v1079_v36  ;;  %v1074_v37 = vld [vmem:[%s1304_s13 + $0x20] sm:$0xf]  ;;  %v1101_v38 = vld [vmem:[%s1304_s13 + $0x24] sm:$0xf0]  ;;  %v1070_v40 = vld [vmem:[%s1304_s13 + $0x10] sm:$0xf] }
 0x539   : > { %v1075_v39 = vor.u32 %v1101_v38, %v1074_v37 }
 0x53a   : > { %v700_v43 = vpack.c.bf16 %v699_v42, %v698_v41  ;;  %v1100_v41 = vld [vmem:[%s1304_s13 + $0x14] sm:$0xf0] }
 0x53b   : > { %v1071_v42 = vor.u32 %v1100_v41, %v1070_v40 }
 0x53c   : > { %1054 = vmatmul.msk.bf16.vlgmr.msrb.gmra.mxu1 %vm353_vm1, %v700_v43  ;;  %868 = vmatpush.bf16.msrb.mxu3 %v1075_v39  ;;  %v1156_v43 = vld [vmem:[%s1309_s16 + $0x9] ss:$0 sm:$0xff] }
 0x540   : > { %869 = vmatpush.bf16.msrb.mxu3 %v1071_v42 }
 0x5b9   : > { %v725_v3 = vpop.f32.mrf.mxu1 }
 0x5ba   : > { %v730_v10 = vadd.f32 %v725_v3, %v1320_v2  ;;  %v1099_v3 = vld [vmem:[%s1304_s13 + $0x4] sm:$0xf0] }
 0x5bc   : > { %v1443_v45 = vadd.f32 %v1153_v44, %v730_v10 }
 0x5be   : > { %v735_v1 = vsel %vm353_vm1, %v1443_v45, 0.0 }
 0x5bf   : > { %736 = vadd.xlane.f32.xlu0 %v735_v1 }
 0x5c1   : > { %v727_v7 = vpop.f32.mrf.mxu1 }
 0x5c2   : > { %v731_v63 = vadd.f32 %v727_v7, %v1325_v4 }
 0x5c4   : > { %v1448_v15 = vadd.f32 %v1153_v44, %v731_v63  ;;  %v1066_v44 = vld [vmem:[%s1304_s13] sm:$0xf] }
 0x5c5   : > { %v1067_v10 = vor.u32 %v1099_v3, %v1066_v44 }
 0x5c6   : > { %v738_v46 = vsel %vm353_vm1, %v1448_v15, 0.0 }
 0x5c7   : > { %739 = vadd.xlane.f32.xlu2 %v738_v46  ;;  %870 = vmatpush.bf16.msrb.mxu3 %v1067_v10 }
 0x632   : > { %v737_v47 = vpop.xlane.xlu0 %736 }
 0x633   : > { %v741_v2 = vmul.f32 %v737_v47, %v1329_v12 }
 0x635   : > { %v743_v48 = vsub.f32 %v1443_v45, %v741_v2 }
 0x637   : > { %v745_v49 = vmul.f32 %v743_v48, %v743_v48 }
 0x639   : > { %v747_v50 = vsel %vm353_vm1, %v745_v49, 0.0 }
 0x63a   : > { %748 = vadd.xlane.f32.xlu1 %v747_v50  ;;  %v740_v4 = vpop.xlane.xlu2 %739 }
 0x63b   : > { %v742_v51 = vmul.f32 %v740_v4, %v1329_v12 }
 0x63d   : > { %v744_v52 = vsub.f32 %v1448_v15, %v742_v51 }
 0x63f   : > { %v746_v53 = vmul.f32 %v744_v52, %v744_v52 }
 0x641   : > { %v750_v54 = vsel %vm353_vm1, %v746_v53, 0.0 }
 0x642   : > { %751 = vadd.xlane.f32.xlu0 %v750_v54 }
 0x6ad   : > { %v749_v60 = vpop.xlane.xlu1 %748 }
 0x6ae   : > { %v753_v62 = vmul.f32 %v749_v60, %v1329_v12 }
 0x6b0   : > { %v755_v0 = vadd.f32 1e-05, %v753_v62 }
 0x6b2   : > { %1176 = vrsqrt.f32 %v755_v0  ;;  %vm763_vm0 = vweird.f32 %v755_v0 }
 0x6b5   : > { %v752_v5 = vpop.xlane.xlu0 %751 }
 0x6b6   : > { %v754_v6 = vmul.f32 %v752_v5, %v1329_v12  ;;  %v1157_v5 = vld [vmem:[%s1309_s16 + $0x7] ss:$0 sm:$0xff] }
 0x6b8   : > { %v1177_v8 = vpop.eup %1176  ;;  %v756_v9 = vadd.f32 1e-05, %v754_v6 }
 0x6b9   : > { %v758_v11 = vmul.f32 %v1177_v8, %v755_v0  ;;  %vm764_vm15 = vweird.f32 %v1177_v8 }
 0x6ba   : > { %1178 = vrsqrt.f32 %v756_v9  ;;  %vm765_vm2 = vmor %vm763_vm0, %vm764_vm15  ;;  %vm773_vm4 = vweird.f32 %v756_v9 }
 0x6bb   : > { %v759_v13 = vmul.f32 %v1177_v8, %v758_v11 }
 0x6bd   : > { %v760_v14 = vmul.f32 0.5, %v759_v13 }
 0x6bf   : > { %v761_v16 = vsub.f32 1.5, %v760_v14 }
 0x6c0   : > { %v1179_v17 = vpop.eup %1178 }
 0x6c1   : > { %v762_v18 = vmul.f32 %v1177_v8, %v761_v16  ;;  %v768_v19 = vmul.f32 %v1179_v17, %v756_v9  ;;  %vm774_vm3 = vweird.f32 %v1179_v17 }
 0x6c2   : > { %vm775_vm5 = vmor %vm773_vm4, %vm774_vm3 }
 0x6c3   : > { %v769_v20 = vmul.f32 %v1179_v17, %v768_v19  ;;  %v766_v21 = vsel %vm765_vm2, %v1177_v8, %v762_v18 }
 0x6c4   : > { %v777_v12 = vmul.f32 %v766_v21, %v743_v48 }
 0x6c5   : > { %v770_v22 = vmul.f32 0.5, %v769_v20 }
 0x6c6   : > { %v780_v28 = vmul.f32 %v1154_v24, %v777_v12 }
 0x6c7   : > { %v771_v23 = vsub.f32 1.5, %v770_v22 }
 0x6c8   : > { %v783_v31 = vadd.f32 %v1155_v29, %v780_v28 }
 0x6c9   : > { %v772_v25 = vmul.f32 %v1179_v17, %v771_v23 }
 0x6cb   : > { %v776_v26 = vsel %vm775_vm5, %v1179_v17, %v772_v25 }
 0x6cc   : > { %v778_v27 = vmul.f32 %v776_v26, %v744_v52 }
 0x6ce   : > { %v781_v30 = vmul.f32 %v1154_v24, %v778_v27 }
 0x6d0   : > { %v784_v32 = vadd.f32 %v1155_v29, %v781_v30 }
 0x6d2   : > { %v785_v33 = vpack.c.bf16 %v784_v32, %v783_v31 }
 0x6d4   : > { %1063 = vmatmul.msk.bf16.vlgmr.msrb.gmra.mxu2 %vm353_vm1, %v785_v33 }
 0x757   : > { %v811_v1 = vpop.f32.mrf.mxu2 }
 0x758   : > { %v812_v7 = vadd.f32 %v1156_v43, %v811_v1 }
 0x75a   : > { %v816_v63 = vmul.f32 %v812_v7, %v812_v7 }
 0x75c   : > { %v818_v46 = vmul.f32 %v816_v63, %v812_v7 }
 0x75e   : > { %v820_v47 = vmul.f32 0.044715, %v818_v46 }
 0x75f   : > { %v813_v2 = vpop.f32.mrf.mxu2 }
 0x760   : > { %v822_v48 = vadd.f32 %v820_v47, %v812_v7  ;;  %v814_v49 = vadd.f32 %v1156_v43, %v813_v2 }
 0x762   : > { %v824_v50 = vmul.f32 0.7978846, %v822_v48  ;;  %v817_v4 = vmul.f32 %v814_v49, %v814_v49 }
 0x764   : > { %v819_v51 = vmul.f32 %v817_v4, %v814_v49  ;;  %1180 = vtanh.f32 %v824_v50 }
 0x766   : > { %v821_v52 = vmul.f32 0.044715, %v819_v51 }
 0x768   : > { %v823_v53 = vadd.f32 %v821_v52, %v814_v49 }
 0x76a   : > { %v825_v54 = vmul.f32 0.7978846, %v823_v53  ;;  %v1181_v55 = vpop.eup %1180 }
 0x76b   : > { %v828_v56 = vadd.f32 1.0, %v1181_v55 }
 0x76c   : > { %1182 = vtanh.f32 %v825_v54 }
 0x76d   : > { %v830_v58 = vmul.f32 0.5, %v828_v56 }
 0x76f   : > { %v832_v61 = vmul.f32 %v830_v58, %v812_v7 }
 0x772   : > { %v1183_v57 = vpop.eup %1182 }
 0x773   : > { %v829_v59 = vadd.f32 1.0, %v1183_v57 }
 0x775   : > { %v831_v60 = vmul.f32 0.5, %v829_v59 }
 0x777   : > { %v833_v62 = vmul.f32 %v831_v60, %v814_v49 }
 0x779   : > { %v834_v0 = vpack.c.bf16 %v833_v62, %v832_v61 }
 0x77b   : > { %1080 = vmatmul.msk.bf16.vlgmr.msrb.gmra.mxu3 %vm859_vm6, %v834_v0 }
 0x7fe   : > { %v872_v6 = vpop.f32.mrf.mxu3 }
 0x7ff   : > { %v877_v8 = vadd.f32 %v872_v6, %v1443_v45 }
 0x801   : > { %v880_v9 = vadd.f32 %v1157_v5, %v877_v8 }
 0x803   : > { %882 = vst.msk [vmem:[%s1314_s27] sm:$0xff] %vm353_vm1, %v880_v9 }
 0x806   : > { %v874_v11 = vpop.f32.mrf.mxu3 }
 0x807   : > { %v878_v13 = vadd.f32 %v874_v11, %v1448_v15 }
 0x809   : > { %v881_v14 = vadd.f32 %v1157_v5, %v878_v13 }
 0x80b   : > { %883 = vst.msk [vmem:[%s1314_s27 + $0x8] sm:$0xff] %vm353_vm1, %v881_v14 }
 0x80c PF: > { %s15_s22 = sadd.s32 1, %s1222_s22   ;;  %s1504_s18 = smov %s1214_s20 }
 0x80d   : > { %p12_p8 = scmp.ge.s32.totalorder %s15_s22, 6   ;;  %s1505_s19 = smov %s1218_s21 }
 0x80e   : > { %s1506_s20 = smov %s1509_s23  ;;  %s1507_s21 = smov %s1513_s24 }
 0x80f   :  { %14 = sbr.rel (!%p12_p8) target bundleno = 3 (0x3), region = 87 }

// kernel: cyclemlp_forward.12
= control target key start
LH: loop header
LB: loop body
LE: loop exit
PB: predicated region body
PF: predicated region fallthrough
CT: control target
= control target key end

     0   :  { %vm175_vm0 = vcmask 261120   ;;  %vm218_vm1 = vcmask 523264   ;;  %s402_s1 = inlined_call_operand.vmem [shape: bf16[288,64], index: 1, kind: input, shape index: {}]   ;;  %s403_s0 = inlined_call_operand.vmem [shape: bf16[8,288], index: 0, kind: input, shape index: {}]   ;;  %s404_s2 = inlined_call_operand.vmem [shape: f32[1,64], index: 2, kind: input, shape index: {}]   ;;  %s405_s3 = inlined_call_operand.vmem [shape: f32[8,64], index: 3, kind: output, shape index: {}]  }
   0x1   :  { %v304_v0 = vld [vmem:[%s402_s1 + $0x38] sm:$0xff]  ;;  %v303_v2 = vld [vmem:[%s402_s1 + $0x30] sm:$0xff]  ;;  %v314_v4 = vld [vmem:[%s402_s1 + $0x88] sm:$0xff] }
   0x2   :  { %v312_v1 = vld [vmem:[%s402_s1 + $0x78] sm:$0xff]  ;;  %179 = vmatpush.bf16.msra.mxu0 %v304_v0  ;;  %v311_v3 = vld [vmem:[%s402_s1 + $0x70] sm:$0xff]  ;;  %211 = vmatpush.bf16.msra.mxu2 %v314_v4  ;;  %v313_v5 = vld [vmem:[%s402_s1 + $0x80] sm:$0xff] }
   0x3   :  { %192 = vmatpush.bf16.msra.mxu1 %v312_v1  ;;  %v16_v6 = vld [vmem:[%s403_s0 + $0x8] sm:$0xf]  ;;  %v301_v11 = vld [vmem:[%s402_s1 + $0x20] sm:$0xff]  ;;  %v300_v13 = vld [vmem:[%s402_s1 + $0x18] sm:$0xff] }
   0x4   :  { %v61_v7 = vunpack.c.l.b16 %v16_v6  ;;  %v302_v8 = vld [vmem:[%s402_s1 + $0x28] sm:$0xff]  ;;  %v309_v12 = vld [vmem:[%s402_s1 + $0x60] sm:$0xff]  ;;  %v308_v14 = vld [vmem:[%s402_s1 + $0x58] sm:$0xff] }
   0x5   :  { %v310_v9 = vld [vmem:[%s402_s1 + $0x68] sm:$0xff]  ;;  %v299_v15 = vld [vmem:[%s402_s1 + $0x10] sm:$0xff]  ;;  %v15_v19 = vld [vmem:[%s403_s0] sm:$0xff] }
   0x6   :  { %180 = vmatpush.bf16.msra.mxu0 %v303_v2  ;;  %v64_v10 = vpack.c.b16 %v61_v7, %v61_v7  ;;  %212 = vmatpush.bf16.msra.mxu2 %v313_v5  ;;  %v307_v16 = vld [vmem:[%s402_s1 + $0x50] sm:$0xff]  ;;  %v298_v17 = vld [vmem:[%s402_s1 + $0x8] sm:$0xff]  ;;  %v59_v20 = vunpack.c.l.b16 %v15_v19  ;;  %v60_v21 = vunpack.c.h.b16 %v15_v19  ;;  %v297_v22 = vld [vmem:[%s402_s1] sm:$0xff] }
   0x7   :  { %193 = vmatpush.bf16.msra.mxu1 %v311_v3  ;;  %v306_v18 = vld [vmem:[%s402_s1 + $0x48] sm:$0xff]  ;;  %v305_v23 = vld [vmem:[%s402_s1 + $0x40] sm:$0xff] }
   0x8   :  { %v62_v24 = vpack.c.b16 %v59_v20, %v59_v20  ;;  %v63_v25 = vpack.c.b16 %v60_v21, %v60_v21  ;;  %v315_v28 = vld [vmem:[%s404_s2] ss:$0 sm:$0xff] }
   0x9   :  { %296 = vmatmul.msk.bf16.vlgmr.msra.gmra.mxu2 %vm175_vm0, %v64_v10 }
   0xa   :  { %181 = vmatpush.bf16.msra.mxu0 %v302_v8 }
   0xb   :  { %194 = vmatpush.bf16.msra.mxu1 %v310_v9 }
   0xe   :  { %182 = vmatpush.bf16.msra.mxu0 %v301_v11 }
   0xf   :  { %195 = vmatpush.bf16.msra.mxu1 %v309_v12 }
  0x12   :  { %183 = vmatpush.bf16.msra.mxu0 %v300_v13 }
  0x13   :  { %196 = vmatpush.bf16.msra.mxu1 %v308_v14 }
  0x16   :  { %184 = vmatpush.bf16.msra.mxu0 %v299_v15 }
  0x17   :  { %197 = vmatpush.bf16.msra.mxu1 %v307_v16 }
  0x1a   :  { %185 = vmatpush.bf16.msra.mxu0 %v298_v17 }
  0x1b   :  { %198 = vmatpush.bf16.msra.mxu1 %v306_v18 }
  0x1e   :  { %186 = vmatpush.bf16.msra.mxu0 %v297_v22 }
  0x1f   :  { %199 = vmatpush.bf16.msra.mxu1 %v305_v23 }
  0x21   :  { %187 = vmatmul.bf16.vlgmr.msra.gmra.mxu0 %v62_v24 }
  0x22   :  { %200 = vmatmul.bf16.vlgmr.msra.gmra.mxu1 %v63_v25 }
  0x8c   :  { %v214_v26 = vpop.f32.mrf.mxu2 }
  0x94   :  { %v216_v27 = vpop.f32.mrf.mxu2 }
  0x9e   :  { %v188_v29 = vpop.f32.mrf.mxu0 }
  0x9f   :  { %v201_v30 = vpop.f32.mrf.mxu1  ;;  %v189_v31 = vadd.f32 %v315_v28, %v188_v29 }
  0xa1   :  { %v202_v32 = vadd.f32 %v201_v30, %v189_v31 }
  0xa3   :  { %v215_v33 = vadd.f32 %v214_v26, %v202_v32 }
  0xa5   :  { %219 = vst.msk [vmem:[%s405_s3] sm:$0xff] %vm218_vm1, %v215_v33 }
  0xa6   :  { %v190_v34 = vpop.f32.mrf.mxu0 }
  0xa7   :  { %v203_v35 = vpop.f32.mrf.mxu1 }

// kernel: cyclemlp_forward.14
= control target key start
LH: loop header
LB: loop body
LE: loop exit
PB: predicated region body
PF: predicated region fallthrough
CT: control target
= control target key end

     0   :  { %vm319_vm0 = vcmask 523264   ;;  %s711_s1 = inlined_call_operand.vmem [shape: bf16[576,128], index: 1, kind: input, shape index: {}]   ;;  %s712_s0 = inlined_call_operand.vmem [shape: bf16[2,576], index: 0, kind: input, shape index: {}]   ;;  %s713_s2 = inlined_call_operand.vmem [shape: f32[1,128], index: 2, kind: input, shape index: {}]   ;;  %s714_s3 = inlined_call_operand.vmem [shape: f32[2,128], index: 3, kind: output, shape index: {}]  }
   0x1   :  { %v544_v0 = vld [vmem:[%s711_s1 + $0x38] sm:$0xff]  ;;  %v543_v4 = vld [vmem:[%s711_s1 + $0x30] sm:$0xff]  ;;  %v542_v8 = vld [vmem:[%s711_s1 + $0x28] sm:$0xff] }
   0x2   :  { %v560_v1 = vld [vmem:[%s711_s1 + $0xb8] sm:$0xff]  ;;  %322 = vmatpush.bf16.msra.mxu0 %v544_v0  ;;  %v559_v5 = vld [vmem:[%s711_s1 + $0xb0] sm:$0xff]  ;;  %v558_v9 = vld [vmem:[%s711_s1 + $0xa8] sm:$0xff] }
   0x3   :  { %v552_v2 = vld [vmem:[%s711_s1 + $0x78] sm:$0xff]  ;;  %348 = vmatpush.bf16.msra.mxu2 %v560_v1  ;;  %v551_v6 = vld [vmem:[%s711_s1 + $0x70] sm:$0xff]  ;;  %v550_v10 = vld [vmem:[%s711_s1 + $0x68] sm:$0xff] }
   0x4   :  { %v568_v3 = vld [vmem:[%s711_s1 + $0xf8] sm:$0xff]  ;;  %335 = vmatpush.bf16.msra.mxu1 %v552_v2  ;;  %v567_v7 = vld [vmem:[%s711_s1 + $0xf0] sm:$0xff]  ;;  %v566_v11 = vld [vmem:[%s711_s1 + $0xe8] sm:$0xff] }
   0x5   :  { %361 = vmatpush.bf16.msra.mxu3 %v568_v3  ;;  %v541_v12 = vld [vmem:[%s711_s1 + $0x20] sm:$0xff]  ;;  %v540_v17 = vld [vmem:[%s711_s1 + $0x18] sm:$0xff]  ;;  %v539_v21 = vld [vmem:[%s711_s1 + $0x10] sm:$0xff] }
   0x6   :  { %323 = vmatpush.bf16.msra.mxu0 %v543_v4  ;;  %v557_v13 = vld [vmem:[%s711_s1 + $0xa0] sm:$0xff]  ;;  %v556_v18 = vld [vmem:[%s711_s1 + $0x98] sm:$0xff]  ;;  %v555_v22 = vld [vmem:[%s711_s1 + $0x90] sm:$0xff] }
   0x7   :  { %349 = vmatpush.bf16.msra.mxu2 %v559_v5  ;;  %v15_v14 = vld [vmem:[%s712_s0] sm:$0x1f]  ;;  %v548_v19 = vld [vmem:[%s711_s1 + $0x58] sm:$0xff]  ;;  %v547_v23 = vld [vmem:[%s711_s1 + $0x50] sm:$0xff] }
   0x8   :  { %336 = vmatpush.bf16.msra.mxu1 %v551_v6  ;;  %v549_v15 = vld [vmem:[%s711_s1 + $0x60] sm:$0xff]  ;;  %93 = vst [vmem:[#allocation1] ss:$9 sm:$0xff] %v15_v14  ;;  %v564_v20 = vld [vmem:[%s711_s1 + $0xd8] sm:$0xff]  ;;  %v563_v24 = vld [vmem:[%s711_s1 + $0xd0] sm:$0xff] }
   0x9   :  { %362 = vmatpush.bf16.msra.mxu3 %v567_v7  ;;  %v565_v16 = vld [vmem:[%s711_s1 + $0xe0] sm:$0xff]  ;;  %v538_v25 = vld [vmem:[%s711_s1 + $0x8] sm:$0xff]  ;;  %v572_v33 = vld [vmem:[%s711_s1 + $0x118] sm:$0xff] }
   0xa   :  { %324 = vmatpush.bf16.msra.mxu0 %v542_v8  ;;  %v554_v26 = vld [vmem:[%s711_s1 + $0x88] sm:$0xff]  ;;  %v537_v29 = vld [vmem:[%s711_s1] sm:$0xff]  ;;  %v571_v38 = vld [vmem:[%s711_s1 + $0x110] sm:$0xff] }
   0xb   :  { %350 = vmatpush.bf16.msra.mxu2 %v558_v9  ;;  %v546_v27 = vld [vmem:[%s711_s1 + $0x48] sm:$0xff]  ;;  %v553_v30 = vld [vmem:[%s711_s1 + $0x80] sm:$0xff] }
   0xc   :  { %337 = vmatpush.bf16.msra.mxu1 %v550_v10  ;;  %v562_v28 = vld [vmem:[%s711_s1 + $0xc8] sm:$0xff]  ;;  %v545_v31 = vld [vmem:[%s711_s1 + $0x40] sm:$0xff] }
   0xd   :  { %363 = vmatpush.bf16.msra.mxu3 %v566_v11  ;;  %v561_v32 = vld [vmem:[%s711_s1 + $0xc0] sm:$0xff]  ;;  %v570_v39 = vld [vmem:[%s711_s1 + $0x108] sm:$0xff] }
   0xe   :  { %325 = vmatpush.bf16.msra.mxu0 %v541_v12  ;;  %v569_v40 = vld [vmem:[%s711_s1 + $0x100] sm:$0xff] }
   0xf   :  { %351 = vmatpush.bf16.msra.mxu2 %v557_v13  ;;  %v94_v34 = vld [vmem:[#allocation1] sm:$0xff]  ;;  %v96_v35 = vld [vmem:[#allocation1 + $0x12] sm:$0xff]  ;;  %v95_v36 = vld [vmem:[#allocation1 + $0x9] sm:$0xff] }
  0x10   :  { %338 = vmatpush.bf16.msra.mxu1 %v549_v15  ;;  %v97_v37 = vld [vmem:[#allocation1 + $0x1b] sm:$0xff]  ;;  %v98_v41 = vld [vmem:[#allocation1 + $0x24] sm:$0xff] }
  0x11   :  { %364 = vmatpush.bf16.msra.mxu3 %v565_v16  ;;  %v573_v43 = vld [vmem:[%s713_s2] ss:$0 sm:$0xff] }
  0x12   :  { %326 = vmatpush.bf16.msra.mxu0 %v540_v17 }
  0x13   :  { %352 = vmatpush.bf16.msra.mxu2 %v556_v18 }
  0x14   :  { %339 = vmatpush.bf16.msra.mxu1 %v548_v19 }
  0x15   :  { %365 = vmatpush.bf16.msra.mxu3 %v564_v20 }
  0x16   :  { %327 = vmatpush.bf16.msra.mxu0 %v539_v21 }
  0x17   :  { %353 = vmatpush.bf16.msra.mxu2 %v555_v22 }
  0x18   :  { %340 = vmatpush.bf16.msra.mxu1 %v547_v23 }
  0x19   :  { %366 = vmatpush.bf16.msra.mxu3 %v563_v24 }
  0x1a   :  { %328 = vmatpush.bf16.msra.mxu0 %v538_v25 }
  0x1b   :  { %354 = vmatpush.bf16.msra.mxu2 %v554_v26 }
  0x1c   :  { %341 = vmatpush.bf16.msra.mxu1 %v546_v27 }
  0x1d   :  { %367 = vmatpush.bf16.msra.mxu3 %v562_v28 }
  0x1e   :  { %329 = vmatpush.bf16.msra.mxu0 %v537_v29 }
  0x1f   :  { %355 = vmatpush.bf16.msra.mxu2 %v553_v30 }
  0x20   :  { %342 = vmatpush.bf16.msra.mxu1 %v545_v31 }
  0x21   :  { %368 = vmatpush.bf16.msra.mxu3 %v561_v32  ;;  %330 = vmatmul.bf16.vlgmr.msra.gmra.mxu0 %v94_v34 }
  0x22   :  { %378 = vmatpush.bf16.msrb.mxu0 %v572_v33  ;;  %356 = vmatmul.bf16.vlgmr.msra.gmra.mxu2 %v96_v35 }
  0x23   :  { %343 = vmatmul.bf16.vlgmr.msra.gmra.mxu1 %v95_v36 }
  0x24   :  { %369 = vmatmul.bf16.vlgmr.msra.gmra.mxu3 %v97_v37 }
  0x26   :  { %379 = vmatpush.bf16.msrb.mxu0 %v571_v38 }
  0x2a   :  { %380 = vmatpush.bf16.msrb.mxu0 %v570_v39 }
  0x2e   :  { %381 = vmatpush.bf16.msrb.mxu0 %v569_v40 }
  0x31   :  { %536 = vmatmul.msk.bf16.vlgmr.msrb.gmra.mxu0 %vm319_vm0, %v98_v41 }
  0x9e   :  { %v331_v42 = vpop.f32.mrf.mxu0 }
  0x9f   :  { %v332_v45 = vadd.f32 %v573_v43, %v331_v42 }
  0xa0   :  { %v344_v44 = vpop.f32.mrf.mxu1 }
  0xa1   :  { %v345_v49 = vadd.f32 %v344_v44, %v332_v45 }
  0xa5   :  { %v357_v46 = vpop.f32.mrf.mxu2 }
  0xa6   :  { %v333_v48 = vpop.f32.mrf.mxu0  ;;  %v358_v51 = vadd.f32 %v357_v46, %v345_v49 }
  0xa7   :  { %v370_v47 = vpop.f32.mrf.mxu3 }
  0xa8   :  { %v346_v50 = vpop.f32.mrf.mxu1  ;;  %v371_v53 = vadd.f32 %v370_v47, %v358_v51 }
  0xad   :  { %v359_v52 = vpop.f32.mrf.mxu2 }
  0xae   :  { %v383_v55 = vpop.f32.mrf.mxu0 }
  0xaf   :  { %v372_v54 = vpop.f32.mrf.mxu3  ;;  %v384_v56 = vadd.f32 %v383_v55, %v371_v53 }
  0xb1   :  { %387 = vst [vmem:[%s714_s3] sm:$0x3] %v384_v56 }
  0xb6   :  { %v385_v57 = vpop.f32.mrf.mxu0 }

// kernel: cyclemlp_forward.13
= control target key start
LH: loop header
LB: loop body
LE: loop exit
PB: predicated region body
PF: predicated region fallthrough
CT: control target
= control target key end

     0   :  { %s1347_s18 = smov 0   ;;  %s1349_s19 = smov 0   ;;  %s1562_s0 = inlined_call_operand.vmem [shape: f32[2,4,64], index: 0, kind: input, shape index: {}]   ;;  %s1563_s1 = inlined_call_operand.vmem [shape: f32[5,4,64], index: 1, kind: input, shape index: {}]   ;;  %s1564_s2 = inlined_call_operand.vmem [shape: bf16[2,64,768], index: 2, kind: input, shape index: {}]   ;;  %s1565_s3 = inlined_call_operand.vmem [shape: bf16[2,128,384], index: 3, kind: input, shape index: {}]   ;;  %s1566_s4 = inlined_call_operand.vmem [shape: f32[2,11,192], index: 4, kind: input, shape index: {}]   ;;  %s1567_s5 = inlined_call_operand.vmem [shape: f32[2,4,64], index: 5, kind: output, shape index: {}]  }
   0x1   :  { %s1351_s20 = smov 0   ;;  %s1353_s21 = smov 0  }
   0x2   :  { %s1355_s22 = smov 0  }
   0x3 LB: > { %s24_s23 = sadd.s32 1, %s1304_s20  ;;  %s27_s24 = sadd.s32 1, %s1308_s21  ;;  %s1312_s22 = sphi %s1355_s22, %s15_s22   ;;  %s1308_s21 = sphi %s1353_s21, %s1571_s21   ;;  %s1304_s20 = sphi %s1351_s20, %s1570_s20   ;;  %s1300_s19 = sphi %s1349_s19, %s1569_s19   ;;  %s1296_s18 = sphi %s1347_s18, %s1568_s18  }
   0x4   : > { %p25_p0 = scmp.ge.s32.totalorder %s24_s23, 2  ;;  %p1016_p1 = scmp.ge.s32.totalorder %s1312_s22, 1 }
   0x5   : > { %p228_p2 = scmp.lt.s32.totalorder %s1312_s22, 5 }
   0x6   : > { %s1573_s23 = smov (%p25_p0, %s24_s23), 0  ;;  %s1575_s24 = smov (!%p25_p0, %s27_s24), %s1308_s21 }
   0x7   : > { %p229_p3 = pnand %p1016_p1, %p228_p2  ;;  %p29_p4 = scmp.ge.s32.totalorder %s1575_s24, 2 }
   0x8   : > { %p269_p5 = scmp.lt.s32.totalorder (!%p229_p3), %s1300_s19, 1  ;;  %p273_p6 = scmp.lt.s32.totalorder (!%p229_p3), %s1296_s18, 1 }
   0x9   : > { %s1577_s24 = smov (%p29_p4, %s1575_s24), 0  ;;  %232 = sbr.rel (%p229_p3) target bundleno = 2025 (0x7e9), region = 40 }
   0xa   : > { %p1023_p7 = scmp.ne.s32.totalorder (!%p229_p3), %s1296_s18, 0 }
   0xe   : > { %s1579_s19 = smov (!%p269_p5, %s1300_s19), 1 }
   0xf   : > { %s274_s25 = scalar_select %p273_p6, %s1296_s18, 1 }
  0x10   : > { %s1017_s26 = sshll.u32 %s1579_s19, 2  ;;  %296 = sbr.rel (%p1023_p7) target bundleno = 23 (0x17), region = 44 }
  0x11   : > { %s272_s29 = scalar_lea.vmem %s1562_s0, %s1017_s26  ;;  %s1210_s30 = smul.u32 192, %s274_s25 }
  0x12   : > { %s1175_s6 = sshll.u32 %s274_s25, 5  ;;  %s1383_s9 = scalar_lea.vmem %s1567_s5, %s1017_s26 }
  0x13   : > { %s1388_s12 = scalar_lea.vmem %s1564_s2, %s1210_s30  ;;  %s1393_s15 = scalar_lea.vmem %s1565_s3, %s1210_s30 }
  0x14   : > { %s1398_s19 = scalar_lea.vmem %s1566_s4, %s1175_s6 }
  0x15   : > { %v297_v0 = vld [vmem:[%s272_s29] sm:$0xf]  ;;  %vm298_vm0 = vcmask 519168  }
  0x16   : > { %299 = vst.msk [vmem:[%s1383_s9] sm:$0xf] %vm298_vm0, %v297_v0 }
  0x17 PF: > { %vm379_vm1 = vcmask 519168   ;;  %v1314_v3 = vmov 64.0   ;;  %v1077_v15 = vld [vmem:[%s1388_s12 + $0x98] sm:$0xf]  ;;  %v1187_v16 = vld [vmem:[%s1388_s12 + $0xac] sm:$0xf0] }
  0x18   : > { %1254 = vrcp.f32 %v1314_v3  ;;  %v1078_v17 = vor.u32 %v1187_v16, %v1077_v15  ;;  %v1073_v18 = vld [vmem:[%s1388_s12 + $0x68] sm:$0xf]  ;;  %v1186_v19 = vld [vmem:[%s1388_s12 + $0x7c] sm:$0xf0]  ;;  %v1069_v21 = vld [vmem:[%s1388_s12 + $0x38] sm:$0xf] }
  0x19   : > { %v1074_v20 = vor.u32 %v1186_v19, %v1073_v18  ;;  %v1185_v22 = vld [vmem:[%s1388_s12 + $0x4c] sm:$0xf0]  ;;  %v1179_v25 = vld [vmem:[%s1388_s12 + $0xa4] sm:$0xf0]  ;;  %v1184_v28 = vld [vmem:[%s1388_s12 + $0x1c] sm:$0xf0] }
  0x1a   : > { %563 = vmatpush.bf16.msra.mxu2 %v1078_v17  ;;  %v1070_v23 = vor.u32 %v1185_v22, %v1069_v21  ;;  %v1043_v24 = vld [vmem:[%s1388_s12 + $0x90] sm:$0xf]  ;;  %v1065_v27 = vld [vmem:[%s1388_s12 + $0x8] sm:$0xf]  ;;  %v1039_v30 = vld [vmem:[%s1388_s12 + $0x60] sm:$0xf] }
  0x1b   : > { %v1044_v26 = vor.u32 %v1179_v25, %v1043_v24  ;;  %v1066_v29 = vor.u32 %v1184_v28, %v1065_v27  ;;  %v1178_v31 = vld [vmem:[%s1388_s12 + $0x74] sm:$0xf0]  ;;  %v1035_v33 = vld [vmem:[%s1388_s12 + $0x30] sm:$0xf]  ;;  %v1177_v34 = vld [vmem:[%s1388_s12 + $0x44] sm:$0xf0] }
  0x1c   : > { %v1040_v32 = vor.u32 %v1178_v31, %v1039_v30  ;;  %v1036_v35 = vor.u32 %v1177_v34, %v1035_v33  ;;  %v1031_v36 = vld [vmem:[%s1388_s12] sm:$0xf]  ;;  %v1176_v37 = vld [vmem:[%s1388_s12 + $0x14] sm:$0xf0]  ;;  %v1060_v42 = vld [vmem:[%s1388_s12 + $0x94] sm:$0xf] }
  0x1d   : > { %v1402_v1 = vld [vmem:[%s1383_s9] sm:$0xf]  ;;  %481 = vmatpush.bf16.msra.mxu1 %v1044_v26  ;;  %v1032_v40 = vor.u32 %v1176_v37, %v1031_v36  ;;  %v1183_v43 = vld [vmem:[%s1388_s12 + $0xa8] sm:$0xf0]  ;;  %v1056_v45 = vld [vmem:[%s1388_s12 + $0x64] sm:$0xf] }
  0x1e   : > { %v380_v2 = vsel %vm379_vm1, %v1402_v1, 0.0  ;;  %v1255_v4 = vpop.eup %1254  ;;  %564 = vmatpush.bf16.msra.mxu2 %v1074_v20  ;;  %v1061_v44 = vor.u32 %v1183_v43, %v1060_v42  ;;  %v1182_v46 = vld [vmem:[%s1388_s12 + $0x78] sm:$0xf0]  ;;  %v1052_v49 = vld [vmem:[%s1388_s12 + $0x34] sm:$0xf]  ;;  %vm473_vm6 = vcmask 523264  }
  0x1f   : > { %381 = vadd.xlane.f32.xlu0 %v380_v2  ;;  %v384_v5 = vmul.f32 64.0, %v1255_v4  ;;  %vm388_vm2 = vweird.f32 %v1255_v4  ;;  %v1057_v47 = vor.u32 %v1182_v46, %v1056_v45  ;;  %v1181_v50 = vld [vmem:[%s1388_s12 + $0x48] sm:$0xf0]  ;;  %v1048_v54 = vld [vmem:[%s1388_s12 + $0x4] sm:$0xf]  ;;  %vm419_vm7 = vcmask 1042432  }
  0x20   : > { %v1053_v53 = vor.u32 %v1181_v50, %v1052_v49  ;;  %v1180_v55 = vld [vmem:[%s1388_s12 + $0x18] sm:$0xf0]  ;;  %v367_v60 = vld [vmem:[%s1398_s19] ss:$0 sm:$0xff]  ;;  %v368_v63 = vld [vmem:[%s1398_s19 + $0x1] ss:$0 sm:$0xff] }
  0x21   : > { %v385_v6 = vsub.f32 1.0, %v384_v5  ;;  %482 = vmatpush.bf16.msra.mxu1 %v1040_v32  ;;  %v1049_v58 = vor.u32 %v1180_v55, %v1048_v54  ;;  %v1025_v3 = vld [vmem:[%s1563_s1 + $0x10] sm:$0xf]  ;;  %vm428_vm8 = vcmask 1040384   ;;  %vm438_vm9 = vcmask 1041408   ;;  %s1316_s10 = smov 64  }
  0x22   : > { %565 = vmatpush.bf16.msra.mxu2 %v1070_v23  ;;  %v1027_v23 = vld [vmem:[%s1563_s1 + $0x8] sm:$0xf]  ;;  %v1028_v25 = vld [vmem:[%s1563_s1 + $0xc] sm:$0xf]  ;;  %v1094_v30 = vld [vmem:[%s1388_s12 + $0xa4] sm:$0xf] }
  0x23   : > { %v386_v7 = vmul.f32 %v1255_v4, %v385_v6  ;;  %v1199_v31 = vld [vmem:[%s1388_s12 + $0xb8] sm:$0xf0]  ;;  %v1090_v33 = vld [vmem:[%s1388_s12 + $0x74] sm:$0xf]  ;;  %v1198_v34 = vld [vmem:[%s1388_s12 + $0x88] sm:$0xf0] }
  0x24   : > { %v1095_v32 = vor.u32 %v1199_v31, %v1094_v30  ;;  %v1086_v36 = vld [vmem:[%s1388_s12 + $0x44] sm:$0xf]  ;;  %v1197_v37 = vld [vmem:[%s1388_s12 + $0x58] sm:$0xf0]  ;;  %v1315_v46 = vmov 4.0   ;;  %vm655_vm11 = vcmask 130048  }
  0x25   : > { %v387_v8 = vadd.f32 %v1255_v4, %v386_v7  ;;  %483 = vmatpush.bf16.msra.mxu1 %v1036_v35  ;;  %v421_v7 = vld [vmem:[%s1563_s1] sm:$0xf]  ;;  %v1091_v35 = vor.u32 %v1198_v34, %v1090_v33 }
  0x26   : > { %566 = vmatpush.bf16.msra.mxu2 %v1066_v29  ;;  %621 = vmatpush.bf16.msra.mxu3 %v1095_v32  ;;  %v370_v49 = vld [vmem:[%s1398_s19 + $0x3] ss:$0 sm:$0xff] }
  0x27   : > { %v1406_v9 = vsel %vm388_vm2, %v1255_v4, %v387_v8 }
  0x29   : > { %484 = vmatpush.bf16.msra.mxu1 %v1032_v40  ;;  %v1082_v40 = vld [vmem:[%s1388_s12 + $0x14] sm:$0xf] }
  0x2a   : > { %622 = vmatpush.bf16.msra.mxu3 %v1091_v35 }
  0x2d   : > { %522 = vmatpush.bf16.msrb.mxu1 %v1061_v44 }
  0x31   : > { %523 = vmatpush.bf16.msrb.mxu1 %v1057_v47 }
  0x35   : > { %524 = vmatpush.bf16.msrb.mxu1 %v1053_v53 }
  0x39   : > { %525 = vmatpush.bf16.msrb.mxu1 %v1049_v58 }
  0x92   : > { %v382_v10 = vpop.xlane.xlu0 %381 }
  0x93   : > { %v390_v11 = vmul.f32 %v1406_v9, %v382_v10 }
  0x95   : > { %v1410_v12 = vsub.f32 %v1402_v1, %v390_v11 }
  0x97   : > { %v392_v13 = vmul.f32 %v1410_v12, %v1410_v12 }
  0x99   : > { %v393_v14 = vsel %vm379_vm1, %v392_v13, 0.0 }
  0x9a   : > { %394 = vadd.xlane.f32.xlu0 %v393_v14 }
 0x10d   : > { %v395_v38 = vpop.xlane.xlu0 %394 }
 0x10e   : > { %v396_v39 = vmul.f32 %v395_v38, %v1406_v9 }
 0x110   : > { %v397_v41 = vadd.f32 1e-05, %v396_v39  ;;  %v1087_v39 = vor.u32 %v1197_v37, %v1086_v36 }
 0x112   : > { %1256 = vrsqrt.f32 %v397_v41  ;;  %vm404_vm4 = vweird.f32 %v397_v41  ;;  %623 = vmatpush.bf16.msra.mxu3 %v1087_v39 }
 0x113   : > { %1258 = vrcp.f32 %v1315_v46 }
 0x118   : > { %v1257_v48 = vpop.eup %1256 }
 0x119   : > { %v399_v51 = vmul.f32 %v1257_v48, %v397_v41  ;;  %vm405_vm3 = vweird.f32 %v1257_v48  ;;  %v1196_v41 = vld [vmem:[%s1388_s12 + $0x28] sm:$0xf0]  ;;  %v1259_v47 = vpop.eup %1258 }
 0x11a   : > { %vm406_vm5 = vmor %vm404_vm4, %vm405_vm3  ;;  %v1083_v43 = vor.u32 %v1196_v41, %v1082_v40  ;;  %v582_v53 = vmul.f32 4.0, %v1259_v47  ;;  %vm586_vm10 = vweird.f32 %v1259_v47 }
 0x11b   : > { %v400_v52 = vmul.f32 %v1257_v48, %v399_v51 }
 0x11c   : > { %624 = vmatpush.bf16.msra.mxu3 %v1083_v43 }
 0x11d   : > { %v401_v56 = vmul.f32 0.5, %v400_v52 }
 0x11f   : > { %v402_v57 = vsub.f32 1.5, %v401_v56  ;;  %v583_v56 = vsub.f32 1.0, %v582_v53 }
 0x121   : > { %v403_v59 = vmul.f32 %v1257_v48, %v402_v57 }
 0x123   : > { %v407_v61 = vsel %vm406_vm5, %v1257_v48, %v403_v59  ;;  %v369_v48 = vld [vmem:[%s1398_s19 + $0x2] ss:$0 sm:$0xff] }
 0x124   : > { %v408_v62 = vmul.f32 %v407_v61, %v1410_v12  ;;  %v1026_v12 = vld [vmem:[%s1563_s1 + $0x4] sm:$0xf] }
 0x126   : > { %v409_v0 = vmul.f32 %v408_v62, %v367_v60  ;;  %v584_v60 = vmul.f32 %v1259_v47, %v583_v56 }
 0x128   : > { %v410_v2 = vadd.f32 %v409_v0, %v368_v63  ;;  %v585_v63 = vadd.f32 %v1259_v47, %v584_v60  ;;  %v1191_v60 = vld [vmem:[%s1388_s12 + $0xb0] sm:$0xf0] }
 0x12a   : > { %v531_v4 = vpack.c.bf16 %v410_v2, %v410_v2  ;;  %v415_v5 = vrot.slane %v410_v2, 1  ;;  %v417_v6 = vrot.slane %v410_v2, 5  ;;  %v424_v8 = vrot.slane %v410_v2, 3 }
 0x12b   : > { %v426_v10 = vrot.slane %v410_v2, 7  ;;  %v413_v13 = vmul.f32 %v1025_v3, %v410_v2  ;;  %v434_v18 = vrot.slane %v410_v2, 2  ;;  %v436_v19 = vrot.slane %v410_v2, 6 }
 0x12c   : > { %1079 = vmatmul.msk.bf16.vlgmr.msra.gmra.mxu2 %vm473_vm6, %v531_v4  ;;  %v420_v11 = vsel %vm419_vm7, %v415_v5, %v417_v6  ;;  %v587_v3 = vsel %vm586_vm10, %v1259_v47, %v585_v63  ;;  %v1190_v63 = vld [vmem:[%s1388_s12 + $0x80] sm:$0xf0] }
 0x12d   : > { %v422_v14 = vmul.f32 %v421_v7, %v420_v11  ;;  %v429_v15 = vsel %vm428_vm8, %v424_v8, %v426_v10  ;;  %v439_v22 = vsel %vm438_vm9, %v434_v18, %v436_v19  ;;  %v1099_v7 = vld [vmem:[%s1393_s15 + $0x4] sm:$0xf]  ;;  %v1209_v8 = vld [vmem:[%s1393_s15 + $0xc] sm:$0xf0]  ;;  %v1208_v10 = vld [vmem:[%s1393_s15 + $0x8] sm:$0xf] }
 0x12e   : > { %v432_v17 = vmul.f32 %v1026_v12, %v429_v15  ;;  %v442_v24 = vmul.f32 %v1027_v23, %v439_v22  ;;  %v446_v27 = vmul.f32 %v1028_v25, %v439_v22  ;;  %v1100_v11 = vor.u32 %v1209_v8, %v1099_v7  ;;  %v1101_v12 = vld [vmem:[%s1393_s15 + $0x10] sm:$0xf0]  ;;  %v1109_v8 = vld [vmem:[%s1388_s12 + $0xc] sm:$0xf] }
 0x12f   : > { %v423_v16 = vadd.f32 %v422_v14, %v413_v13  ;;  %v375_v14 = vld [vmem:[%s1398_s19 + $0x10] ss:$0 sm:$0xff] }
 0x130   : > { %v443_v26 = vadd.f32 %v442_v24, %v413_v13  ;;  %v1104_v13 = vor.u32 %v1208_v10, %v1101_v12  ;;  %666 = vmatpush.bf16.msra.mxu0 %v1100_v11  ;;  %v1188_v10 = vld [vmem:[%s1388_s12 + $0x20] sm:$0xf0] }
 0x131   : > { %v433_v20 = vadd.f32 %v432_v17, %v423_v16  ;;  %v1110_v11 = vor.u32 %v1188_v10, %v1109_v8  ;;  %v1203_v8 = vld [vmem:[%s1393_s15 + $0x50] sm:$0xf0]  ;;  %v1151_v10 = vld [vmem:[%s1393_s15 + $0x30] sm:$0xf] }
 0x132   : > { %v447_v28 = vadd.f32 %v446_v27, %v443_v26 }
 0x133   : > { %v448_v21 = vpack.c.bf16 %v433_v20, %v433_v20 }
 0x134   : > { %v490_v29 = vpack.c.bf16 %v447_v28, %v447_v28  ;;  %v1024_v28 = vld [vmem:[%s1398_s19 + $0x12] ss:$8 sm:$0x3] }
 0x135   : > { %1045 = vmatmul.msk.bf16.vlgmr.msra.gmra.mxu1 %vm473_vm6, %v448_v21  ;;  %v652_v35 = vperm.slane %v1024_v28, 1 }
 0x136   : > { %679 = vmatpush.bf16.msra.mxu1 %v1104_v13 }
 0x145   : > { %1062 = vmatmul.msk.bf16.vlgmr.msrb.gmra.mxu1 %vm473_vm6, %v490_v29  ;;  %v651_v29 = vperm.slane %v1024_v28, 0  ;;  %v1138_v28 = vld [vmem:[%s1388_s12 + $0xa0] sm:$0xf] }
 0x1af   : > { %v1467_v38 = vpop.f32.mrf.mxu2 }
 0x1b2   : > { %v486_v42 = vpop.f32.mrf.mxu1 }
 0x1b3   : > { %v1473_v51 = vadd.f32 %v486_v42, %v369_v48 }
 0x1b7   : > { %v570_v44 = vpop.f32.mrf.mxu2 }
 0x1ba   : > { %v488_v45 = vpop.f32.mrf.mxu1 }
 0x1c2   : > { %v527_v50 = vpop.f32.mrf.mxu1 }
 0x1c3   : > { %v1475_v52 = vadd.f32 %v527_v50, %v370_v49 }
 0x1c5   : > { %v572_v54 = vadd.f32 %v1475_v52, %v1473_v51 }
 0x1c7   : > { %v573_v55 = vadd.f32 %v572_v54, %v1467_v38 }
 0x1c9   : > { %v574_v57 = vsel %vm379_vm1, %v573_v55, 0.0 }
 0x1ca   : > { %v575_v58 = vrot.slane %v574_v57, 4  ;;  %v529_v59 = vpop.f32.mrf.mxu1 }
 0x1cb   : > { %v1121_v59 = vld [vmem:[%s1388_s12 + $0x9c] sm:$0xf] }
 0x1cc   : > { %v576_v61 = vadd.f32 %v575_v58, %v574_v57 }
 0x1ce   : > { %v577_v62 = vrot.slane %v576_v61, 2 }
 0x1d0   : > { %v578_v0 = vadd.f32 %v577_v62, %v576_v61  ;;  %v1117_v61 = vld [vmem:[%s1388_s12 + $0x6c] sm:$0xf]  ;;  %v1122_v62 = vor.u32 %v1191_v60, %v1121_v59 }
 0x1d2   : > { %v579_v2 = vrot.slane %v578_v0, 1  ;;  %762 = vmatpush.bf16.msrb.mxu2 %v1122_v62  ;;  %v1206_v62 = vld [vmem:[%s1393_s15 + $0x98] sm:$0xf0] }
 0x1d4   : > { %v580_v4 = vadd.f32 %v579_v2, %v578_v0  ;;  %v1118_v0 = vor.u32 %v1190_v63, %v1117_v61  ;;  %v1167_v61 = vld [vmem:[%s1393_s15 + $0x90] sm:$0xf] }
 0x1d5   : > { %v1168_v63 = vor.u32 %v1206_v62, %v1167_v61 }
 0x1d6   : > { %v588_v5 = vmul.f32 %v587_v3, %v580_v4  ;;  %763 = vmatpush.bf16.msrb.mxu2 %v1118_v0  ;;  %v1163_v0 = vld [vmem:[%s1393_s15 + $0x78] sm:$0xf] }
 0x1d8   : > { %v589_v6 = vpack.c.bf16 %v588_v5, %v588_v5  ;;  %v1113_v5 = vld [vmem:[%s1388_s12 + $0x3c] sm:$0xf] }
 0x1da   : > { %1096 = vmatmul.msk.bf16.vlgmr.msra.gmra.mxu3 %vm473_vm6, %v589_v6  ;;  %v1189_v6 = vld [vmem:[%s1388_s12 + $0x50] sm:$0xf0] }
 0x1db   : > { %v1114_v7 = vor.u32 %v1189_v6, %v1113_v5  ;;  %v1204_v5 = vld [vmem:[%s1393_s15 + $0x68] sm:$0xf0] }
 0x1dd   : > { %764 = vmatpush.bf16.msrb.mxu2 %v1114_v7  ;;  %v1155_v7 = vld [vmem:[%s1393_s15 + $0x48] sm:$0xf] }
 0x1e1   : > { %765 = vmatpush.bf16.msrb.mxu2 %v1110_v11  ;;  %v1156_v11 = vor.u32 %v1203_v8, %v1155_v7 }
 0x25d   : > { %v626_v15 = vpop.f32.mrf.mxu3 }
 0x25e   : > { %v627_v16 = vadd.f32 %v626_v15, %v375_v14 }
 0x260   : > { %v630_v17 = vmul.f32 %v627_v16, %v627_v16 }
 0x262   : > { %v631_v18 = vmul.f32 %v630_v17, %v627_v16 }
 0x264   : > { %v632_v19 = vmul.f32 0.044715, %v631_v18 }
 0x265   : > { %v628_v20 = vpop.f32.mrf.mxu3 }
 0x266   : > { %v633_v21 = vadd.f32 %v632_v19, %v627_v16 }
 0x268   : > { %v634_v22 = vmul.f32 0.7978846, %v633_v21  ;;  %v371_v21 = vld [vmem:[%s1398_s19 + $0x4] ss:$0 sm:$0xff] }
 0x26a   : > { %1260 = vtanh.f32 %v634_v22 }
 0x270   : > { %v1261_v23 = vpop.eup %1260 }
 0x271   : > { %v636_v24 = vadd.f32 1.0, %v1261_v23 }
 0x273   : > { %v637_v25 = vmul.f32 0.5, %v636_v24 }
 0x275   : > { %v638_v26 = vmul.f32 %v637_v25, %v627_v16 }
 0x277   : > { %v639_v27 = vpack.c.bf16 %v638_v26, %v638_v26 }
 0x279   : > { %1105 = vmatmul.msk.bf16.vlgmr.msra.gmra.mxu0 %vm655_vm11, %v639_v27  ;;  %1106 = vmatmul.msk.bf16.vlgmr.msra.gmra.mxu1 %vm655_vm11, %v639_v27 }
 0x2f6   : > { %v668_v30 = vpop.f32.mrf.mxu0  ;;  %v681_v31 = vpop.f32.mrf.mxu1 }
 0x2f7   : > { %v669_v32 = vadd.f32 %v668_v30, %v651_v29  ;;  %v682_v37 = vadd.f32 %v681_v31, %v652_v35  ;;  %v1195_v29 = vld [vmem:[%s1388_s12 + $0xb4] sm:$0xf0]  ;;  %v1134_v31 = vld [vmem:[%s1388_s12 + $0x70] sm:$0xf] }
 0x2f8   : > { %v1139_v30 = vor.u32 %v1195_v29, %v1138_v28  ;;  %v1193_v35 = vld [vmem:[%s1388_s12 + $0x54] sm:$0xf0] }
 0x2f9   : > { %686 = vrot.lane.b32.xlu1 %v669_v32, %s1316_s10 }
 0x2fa   : > { %829 = vmatpush.bf16.msrb.mxu3 %v1139_v30 }
 0x2fe   : > { %v670_v33 = vpop.f32.mrf.mxu0  ;;  %v683_v34 = vpop.f32.mrf.mxu1 }
 0x2ff   : > { %v1130_v34 = vld [vmem:[%s1388_s12 + $0x40] sm:$0xf] }
 0x36b   : > { %v687_v36 = vpop.permute.xlu1 %686 }
 0x36c   : > { %v689_v39 = vmax.f32 %v669_v32, %v687_v36  ;;  %v1131_v36 = vor.u32 %v1193_v35, %v1130_v34 }
 0x36e   : > { %v690_v40 = vmax.f32 %v689_v39, %v682_v37  ;;  %v1192_v39 = vld [vmem:[%s1388_s12 + $0x24] sm:$0xf0] }
 0x370   : > { %v701_v41 = vsub.f32 %v682_v37, %v690_v40  ;;  %695 = vrot.lane.b32.xlu1 %v690_v40, %s1316_s10  ;;  %v691_v46 = vsub.f32 %v669_v32, %v690_v40  ;;  %v1126_v37 = vld [vmem:[%s1388_s12 + $0x10] sm:$0xf] }
 0x371   : > { %v1127_v40 = vor.u32 %v1192_v39, %v1126_v37 }
 0x372   : > { %v692_v47 = vmul.f32 1.442695, %v691_v46  ;;  %v702_v48 = vmul.f32 1.442695, %v701_v41  ;;  %v1171_v41 = vld [vmem:[%s1393_s15 + $0xa8] sm:$0xf] }
 0x3e2   : > { %v696_v42 = vpop.permute.xlu1 %695 }
 0x3e3   : > { %v698_v43 = vsub.f32 %v669_v32, %v696_v42  ;;  %v1194_v32 = vld [vmem:[%s1388_s12 + $0x84] sm:$0xf0]  ;;  %v1207_v42 = vld [vmem:[%s1393_s15 + $0xb0] sm:$0xf0] }
 0x3e4   : > { %v1135_v33 = vor.u32 %v1194_v32, %v1134_v31  ;;  %v374_v31 = vld [vmem:[%s1398_s19 + $0x7] ss:$0 sm:$0xff] }
 0x3e5   : > { %v699_v44 = vmul.f32 1.442695, %v698_v43 }
 0x3e6   : > { %830 = vmatpush.bf16.msrb.mxu3 %v1135_v33 }
 0x3e7   : > { %1262 = vpow2.f32 %v699_v44  ;;  %v1172_v44 = vor.u32 %v1207_v42, %v1171_v41 }
 0x3e8   : > { %1264 = vpow2.f32 %v692_v47 }
 0x3e9   : > { %1266 = vpow2.f32 %v702_v48  ;;  %896 = vmatpush.bf16.msrb.mxu0 %v1172_v44 }
 0x3ea   : > { %831 = vmatpush.bf16.msrb.mxu3 %v1131_v36 }
 0x3ed   : > { %v1263_v45 = vpop.eup %1262  ;;  %897 = vmatpush.bf16.msrb.mxu0 %v1168_v63 }
 0x3ee   : > { %705 = vrot.lane.b32.xlu2 %v1263_v45, %s1316_s10  ;;  %v1265_v49 = vpop.eup %1264  ;;  %832 = vmatpush.bf16.msrb.mxu3 %v1127_v40 }
 0x3ef   : > { %v1267_v54 = vpop.eup %1266 }
 0x448   : > { %v706_v50 = vpop.permute.xlu2 %705 }
 0x449   : > { %v708_v53 = vadd.f32 %v1265_v49, %v706_v50 }
 0x44b   : > { %v709_v55 = vadd.f32 %v1267_v54, %v708_v53 }
 0x44d   : > { %1268 = vrcp.f32 %v709_v55 }
 0x453   : > { %v1269_v56 = vpop.eup %1268 }
 0x454   : > { %713 = vrot.lane.b32.xlu2 %v1269_v56, %s1316_s10  ;;  %v711_v57 = vmul.f32 %v1269_v56, %v1265_v49  ;;  %v717_v58 = vmul.f32 %v1269_v56, %v1267_v54 }
 0x456   : > { %v718_v12 = vperm.slane %v711_v57, 0  ;;  %v727_v13 = vperm.slane %v717_v58, 0  ;;  %v373_v57 = vld [vmem:[%s1398_s19 + $0x6] ss:$0 sm:$0xff] }
 0x458   : > { %v719_v15 = vmul.f32 %v718_v12, %v1473_v51  ;;  %v728_v18 = vmul.f32 %v727_v13, %v1467_v38  ;;  %v1202_v12 = vld [vmem:[%s1393_s15 + $0x38] sm:$0xf0] }
 0x459   : > { %v1152_v13 = vor.u32 %v1202_v12, %v1151_v10 }
 0x4ae   : > { %v714_v2 = vpop.permute.xlu2 %713 }
 0x4af   : > { %v716_v3 = vmul.f32 %v1263_v45, %v714_v2  ;;  %v1205_v2 = vld [vmem:[%s1393_s15 + $0x80] sm:$0xf0] }
 0x4b1   : > { %v720_v4 = vperm.slane %v716_v3, 0  ;;  %v1164_v3 = vor.u32 %v1205_v2, %v1163_v0 }
 0x4b3   : > { %722 = vrot.lane.b32.xlu0 %v720_v4, %s1316_s10  ;;  %898 = vmatpush.bf16.msrb.mxu0 %v1164_v3  ;;  %v1159_v4 = vld [vmem:[%s1393_s15 + $0x60] sm:$0xf] }
 0x4b4   : > { %v1160_v6 = vor.u32 %v1204_v5, %v1159_v4 }
 0x4b7   : > { %899 = vmatpush.bf16.msrb.mxu0 %v1160_v6 }
 0x4bb   : > { %900 = vmatpush.bf16.msrb.mxu0 %v1156_v11 }
 0x4bf   : > { %901 = vmatpush.bf16.msrb.mxu0 %v1152_v13 }
 0x525   : > { %v723_v14 = vpop.permute.xlu0 %722 }
 0x526   : > { %v725_v16 = vmul.f32 %v723_v14, %v1475_v52  ;;  %v1147_v14 = vld [vmem:[%s1393_s15 + $0x18] sm:$0xf] }
 0x528   : > { %v726_v17 = vadd.f32 %v725_v16, %v719_v15  ;;  %v1201_v15 = vld [vmem:[%s1393_s15 + $0x20] sm:$0xf0] }
 0x529   : > { %v1148_v16 = vor.u32 %v1201_v15, %v1147_v14 }
 0x52a   : > { %v729_v19 = vadd.f32 %v728_v18, %v726_v17  ;;  %v1143_v17 = vld [vmem:[%s1393_s15] sm:$0xf]  ;;  %v1200_v18 = vld [vmem:[%s1393_s15 + $0x8] sm:$0xf0] }
 0x52b   : > { %902 = vmatpush.bf16.msrb.mxu0 %v1148_v16 }
 0x52c   : > { %v730_v20 = vpack.c.bf16 %v729_v19, %v729_v19  ;;  %v1144_v19 = vor.u32 %v1200_v18, %v1143_v17 }
 0x52e   : > { %1123 = vmatmul.msk.bf16.vlgmr.msrb.gmra.mxu2 %vm473_vm6, %v730_v20  ;;  %v376_v20 = vld [vmem:[%s1398_s19 + $0x11] ss:$0 sm:$0xff] }
 0x52f   : > { %903 = vmatpush.bf16.msrb.mxu0 %v1144_v19 }
 0x5b1   : > { %v767_v22 = vpop.f32.mrf.mxu2 }
 0x5b2   : > { %v771_v23 = vadd.f32 %v767_v22, %v1402_v1 }
 0x5b4   : > { %v1507_v24 = vadd.f32 %v771_v23, %v371_v21 }
 0x5b6   : > { %v773_v51 = vsel %vm379_vm1, %v1507_v24, 0.0 }
 0x5b7   : > { %774 = vadd.xlane.f32.xlu1 %v773_v51 }
 0x5b9   : > { %v769_v38 = vpop.f32.mrf.mxu2 }
 0x62a   : > { %v775_v52 = vpop.xlane.xlu1 %774 }
 0x62b   : > { %v776_v25 = vmul.f32 %v775_v52, %v1406_v9 }
 0x62d   : > { %v777_v26 = vsub.f32 %v1507_v24, %v776_v25 }
 0x62f   : > { %v778_v27 = vmul.f32 %v777_v26, %v777_v26 }
 0x631   : > { %v779_v1 = vsel %vm379_vm1, %v778_v27, 0.0 }
 0x632   : > { %780 = vadd.xlane.f32.xlu2 %v779_v1 }
 0x6a5   : > { %v781_v43 = vpop.xlane.xlu2 %780 }
 0x6a6   : > { %v782_v45 = vmul.f32 %v781_v43, %v1406_v9  ;;  %v372_v9 = vld [vmem:[%s1398_s19 + $0x5] ss:$0 sm:$0xff] }
 0x6a8   : > { %v783_v46 = vadd.f32 1e-05, %v782_v45 }
 0x6aa   : > { %1270 = vrsqrt.f32 %v783_v46  ;;  %vm790_vm13 = vweird.f32 %v783_v46 }
 0x6b0   : > { %v1271_v47 = vpop.eup %1270 }
 0x6b1   : > { %v785_v48 = vmul.f32 %v1271_v47, %v783_v46  ;;  %vm791_vm12 = vweird.f32 %v1271_v47 }
 0x6b2   : > { %vm792_vm14 = vmor %vm790_vm13, %vm791_vm12 }
 0x6b3   : > { %v786_v49 = vmul.f32 %v1271_v47, %v785_v48 }
 0x6b5   : > { %v787_v50 = vmul.f32 0.5, %v786_v49 }
 0x6b7   : > { %v788_v53 = vsub.f32 1.5, %v787_v50 }
 0x6b9   : > { %v789_v54 = vmul.f32 %v1271_v47, %v788_v53 }
 0x6bb   : > { %v793_v55 = vsel %vm792_vm14, %v1271_v47, %v789_v54 }
 0x6bc   : > { %v794_v56 = vmul.f32 %v793_v55, %v777_v26 }
 0x6be   : > { %v795_v58 = vmul.f32 %v794_v56, %v372_v9 }
 0x6c0   : > { %v796_v59 = vadd.f32 %v795_v58, %v373_v57 }
 0x6c2   : > { %v797_v60 = vpack.c.bf16 %v796_v59, %v796_v59 }
 0x6c4   : > { %1140 = vmatmul.msk.bf16.vlgmr.msrb.gmra.mxu3 %vm473_vm6, %v797_v60 }
 0x747   : > { %v834_v21 = vpop.f32.mrf.mxu3 }
 0x748   : > { %v835_v22 = vadd.f32 %v834_v21, %v376_v20 }
 0x74a   : > { %v838_v23 = vmul.f32 %v835_v22, %v835_v22 }
 0x74c   : > { %v839_v51 = vmul.f32 %v838_v23, %v835_v22 }
 0x74e   : > { %v840_v38 = vmul.f32 0.044715, %v839_v51 }
 0x74f   : > { %v836_v52 = vpop.f32.mrf.mxu3 }
 0x750   : > { %v841_v25 = vadd.f32 %v840_v38, %v835_v22 }
 0x752   : > { %v842_v26 = vmul.f32 0.7978846, %v841_v25 }
 0x754   : > { %1272 = vtanh.f32 %v842_v26 }
 0x75a   : > { %v1273_v27 = vpop.eup %1272 }
 0x75b   : > { %v844_v1 = vadd.f32 1.0, %v1273_v27 }
 0x75d   : > { %v845_v28 = vmul.f32 0.5, %v844_v1 }
 0x75f   : > { %v846_v29 = vmul.f32 %v845_v28, %v835_v22 }
 0x761   : > { %v847_v30 = vpack.c.bf16 %v846_v29, %v846_v29 }
 0x763   : > { %904 = vmatmul.bf16.vlgmr.msrb.gmra.mxu0 %v847_v30 }
 0x7e0   : > { %v905_v32 = vpop.f32.mrf.mxu0 }
 0x7e1   : > { %v909_v33 = vadd.f32 %v905_v32, %v1507_v24 }
 0x7e3   : > { %v910_v34 = vadd.f32 %v909_v33, %v374_v31 }
 0x7e5   : > { %911 = vst.msk [vmem:[%s1383_s9] sm:$0xf] %vm379_vm1, %v910_v34 }
 0x7e8   : > { %v907_v35 = vpop.f32.mrf.mxu0 }
 0x7e9 PF: > { %s15_s22 = sadd.s32 1, %s1312_s22   ;;  %s1568_s18 = smov %s1304_s20 }
 0x7ea   : > { %p12_p8 = scmp.ge.s32.totalorder %s15_s22, 6   ;;  %s1569_s19 = smov %s1308_s21 }
 0x7eb   : > { %s1570_s20 = smov %s1573_s23  ;;  %s1571_s21 = smov %s1577_s24 }
 0x7ec   :  { %14 = sbr.rel (!%p12_p8) target bundleno = 3 (0x3), region = 88 }

// kernel: cyclemlp_forward.15
= control target key start
LH: loop header
LB: loop body
LE: loop exit
PB: predicated region body
PF: predicated region fallthrough
CT: control target
= control target key end

     0   :  { %s1841_s18 = smov 0   ;;  %s1843_s19 = smov 0   ;;  %s2136_s0 = inlined_call_operand.vmem [shape: f32[2,1,128], index: 0, kind: input, shape index: {}]   ;;  %s2137_s1 = inlined_call_operand.vmem [shape: f32[5,1,128], index: 1, kind: input, shape index: {}]   ;;  %s2138_s2 = inlined_call_operand.vmem [shape: bf16[2,128,896], index: 2, kind: input, shape index: {}]   ;;  %s2139_s3 = inlined_call_operand.vmem [shape: bf16[2,256,512], index: 3, kind: input, shape index: {}]   ;;  %s2140_s4 = inlined_call_operand.vmem [shape: f32[2,11,384], index: 4, kind: input, shape index: {}]   ;;  %s2141_s5 = inlined_call_operand.vmem [shape: f32[2,1,128], index: 5, kind: output, shape index: {}]  }
   0x1   :  { %s1845_s20 = smov 0   ;;  %s1847_s21 = smov 0  }
   0x2   :  { %s1849_s22 = smov 0  }
   0x3 LB: > { %s24_s23 = sadd.s32 1, %s1800_s20  ;;  %s27_s24 = sadd.s32 1, %s1804_s21  ;;  %s1808_s22 = sphi %s1849_s22, %s15_s22   ;;  %s1804_s21 = sphi %s1847_s21, %s2145_s21   ;;  %s1800_s20 = sphi %s1845_s20, %s2144_s20   ;;  %s1796_s19 = sphi %s1843_s19, %s2143_s19   ;;  %s1792_s18 = sphi %s1841_s18, %s2142_s18  }
   0x4   : > { %p25_p0 = scmp.ge.s32.totalorder %s24_s23, 2  ;;  %p1299_p1 = scmp.ge.s32.totalorder %s1808_s22, 1 }
   0x5   : > { %p227_p2 = scmp.lt.s32.totalorder %s1808_s22, 5 }
   0x6   : > { %s2147_s23 = smov (%p25_p0, %s24_s23), 0  ;;  %s2149_s24 = smov (!%p25_p0, %s27_s24), %s1804_s21 }
   0x7   : > { %p228_p3 = pnand %p1299_p1, %p227_p2  ;;  %p29_p4 = scmp.ge.s32.totalorder %s2149_s24, 2 }
   0x8   : > { %p266_p5 = scmp.lt.s32.totalorder (!%p228_p3), %s1796_s19, 1  ;;  %p269_p6 = scmp.lt.s32.totalorder (!%p228_p3), %s1792_s18, 1 }
   0x9   : > { %s2151_s24 = smov (%p29_p4, %s2149_s24), 0  ;;  %231 = sbr.rel (%p228_p3) target bundleno = 1473 (0x5c1), region = 40 }
   0xa   : > { %p1304_p7 = scmp.ne.s32.totalorder (!%p228_p3), %s1792_s18, 0 }
   0xe   : > { %s2153_s19 = smov (!%p266_p5, %s1796_s19), 1 }
   0xf   : > { %s270_s25 = scalar_select %p269_p6, %s1792_s18, 1 }
  0x10   : > { %s268_s28 = scalar_lea.vmem %s2136_s0, %s2153_s19  ;;  %s1877_s6 = scalar_lea.vmem %s2141_s5, %s2153_s19 }
  0x11   : > { %s1707_s7 = smul.u32 448, %s270_s25  ;;  %s1628_s8 = sshll.u32 %s270_s25, 9 }
  0x12   : > { %s1882_s11 = scalar_lea.vmem %s2139_s3, %s1628_s8  ;;  %s1708_s12 = smul.u32 48, %s270_s25 }
  0x13   : > { %s1887_s15 = scalar_lea.vmem %s2138_s2, %s1707_s7  ;;  %291 = sbr.rel (%p1304_p7) target bundleno = 26 (0x1a), region = 44 }
  0x14   : > { %s1892_s26 = scalar_lea.vmem %s2140_s4, %s1708_s12 }
  0x18   : > { %v292_v0 = vld [vmem:[%s268_s28] sm:$0x1] }
  0x19   : > { %293 = vst [vmem:[%s1877_s6] sm:$0x1] %v292_v0 }
  0x1a PF: > { %vm444_vm0 = vcmask 1040384   ;;  %v1810_v3 = vmov 128.0   ;;  %v1405_v4 = vld [vmem:[%s1887_s15 + $0x190] sm:$0xf]  ;;  %v1652_v5 = vld [vmem:[%s1887_s15 + $0x1a8] sm:$0xf0] }
  0x1b   : > { %1750 = vrcp.f32 %v1810_v3  ;;  %v1406_v6 = vor.u32 %v1652_v5, %v1405_v4  ;;  %v1401_v18 = vld [vmem:[%s1887_s15 + $0x158] sm:$0xf]  ;;  %v1651_v19 = vld [vmem:[%s1887_s15 + $0x170] sm:$0xf0]  ;;  %v1341_v21 = vld [vmem:[%s1887_s15 + $0x188] sm:$0xf] }
  0x1c   : > { %v1402_v20 = vor.u32 %v1651_v19, %v1401_v18  ;;  %v1636_v22 = vld [vmem:[%s1887_s15 + $0x1a0] sm:$0xf0]  ;;  %v1373_v23 = vld [vmem:[%s1887_s15 + $0x18c] sm:$0xf]  ;;  %v1644_v25 = vld [vmem:[%s1887_s15 + $0x1a4] sm:$0xf0] }
  0x1d   : > { %667 = vmatpush.bf16.msra.mxu2 %v1406_v6  ;;  %v1342_v24 = vor.u32 %v1636_v22, %v1341_v21  ;;  %v1374_v26 = vor.u32 %v1644_v25, %v1373_v23  ;;  %v1397_v27 = vld [vmem:[%s1887_s15 + $0x120] sm:$0xf]  ;;  %v1650_v28 = vld [vmem:[%s1887_s15 + $0x138] sm:$0xf0]  ;;  %v1337_v30 = vld [vmem:[%s1887_s15 + $0x150] sm:$0xf] }
  0x1e   : > { %v1398_v29 = vor.u32 %v1650_v28, %v1397_v27  ;;  %v1635_v31 = vld [vmem:[%s1887_s15 + $0x168] sm:$0xf0]  ;;  %v1369_v32 = vld [vmem:[%s1887_s15 + $0x154] sm:$0xf]  ;;  %v1643_v34 = vld [vmem:[%s1887_s15 + $0x16c] sm:$0xf0] }
  0x1f   : > { %543 = vmatpush.bf16.msra.mxu0 %v1342_v24  ;;  %605 = vmatpush.bf16.msra.mxu1 %v1374_v26  ;;  %v1338_v33 = vor.u32 %v1635_v31, %v1337_v30  ;;  %v1370_v35 = vor.u32 %v1643_v34, %v1369_v32  ;;  %v1393_v36 = vld [vmem:[%s1887_s15 + $0xe8] sm:$0xf]  ;;  %v1649_v37 = vld [vmem:[%s1887_s15 + $0x100] sm:$0xf0]  ;;  %v1333_v39 = vld [vmem:[%s1887_s15 + $0x118] sm:$0xf] }
  0x20   : > { %v1896_v1 = vld [vmem:[%s1877_s6] sm:$0x1]  ;;  %v1394_v38 = vor.u32 %v1649_v37, %v1393_v36  ;;  %v1634_v40 = vld [vmem:[%s1887_s15 + $0x130] sm:$0xf0]  ;;  %v1365_v41 = vld [vmem:[%s1887_s15 + $0x11c] sm:$0xf] }
  0x21   : > { %v445_v2 = vsel %vm444_vm0, %v1896_v1, 0.0  ;;  %v1751_v7 = vpop.eup %1750  ;;  %668 = vmatpush.bf16.msra.mxu2 %v1402_v20  ;;  %v1334_v42 = vor.u32 %v1634_v40, %v1333_v39  ;;  %v1642_v43 = vld [vmem:[%s1887_s15 + $0x134] sm:$0xf0]  ;;  %v1389_v45 = vld [vmem:[%s1887_s15 + $0xb0] sm:$0xf]  ;;  %vm794_vm5 = vcmask 261120  }
  0x22   : > { %446 = vadd.xlane.f32.xlu0 %v445_v2  ;;  %v449_v8 = vmul.f32 128.0, %v1751_v7  ;;  %vm453_vm1 = vweird.f32 %v1751_v7  ;;  %v1366_v44 = vor.u32 %v1642_v43, %v1365_v41  ;;  %v1648_v46 = vld [vmem:[%s1887_s15 + $0xc8] sm:$0xf0]  ;;  %v1329_v48 = vld [vmem:[%s1887_s15 + $0xe0] sm:$0xf] }
  0x23   : > { %544 = vmatpush.bf16.msra.mxu0 %v1338_v33  ;;  %606 = vmatpush.bf16.msra.mxu1 %v1370_v35  ;;  %v1390_v47 = vor.u32 %v1648_v46, %v1389_v45  ;;  %v1633_v49 = vld [vmem:[%s1887_s15 + $0xf8] sm:$0xf0]  ;;  %v1361_v50 = vld [vmem:[%s1887_s15 + $0xe4] sm:$0xf]  ;;  %v1641_v52 = vld [vmem:[%s1887_s15 + $0xfc] sm:$0xf0] }
  0x24   : > { %v450_v9 = vsub.f32 1.0, %v449_v8  ;;  %v1330_v51 = vor.u32 %v1633_v49, %v1329_v48  ;;  %v1362_v53 = vor.u32 %v1641_v52, %v1361_v50  ;;  %v1385_v54 = vld [vmem:[%s1887_s15 + $0x78] sm:$0xf]  ;;  %v1647_v55 = vld [vmem:[%s1887_s15 + $0x90] sm:$0xf0] }
  0x25   : > { %669 = vmatpush.bf16.msra.mxu2 %v1398_v29  ;;  %v1386_v56 = vor.u32 %v1647_v55, %v1385_v54  ;;  %v1325_v57 = vld [vmem:[%s1887_s15 + $0xa8] sm:$0xf]  ;;  %v1632_v58 = vld [vmem:[%s1887_s15 + $0xc0] sm:$0xf0]  ;;  %v1357_v59 = vld [vmem:[%s1887_s15 + $0xac] sm:$0xf] }
  0x26   : > { %v451_v10 = vmul.f32 %v1751_v7, %v450_v9  ;;  %v1326_v60 = vor.u32 %v1632_v58, %v1325_v57  ;;  %v1640_v61 = vld [vmem:[%s1887_s15 + $0xc4] sm:$0xf0]  ;;  %v1381_v63 = vld [vmem:[%s1887_s15 + $0x40] sm:$0xf]  ;;  %v1646_v0 = vld [vmem:[%s1887_s15 + $0x58] sm:$0xf0] }
  0x27   : > { %545 = vmatpush.bf16.msra.mxu0 %v1334_v42  ;;  %607 = vmatpush.bf16.msra.mxu1 %v1366_v44  ;;  %v1358_v62 = vor.u32 %v1640_v61, %v1357_v59  ;;  %v1382_v2 = vor.u32 %v1646_v0, %v1381_v63  ;;  %v1321_v3 = vld [vmem:[%s1887_s15 + $0x70] sm:$0xf]  ;;  %v1631_v4 = vld [vmem:[%s1887_s15 + $0x88] sm:$0xf0]  ;;  %v1353_v5 = vld [vmem:[%s1887_s15 + $0x74] sm:$0xf] }
  0x28   : > { %v452_v11 = vadd.f32 %v1751_v7, %v451_v10  ;;  %v1322_v6 = vor.u32 %v1631_v4, %v1321_v3  ;;  %v1377_v9 = vld [vmem:[%s1887_s15 + $0x8] sm:$0xf]  ;;  %v1645_v10 = vld [vmem:[%s1887_s15 + $0x20] sm:$0xf0]  ;;  %v1638_v18 = vld [vmem:[%s1887_s15 + $0x54] sm:$0xf0] }
  0x29   : > { %670 = vmatpush.bf16.msra.mxu2 %v1394_v38  ;;  %v1313_v20 = vld [vmem:[%s1887_s15] sm:$0xf]  ;;  %v1629_v21 = vld [vmem:[%s1887_s15 + $0x18] sm:$0xf0]  ;;  %v1345_v22 = vld [vmem:[%s1887_s15 + $0x4] sm:$0xf] }
  0x2a   : > { %v1902_v12 = vsel %vm453_vm1, %v1751_v7, %v452_v11  ;;  %v1639_v7 = vld [vmem:[%s1887_s15 + $0x8c] sm:$0xf0]  ;;  %v1378_v11 = vor.u32 %v1645_v10, %v1377_v9  ;;  %v1314_v24 = vor.u32 %v1629_v21, %v1313_v20  ;;  %v1637_v25 = vld [vmem:[%s1887_s15 + $0x1c] sm:$0xf0]  ;;  %v1684_v30 = vld [vmem:[%s1887_s15 + $0x1b8] sm:$0xf0] }
  0x2b   : > { %546 = vmatpush.bf16.msra.mxu0 %v1330_v51  ;;  %608 = vmatpush.bf16.msra.mxu1 %v1362_v53  ;;  %v1354_v8 = vor.u32 %v1639_v7, %v1353_v5  ;;  %v1346_v27 = vor.u32 %v1637_v25, %v1345_v22  ;;  %v1437_v29 = vld [vmem:[%s1887_s15 + $0x1a0] sm:$0xf]  ;;  %v1433_v31 = vld [vmem:[%s1887_s15 + $0x168] sm:$0xf]  ;;  %v1683_v33 = vld [vmem:[%s1887_s15 + $0x180] sm:$0xf0] }
  0x2c   : > { %v1438_v32 = vor.u32 %v1684_v30, %v1437_v29  ;;  %v1434_v34 = vor.u32 %v1683_v33, %v1433_v31  ;;  %v1429_v35 = vld [vmem:[%s1887_s15 + $0x130] sm:$0xf]  ;;  %v1682_v36 = vld [vmem:[%s1887_s15 + $0x148] sm:$0xf0]  ;;  %v1425_v41 = vld [vmem:[%s1887_s15 + $0xf8] sm:$0xf] }
  0x2d   : > { %671 = vmatpush.bf16.msra.mxu2 %v1390_v47  ;;  %v1430_v39 = vor.u32 %v1682_v36, %v1429_v35  ;;  %v1681_v42 = vld [vmem:[%s1887_s15 + $0x110] sm:$0xf0]  ;;  %v1421_v46 = vld [vmem:[%s1887_s15 + $0xc0] sm:$0xf]  ;;  %v1680_v47 = vld [vmem:[%s1887_s15 + $0xd8] sm:$0xf0] }
  0x2e   : > { %732 = vmatpush.bf16.msra.mxu3 %v1438_v32  ;;  %v1426_v44 = vor.u32 %v1681_v42, %v1425_v41  ;;  %v1422_v49 = vor.u32 %v1680_v47, %v1421_v46  ;;  %v431_v50 = vld [vmem:[%s1892_s26] ss:$0 sm:$0xff]  ;;  %v1417_v52 = vld [vmem:[%s1887_s15 + $0x88] sm:$0xf]  ;;  %v1679_v53 = vld [vmem:[%s1887_s15 + $0xa0] sm:$0xf0] }
  0x2f   : > { %547 = vmatpush.bf16.msra.mxu0 %v1326_v60  ;;  %609 = vmatpush.bf16.msra.mxu1 %v1358_v62  ;;  %v432_v55 = vld [vmem:[%s1892_s26 + $0x1] ss:$0 sm:$0xff]  ;;  %v1418_v57 = vor.u32 %v1679_v53, %v1417_v52  ;;  %v1307_v58 = vld [vmem:[%s2137_s1 + $0x4] sm:$0x1]  ;;  %v479_v59 = vld [vmem:[%s2137_s1] sm:$0x1] }
  0x30   : > { %v1309_v61 = vld [vmem:[%s2137_s1 + $0x2] sm:$0x1]  ;;  %v434_v21 = vld [vmem:[%s1892_s26 + $0x3] ss:$0 sm:$0xff]  ;;  %v1461_v33 = vld [vmem:[%s1882_s11 + $0x2c] sm:$0xf] }
  0x31   : > { %672 = vmatpush.bf16.msra.mxu2 %v1386_v56  ;;  %v433_v20 = vld [vmem:[%s1892_s26 + $0x2] ss:$0 sm:$0xff]  ;;  %v1453_v35 = vld [vmem:[%s1882_s11 + $0x24] sm:$0xf]  ;;  %v1449_v42 = vld [vmem:[%s1882_s11 + $0xc] sm:$0xf] }
  0x32   : > { %733 = vmatpush.bf16.msra.mxu3 %v1434_v34  ;;  %v1706_v34 = vld [vmem:[%s1882_s11 + $0x38] sm:$0xf0]  ;;  %v1702_v46 = vld [vmem:[%s1882_s11 + $0x10] sm:$0xf0]  ;;  %v1701_v47 = vld [vmem:[%s1882_s11 + $0x8] sm:$0xf] }
  0x33   : > { %548 = vmatpush.bf16.msra.mxu0 %v1322_v6  ;;  %610 = vmatpush.bf16.msra.mxu1 %v1354_v8  ;;  %v1462_v36 = vor.u32 %v1706_v34, %v1461_v33 }
  0x35   : > { %673 = vmatpush.bf16.msra.mxu2 %v1382_v2  ;;  %v1310_v2 = vld [vmem:[%s2137_s1 + $0x3] sm:$0x1] }
  0x36   : > { %734 = vmatpush.bf16.msra.mxu3 %v1430_v39  ;;  %v1455_v39 = vld [vmem:[%s1882_s11 + $0x34] sm:$0xf0] }
  0x39   : > { %674 = vmatpush.bf16.msra.mxu2 %v1378_v11 }
  0x3a   : > { %735 = vmatpush.bf16.msra.mxu3 %v1426_v44  ;;  %v1441_v44 = vld [vmem:[%s1882_s11 + $0x4] sm:$0xf] }
  0x3d   : > { %830 = vmatpush.bf16.msrb.mxu2 %v1462_v36  ;;  %v1653_v36 = vld [vmem:[%s1887_s15 + $0x24] sm:$0xf0] }
  0x3e   : > { %736 = vmatpush.bf16.msra.mxu3 %v1422_v49  ;;  %v1442_v49 = vor.u32 %v1702_v46, %v1441_v44 }
  0x42   : > { %737 = vmatpush.bf16.msra.mxu3 %v1418_v57 }
  0x95   : > { %v447_v13 = vpop.xlane.xlu0 %446 }
  0x96   : > { %v455_v14 = vmul.f32 %v1902_v12, %v447_v13  ;;  %v1317_v13 = vld [vmem:[%s1887_s15 + $0x38] sm:$0xf] }
  0x98   : > { %v1906_v15 = vsub.f32 %v1896_v1, %v455_v14  ;;  %v1630_v14 = vld [vmem:[%s1887_s15 + $0x50] sm:$0xf0] }
  0x9a   : > { %v457_v16 = vmul.f32 %v1906_v15, %v1906_v15 }
  0x9c   : > { %v458_v17 = vsel %vm444_vm0, %v457_v16, 0.0  ;;  %v1349_v16 = vld [vmem:[%s1887_s15 + $0x3c] sm:$0xf] }
  0x9d   : > { %459 = vadd.xlane.f32.xlu0 %v458_v17  ;;  %v1318_v17 = vor.u32 %v1630_v14, %v1317_v13  ;;  %v1350_v19 = vor.u32 %v1638_v18, %v1349_v16  ;;  %v1413_v13 = vld [vmem:[%s1887_s15 + $0x50] sm:$0xf]  ;;  %v1678_v14 = vld [vmem:[%s1887_s15 + $0x68] sm:$0xf0]  ;;  %v1677_v18 = vld [vmem:[%s1887_s15 + $0x30] sm:$0xf0] }
  0x9e   : > { %v1414_v16 = vor.u32 %v1678_v14, %v1413_v13  ;;  %v1480_v14 = vld [vmem:[%s1887_s15 + $0xb4] sm:$0xf] }
  0x9f   : > { %549 = vmatpush.bf16.msra.mxu0 %v1318_v17  ;;  %611 = vmatpush.bf16.msra.mxu1 %v1350_v19  ;;  %v1409_v17 = vld [vmem:[%s1887_s15 + $0x18] sm:$0xf] }
  0xa0   : > { %738 = vmatpush.bf16.msra.mxu3 %v1414_v16  ;;  %v1410_v19 = vor.u32 %v1677_v18, %v1409_v17  ;;  %v1656_v16 = vld [vmem:[%s1887_s15 + $0xcc] sm:$0xf0]  ;;  %v1476_v17 = vld [vmem:[%s1887_s15 + $0x7c] sm:$0xf] }
  0xa1   : > { %v1306_v18 = vld [vmem:[%s1892_s26 + $0x1a] ss:$8 sm:$0x7] }
  0xa2   : > { %v790_v34 = vperm.slane %v1306_v18, 2 }
  0xa3   : > { %550 = vmatpush.bf16.msra.mxu0 %v1314_v24  ;;  %612 = vmatpush.bf16.msra.mxu1 %v1346_v27 }
  0xa4   : > { %739 = vmatpush.bf16.msra.mxu3 %v1410_v19  ;;  %v1481_v19 = vor.u32 %v1656_v16, %v1480_v14 }
 0x110   : > { %v460_v23 = vpop.xlane.xlu0 %459 }
 0x111   : > { %v461_v26 = vmul.f32 %v460_v23, %v1902_v12 }
 0x113   : > { %v462_v28 = vadd.f32 1e-05, %v461_v26 }
 0x115   : > { %1752 = vrsqrt.f32 %v462_v28  ;;  %vm469_vm3 = vweird.f32 %v462_v28 }
 0x11b   : > { %v1753_v37 = vpop.eup %1752 }
 0x11c   : > { %v464_v38 = vmul.f32 %v1753_v37, %v462_v28  ;;  %vm470_vm2 = vweird.f32 %v1753_v37 }
 0x11d   : > { %vm471_vm4 = vmor %vm469_vm3, %vm470_vm2 }
 0x11e   : > { %v465_v40 = vmul.f32 %v1753_v37, %v464_v38  ;;  %v1704_v38 = vld [vmem:[%s1882_s11 + $0x28] sm:$0xf] }
 0x11f   : > { %v1458_v41 = vor.u32 %v1704_v38, %v1455_v39 }
 0x120   : > { %v466_v43 = vmul.f32 0.5, %v465_v40 }
 0x121   : > { %817 = vmatpush.bf16.msrb.mxu1 %v1458_v41 }
 0x122   : > { %v467_v45 = vsub.f32 1.5, %v466_v43  ;;  %v1703_v43 = vld [vmem:[%s1882_s11 + $0x18] sm:$0xf0] }
 0x124   : > { %v468_v48 = vmul.f32 %v1753_v37, %v467_v45  ;;  %v1450_v45 = vor.u32 %v1703_v43, %v1449_v42 }
 0x126   : > { %v472_v51 = vsel %vm471_vm4, %v1753_v37, %v468_v48  ;;  %v1705_v37 = vld [vmem:[%s1882_s11 + $0x30] sm:$0xf0]  ;;  %v1443_v48 = vld [vmem:[%s1882_s11 + $0x14] sm:$0xf0]  ;;  %831 = vmatpush.bf16.msrb.mxu2 %v1450_v45 }
 0x127   : > { %v473_v54 = vmul.f32 %v472_v51, %v1906_v15  ;;  %v1308_v15 = vld [vmem:[%s2137_s1 + $0x1] sm:$0x1]  ;;  %v1454_v40 = vor.u32 %v1705_v37, %v1453_v35  ;;  %v439_v51 = vld [vmem:[%s1892_s26 + $0x18] ss:$0 sm:$0xff]  ;;  %v1468_v35 = vld [vmem:[%s1887_s15 + $0xc] sm:$0xf] }
 0x128   : > { %v1469_v38 = vor.u32 %v1653_v36, %v1468_v35  ;;  %v1534_v36 = vld [vmem:[%s1887_s15 + $0x10c] sm:$0xf0] }
 0x129   : > { %v474_v56 = vmul.f32 %v473_v54, %v431_v50  ;;  %804 = vmatpush.bf16.msrb.mxu0 %v1454_v40  ;;  %v1446_v50 = vor.u32 %v1701_v47, %v1443_v48 }
 0x12b   : > { %v475_v60 = vadd.f32 %v474_v56, %v432_v55  ;;  %818 = vmatpush.bf16.msrb.mxu1 %v1446_v50 }
 0x12d   : > { %v618_v62 = vpack.c.bf16 %v475_v60, %v475_v60  ;;  %v478_v63 = vmul.f32 %v1307_v58, %v475_v60  ;;  %v480_v0 = vmul.f32 %v479_v59, %v475_v60  ;;  %v488_v3 = vmul.f32 %v1309_v61, %v475_v60  ;;  %805 = vmatpush.bf16.msrb.mxu0 %v1442_v49 }
 0x12e   : > { %v484_v5 = vmul.f32 %v1308_v15, %v475_v60  ;;  %v492_v7 = vmul.f32 %v1310_v2, %v475_v60  ;;  %v1660_v2 = vld [vmem:[%s1887_s15 + $0x1ac] sm:$0xf0] }
 0x12f   : > { %675 = vmatmul.bf16.vlgmr.msra.gmra.mxu2 %v618_v62  ;;  %v481_v4 = vadd.f32 %v480_v0, %v478_v63  ;;  %v489_v6 = vadd.f32 %v488_v3, %v478_v63  ;;  %v1496_v0 = vld [vmem:[%s1887_s15 + $0x194] sm:$0xf] }
 0x130   : > { %v1497_v3 = vor.u32 %v1660_v2, %v1496_v0  ;;  %v435_v2 = vld [vmem:[%s1892_s26 + $0x4] ss:$0 sm:$0xff] }
 0x131   : > { %v485_v8 = vadd.f32 %v484_v5, %v481_v4  ;;  %v493_v9 = vadd.f32 %v492_v7, %v489_v6  ;;  %v1492_v4 = vld [vmem:[%s1887_s15 + $0x15c] sm:$0xf]  ;;  %v1659_v5 = vld [vmem:[%s1887_s15 + $0x174] sm:$0xf0]  ;;  %v1488_v7 = vld [vmem:[%s1887_s15 + $0x124] sm:$0xf] }
 0x132   : > { %908 = vmatpush.bf16.msrb.mxu3 %v1497_v3  ;;  %v1493_v6 = vor.u32 %v1659_v5, %v1492_v4 }
 0x133   : > { %v494_v10 = vpack.c.bf16 %v485_v8, %v485_v8  ;;  %v556_v11 = vpack.c.bf16 %v493_v9, %v493_v9  ;;  %v1658_v8 = vld [vmem:[%s1887_s15 + $0x13c] sm:$0xf0] }
 0x134   : > { %v1489_v9 = vor.u32 %v1658_v8, %v1488_v7  ;;  %v1676_v7 = vld [vmem:[%s1887_s15 + $0x1b0] sm:$0xf0] }
 0x135   : > { %551 = vmatmul.bf16.vlgmr.msra.gmra.mxu0 %v494_v10  ;;  %613 = vmatmul.bf16.vlgmr.msra.gmra.mxu1 %v556_v11  ;;  %v1484_v10 = vld [vmem:[%s1887_s15 + $0xec] sm:$0xf]  ;;  %v1657_v11 = vld [vmem:[%s1887_s15 + $0x104] sm:$0xf0] }
 0x136   : > { %909 = vmatpush.bf16.msrb.mxu3 %v1493_v6  ;;  %v1485_v13 = vor.u32 %v1657_v11, %v1484_v10 }
 0x13a   : > { %910 = vmatpush.bf16.msrb.mxu3 %v1489_v9  ;;  %v1558_v9 = vld [vmem:[%s1887_s15 + $0x1b4] sm:$0xf0] }
 0x13e   : > { %911 = vmatpush.bf16.msrb.mxu3 %v1485_v13 }
 0x142   : > { %912 = vmatpush.bf16.msrb.mxu3 %v1481_v19  ;;  %v1673_v19 = vld [vmem:[%s1887_s15 + $0x164] sm:$0xf] }
 0x1b2   : > { %v552_v22 = vpop.f32.mrf.mxu0  ;;  %v1994_v23 = vpop.f32.mrf.mxu2 }
 0x1b3   : > { %v1996_v24 = vadd.f32 %v552_v22, %v433_v20  ;;  %v614_v25 = vpop.f32.mrf.mxu1  ;;  %v1655_v20 = vld [vmem:[%s1887_s15 + $0x94] sm:$0xf0]  ;;  %v788_v22 = vperm.slane %v1306_v18, 0 }
 0x1b4   : > { %v1998_v26 = vadd.f32 %v614_v25, %v434_v21  ;;  %v1477_v21 = vor.u32 %v1655_v20, %v1476_v17  ;;  %v1548_v17 = vld [vmem:[%s1887_s15 + $0x160] sm:$0xf] }
 0x1b6   : > { %v680_v27 = vadd.f32 %v1998_v26, %v1996_v24  ;;  %913 = vmatpush.bf16.msrb.mxu3 %v1477_v21  ;;  %v1550_v21 = vld [vmem:[%s1887_s15 + $0x17c] sm:$0xf0] }
 0x1b8   : > { %v681_v28 = vadd.f32 %v680_v27, %v1994_v23  ;;  %v789_v27 = vperm.slane %v1306_v18, 1  ;;  %v1674_v18 = vld [vmem:[%s1887_s15 + $0x178] sm:$0xf0] }
 0x1b9   : > { %v1549_v20 = vor.u32 %v1674_v18, %v1548_v17 }
 0x1ba   : > { %v554_v29 = vpop.f32.mrf.mxu0  ;;  %v678_v30 = vpop.f32.mrf.mxu2  ;;  %v683_v31 = vpack.c.bf16 %v681_v28, %v681_v28 }
 0x1bb   : > { %v616_v32 = vpop.f32.mrf.mxu1  ;;  %v1472_v29 = vld [vmem:[%s1887_s15 + $0x44] sm:$0xf]  ;;  %v1654_v30 = vld [vmem:[%s1887_s15 + $0x5c] sm:$0xf0] }
 0x1bc   : > { %740 = vmatmul.bf16.vlgmr.msra.gmra.mxu3 %v683_v31  ;;  %v1473_v31 = vor.u32 %v1654_v30, %v1472_v29  ;;  %v1542_v30 = vld [vmem:[%s1887_s15 + $0x144] sm:$0xf0] }
 0x1be   : > { %914 = vmatpush.bf16.msrb.mxu3 %v1473_v31 }
 0x1c2   : > { %915 = vmatpush.bf16.msrb.mxu3 %v1469_v38  ;;  %v1524_v38 = vld [vmem:[%s1887_s15 + $0xb8] sm:$0xf] }
 0x23f   : > { %v741_v52 = vpop.f32.mrf.mxu3 }
 0x240   : > { %v742_v53 = vadd.f32 %v741_v52, %v439_v51 }
 0x242   : > { %v745_v54 = vmul.f32 %v742_v53, %v742_v53 }
 0x244   : > { %v746_v55 = vmul.f32 %v745_v54, %v742_v53 }
 0x246   : > { %v747_v56 = vmul.f32 0.044715, %v746_v55 }
 0x247   : > { %v743_v57 = vpop.f32.mrf.mxu3 }
 0x248   : > { %v748_v58 = vadd.f32 %v747_v56, %v742_v53 }
 0x24a   : > { %v749_v59 = vmul.f32 0.7978846, %v748_v58 }
 0x24c   : > { %1754 = vtanh.f32 %v749_v59 }
 0x252   : > { %v1755_v60 = vpop.eup %1754 }
 0x253   : > { %v751_v61 = vadd.f32 1.0, %v1755_v60 }
 0x255   : > { %v752_v15 = vmul.f32 0.5, %v751_v61 }
 0x257   : > { %v753_v62 = vmul.f32 %v752_v15, %v742_v53 }
 0x259   : > { %v754_v63 = vpack.c.bf16 %v753_v62, %v753_v62 }
 0x25b   : > { %1463 = vmatmul.msk.bf16.vlgmr.msrb.gmra.mxu0 %vm794_vm5, %v754_v63  ;;  %1464 = vmatmul.msk.bf16.vlgmr.msrb.gmra.mxu1 %vm794_vm5, %v754_v63 }
 0x25c   : > { %1465 = vmatmul.msk.bf16.vlgmr.msrb.gmra.mxu2 %vm794_vm5, %v754_v63 }
 0x2d8   : > { %v807_v25 = vpop.f32.mrf.mxu0  ;;  %v820_v28 = vpop.f32.mrf.mxu1 }
 0x2d9   : > { %v808_v32 = vadd.f32 %v807_v25, %v788_v22  ;;  %v821_v33 = vadd.f32 %v820_v28, %v789_v27  ;;  %v1553_v22 = vor.u32 %v1673_v19, %v1550_v21  ;;  %v1540_v25 = vld [vmem:[%s1887_s15 + $0x128] sm:$0xf]  ;;  %v1672_v27 = vld [vmem:[%s1887_s15 + $0x140] sm:$0xf0]  ;;  %v1671_v28 = vld [vmem:[%s1887_s15 + $0x12c] sm:$0xf] }
 0x2da   : > { %v1541_v29 = vor.u32 %v1672_v27, %v1540_v25  ;;  %v1545_v31 = vor.u32 %v1671_v28, %v1542_v30  ;;  %v1588_v19 = vld [vmem:[%s1882_s11 + $0xc0] sm:$0xf]  ;;  %v1699_v25 = vld [vmem:[%s1882_s11 + $0x1cc] sm:$0xf0] }
 0x2db   : > { %v837_v39 = vmax.f32 %v808_v32, %v821_v33  ;;  %v1620_v21 = vld [vmem:[%s1882_s11 + $0x1c0] sm:$0xf]  ;;  %v1690_v28 = vld [vmem:[%s1882_s11 + $0xac] sm:$0xf0] }
 0x2dc   : > { %v1621_v27 = vor.u32 %v1699_v25, %v1620_v21 }
 0x2df   : > { %v833_v37 = vpop.f32.mrf.mxu2 }
 0x2e0   : > { %v834_v40 = vadd.f32 %v833_v37, %v790_v34  ;;  %v809_v41 = vpop.f32.mrf.mxu0  ;;  %v822_v42 = vpop.f32.mrf.mxu1  ;;  %v1669_v34 = vld [vmem:[%s1887_s15 + $0xf4] sm:$0xf] }
 0x2e1   : > { %v1537_v37 = vor.u32 %v1669_v34, %v1534_v36  ;;  %v1526_v42 = vld [vmem:[%s1887_s15 + $0xd4] sm:$0xf0]  ;;  %v1689_v34 = vld [vmem:[%s1882_s11 + $0x8c] sm:$0xf0] }
 0x2e2   : > { %v838_v43 = vmax.f32 %v837_v39, %v834_v40  ;;  %v1668_v39 = vld [vmem:[%s1887_s15 + $0xd0] sm:$0xf0] }
 0x2e3   : > { %v1525_v41 = vor.u32 %v1668_v39, %v1524_v38  ;;  %v1576_v39 = vld [vmem:[%s1882_s11 + $0x60] sm:$0xf] }
 0x2e4   : > { %v839_v44 = vsub.f32 %v808_v32, %v838_v43  ;;  %v842_v45 = vsub.f32 %v821_v33, %v838_v43  ;;  %v845_v46 = vsub.f32 %v834_v40, %v838_v43  ;;  %v1532_v32 = vld [vmem:[%s1887_s15 + $0xf0] sm:$0xf]  ;;  %v1670_v33 = vld [vmem:[%s1887_s15 + $0x108] sm:$0xf0]  ;;  %v1667_v40 = vld [vmem:[%s1887_s15 + $0xbc] sm:$0xf] }
 0x2e5   : > { %v1533_v35 = vor.u32 %v1670_v33, %v1532_v32  ;;  %v1529_v43 = vor.u32 %v1667_v40, %v1526_v42  ;;  %v1580_v33 = vld [vmem:[%s1882_s11 + $0x80] sm:$0xf]  ;;  %v1688_v40 = vld [vmem:[%s1882_s11 + $0x6c] sm:$0xf0] }
 0x2e6   : > { %v840_v47 = vmul.f32 1.442695, %v839_v44  ;;  %v843_v48 = vmul.f32 1.442695, %v842_v45  ;;  %v846_v49 = vmul.f32 1.442695, %v845_v46  ;;  %v1581_v36 = vor.u32 %v1689_v34, %v1580_v33 }
 0x2e7   : > { %v835_v50 = vpop.f32.mrf.mxu2  ;;  %v1516_v44 = vld [vmem:[%s1887_s15 + $0x80] sm:$0xf]  ;;  %v1666_v45 = vld [vmem:[%s1887_s15 + $0x98] sm:$0xf0]  ;;  %v1665_v46 = vld [vmem:[%s1887_s15 + $0x84] sm:$0xf]  ;;  %v1577_v42 = vor.u32 %v1688_v40, %v1576_v39 }
 0x2e8   : > { %1756 = vpow2.f32 %v840_v47  ;;  %v1517_v47 = vor.u32 %v1666_v45, %v1516_v44  ;;  %v1508_v50 = vld [vmem:[%s1887_s15 + $0x48] sm:$0xf]  ;;  %v1572_v45 = vld [vmem:[%s1882_s11 + $0x40] sm:$0xf] }
 0x2e9   : > { %1758 = vpow2.f32 %v843_v48  ;;  %v1518_v48 = vld [vmem:[%s1887_s15 + $0x9c] sm:$0xf0] }
 0x2ea   : > { %1760 = vpow2.f32 %v846_v49  ;;  %v1521_v49 = vor.u32 %v1665_v46, %v1518_v48  ;;  %v1687_v46 = vld [vmem:[%s1882_s11 + $0x4c] sm:$0xf0] }
 0x2eb   : > { %v1573_v48 = vor.u32 %v1687_v46, %v1572_v45 }
 0x2ee   : > { %v1757_v51 = vpop.eup %1756 }
 0x2ef   : > { %v1759_v52 = vpop.eup %1758 }
 0x2f0   : > { %v848_v53 = vadd.f32 %v1759_v52, %v1757_v51  ;;  %v1761_v54 = vpop.eup %1760 }
 0x2f2   : > { %v849_v55 = vadd.f32 %v1761_v54, %v848_v53 }
 0x2f4   : > { %1762 = vrcp.f32 %v849_v55  ;;  %v1500_v55 = vld [vmem:[%s1887_s15 + $0x10] sm:$0xf] }
 0x2fa   : > { %v1763_v56 = vpop.eup %1762 }
 0x2fb   : > { %v851_v57 = vmul.f32 %v1763_v56, %v1757_v51  ;;  %v852_v58 = vmul.f32 %v1763_v56, %v1759_v52  ;;  %v853_v59 = vmul.f32 %v1763_v56, %v1761_v54  ;;  %v1664_v51 = vld [vmem:[%s1887_s15 + $0x60] sm:$0xf0]  ;;  %v1663_v52 = vld [vmem:[%s1887_s15 + $0x4c] sm:$0xf]  ;;  %v1510_v54 = vld [vmem:[%s1887_s15 + $0x64] sm:$0xf0] }
 0x2fc   : > { %v1509_v53 = vor.u32 %v1664_v51, %v1508_v50  ;;  %v1662_v56 = vld [vmem:[%s1887_s15 + $0x28] sm:$0xf0]  ;;  %v1568_v50 = vld [vmem:[%s1882_s11 + $0x20] sm:$0xf]  ;;  %v1686_v51 = vld [vmem:[%s1882_s11 + $0x2c] sm:$0xf0] }
 0x2fd   : > { %v854_v60 = vmul.f32 %v851_v57, %v1996_v24  ;;  %v855_v61 = vmul.f32 %v852_v58, %v1998_v26  ;;  %v857_v62 = vmul.f32 %v853_v59, %v1994_v23  ;;  %v1556_v26 = vld [vmem:[%s1887_s15 + $0x198] sm:$0xf]  ;;  %v1675_v23 = vld [vmem:[%s1887_s15 + $0x19c] sm:$0xf]  ;;  %v1513_v57 = vor.u32 %v1663_v52, %v1510_v54  ;;  %v1661_v58 = vld [vmem:[%s1887_s15 + $0x14] sm:$0xf] }
 0x2fe   : > { %v1557_v8 = vor.u32 %v1676_v7, %v1556_v26  ;;  %v1561_v10 = vor.u32 %v1675_v23, %v1558_v9  ;;  %v1502_v59 = vld [vmem:[%s1887_s15 + $0x2c] sm:$0xf0] }
 0x2ff   : > { %v856_v15 = vadd.f32 %v855_v61, %v854_v60  ;;  %v1501_v60 = vor.u32 %v1662_v56, %v1500_v55  ;;  %v1505_v61 = vor.u32 %v1661_v58, %v1502_v59  ;;  %v1694_v54 = vld [vmem:[%s1882_s11 + $0x12c] sm:$0xf0]  ;;  %v1569_v55 = vor.u32 %v1686_v51, %v1568_v50  ;;  %v1596_v59 = vld [vmem:[%s1882_s11 + $0x100] sm:$0xf] }
 0x300   : > { %1033 = vmatpush.bf16.msra.mxu0 %v1557_v8  ;;  %1046 = vmatpush.bf16.msra.mxu1 %v1561_v10  ;;  %v1685_v58 = vld [vmem:[%s1882_s11 + $0xc] sm:$0xf0] }
 0x301   : > { %v858_v63 = vadd.f32 %v857_v62, %v856_v15  ;;  %v1592_v15 = vld [vmem:[%s1882_s11 + $0xe0] sm:$0xf]  ;;  %v1692_v62 = vld [vmem:[%s1882_s11 + $0xec] sm:$0xf0] }
 0x303   : > { %v859_v0 = vpack.c.bf16 %v858_v63, %v858_v63  ;;  %v1624_v63 = vld [vmem:[%s1882_s11 + $0x1e0] sm:$0xf] }
 0x304   : > { %1034 = vmatpush.bf16.msra.mxu0 %v1549_v20  ;;  %1047 = vmatpush.bf16.msra.mxu1 %v1553_v22  ;;  %v1691_v20 = vld [vmem:[%s1882_s11 + $0xcc] sm:$0xf0] }
 0x305   : > { %916 = vmatmul.bf16.vlgmr.msrb.gmra.mxu3 %v859_v0  ;;  %v1589_v22 = vor.u32 %v1691_v20, %v1588_v19 }
 0x308   : > { %1035 = vmatpush.bf16.msra.mxu0 %v1541_v29  ;;  %1048 = vmatpush.bf16.msra.mxu1 %v1545_v31  ;;  %v1616_v29 = vld [vmem:[%s1882_s11 + $0x1a0] sm:$0xf]  ;;  %v1698_v31 = vld [vmem:[%s1882_s11 + $0x1ac] sm:$0xf0] }
 0x309   : > { %v1617_v32 = vor.u32 %v1698_v31, %v1616_v29 }
 0x30c   : > { %1036 = vmatpush.bf16.msra.mxu0 %v1533_v35  ;;  %1049 = vmatpush.bf16.msra.mxu1 %v1537_v37  ;;  %v1612_v35 = vld [vmem:[%s1882_s11 + $0x180] sm:$0xf]  ;;  %v1697_v37 = vld [vmem:[%s1882_s11 + $0x18c] sm:$0xf0] }
 0x30d   : > { %v1613_v38 = vor.u32 %v1697_v37, %v1612_v35 }
 0x310   : > { %1037 = vmatpush.bf16.msra.mxu0 %v1525_v41  ;;  %1050 = vmatpush.bf16.msra.mxu1 %v1529_v43  ;;  %v1608_v41 = vld [vmem:[%s1882_s11 + $0x160] sm:$0xf]  ;;  %v1696_v43 = vld [vmem:[%s1882_s11 + $0x16c] sm:$0xf0] }
 0x311   : > { %v1609_v44 = vor.u32 %v1696_v43, %v1608_v41 }
 0x314   : > { %1038 = vmatpush.bf16.msra.mxu0 %v1517_v47  ;;  %1051 = vmatpush.bf16.msra.mxu1 %v1521_v49  ;;  %v1604_v47 = vld [vmem:[%s1882_s11 + $0x140] sm:$0xf]  ;;  %v1695_v49 = vld [vmem:[%s1882_s11 + $0x14c] sm:$0xf0] }
 0x315   : > { %v1605_v52 = vor.u32 %v1695_v49, %v1604_v47 }
 0x318   : > { %1039 = vmatpush.bf16.msra.mxu0 %v1509_v53  ;;  %1052 = vmatpush.bf16.msra.mxu1 %v1513_v57  ;;  %v1600_v53 = vld [vmem:[%s1882_s11 + $0x120] sm:$0xf] }
 0x319   : > { %v1601_v56 = vor.u32 %v1694_v54, %v1600_v53  ;;  %v1564_v57 = vld [vmem:[%s1882_s11] sm:$0xf] }
 0x31c   : > { %1040 = vmatpush.bf16.msra.mxu0 %v1501_v60  ;;  %1053 = vmatpush.bf16.msra.mxu1 %v1505_v61  ;;  %v1693_v60 = vld [vmem:[%s1882_s11 + $0x10c] sm:$0xf0]  ;;  %v1565_v61 = vor.u32 %v1685_v58, %v1564_v57 }
 0x388   : > { %v917_v3 = vpop.f32.mrf.mxu3 }
 0x389   : > { %v921_v4 = vadd.f32 %v917_v3, %v1896_v1  ;;  %v1700_v3 = vld [vmem:[%s1882_s11 + $0x1ec] sm:$0xf0] }
 0x38b   : > { %v2038_v5 = vadd.f32 %v921_v4, %v435_v2  ;;  %v1593_v2 = vor.u32 %v1692_v62, %v1592_v15  ;;  %v1597_v15 = vor.u32 %v1693_v60, %v1596_v59  ;;  %v1305_v62 = vld [vmem:[%s1892_s26 + $0x19] ss:$8 sm:$0x3] }
 0x38d   : > { %v923_v6 = vsel %vm444_vm0, %v2038_v5, 0.0  ;;  %1175 = vmatpush.bf16.msra.mxu2 %v1593_v2 }
 0x38e   : > { %924 = vadd.xlane.f32.xlu1 %v923_v6  ;;  %v1625_v6 = vor.u32 %v1700_v3, %v1624_v63  ;;  %v1029_v63 = vperm.slane %v1305_v62, 0 }
 0x390   : > { %v919_v24 = vpop.f32.mrf.mxu3  ;;  %1188 = vmatpush.bf16.msra.mxu3 %v1625_v6 }
 0x391   : > { %1176 = vmatpush.bf16.msra.mxu2 %v1589_v22 }
 0x394   : > { %1189 = vmatpush.bf16.msra.mxu3 %v1621_v27 }
 0x398   : > { %1190 = vmatpush.bf16.msra.mxu3 %v1617_v32  ;;  %v438_v32 = vld [vmem:[%s1892_s26 + $0x7] ss:$0 sm:$0xff] }
 0x39c   : > { %1191 = vmatpush.bf16.msra.mxu3 %v1613_v38 }
 0x3a0   : > { %1192 = vmatpush.bf16.msra.mxu3 %v1609_v44 }
 0x3a4   : > { %1193 = vmatpush.bf16.msra.mxu3 %v1605_v52 }
 0x3a8   : > { %1194 = vmatpush.bf16.msra.mxu3 %v1601_v56 }
 0x3ac   : > { %1195 = vmatpush.bf16.msra.mxu3 %v1597_v15 }
 0x401   : > { %v925_v1 = vpop.xlane.xlu1 %924 }
 0x402   : > { %v926_v11 = vmul.f32 %v925_v1, %v1902_v12  ;;  %v436_v1 = vld [vmem:[%s1892_s26 + $0x5] ss:$0 sm:$0xff] }
 0x404   : > { %v2048_v13 = vsub.f32 %v2038_v5, %v926_v11 }
 0x406   : > { %v928_v14 = vmul.f32 %v2048_v13, %v2048_v13 }
 0x408   : > { %v929_v16 = vsel %vm444_vm0, %v928_v14, 0.0  ;;  %v437_v14 = vld [vmem:[%s1892_s26 + $0x6] ss:$0 sm:$0xff] }
 0x409   : > { %930 = vadd.xlane.f32.xlu1 %v929_v16 }
 0x47c   : > { %v931_v0 = vpop.xlane.xlu1 %930 }
 0x47d   : > { %v932_v4 = vmul.f32 %v931_v0, %v1902_v12  ;;  %v1030_v0 = vperm.slane %v1305_v62, 1 }
 0x47f   : > { %v933_v24 = vadd.f32 1e-05, %v932_v4 }
 0x481   : > { %1764 = vrsqrt.f32 %v933_v24  ;;  %vm940_vm7 = vweird.f32 %v933_v24 }
 0x487   : > { %v1765_v26 = vpop.eup %1764 }
 0x488   : > { %v935_v7 = vmul.f32 %v1765_v26, %v933_v24  ;;  %vm941_vm6 = vweird.f32 %v1765_v26 }
 0x489   : > { %vm942_vm8 = vmor %vm940_vm7, %vm941_vm6 }
 0x48a   : > { %v936_v23 = vmul.f32 %v1765_v26, %v935_v7 }
 0x48c   : > { %v937_v8 = vmul.f32 0.5, %v936_v23 }
 0x48e   : > { %v938_v9 = vsub.f32 1.5, %v937_v8 }
 0x490   : > { %v939_v10 = vmul.f32 %v1765_v26, %v938_v9 }
 0x492   : > { %v943_v12 = vsel %vm942_vm8, %v1765_v26, %v939_v10 }
 0x493   : > { %v944_v11 = vmul.f32 %v943_v12, %v2048_v13  ;;  %v1584_v13 = vld [vmem:[%s1882_s11 + $0xa0] sm:$0xf] }
 0x494   : > { %v1585_v30 = vor.u32 %v1690_v28, %v1584_v13 }
 0x495   : > { %v945_v16 = vmul.f32 %v944_v11, %v436_v1 }
 0x496   : > { %1177 = vmatpush.bf16.msra.mxu2 %v1585_v30 }
 0x497   : > { %v946_v17 = vadd.f32 %v945_v16, %v437_v14 }
 0x499   : > { %v947_v18 = vpack.c.bf16 %v946_v17, %v946_v17 }
 0x49a   : > { %1178 = vmatpush.bf16.msra.mxu2 %v1581_v36 }
 0x49b   : > { %1041 = vmatmul.bf16.vlgmr.msra.gmra.mxu0 %v947_v18  ;;  %1054 = vmatmul.bf16.vlgmr.msra.gmra.mxu1 %v947_v18 }
 0x49e   : > { %1179 = vmatpush.bf16.msra.mxu2 %v1577_v42 }
 0x4a2   : > { %1180 = vmatpush.bf16.msra.mxu2 %v1573_v48 }
 0x4a6   : > { %1181 = vmatpush.bf16.msra.mxu2 %v1569_v55 }
 0x4aa   : > { %1182 = vmatpush.bf16.msra.mxu2 %v1565_v61 }
 0x518   : > { %v1042_v2 = vpop.f32.mrf.mxu0  ;;  %v1055_v3 = vpop.f32.mrf.mxu1 }
 0x519   : > { %v1043_v4 = vadd.f32 %v1042_v2, %v1029_v63  ;;  %v1056_v6 = vadd.f32 %v1055_v3, %v1030_v0 }
 0x51b   : > { %v1059_v24 = vmul.f32 %v1043_v4, %v1043_v4  ;;  %v1060_v26 = vmul.f32 %v1056_v6, %v1056_v6 }
 0x51d   : > { %v1061_v7 = vmul.f32 %v1059_v24, %v1043_v4  ;;  %v1062_v23 = vmul.f32 %v1060_v26, %v1056_v6 }
 0x51f   : > { %v1063_v8 = vmul.f32 0.044715, %v1061_v7  ;;  %v1064_v9 = vmul.f32 0.044715, %v1062_v23 }
 0x520   : > { %v1044_v10 = vpop.f32.mrf.mxu0  ;;  %v1057_v12 = vpop.f32.mrf.mxu1 }
 0x521   : > { %v1065_v1 = vadd.f32 %v1063_v8, %v1043_v4  ;;  %v1066_v11 = vadd.f32 %v1064_v9, %v1056_v6 }
 0x523   : > { %v1067_v14 = vmul.f32 0.7978846, %v1065_v1  ;;  %v1068_v16 = vmul.f32 0.7978846, %v1066_v11 }
 0x525   : > { %1766 = vtanh.f32 %v1067_v14 }
 0x526   : > { %1768 = vtanh.f32 %v1068_v16 }
 0x52b   : > { %v1767_v17 = vpop.eup %1766 }
 0x52c   : > { %v1769_v18 = vpop.eup %1768  ;;  %v1071_v19 = vadd.f32 1.0, %v1767_v17 }
 0x52d   : > { %v1072_v20 = vadd.f32 1.0, %v1769_v18 }
 0x52e   : > { %v1073_v21 = vmul.f32 0.5, %v1071_v19 }
 0x52f   : > { %v1074_v22 = vmul.f32 0.5, %v1072_v20 }
 0x530   : > { %v1075_v25 = vmul.f32 %v1073_v21, %v1043_v4 }
 0x531   : > { %v1076_v27 = vmul.f32 %v1074_v22, %v1056_v6 }
 0x532   : > { %v1077_v13 = vpack.c.bf16 %v1075_v25, %v1075_v25 }
 0x533   : > { %v1078_v28 = vpack.c.bf16 %v1076_v27, %v1076_v27 }
 0x534   : > { %1183 = vmatmul.bf16.vlgmr.msra.gmra.mxu2 %v1077_v13 }
 0x535   : > { %1196 = vmatmul.bf16.vlgmr.msra.gmra.mxu3 %v1078_v28 }
 0x5b7   : > { %v1184_v29 = vpop.f32.mrf.mxu2 }
 0x5b8   : > { %v1197_v30 = vpop.f32.mrf.mxu3 }
 0x5b9   : > { %v1198_v31 = vadd.f32 %v1197_v30, %v1184_v29 }
 0x5bb   : > { %v1201_v33 = vadd.f32 %v1198_v31, %v2038_v5 }
 0x5bd   : > { %v1202_v34 = vadd.f32 %v1201_v33, %v438_v32 }
 0x5bf   : > { %1203 = vst [vmem:[%s1877_s6] sm:$0x1] %v1202_v34  ;;  %v1186_v35 = vpop.f32.mrf.mxu2 }
 0x5c0   : > { %v1199_v36 = vpop.f32.mrf.mxu3 }
 0x5c1 PF: > { %s15_s22 = sadd.s32 1, %s1808_s22   ;;  %s2142_s18 = smov %s1800_s20 }
 0x5c2   : > { %p12_p8 = scmp.ge.s32.totalorder %s15_s22, 6   ;;  %s2143_s19 = smov %s1804_s21 }
 0x5c3   : > { %s2144_s20 = smov %s2147_s23  ;;  %s2145_s21 = smov %s2151_s24 }
 0x5c4   :  { %14 = sbr.rel (!%p12_p8) target bundleno = 3 (0x3), region = 89 }

</bundles_post_ra>
